<compile_context>
chip_gen: v5e
topology: v5e:2x2
jax: 0.10.0
libtpu: 0.0.40
codegen_flags: <defaults>
</compile_context>

<pallas_src>
import functools

import jax
import jax.numpy as jnp
from jax import lax
from jax.experimental import pallas as pl
from jax.experimental.pallas import tpu as pltpu

C1 = 32   # conv1 output channels
C2 = 64   # conv2 output channels
KK = 5    # conv kernel size (5x5, padding 2)


def _conv1_pool_relu_kernel(xp_ref, w_ref, b_ref, o_ref, *, out_rows, out_cols):
    """Fused conv1(1->C1, 5x5, pad 2) + maxpool(2) + relu for one image.

    xp_ref: (1, 2, (out_rows+2)*out_cols, 6) phase planes of the zero-padded input:
            xp_ref[0, p, i*out_cols + j, t] = x_pad[2*i + p, 2*j + t]
    w_ref : (2*KK, 6, C1): w_ref[dj*KK + dh, t, c] = conv1_w[c, 0, dh, t - dj] (0 outside)
    b_ref : (1, C1)
    o_ref : (1, out_rows*out_cols, C1) pooled+relu output, row index = i*out_cols + j
    """
    S = out_rows * out_cols
    pooled = None
    for di in range(2):          # vertical position inside the 2x2 pool window
        for dj in range(2):      # horizontal position inside the 2x2 pool window
            acc = jnp.zeros((S, C1), jnp.float32)
            for dh in range(KK):
                s = di + dh
                base = (s // 2) * out_cols
                slab = xp_ref[0, s % 2, base:base + S, :]              # (S, 6)
                acc = acc + jnp.dot(slab, w_ref[dj * KK + dh],
                                    preferred_element_type=jnp.float32)
            pooled = acc if pooled is None else jnp.maximum(pooled, acc)
    o_ref[0] = jnp.maximum(pooled + b_ref[...], 0.0)


def _conv2_pool_relu_kernel(zp_ref, w_ref, b_ref, o_ref, *, out_rows, out_cols):
    """Fused conv2(C1->C2, 5x5, pad 2) + maxpool(2) + relu for one image.

    zp_ref: (1, 4, (out_rows+2)*out_cols, KK*C1) phase planes of the padded stage-1 map:
            zp_ref[0, p*2 + dj, i*out_cols + j, dw*C1 + c] = z_pad[2*i + p, 2*j + dj + dw, c]
    w_ref : (KK, KK*C1, C2): w_ref[dh, dw*C1 + ci, co] = conv2_w[co, ci, dh, dw]
    b_ref : (1, C2)
    o_ref : (1, out_rows*out_cols, C2)
    """
    S = out_rows * out_cols
    pooled = None
    for di in range(2):
        for dj in range(2):
            acc = jnp.zeros((S, C2), jnp.float32)
            for dh in range(KK):
                s = di + dh
                base = (s // 2) * out_cols
                slab = zp_ref[0, (s % 2) * 2 + dj, base:base + S, :]   # (S, KK*C1)
                acc = acc + jnp.dot(slab, w_ref[dh],
                                    preferred_element_type=jnp.float32)
            pooled = acc if pooled is None else jnp.maximum(pooled, acc)
    o_ref[0] = jnp.maximum(pooled + b_ref[...], 0.0)


def _mlp_kernel(x_ref, w1_ref, b1_ref, w2_ref, b2_ref, o_ref):
    """relu(x @ W1 + b1) @ W2pad + b2pad;  W2pad is zero-padded to 128 lanes."""
    h = jnp.dot(x_ref[...], w1_ref[...], preferred_element_type=jnp.float32) + b1_ref[...]
    h = jnp.maximum(h, 0.0)
    o_ref[...] = (jnp.dot(h, w2_ref[...], preferred_element_type=jnp.float32)
                  + b2_ref[...]).astype(o_ref.dtype)


@jax.jit
def cnn_regressor_forward(x, c1w, c1b, c2w, c2b, f1w, f1b, f2w, f2b):
    """x: (B, H, W) f32.  Parameters in PyTorch layouts:
       c1w (C1,1,5,5), c1b (C1,), c2w (C2,C1,5,5), c2b (C2,),
       f1w (32, C2*H//4*W//4), f1b (32,), f2w (2,32), f2b (2,).  Returns (B, 2)."""
    f32 = jnp.float32
    B, H, W = x.shape
    assert H % 4 == 0 and W % 4 == 0
    H2, W2 = H // 2, W // 2
    H4, W4 = H2 // 2, W2 // 2
    assert f1w.shape[1] == C2 * H4 * W4

    # ---------------- stage 1: conv1 + maxpool2 + relu ----------------
    xpad = jnp.pad(x.astype(f32), ((0, 0), (2, 2), (2, 2)))          # (B, H+4, W+4)
    parts = []
    for p in range(2):
        rows = xpad[:, p::2, :]                                      # (B, H2+2, W+4)
        tsl = [rows[:, :, t:t + 2 * W2:2] for t in range(6)]         # 6 x (B, H2+2, W2)
        parts.append(jnp.stack(tsl, axis=-1).reshape(B, (H2 + 2) * W2, 6))
    x1p = jnp.stack(parts, axis=1)                                   # (B, 2, (H2+2)*W2, 6)

    w_hwc = jnp.transpose(c1w[:, 0, :, :], (1, 2, 0)).astype(f32)    # (5, 5, C1): [dh, dw, c]
    w1m = jnp.zeros((2, KK, 6, C1), f32)
    w1m = w1m.at[0, :, 0:KK, :].set(w_hwc)                           # dj = 0 -> t = dw
    w1m = w1m.at[1, :, 1:KK + 1, :].set(w_hwc)                       # dj = 1 -> t = dw + 1
    w1m = w1m.reshape(2 * KK, 6, C1)
    b1 = c1b.reshape(1, C1).astype(f32)

    y1 = pl.pallas_call(
        functools.partial(_conv1_pool_relu_kernel, out_rows=H2, out_cols=W2),
        out_shape=jax.ShapeDtypeStruct((B, H2 * W2, C1), f32),
        grid_spec=pltpu.PrefetchScalarGridSpec(
            num_scalar_prefetch=0,
            grid=(B,),
            in_specs=[
                pl.BlockSpec((1, 2, (H2 + 2) * W2, 6), lambda b: (b, 0, 0, 0)),
                pl.BlockSpec((2 * KK, 6, C1), lambda b: (0, 0, 0)),
                pl.BlockSpec((1, C1), lambda b: (0, 0)),
            ],
            out_specs=pl.BlockSpec((1, H2 * W2, C1), lambda b: (b, 0, 0)),
        ),
        compiler_params=pltpu.CompilerParams(dimension_semantics=("parallel",)),
    )(x1p, w1m, b1)

    # ---------------- stage 2: conv2 + maxpool2 + relu ----------------
    zpad = jnp.pad(y1.reshape(B, H2, W2, C1), ((0, 0), (2, 2), (2, 2), (0, 0)))
    planes = []
    for p in range(2):
        rows = zpad[:, p::2, :, :]                                   # (B, H4+2, W2+4, C1)
        for dj in range(2):
            sl = [rows[:, :, dj + dw:dj + dw + 2 * W4:2, :] for dw in range(KK)]
            blk = jnp.stack(sl, axis=3)                              # (B, H4+2, W4, KK, C1)
            planes.append(blk.reshape(B, (H4 + 2) * W4, KK * C1))
    z2p = jnp.stack(planes, axis=1)                                  # (B, 4, (H4+2)*W4, KK*C1)

    w2cat = jnp.transpose(c2w, (2, 3, 1, 0)).reshape(KK, KK * C1, C2).astype(f32)
    b2 = c2b.reshape(1, C2).astype(f32)

    y2 = pl.pallas_call(
        functools.partial(_conv2_pool_relu_kernel, out_rows=H4, out_cols=W4),
        out_shape=jax.ShapeDtypeStruct((B, H4 * W4, C2), f32),
        grid_spec=pltpu.PrefetchScalarGridSpec(
            num_scalar_prefetch=0,
            grid=(B,),
            in_specs=[
                pl.BlockSpec((1, 4, (H4 + 2) * W4, KK * C1), lambda b: (b, 0, 0, 0)),
                pl.BlockSpec((KK, KK * C1, C2), lambda b: (0, 0, 0)),
                pl.BlockSpec((1, C2), lambda b: (0, 0)),
            ],
            out_specs=pl.BlockSpec((1, H4 * W4, C2), lambda b: (b, 0, 0)),
        ),
        compiler_params=pltpu.CompilerParams(dimension_semantics=("parallel",)),
    )(z2p, w2cat, b2)

    # ---------------- stage 3: flatten + fc1 + relu + fc2 ----------------
    D = H4 * W4 * C2
    feat = y2.reshape(B, D)                       # NHWC flatten: (h*W4 + w)*C2 + c
    # Permute fc1 columns from PyTorch's NCHW flatten order to our NHWC flatten order.
    w1p = jnp.transpose(f1w.reshape(32, C2, H4, W4), (2, 3, 1, 0)).reshape(D, 32).astype(f32)
    b1p = f1b.reshape(1, 32).astype(f32)
    NLANE = 128                                   # lane-dense padded fc2 output
    w2p = jnp.zeros((32, NLANE), f32).at[:, :2].set(f2w.T.astype(f32))
    b2p = jnp.zeros((1, NLANE), f32).at[:, :2].set(f2b.reshape(1, 2).astype(f32))

    TB = B if B <= 512 else 512                   # batch tile (whole batch for small B)
    out_pad = pl.pallas_call(
        _mlp_kernel,
        out_shape=jax.ShapeDtypeStruct((B, NLANE), f32),
        grid_spec=pltpu.PrefetchScalarGridSpec(
            num_scalar_prefetch=0,
            grid=(pl.cdiv(B, TB),),
            in_specs=[
                pl.BlockSpec((TB, D), lambda i: (i, 0)),
                pl.BlockSpec((D, 32), lambda i: (0, 0)),
                pl.BlockSpec((1, 32), lambda i: (0, 0)),
                pl.BlockSpec((32, NLANE), lambda i: (0, 0)),
                pl.BlockSpec((1, NLANE), lambda i: (0, 0)),
            ],
            out_specs=pl.BlockSpec((TB, NLANE), lambda i: (i, 0)),
        ),
        compiler_params=pltpu.CompilerParams(dimension_semantics=("parallel",)),
    )(feat, w1p, b1p, w2p, b2p)
    return out_pad[:, :2]


# ---------------- pure-JAX reference mirroring the PyTorch forward ----------------
def _maxpool2_nchw(o):
    B, C, H, W = o.shape
    return o.reshape(B, C, H // 2, 2, W // 2, 2).max(axis=(3, 5))


def reference_forward(x, c1w, c1b, c2w, c2b, f1w, f1b, f2w, f2b):
    dn = ("NCHW", "OIHW", "NCHW")
    o = lax.conv_general_dilated(x[:, None, :, :], c1w, (1, 1), ((2, 2), (2, 2)),
                                 dimension_numbers=dn) + c1b[None, :, None, None]
    o = jnp.maximum(_maxpool2_nchw(o), 0.0)
    o = lax.conv_general_dilated(o, c2w, (1, 1), ((2, 2), (2, 2)),
                                 dimension_numbers=dn) + c2b[None, :, None, None]
    o = jnp.maximum(_maxpool2_nchw(o), 0.0)
    o = o.reshape(o.shape[0], -1)
    o = jnp.maximum(o @ f1w.T + f1b[None, :], 0.0)
    return o @ f2w.T + f2b[None, :]


if __name__ == "__main__":
    key = jax.random.PRNGKey(0)
    kx, k1, k2, k3, k4, k5, k6, k7, k8 = jax.random.split(key, 9)

    # Small shapes consistent with the module: flatten size must be 3072 = 64*(H/4)*(W/4).
    B, H, W = 2, 24, 32

    def uni(k, shape, fan_in):
        bound = float(fan_in) ** -0.5
        return jax.random.uniform(k, shape, jnp.float32, -bound, bound)

    x = jax.random.normal(kx, (B, H, W), dtype=jnp.float32)
    c1w = uni(k1, (C1, 1, KK, KK), 1 * KK * KK)
    c1b = uni(k2, (C1,), 1 * KK * KK)
    c2w = uni(k3, (C2, C1, KK, KK), C1 * KK * KK)
    c2b = uni(k4, (C2,), C1 * KK * KK)
    f1w = uni(k5, (32, 3072), 3072)
    f1b = uni(k6, (32,), 3072)
    f2w = uni(k7, (2, 32), 32)
    f2b = uni(k8, (2,), 32)

    out = cnn_regressor_forward(x, c1w, c1b, c2w, c2b, f1w, f1b, f2w, f2b)
    out = jax.block_until_ready(out)

    ref = reference_forward(x, c1w, c1b, c2w, c2b, f1w, f1b, f2w, f2b)
    assert out.shape == (B, 2)
    # Both paths use the TPU's default (bf16-multiplicand) matmul precision; tolerance covers
    # the different accumulation groupings.  Real bugs produce O(0.1-1) errors.
    assert jnp.allclose(out, ref, atol=1e-2, rtol=1e-2)

    print("KERNEL_OK")
</pallas_src>

<mosaic_0001>
module attributes {stable_mosaic.version = 11 : i64} {
  func.func @_conv1_pool_relu_kernel(%arg0: i32, %arg1: memref<1x2x224x6xf32, #tpu.memory_space<vmem>>, %arg2: memref<10x6x32xf32, #tpu.memory_space<vmem>>, %arg3: memref<1x32xf32, #tpu.memory_space<vmem>>, %arg4: memref<1x192x32xf32, #tpu.memory_space<vmem>>) attributes {dimension_semantics = [#tpu.dimension_semantics<parallel>], iteration_bounds = array<i64: 2>, scalar_prefetch = 0 : i64, scratch_operands = 0 : i64, tpu.core_type = #tpu.core_type<tc>, window_params = [{transform_indices = @transform_0, window_bounds = array<i64: 1, 2, 224, 6>}, {pipeline_mode = #tpu.pipeline_mode<synchronous>, transform_indices = @transform_1, window_bounds = array<i64: 10, 6, 32>}, {pipeline_mode = #tpu.pipeline_mode<synchronous>, transform_indices = @transform_2, window_bounds = array<i64: 1, 32>}, {transform_indices = @transform_3, window_bounds = array<i64: 1, 192, 32>}]} {
    %cst = arith.constant 0.000000e+00 : f32
    %0 = vector.broadcast %cst : f32 to vector<192x32xf32>
    %c0 = arith.constant 0 : index
    %c0_0 = arith.constant 0 : index
    %c0_1 = arith.constant 0 : index
    %c0_2 = arith.constant 0 : index
    %1 = vector.load %arg1[%c0, %c0_0, %c0_1, %c0_2] : memref<1x2x224x6xf32, #tpu.memory_space<vmem>>, vector<1x1x192x6xf32>
    %2 = vector.shape_cast %1 : vector<1x1x192x6xf32> to vector<192x6xf32>
    %c0_3 = arith.constant 0 : index
    %c0_4 = arith.constant 0 : index
    %c0_5 = arith.constant 0 : index
    %3 = vector.load %arg2[%c0_3, %c0_4, %c0_5] : memref<10x6x32xf32, #tpu.memory_space<vmem>>, vector<1x6x32xf32>
    %4 = vector.shape_cast %3 : vector<1x6x32xf32> to vector<6x32xf32>
    %cst_6 = arith.constant dense<0.000000e+00> : vector<192x32xf32>
    %5 = tpu.matmul %2, %4, %cst_6 {dimension_numbers = #tpu.dot_dimension_numbers<[1], [0], [0], [1], [0, 0, 1, 1], [], []>} : vector<192x6xf32>, vector<6x32xf32>, vector<192x32xf32> -> vector<192x32xf32>
    %6 = arith.addf %0, %5 : vector<192x32xf32>
    %c0_7 = arith.constant 0 : index
    %c1 = arith.constant 1 : index
    %c0_8 = arith.constant 0 : index
    %c0_9 = arith.constant 0 : index
    %7 = vector.load %arg1[%c0_7, %c1, %c0_8, %c0_9] : memref<1x2x224x6xf32, #tpu.memory_space<vmem>>, vector<1x1x192x6xf32>
    %8 = vector.shape_cast %7 : vector<1x1x192x6xf32> to vector<192x6xf32>
    %c1_10 = arith.constant 1 : index
    %c0_11 = arith.constant 0 : index
    %c0_12 = arith.constant 0 : index
    %9 = vector.load %arg2[%c1_10, %c0_11, %c0_12] : memref<10x6x32xf32, #tpu.memory_space<vmem>>, vector<1x6x32xf32>
    %10 = vector.shape_cast %9 : vector<1x6x32xf32> to vector<6x32xf32>
    %cst_13 = arith.constant dense<0.000000e+00> : vector<192x32xf32>
    %11 = tpu.matmul %8, %10, %cst_13 {dimension_numbers = #tpu.dot_dimension_numbers<[1], [0], [0], [1], [0, 0, 1, 1], [], []>} : vector<192x6xf32>, vector<6x32xf32>, vector<192x32xf32> -> vector<192x32xf32>
    %12 = arith.addf %6, %11 : vector<192x32xf32>
    %c0_14 = arith.constant 0 : index
    %c0_15 = arith.constant 0 : index
    %c16 = arith.constant 16 : index
    %c0_16 = arith.constant 0 : index
    %13 = vector.load %arg1[%c0_14, %c0_15, %c16, %c0_16] : memref<1x2x224x6xf32, #tpu.memory_space<vmem>>, vector<1x1x192x6xf32>
    %14 = vector.shape_cast %13 : vector<1x1x192x6xf32> to vector<192x6xf32>
    %c2 = arith.constant 2 : index
    %c0_17 = arith.constant 0 : index
    %c0_18 = arith.constant 0 : index
    %15 = vector.load %arg2[%c2, %c0_17, %c0_18] : memref<10x6x32xf32, #tpu.memory_space<vmem>>, vector<1x6x32xf32>
    %16 = vector.shape_cast %15 : vector<1x6x32xf32> to vector<6x32xf32>
    %cst_19 = arith.constant dense<0.000000e+00> : vector<192x32xf32>
    %17 = tpu.matmul %14, %16, %cst_19 {dimension_numbers = #tpu.dot_dimension_numbers<[1], [0], [0], [1], [0, 0, 1, 1], [], []>} : vector<192x6xf32>, vector<6x32xf32>, vector<192x32xf32> -> vector<192x32xf32>
    %18 = arith.addf %12, %17 : vector<192x32xf32>
    %c0_20 = arith.constant 0 : index
    %c1_21 = arith.constant 1 : index
    %c16_22 = arith.constant 16 : index
    %c0_23 = arith.constant 0 : index
    %19 = vector.load %arg1[%c0_20, %c1_21, %c16_22, %c0_23] : memref<1x2x224x6xf32, #tpu.memory_space<vmem>>, vector<1x1x192x6xf32>
    %20 = vector.shape_cast %19 : vector<1x1x192x6xf32> to vector<192x6xf32>
    %c3 = arith.constant 3 : index
    %c0_24 = arith.constant 0 : index
    %c0_25 = arith.constant 0 : index
    %21 = vector.load %arg2[%c3, %c0_24, %c0_25] : memref<10x6x32xf32, #tpu.memory_space<vmem>>, vector<1x6x32xf32>
    %22 = vector.shape_cast %21 : vector<1x6x32xf32> to vector<6x32xf32>
    %cst_26 = arith.constant dense<0.000000e+00> : vector<192x32xf32>
    %23 = tpu.matmul %20, %22, %cst_26 {dimension_numbers = #tpu.dot_dimension_numbers<[1], [0], [0], [1], [0, 0, 1, 1], [], []>} : vector<192x6xf32>, vector<6x32xf32>, vector<192x32xf32> -> vector<192x32xf32>
    %24 = arith.addf %18, %23 : vector<192x32xf32>
    %c0_27 = arith.constant 0 : index
    %c0_28 = arith.constant 0 : index
    %c32 = arith.constant 32 : index
    %c0_29 = arith.constant 0 : index
    %25 = vector.load %arg1[%c0_27, %c0_28, %c32, %c0_29] : memref<1x2x224x6xf32, #tpu.memory_space<vmem>>, vector<1x1x192x6xf32>
    %26 = vector.shape_cast %25 : vector<1x1x192x6xf32> to vector<192x6xf32>
    %c4 = arith.constant 4 : index
    %c0_30 = arith.constant 0 : index
    %c0_31 = arith.constant 0 : index
    %27 = vector.load %arg2[%c4, %c0_30, %c0_31] : memref<10x6x32xf32, #tpu.memory_space<vmem>>, vector<1x6x32xf32>
    %28 = vector.shape_cast %27 : vector<1x6x32xf32> to vector<6x32xf32>
    %cst_32 = arith.constant dense<0.000000e+00> : vector<192x32xf32>
    %29 = tpu.matmul %26, %28, %cst_32 {dimension_numbers = #tpu.dot_dimension_numbers<[1], [0], [0], [1], [0, 0, 1, 1], [], []>} : vector<192x6xf32>, vector<6x32xf32>, vector<192x32xf32> -> vector<192x32xf32>
    %30 = arith.addf %24, %29 : vector<192x32xf32>
    %cst_33 = arith.constant 0.000000e+00 : f32
    %31 = vector.broadcast %cst_33 : f32 to vector<192x32xf32>
    %c0_34 = arith.constant 0 : index
    %c0_35 = arith.constant 0 : index
    %c0_36 = arith.constant 0 : index
    %c0_37 = arith.constant 0 : index
    %32 = vector.load %arg1[%c0_34, %c0_35, %c0_36, %c0_37] : memref<1x2x224x6xf32, #tpu.memory_space<vmem>>, vector<1x1x192x6xf32>
    %33 = vector.shape_cast %32 : vector<1x1x192x6xf32> to vector<192x6xf32>
    %c5 = arith.constant 5 : index
    %c0_38 = arith.constant 0 : index
    %c0_39 = arith.constant 0 : index
    %34 = vector.load %arg2[%c5, %c0_38, %c0_39] : memref<10x6x32xf32, #tpu.memory_space<vmem>>, vector<1x6x32xf32>
    %35 = vector.shape_cast %34 : vector<1x6x32xf32> to vector<6x32xf32>
    %cst_40 = arith.constant dense<0.000000e+00> : vector<192x32xf32>
    %36 = tpu.matmul %33, %35, %cst_40 {dimension_numbers = #tpu.dot_dimension_numbers<[1], [0], [0], [1], [0, 0, 1, 1], [], []>} : vector<192x6xf32>, vector<6x32xf32>, vector<192x32xf32> -> vector<192x32xf32>
    %37 = arith.addf %31, %36 : vector<192x32xf32>
    %c0_41 = arith.constant 0 : index
    %c1_42 = arith.constant 1 : index
    %c0_43 = arith.constant 0 : index
    %c0_44 = arith.constant 0 : index
    %38 = vector.load %arg1[%c0_41, %c1_42, %c0_43, %c0_44] : memref<1x2x224x6xf32, #tpu.memory_space<vmem>>, vector<1x1x192x6xf32>
    %39 = vector.shape_cast %38 : vector<1x1x192x6xf32> to vector<192x6xf32>
    %c6 = arith.constant 6 : index
    %c0_45 = arith.constant 0 : index
    %c0_46 = arith.constant 0 : index
    %40 = vector.load %arg2[%c6, %c0_45, %c0_46] : memref<10x6x32xf32, #tpu.memory_space<vmem>>, vector<1x6x32xf32>
    %41 = vector.shape_cast %40 : vector<1x6x32xf32> to vector<6x32xf32>
    %cst_47 = arith.constant dense<0.000000e+00> : vector<192x32xf32>
    %42 = tpu.matmul %39, %41, %cst_47 {dimension_numbers = #tpu.dot_dimension_numbers<[1], [0], [0], [1], [0, 0, 1, 1], [], []>} : vector<192x6xf32>, vector<6x32xf32>, vector<192x32xf32> -> vector<192x32xf32>
    %43 = arith.addf %37, %42 : vector<192x32xf32>
    %c0_48 = arith.constant 0 : index
    %c0_49 = arith.constant 0 : index
    %c16_50 = arith.constant 16 : index
    %c0_51 = arith.constant 0 : index
    %44 = vector.load %arg1[%c0_48, %c0_49, %c16_50, %c0_51] : memref<1x2x224x6xf32, #tpu.memory_space<vmem>>, vector<1x1x192x6xf32>
    %45 = vector.shape_cast %44 : vector<1x1x192x6xf32> to vector<192x6xf32>
    %c7 = arith.constant 7 : index
    %c0_52 = arith.constant 0 : index
    %c0_53 = arith.constant 0 : index
    %46 = vector.load %arg2[%c7, %c0_52, %c0_53] : memref<10x6x32xf32, #tpu.memory_space<vmem>>, vector<1x6x32xf32>
    %47 = vector.shape_cast %46 : vector<1x6x32xf32> to vector<6x32xf32>
    %cst_54 = arith.constant dense<0.000000e+00> : vector<192x32xf32>
    %48 = tpu.matmul %45, %47, %cst_54 {dimension_numbers = #tpu.dot_dimension_numbers<[1], [0], [0], [1], [0, 0, 1, 1], [], []>} : vector<192x6xf32>, vector<6x32xf32>, vector<192x32xf32> -> vector<192x32xf32>
    %49 = arith.addf %43, %48 : vector<192x32xf32>
    %c0_55 = arith.constant 0 : index
    %c1_56 = arith.constant 1 : index
    %c16_57 = arith.constant 16 : index
    %c0_58 = arith.constant 0 : index
    %50 = vector.load %arg1[%c0_55, %c1_56, %c16_57, %c0_58] : memref<1x2x224x6xf32, #tpu.memory_space<vmem>>, vector<1x1x192x6xf32>
    %51 = vector.shape_cast %50 : vector<1x1x192x6xf32> to vector<192x6xf32>
    %c8 = arith.constant 8 : index
    %c0_59 = arith.constant 0 : index
    %c0_60 = arith.constant 0 : index
    %52 = vector.load %arg2[%c8, %c0_59, %c0_60] : memref<10x6x32xf32, #tpu.memory_space<vmem>>, vector<1x6x32xf32>
    %53 = vector.shape_cast %52 : vector<1x6x32xf32> to vector<6x32xf32>
    %cst_61 = arith.constant dense<0.000000e+00> : vector<192x32xf32>
    %54 = tpu.matmul %51, %53, %cst_61 {dimension_numbers = #tpu.dot_dimension_numbers<[1], [0], [0], [1], [0, 0, 1, 1], [], []>} : vector<192x6xf32>, vector<6x32xf32>, vector<192x32xf32> -> vector<192x32xf32>
    %55 = arith.addf %49, %54 : vector<192x32xf32>
    %c0_62 = arith.constant 0 : index
    %c0_63 = arith.constant 0 : index
    %c32_64 = arith.constant 32 : index
    %c0_65 = arith.constant 0 : index
    %56 = vector.load %arg1[%c0_62, %c0_63, %c32_64, %c0_65] : memref<1x2x224x6xf32, #tpu.memory_space<vmem>>, vector<1x1x192x6xf32>
    %57 = vector.shape_cast %56 : vector<1x1x192x6xf32> to vector<192x6xf32>
    %c9 = arith.constant 9 : index
    %c0_66 = arith.constant 0 : index
    %c0_67 = arith.constant 0 : index
    %58 = vector.load %arg2[%c9, %c0_66, %c0_67] : memref<10x6x32xf32, #tpu.memory_space<vmem>>, vector<1x6x32xf32>
    %59 = vector.shape_cast %58 : vector<1x6x32xf32> to vector<6x32xf32>
    %cst_68 = arith.constant dense<0.000000e+00> : vector<192x32xf32>
    %60 = tpu.matmul %57, %59, %cst_68 {dimension_numbers = #tpu.dot_dimension_numbers<[1], [0], [0], [1], [0, 0, 1, 1], [], []>} : vector<192x6xf32>, vector<6x32xf32>, vector<192x32xf32> -> vector<192x32xf32>
    %61 = arith.addf %55, %60 : vector<192x32xf32>
    %62 = arith.maximumf %30, %61 : vector<192x32xf32>
    %cst_69 = arith.constant 0.000000e+00 : f32
    %63 = vector.broadcast %cst_69 : f32 to vector<192x32xf32>
    %c0_70 = arith.constant 0 : index
    %c1_71 = arith.constant 1 : index
    %c0_72 = arith.constant 0 : index
    %c0_73 = arith.constant 0 : index
    %64 = vector.load %arg1[%c0_70, %c1_71, %c0_72, %c0_73] : memref<1x2x224x6xf32, #tpu.memory_space<vmem>>, vector<1x1x192x6xf32>
    %65 = vector.shape_cast %64 : vector<1x1x192x6xf32> to vector<192x6xf32>
    %c0_74 = arith.constant 0 : index
    %c0_75 = arith.constant 0 : index
    %c0_76 = arith.constant 0 : index
    %66 = vector.load %arg2[%c0_74, %c0_75, %c0_76] : memref<10x6x32xf32, #tpu.memory_space<vmem>>, vector<1x6x32xf32>
    %67 = vector.shape_cast %66 : vector<1x6x32xf32> to vector<6x32xf32>
    %cst_77 = arith.constant dense<0.000000e+00> : vector<192x32xf32>
    %68 = tpu.matmul %65, %67, %cst_77 {dimension_numbers = #tpu.dot_dimension_numbers<[1], [0], [0], [1], [0, 0, 1, 1], [], []>} : vector<192x6xf32>, vector<6x32xf32>, vector<192x32xf32> -> vector<192x32xf32>
    %69 = arith.addf %63, %68 : vector<192x32xf32>
    %c0_78 = arith.constant 0 : index
    %c0_79 = arith.constant 0 : index
    %c16_80 = arith.constant 16 : index
    %c0_81 = arith.constant 0 : index
    %70 = vector.load %arg1[%c0_78, %c0_79, %c16_80, %c0_81] : memref<1x2x224x6xf32, #tpu.memory_space<vmem>>, vector<1x1x192x6xf32>
    %71 = vector.shape_cast %70 : vector<1x1x192x6xf32> to vector<192x6xf32>
    %c1_82 = arith.constant 1 : index
    %c0_83 = arith.constant 0 : index
    %c0_84 = arith.constant 0 : index
    %72 = vector.load %arg2[%c1_82, %c0_83, %c0_84] : memref<10x6x32xf32, #tpu.memory_space<vmem>>, vector<1x6x32xf32>
    %73 = vector.shape_cast %72 : vector<1x6x32xf32> to vector<6x32xf32>
    %cst_85 = arith.constant dense<0.000000e+00> : vector<192x32xf32>
    %74 = tpu.matmul %71, %73, %cst_85 {dimension_numbers = #tpu.dot_dimension_numbers<[1], [0], [0], [1], [0, 0, 1, 1], [], []>} : vector<192x6xf32>, vector<6x32xf32>, vector<192x32xf32> -> vector<192x32xf32>
    %75 = arith.addf %69, %74 : vector<192x32xf32>
    %c0_86 = arith.constant 0 : index
    %c1_87 = arith.constant 1 : index
    %c16_88 = arith.constant 16 : index
    %c0_89 = arith.constant 0 : index
    %76 = vector.load %arg1[%c0_86, %c1_87, %c16_88, %c0_89] : memref<1x2x224x6xf32, #tpu.memory_space<vmem>>, vector<1x1x192x6xf32>
    %77 = vector.shape_cast %76 : vector<1x1x192x6xf32> to vector<192x6xf32>
    %c2_90 = arith.constant 2 : index
    %c0_91 = arith.constant 0 : index
    %c0_92 = arith.constant 0 : index
    %78 = vector.load %arg2[%c2_90, %c0_91, %c0_92] : memref<10x6x32xf32, #tpu.memory_space<vmem>>, vector<1x6x32xf32>
    %79 = vector.shape_cast %78 : vector<1x6x32xf32> to vector<6x32xf32>
    %cst_93 = arith.constant dense<0.000000e+00> : vector<192x32xf32>
    %80 = tpu.matmul %77, %79, %cst_93 {dimension_numbers = #tpu.dot_dimension_numbers<[1], [0], [0], [1], [0, 0, 1, 1], [], []>} : vector<192x6xf32>, vector<6x32xf32>, vector<192x32xf32> -> vector<192x32xf32>
    %81 = arith.addf %75, %80 : vector<192x32xf32>
    %c0_94 = arith.constant 0 : index
    %c0_95 = arith.constant 0 : index
    %c32_96 = arith.constant 32 : index
    %c0_97 = arith.constant 0 : index
    %82 = vector.load %arg1[%c0_94, %c0_95, %c32_96, %c0_97] : memref<1x2x224x6xf32, #tpu.memory_space<vmem>>, vector<1x1x192x6xf32>
    %83 = vector.shape_cast %82 : vector<1x1x192x6xf32> to vector<192x6xf32>
    %c3_98 = arith.constant 3 : index
    %c0_99 = arith.constant 0 : index
    %c0_100 = arith.constant 0 : index
    %84 = vector.load %arg2[%c3_98, %c0_99, %c0_100] : memref<10x6x32xf32, #tpu.memory_space<vmem>>, vector<1x6x32xf32>
    %85 = vector.shape_cast %84 : vector<1x6x32xf32> to vector<6x32xf32>
    %cst_101 = arith.constant dense<0.000000e+00> : vector<192x32xf32>
    %86 = tpu.matmul %83, %85, %cst_101 {dimension_numbers = #tpu.dot_dimension_numbers<[1], [0], [0], [1], [0, 0, 1, 1], [], []>} : vector<192x6xf32>, vector<6x32xf32>, vector<192x32xf32> -> vector<192x32xf32>
    %87 = arith.addf %81, %86 : vector<192x32xf32>
    %c0_102 = arith.constant 0 : index
    %c1_103 = arith.constant 1 : index
    %c32_104 = arith.constant 32 : index
    %c0_105 = arith.constant 0 : index
    %88 = vector.load %arg1[%c0_102, %c1_103, %c32_104, %c0_105] : memref<1x2x224x6xf32, #tpu.memory_space<vmem>>, vector<1x1x192x6xf32>
    %89 = vector.shape_cast %88 : vector<1x1x192x6xf32> to vector<192x6xf32>
    %c4_106 = arith.constant 4 : index
    %c0_107 = arith.constant 0 : index
    %c0_108 = arith.constant 0 : index
    %90 = vector.load %arg2[%c4_106, %c0_107, %c0_108] : memref<10x6x32xf32, #tpu.memory_space<vmem>>, vector<1x6x32xf32>
    %91 = vector.shape_cast %90 : vector<1x6x32xf32> to vector<6x32xf32>
    %cst_109 = arith.constant dense<0.000000e+00> : vector<192x32xf32>
    %92 = tpu.matmul %89, %91, %cst_109 {dimension_numbers = #tpu.dot_dimension_numbers<[1], [0], [0], [1], [0, 0, 1, 1], [], []>} : vector<192x6xf32>, vector<6x32xf32>, vector<192x32xf32> -> vector<192x32xf32>
    %93 = arith.addf %87, %92 : vector<192x32xf32>
    %94 = arith.maximumf %62, %93 : vector<192x32xf32>
    %cst_110 = arith.constant 0.000000e+00 : f32
    %95 = vector.broadcast %cst_110 : f32 to vector<192x32xf32>
    %c0_111 = arith.constant 0 : index
    %c1_112 = arith.constant 1 : index
    %c0_113 = arith.constant 0 : index
    %c0_114 = arith.constant 0 : index
    %96 = vector.load %arg1[%c0_111, %c1_112, %c0_113, %c0_114] : memref<1x2x224x6xf32, #tpu.memory_space<vmem>>, vector<1x1x192x6xf32>
    %97 = vector.shape_cast %96 : vector<1x1x192x6xf32> to vector<192x6xf32>
    %c5_115 = arith.constant 5 : index
    %c0_116 = arith.constant 0 : index
    %c0_117 = arith.constant 0 : index
    %98 = vector.load %arg2[%c5_115, %c0_116, %c0_117] : memref<10x6x32xf32, #tpu.memory_space<vmem>>, vector<1x6x32xf32>
    %99 = vector.shape_cast %98 : vector<1x6x32xf32> to vector<6x32xf32>
    %cst_118 = arith.constant dense<0.000000e+00> : vector<192x32xf32>
    %100 = tpu.matmul %97, %99, %cst_118 {dimension_numbers = #tpu.dot_dimension_numbers<[1], [0], [0], [1], [0, 0, 1, 1], [], []>} : vector<192x6xf32>, vector<6x32xf32>, vector<192x32xf32> -> vector<192x32xf32>
    %101 = arith.addf %95, %100 : vector<192x32xf32>
    %c0_119 = arith.constant 0 : index
    %c0_120 = arith.constant 0 : index
    %c16_121 = arith.constant 16 : index
    %c0_122 = arith.constant 0 : index
    %102 = vector.load %arg1[%c0_119, %c0_120, %c16_121, %c0_122] : memref<1x2x224x6xf32, #tpu.memory_space<vmem>>, vector<1x1x192x6xf32>
    %103 = vector.shape_cast %102 : vector<1x1x192x6xf32> to vector<192x6xf32>
    %c6_123 = arith.constant 6 : index
    %c0_124 = arith.constant 0 : index
    %c0_125 = arith.constant 0 : index
    %104 = vector.load %arg2[%c6_123, %c0_124, %c0_125] : memref<10x6x32xf32, #tpu.memory_space<vmem>>, vector<1x6x32xf32>
    %105 = vector.shape_cast %104 : vector<1x6x32xf32> to vector<6x32xf32>
    %cst_126 = arith.constant dense<0.000000e+00> : vector<192x32xf32>
    %106 = tpu.matmul %103, %105, %cst_126 {dimension_numbers = #tpu.dot_dimension_numbers<[1], [0], [0], [1], [0, 0, 1, 1], [], []>} : vector<192x6xf32>, vector<6x32xf32>, vector<192x32xf32> -> vector<192x32xf32>
    %107 = arith.addf %101, %106 : vector<192x32xf32>
    %c0_127 = arith.constant 0 : index
    %c1_128 = arith.constant 1 : index
    %c16_129 = arith.constant 16 : index
    %c0_130 = arith.constant 0 : index
    %108 = vector.load %arg1[%c0_127, %c1_128, %c16_129, %c0_130] : memref<1x2x224x6xf32, #tpu.memory_space<vmem>>, vector<1x1x192x6xf32>
    %109 = vector.shape_cast %108 : vector<1x1x192x6xf32> to vector<192x6xf32>
    %c7_131 = arith.constant 7 : index
    %c0_132 = arith.constant 0 : index
    %c0_133 = arith.constant 0 : index
    %110 = vector.load %arg2[%c7_131, %c0_132, %c0_133] : memref<10x6x32xf32, #tpu.memory_space<vmem>>, vector<1x6x32xf32>
    %111 = vector.shape_cast %110 : vector<1x6x32xf32> to vector<6x32xf32>
    %cst_134 = arith.constant dense<0.000000e+00> : vector<192x32xf32>
    %112 = tpu.matmul %109, %111, %cst_134 {dimension_numbers = #tpu.dot_dimension_numbers<[1], [0], [0], [1], [0, 0, 1, 1], [], []>} : vector<192x6xf32>, vector<6x32xf32>, vector<192x32xf32> -> vector<192x32xf32>
    %113 = arith.addf %107, %112 : vector<192x32xf32>
    %c0_135 = arith.constant 0 : index
    %c0_136 = arith.constant 0 : index
    %c32_137 = arith.constant 32 : index
    %c0_138 = arith.constant 0 : index
    %114 = vector.load %arg1[%c0_135, %c0_136, %c32_137, %c0_138] : memref<1x2x224x6xf32, #tpu.memory_space<vmem>>, vector<1x1x192x6xf32>
    %115 = vector.shape_cast %114 : vector<1x1x192x6xf32> to vector<192x6xf32>
    %c8_139 = arith.constant 8 : index
    %c0_140 = arith.constant 0 : index
    %c0_141 = arith.constant 0 : index
    %116 = vector.load %arg2[%c8_139, %c0_140, %c0_141] : memref<10x6x32xf32, #tpu.memory_space<vmem>>, vector<1x6x32xf32>
    %117 = vector.shape_cast %116 : vector<1x6x32xf32> to vector<6x32xf32>
    %cst_142 = arith.constant dense<0.000000e+00> : vector<192x32xf32>
    %118 = tpu.matmul %115, %117, %cst_142 {dimension_numbers = #tpu.dot_dimension_numbers<[1], [0], [0], [1], [0, 0, 1, 1], [], []>} : vector<192x6xf32>, vector<6x32xf32>, vector<192x32xf32> -> vector<192x32xf32>
    %119 = arith.addf %113, %118 : vector<192x32xf32>
    %c0_143 = arith.constant 0 : index
    %c1_144 = arith.constant 1 : index
    %c32_145 = arith.constant 32 : index
    %c0_146 = arith.constant 0 : index
    %120 = vector.load %arg1[%c0_143, %c1_144, %c32_145, %c0_146] : memref<1x2x224x6xf32, #tpu.memory_space<vmem>>, vector<1x1x192x6xf32>
    %121 = vector.shape_cast %120 : vector<1x1x192x6xf32> to vector<192x6xf32>
    %c9_147 = arith.constant 9 : index
    %c0_148 = arith.constant 0 : index
    %c0_149 = arith.constant 0 : index
    %122 = vector.load %arg2[%c9_147, %c0_148, %c0_149] : memref<10x6x32xf32, #tpu.memory_space<vmem>>, vector<1x6x32xf32>
    %123 = vector.shape_cast %122 : vector<1x6x32xf32> to vector<6x32xf32>
    %cst_150 = arith.constant dense<0.000000e+00> : vector<192x32xf32>
    %124 = tpu.matmul %121, %123, %cst_150 {dimension_numbers = #tpu.dot_dimension_numbers<[1], [0], [0], [1], [0, 0, 1, 1], [], []>} : vector<192x6xf32>, vector<6x32xf32>, vector<192x32xf32> -> vector<192x32xf32>
    %125 = arith.addf %119, %124 : vector<192x32xf32>
    %126 = arith.maximumf %94, %125 : vector<192x32xf32>
    %c0_151 = arith.constant 0 : index
    %c0_152 = arith.constant 0 : index
    %127 = vector.load %arg3[%c0_151, %c0_152] : memref<1x32xf32, #tpu.memory_space<vmem>>, vector<1x32xf32>
    %128 = vector.broadcast %127 : vector<1x32xf32> to vector<192x32xf32>
    %129 = arith.addf %126, %128 : vector<192x32xf32>
    %cst_153 = arith.constant 0.000000e+00 : f32
    %130 = vector.broadcast %cst_153 : f32 to vector<192x32xf32>
    %131 = arith.maximumf %129, %130 : vector<192x32xf32>
    %c0_154 = arith.constant 0 : index
    %c0_155 = arith.constant 0 : index
    %c0_156 = arith.constant 0 : index
    %132 = vector.load %arg4[%c0_154, %c0_155, %c0_156] : memref<1x192x32xf32, #tpu.memory_space<vmem>>, vector<1x192x32xf32>
    %133 = vector.shape_cast %132 : vector<1x192x32xf32> to vector<192x32xf32>
    %134 = vector.shape_cast %131 : vector<192x32xf32> to vector<1x192x32xf32>
    tpu.vector_store %arg4[%c0_154, %c0_155, %c0_156], %134 {strides = array<i32>} : memref<1x192x32xf32, #tpu.memory_space<vmem>>, vector<1x192x32xf32>,
    return
  }
  func.func @transform_0(%arg0: i32) -> (i32, i32, i32, i32) {
    %c0_i32 = arith.constant 0 : i32
    %c0_i32_0 = arith.constant 0 : i32
    %c0_i32_1 = arith.constant 0 : i32
    %c0_i32_2 = arith.constant 0 : i32
    return %arg0, %c0_i32, %c0_i32_0, %c0_i32_1 : i32, i32, i32, i32
  }
  func.func @transform_1(%arg0: i32) -> (i32, i32, i32) {
    %c0_i32 = arith.constant 0 : i32
    %c0_i32_0 = arith.constant 0 : i32
    %c0_i32_1 = arith.constant 0 : i32
    %c0_i32_2 = arith.constant 0 : i32
    return %c0_i32, %c0_i32_0, %c0_i32_1 : i32, i32, i32
  }
  func.func @transform_2(%arg0: i32) -> (i32, i32) {
    %c0_i32 = arith.constant 0 : i32
    %c0_i32_0 = arith.constant 0 : i32
    %c0_i32_1 = arith.constant 0 : i32
    return %c0_i32, %c0_i32_0 : i32, i32
  }
  func.func @transform_3(%arg0: i32) -> (i32, i32, i32) {
    %c0_i32 = arith.constant 0 : i32
    %c0_i32_0 = arith.constant 0 : i32
    %c0_i32_1 = arith.constant 0 : i32
    return %arg0, %c0_i32, %c0_i32_0 : i32, i32, i32
  }
}

module attributes {stable_mosaic.version = 11 : i64} {
  func.func @_conv2_pool_relu_kernel(%arg0: i32, %arg1: memref<1x4x64x160xf32, #tpu.memory_space<vmem>>, %arg2: memref<5x160x64xf32, #tpu.memory_space<vmem>>, %arg3: memref<1x64xf32, #tpu.memory_space<vmem>>, %arg4: memref<1x48x64xf32, #tpu.memory_space<vmem>>) attributes {dimension_semantics = [#tpu.dimension_semantics<parallel>], iteration_bounds = array<i64: 2>, scalar_prefetch = 0 : i64, scratch_operands = 0 : i64, tpu.core_type = #tpu.core_type<tc>, window_params = [{transform_indices = @transform_0, window_bounds = array<i64: 1, 4, 64, 160>}, {pipeline_mode = #tpu.pipeline_mode<synchronous>, transform_indices = @transform_1, window_bounds = array<i64: 5, 160, 64>}, {pipeline_mode = #tpu.pipeline_mode<synchronous>, transform_indices = @transform_2, window_bounds = array<i64: 1, 64>}, {transform_indices = @transform_3, window_bounds = array<i64: 1, 48, 64>}]} {
    %cst = arith.constant 0.000000e+00 : f32
    %0 = vector.broadcast %cst : f32 to vector<48x64xf32>
    %c0 = arith.constant 0 : index
    %c0_0 = arith.constant 0 : index
    %c0_1 = arith.constant 0 : index
    %c0_2 = arith.constant 0 : index
    %1 = vector.load %arg1[%c0, %c0_0, %c0_1, %c0_2] : memref<1x4x64x160xf32, #tpu.memory_space<vmem>>, vector<1x1x48x160xf32>
    %2 = vector.shape_cast %1 : vector<1x1x48x160xf32> to vector<48x160xf32>
    %c0_3 = arith.constant 0 : index
    %c0_4 = arith.constant 0 : index
    %c0_5 = arith.constant 0 : index
    %3 = vector.load %arg2[%c0_3, %c0_4, %c0_5] : memref<5x160x64xf32, #tpu.memory_space<vmem>>, vector<1x160x64xf32>
    %4 = vector.shape_cast %3 : vector<1x160x64xf32> to vector<160x64xf32>
    %cst_6 = arith.constant dense<0.000000e+00> : vector<48x64xf32>
    %5 = tpu.matmul %2, %4, %cst_6 {dimension_numbers = #tpu.dot_dimension_numbers<[1], [0], [0], [1], [0, 0, 1, 1], [], []>} : vector<48x160xf32>, vector<160x64xf32>, vector<48x64xf32> -> vector<48x64xf32>
    %6 = arith.addf %0, %5 : vector<48x64xf32>
    %c0_7 = arith.constant 0 : index
    %c2 = arith.constant 2 : index
    %c0_8 = arith.constant 0 : index
    %c0_9 = arith.constant 0 : index
    %7 = vector.load %arg1[%c0_7, %c2, %c0_8, %c0_9] : memref<1x4x64x160xf32, #tpu.memory_space<vmem>>, vector<1x1x48x160xf32>
    %8 = vector.shape_cast %7 : vector<1x1x48x160xf32> to vector<48x160xf32>
    %c1 = arith.constant 1 : index
    %c0_10 = arith.constant 0 : index
    %c0_11 = arith.constant 0 : index
    %9 = vector.load %arg2[%c1, %c0_10, %c0_11] : memref<5x160x64xf32, #tpu.memory_space<vmem>>, vector<1x160x64xf32>
    %10 = vector.shape_cast %9 : vector<1x160x64xf32> to vector<160x64xf32>
    %cst_12 = arith.constant dense<0.000000e+00> : vector<48x64xf32>
    %11 = tpu.matmul %8, %10, %cst_12 {dimension_numbers = #tpu.dot_dimension_numbers<[1], [0], [0], [1], [0, 0, 1, 1], [], []>} : vector<48x160xf32>, vector<160x64xf32>, vector<48x64xf32> -> vector<48x64xf32>
    %12 = arith.addf %6, %11 : vector<48x64xf32>
    %c0_13 = arith.constant 0 : index
    %c0_14 = arith.constant 0 : index
    %c8 = arith.constant 8 : index
    %c0_15 = arith.constant 0 : index
    %13 = vector.load %arg1[%c0_13, %c0_14, %c8, %c0_15] : memref<1x4x64x160xf32, #tpu.memory_space<vmem>>, vector<1x1x48x160xf32>
    %14 = vector.shape_cast %13 : vector<1x1x48x160xf32> to vector<48x160xf32>
    %c2_16 = arith.constant 2 : index
    %c0_17 = arith.constant 0 : index
    %c0_18 = arith.constant 0 : index
    %15 = vector.load %arg2[%c2_16, %c0_17, %c0_18] : memref<5x160x64xf32, #tpu.memory_space<vmem>>, vector<1x160x64xf32>
    %16 = vector.shape_cast %15 : vector<1x160x64xf32> to vector<160x64xf32>
    %cst_19 = arith.constant dense<0.000000e+00> : vector<48x64xf32>
    %17 = tpu.matmul %14, %16, %cst_19 {dimension_numbers = #tpu.dot_dimension_numbers<[1], [0], [0], [1], [0, 0, 1, 1], [], []>} : vector<48x160xf32>, vector<160x64xf32>, vector<48x64xf32> -> vector<48x64xf32>
    %18 = arith.addf %12, %17 : vector<48x64xf32>
    %c0_20 = arith.constant 0 : index
    %c2_21 = arith.constant 2 : index
    %c8_22 = arith.constant 8 : index
    %c0_23 = arith.constant 0 : index
    %19 = vector.load %arg1[%c0_20, %c2_21, %c8_22, %c0_23] : memref<1x4x64x160xf32, #tpu.memory_space<vmem>>, vector<1x1x48x160xf32>
    %20 = vector.shape_cast %19 : vector<1x1x48x160xf32> to vector<48x160xf32>
    %c3 = arith.constant 3 : index
    %c0_24 = arith.constant 0 : index
    %c0_25 = arith.constant 0 : index
    %21 = vector.load %arg2[%c3, %c0_24, %c0_25] : memref<5x160x64xf32, #tpu.memory_space<vmem>>, vector<1x160x64xf32>
    %22 = vector.shape_cast %21 : vector<1x160x64xf32> to vector<160x64xf32>
    %cst_26 = arith.constant dense<0.000000e+00> : vector<48x64xf32>
    %23 = tpu.matmul %20, %22, %cst_26 {dimension_numbers = #tpu.dot_dimension_numbers<[1], [0], [0], [1], [0, 0, 1, 1], [], []>} : vector<48x160xf32>, vector<160x64xf32>, vector<48x64xf32> -> vector<48x64xf32>
    %24 = arith.addf %18, %23 : vector<48x64xf32>
    %c0_27 = arith.constant 0 : index
    %c0_28 = arith.constant 0 : index
    %c16 = arith.constant 16 : index
    %c0_29 = arith.constant 0 : index
    %25 = vector.load %arg1[%c0_27, %c0_28, %c16, %c0_29] : memref<1x4x64x160xf32, #tpu.memory_space<vmem>>, vector<1x1x48x160xf32>
    %26 = vector.shape_cast %25 : vector<1x1x48x160xf32> to vector<48x160xf32>
    %c4 = arith.constant 4 : index
    %c0_30 = arith.constant 0 : index
    %c0_31 = arith.constant 0 : index
    %27 = vector.load %arg2[%c4, %c0_30, %c0_31] : memref<5x160x64xf32, #tpu.memory_space<vmem>>, vector<1x160x64xf32>
    %28 = vector.shape_cast %27 : vector<1x160x64xf32> to vector<160x64xf32>
    %cst_32 = arith.constant dense<0.000000e+00> : vector<48x64xf32>
    %29 = tpu.matmul %26, %28, %cst_32 {dimension_numbers = #tpu.dot_dimension_numbers<[1], [0], [0], [1], [0, 0, 1, 1], [], []>} : vector<48x160xf32>, vector<160x64xf32>, vector<48x64xf32> -> vector<48x64xf32>
    %30 = arith.addf %24, %29 : vector<48x64xf32>
    %cst_33 = arith.constant 0.000000e+00 : f32
    %31 = vector.broadcast %cst_33 : f32 to vector<48x64xf32>
    %c0_34 = arith.constant 0 : index
    %c1_35 = arith.constant 1 : index
    %c0_36 = arith.constant 0 : index
    %c0_37 = arith.constant 0 : index
    %32 = vector.load %arg1[%c0_34, %c1_35, %c0_36, %c0_37] : memref<1x4x64x160xf32, #tpu.memory_space<vmem>>, vector<1x1x48x160xf32>
    %33 = vector.shape_cast %32 : vector<1x1x48x160xf32> to vector<48x160xf32>
    %c0_38 = arith.constant 0 : index
    %c0_39 = arith.constant 0 : index
    %c0_40 = arith.constant 0 : index
    %34 = vector.load %arg2[%c0_38, %c0_39, %c0_40] : memref<5x160x64xf32, #tpu.memory_space<vmem>>, vector<1x160x64xf32>
    %35 = vector.shape_cast %34 : vector<1x160x64xf32> to vector<160x64xf32>
    %cst_41 = arith.constant dense<0.000000e+00> : vector<48x64xf32>
    %36 = tpu.matmul %33, %35, %cst_41 {dimension_numbers = #tpu.dot_dimension_numbers<[1], [0], [0], [1], [0, 0, 1, 1], [], []>} : vector<48x160xf32>, vector<160x64xf32>, vector<48x64xf32> -> vector<48x64xf32>
    %37 = arith.addf %31, %36 : vector<48x64xf32>
    %c0_42 = arith.constant 0 : index
    %c3_43 = arith.constant 3 : index
    %c0_44 = arith.constant 0 : index
    %c0_45 = arith.constant 0 : index
    %38 = vector.load %arg1[%c0_42, %c3_43, %c0_44, %c0_45] : memref<1x4x64x160xf32, #tpu.memory_space<vmem>>, vector<1x1x48x160xf32>
    %39 = vector.shape_cast %38 : vector<1x1x48x160xf32> to vector<48x160xf32>
    %c1_46 = arith.constant 1 : index
    %c0_47 = arith.constant 0 : index
    %c0_48 = arith.constant 0 : index
    %40 = vector.load %arg2[%c1_46, %c0_47, %c0_48] : memref<5x160x64xf32, #tpu.memory_space<vmem>>, vector<1x160x64xf32>
    %41 = vector.shape_cast %40 : vector<1x160x64xf32> to vector<160x64xf32>
    %cst_49 = arith.constant dense<0.000000e+00> : vector<48x64xf32>
    %42 = tpu.matmul %39, %41, %cst_49 {dimension_numbers = #tpu.dot_dimension_numbers<[1], [0], [0], [1], [0, 0, 1, 1], [], []>} : vector<48x160xf32>, vector<160x64xf32>, vector<48x64xf32> -> vector<48x64xf32>
    %43 = arith.addf %37, %42 : vector<48x64xf32>
    %c0_50 = arith.constant 0 : index
    %c1_51 = arith.constant 1 : index
    %c8_52 = arith.constant 8 : index
    %c0_53 = arith.constant 0 : index
    %44 = vector.load %arg1[%c0_50, %c1_51, %c8_52, %c0_53] : memref<1x4x64x160xf32, #tpu.memory_space<vmem>>, vector<1x1x48x160xf32>
    %45 = vector.shape_cast %44 : vector<1x1x48x160xf32> to vector<48x160xf32>
    %c2_54 = arith.constant 2 : index
    %c0_55 = arith.constant 0 : index
    %c0_56 = arith.constant 0 : index
    %46 = vector.load %arg2[%c2_54, %c0_55, %c0_56] : memref<5x160x64xf32, #tpu.memory_space<vmem>>, vector<1x160x64xf32>
    %47 = vector.shape_cast %46 : vector<1x160x64xf32> to vector<160x64xf32>
    %cst_57 = arith.constant dense<0.000000e+00> : vector<48x64xf32>
    %48 = tpu.matmul %45, %47, %cst_57 {dimension_numbers = #tpu.dot_dimension_numbers<[1], [0], [0], [1], [0, 0, 1, 1], [], []>} : vector<48x160xf32>, vector<160x64xf32>, vector<48x64xf32> -> vector<48x64xf32>
    %49 = arith.addf %43, %48 : vector<48x64xf32>
    %c0_58 = arith.constant 0 : index
    %c3_59 = arith.constant 3 : index
    %c8_60 = arith.constant 8 : index
    %c0_61 = arith.constant 0 : index
    %50 = vector.load %arg1[%c0_58, %c3_59, %c8_60, %c0_61] : memref<1x4x64x160xf32, #tpu.memory_space<vmem>>, vector<1x1x48x160xf32>
    %51 = vector.shape_cast %50 : vector<1x1x48x160xf32> to vector<48x160xf32>
    %c3_62 = arith.constant 3 : index
    %c0_63 = arith.constant 0 : index
    %c0_64 = arith.constant 0 : index
    %52 = vector.load %arg2[%c3_62, %c0_63, %c0_64] : memref<5x160x64xf32, #tpu.memory_space<vmem>>, vector<1x160x64xf32>
    %53 = vector.shape_cast %52 : vector<1x160x64xf32> to vector<160x64xf32>
    %cst_65 = arith.constant dense<0.000000e+00> : vector<48x64xf32>
    %54 = tpu.matmul %51, %53, %cst_65 {dimension_numbers = #tpu.dot_dimension_numbers<[1], [0], [0], [1], [0, 0, 1, 1], [], []>} : vector<48x160xf32>, vector<160x64xf32>, vector<48x64xf32> -> vector<48x64xf32>
    %55 = arith.addf %49, %54 : vector<48x64xf32>
    %c0_66 = arith.constant 0 : index
    %c1_67 = arith.constant 1 : index
    %c16_68 = arith.constant 16 : index
    %c0_69 = arith.constant 0 : index
    %56 = vector.load %arg1[%c0_66, %c1_67, %c16_68, %c0_69] : memref<1x4x64x160xf32, #tpu.memory_space<vmem>>, vector<1x1x48x160xf32>
    %57 = vector.shape_cast %56 : vector<1x1x48x160xf32> to vector<48x160xf32>
    %c4_70 = arith.constant 4 : index
    %c0_71 = arith.constant 0 : index
    %c0_72 = arith.constant 0 : index
    %58 = vector.load %arg2[%c4_70, %c0_71, %c0_72] : memref<5x160x64xf32, #tpu.memory_space<vmem>>, vector<1x160x64xf32>
    %59 = vector.shape_cast %58 : vector<1x160x64xf32> to vector<160x64xf32>
    %cst_73 = arith.constant dense<0.000000e+00> : vector<48x64xf32>
    %60 = tpu.matmul %57, %59, %cst_73 {dimension_numbers = #tpu.dot_dimension_numbers<[1], [0], [0], [1], [0, 0, 1, 1], [], []>} : vector<48x160xf32>, vector<160x64xf32>, vector<48x64xf32> -> vector<48x64xf32>
    %61 = arith.addf %55, %60 : vector<48x64xf32>
    %62 = arith.maximumf %30, %61 : vector<48x64xf32>
    %cst_74 = arith.constant 0.000000e+00 : f32
    %63 = vector.broadcast %cst_74 : f32 to vector<48x64xf32>
    %c0_75 = arith.constant 0 : index
    %c2_76 = arith.constant 2 : index
    %c0_77 = arith.constant 0 : index
    %c0_78 = arith.constant 0 : index
    %64 = vector.load %arg1[%c0_75, %c2_76, %c0_77, %c0_78] : memref<1x4x64x160xf32, #tpu.memory_space<vmem>>, vector<1x1x48x160xf32>
    %65 = vector.shape_cast %64 : vector<1x1x48x160xf32> to vector<48x160xf32>
    %c0_79 = arith.constant 0 : index
    %c0_80 = arith.constant 0 : index
    %c0_81 = arith.constant 0 : index
    %66 = vector.load %arg2[%c0_79, %c0_80, %c0_81] : memref<5x160x64xf32, #tpu.memory_space<vmem>>, vector<1x160x64xf32>
    %67 = vector.shape_cast %66 : vector<1x160x64xf32> to vector<160x64xf32>
    %cst_82 = arith.constant dense<0.000000e+00> : vector<48x64xf32>
    %68 = tpu.matmul %65, %67, %cst_82 {dimension_numbers = #tpu.dot_dimension_numbers<[1], [0], [0], [1], [0, 0, 1, 1], [], []>} : vector<48x160xf32>, vector<160x64xf32>, vector<48x64xf32> -> vector<48x64xf32>
    %69 = arith.addf %63, %68 : vector<48x64xf32>
    %c0_83 = arith.constant 0 : index
    %c0_84 = arith.constant 0 : index
    %c8_85 = arith.constant 8 : index
    %c0_86 = arith.constant 0 : index
    %70 = vector.load %arg1[%c0_83, %c0_84, %c8_85, %c0_86] : memref<1x4x64x160xf32, #tpu.memory_space<vmem>>, vector<1x1x48x160xf32>
    %71 = vector.shape_cast %70 : vector<1x1x48x160xf32> to vector<48x160xf32>
    %c1_87 = arith.constant 1 : index
    %c0_88 = arith.constant 0 : index
    %c0_89 = arith.constant 0 : index
    %72 = vector.load %arg2[%c1_87, %c0_88, %c0_89] : memref<5x160x64xf32, #tpu.memory_space<vmem>>, vector<1x160x64xf32>
    %73 = vector.shape_cast %72 : vector<1x160x64xf32> to vector<160x64xf32>
    %cst_90 = arith.constant dense<0.000000e+00> : vector<48x64xf32>
    %74 = tpu.matmul %71, %73, %cst_90 {dimension_numbers = #tpu.dot_dimension_numbers<[1], [0], [0], [1], [0, 0, 1, 1], [], []>} : vector<48x160xf32>, vector<160x64xf32>, vector<48x64xf32> -> vector<48x64xf32>
    %75 = arith.addf %69, %74 : vector<48x64xf32>
    %c0_91 = arith.constant 0 : index
    %c2_92 = arith.constant 2 : index
    %c8_93 = arith.constant 8 : index
    %c0_94 = arith.constant 0 : index
    %76 = vector.load %arg1[%c0_91, %c2_92, %c8_93, %c0_94] : memref<1x4x64x160xf32, #tpu.memory_space<vmem>>, vector<1x1x48x160xf32>
    %77 = vector.shape_cast %76 : vector<1x1x48x160xf32> to vector<48x160xf32>
    %c2_95 = arith.constant 2 : index
    %c0_96 = arith.constant 0 : index
    %c0_97 = arith.constant 0 : index
    %78 = vector.load %arg2[%c2_95, %c0_96, %c0_97] : memref<5x160x64xf32, #tpu.memory_space<vmem>>, vector<1x160x64xf32>
    %79 = vector.shape_cast %78 : vector<1x160x64xf32> to vector<160x64xf32>
    %cst_98 = arith.constant dense<0.000000e+00> : vector<48x64xf32>
    %80 = tpu.matmul %77, %79, %cst_98 {dimension_numbers = #tpu.dot_dimension_numbers<[1], [0], [0], [1], [0, 0, 1, 1], [], []>} : vector<48x160xf32>, vector<160x64xf32>, vector<48x64xf32> -> vector<48x64xf32>
    %81 = arith.addf %75, %80 : vector<48x64xf32>
    %c0_99 = arith.constant 0 : index
    %c0_100 = arith.constant 0 : index
    %c16_101 = arith.constant 16 : index
    %c0_102 = arith.constant 0 : index
    %82 = vector.load %arg1[%c0_99, %c0_100, %c16_101, %c0_102] : memref<1x4x64x160xf32, #tpu.memory_space<vmem>>, vector<1x1x48x160xf32>
    %83 = vector.shape_cast %82 : vector<1x1x48x160xf32> to vector<48x160xf32>
    %c3_103 = arith.constant 3 : index
    %c0_104 = arith.constant 0 : index
    %c0_105 = arith.constant 0 : index
    %84 = vector.load %arg2[%c3_103, %c0_104, %c0_105] : memref<5x160x64xf32, #tpu.memory_space<vmem>>, vector<1x160x64xf32>
    %85 = vector.shape_cast %84 : vector<1x160x64xf32> to vector<160x64xf32>
    %cst_106 = arith.constant dense<0.000000e+00> : vector<48x64xf32>
    %86 = tpu.matmul %83, %85, %cst_106 {dimension_numbers = #tpu.dot_dimension_numbers<[1], [0], [0], [1], [0, 0, 1, 1], [], []>} : vector<48x160xf32>, vector<160x64xf32>, vector<48x64xf32> -> vector<48x64xf32>
    %87 = arith.addf %81, %86 : vector<48x64xf32>
    %c0_107 = arith.constant 0 : index
    %c2_108 = arith.constant 2 : index
    %c16_109 = arith.constant 16 : index
    %c0_110 = arith.constant 0 : index
    %88 = vector.load %arg1[%c0_107, %c2_108, %c16_109, %c0_110] : memref<1x4x64x160xf32, #tpu.memory_space<vmem>>, vector<1x1x48x160xf32>
    %89 = vector.shape_cast %88 : vector<1x1x48x160xf32> to vector<48x160xf32>
    %c4_111 = arith.constant 4 : index
    %c0_112 = arith.constant 0 : index
    %c0_113 = arith.constant 0 : index
    %90 = vector.load %arg2[%c4_111, %c0_112, %c0_113] : memref<5x160x64xf32, #tpu.memory_space<vmem>>, vector<1x160x64xf32>
    %91 = vector.shape_cast %90 : vector<1x160x64xf32> to vector<160x64xf32>
    %cst_114 = arith.constant dense<0.000000e+00> : vector<48x64xf32>
    %92 = tpu.matmul %89, %91, %cst_114 {dimension_numbers = #tpu.dot_dimension_numbers<[1], [0], [0], [1], [0, 0, 1, 1], [], []>} : vector<48x160xf32>, vector<160x64xf32>, vector<48x64xf32> -> vector<48x64xf32>
    %93 = arith.addf %87, %92 : vector<48x64xf32>
    %94 = arith.maximumf %62, %93 : vector<48x64xf32>
    %cst_115 = arith.constant 0.000000e+00 : f32
    %95 = vector.broadcast %cst_115 : f32 to vector<48x64xf32>
    %c0_116 = arith.constant 0 : index
    %c3_117 = arith.constant 3 : index
    %c0_118 = arith.constant 0 : index
    %c0_119 = arith.constant 0 : index
    %96 = vector.load %arg1[%c0_116, %c3_117, %c0_118, %c0_119] : memref<1x4x64x160xf32, #tpu.memory_space<vmem>>, vector<1x1x48x160xf32>
    %97 = vector.shape_cast %96 : vector<1x1x48x160xf32> to vector<48x160xf32>
    %c0_120 = arith.constant 0 : index
    %c0_121 = arith.constant 0 : index
    %c0_122 = arith.constant 0 : index
    %98 = vector.load %arg2[%c0_120, %c0_121, %c0_122] : memref<5x160x64xf32, #tpu.memory_space<vmem>>, vector<1x160x64xf32>
    %99 = vector.shape_cast %98 : vector<1x160x64xf32> to vector<160x64xf32>
    %cst_123 = arith.constant dense<0.000000e+00> : vector<48x64xf32>
    %100 = tpu.matmul %97, %99, %cst_123 {dimension_numbers = #tpu.dot_dimension_numbers<[1], [0], [0], [1], [0, 0, 1, 1], [], []>} : vector<48x160xf32>, vector<160x64xf32>, vector<48x64xf32> -> vector<48x64xf32>
    %101 = arith.addf %95, %100 : vector<48x64xf32>
    %c0_124 = arith.constant 0 : index
    %c1_125 = arith.constant 1 : index
    %c8_126 = arith.constant 8 : index
    %c0_127 = arith.constant 0 : index
    %102 = vector.load %arg1[%c0_124, %c1_125, %c8_126, %c0_127] : memref<1x4x64x160xf32, #tpu.memory_space<vmem>>, vector<1x1x48x160xf32>
    %103 = vector.shape_cast %102 : vector<1x1x48x160xf32> to vector<48x160xf32>
    %c1_128 = arith.constant 1 : index
    %c0_129 = arith.constant 0 : index
    %c0_130 = arith.constant 0 : index
    %104 = vector.load %arg2[%c1_128, %c0_129, %c0_130] : memref<5x160x64xf32, #tpu.memory_space<vmem>>, vector<1x160x64xf32>
    %105 = vector.shape_cast %104 : vector<1x160x64xf32> to vector<160x64xf32>
    %cst_131 = arith.constant dense<0.000000e+00> : vector<48x64xf32>
    %106 = tpu.matmul %103, %105, %cst_131 {dimension_numbers = #tpu.dot_dimension_numbers<[1], [0], [0], [1], [0, 0, 1, 1], [], []>} : vector<48x160xf32>, vector<160x64xf32>, vector<48x64xf32> -> vector<48x64xf32>
    %107 = arith.addf %101, %106 : vector<48x64xf32>
    %c0_132 = arith.constant 0 : index
    %c3_133 = arith.constant 3 : index
    %c8_134 = arith.constant 8 : index
    %c0_135 = arith.constant 0 : index
    %108 = vector.load %arg1[%c0_132, %c3_133, %c8_134, %c0_135] : memref<1x4x64x160xf32, #tpu.memory_space<vmem>>, vector<1x1x48x160xf32>
    %109 = vector.shape_cast %108 : vector<1x1x48x160xf32> to vector<48x160xf32>
    %c2_136 = arith.constant 2 : index
    %c0_137 = arith.constant 0 : index
    %c0_138 = arith.constant 0 : index
    %110 = vector.load %arg2[%c2_136, %c0_137, %c0_138] : memref<5x160x64xf32, #tpu.memory_space<vmem>>, vector<1x160x64xf32>
    %111 = vector.shape_cast %110 : vector<1x160x64xf32> to vector<160x64xf32>
    %cst_139 = arith.constant dense<0.000000e+00> : vector<48x64xf32>
    %112 = tpu.matmul %109, %111, %cst_139 {dimension_numbers = #tpu.dot_dimension_numbers<[1], [0], [0], [1], [0, 0, 1, 1], [], []>} : vector<48x160xf32>, vector<160x64xf32>, vector<48x64xf32> -> vector<48x64xf32>
    %113 = arith.addf %107, %112 : vector<48x64xf32>
    %c0_140 = arith.constant 0 : index
    %c1_141 = arith.constant 1 : index
    %c16_142 = arith.constant 16 : index
    %c0_143 = arith.constant 0 : index
    %114 = vector.load %arg1[%c0_140, %c1_141, %c16_142, %c0_143] : memref<1x4x64x160xf32, #tpu.memory_space<vmem>>, vector<1x1x48x160xf32>
    %115 = vector.shape_cast %114 : vector<1x1x48x160xf32> to vector<48x160xf32>
    %c3_144 = arith.constant 3 : index
    %c0_145 = arith.constant 0 : index
    %c0_146 = arith.constant 0 : index
    %116 = vector.load %arg2[%c3_144, %c0_145, %c0_146] : memref<5x160x64xf32, #tpu.memory_space<vmem>>, vector<1x160x64xf32>
    %117 = vector.shape_cast %116 : vector<1x160x64xf32> to vector<160x64xf32>
    %cst_147 = arith.constant dense<0.000000e+00> : vector<48x64xf32>
    %118 = tpu.matmul %115, %117, %cst_147 {dimension_numbers = #tpu.dot_dimension_numbers<[1], [0], [0], [1], [0, 0, 1, 1], [], []>} : vector<48x160xf32>, vector<160x64xf32>, vector<48x64xf32> -> vector<48x64xf32>
    %119 = arith.addf %113, %118 : vector<48x64xf32>
    %c0_148 = arith.constant 0 : index
    %c3_149 = arith.constant 3 : index
    %c16_150 = arith.constant 16 : index
    %c0_151 = arith.constant 0 : index
    %120 = vector.load %arg1[%c0_148, %c3_149, %c16_150, %c0_151] : memref<1x4x64x160xf32, #tpu.memory_space<vmem>>, vector<1x1x48x160xf32>
    %121 = vector.shape_cast %120 : vector<1x1x48x160xf32> to vector<48x160xf32>
    %c4_152 = arith.constant 4 : index
    %c0_153 = arith.constant 0 : index
    %c0_154 = arith.constant 0 : index
    %122 = vector.load %arg2[%c4_152, %c0_153, %c0_154] : memref<5x160x64xf32, #tpu.memory_space<vmem>>, vector<1x160x64xf32>
    %123 = vector.shape_cast %122 : vector<1x160x64xf32> to vector<160x64xf32>
    %cst_155 = arith.constant dense<0.000000e+00> : vector<48x64xf32>
    %124 = tpu.matmul %121, %123, %cst_155 {dimension_numbers = #tpu.dot_dimension_numbers<[1], [0], [0], [1], [0, 0, 1, 1], [], []>} : vector<48x160xf32>, vector<160x64xf32>, vector<48x64xf32> -> vector<48x64xf32>
    %125 = arith.addf %119, %124 : vector<48x64xf32>
    %126 = arith.maximumf %94, %125 : vector<48x64xf32>
    %c0_156 = arith.constant 0 : index
    %c0_157 = arith.constant 0 : index
    %127 = vector.load %arg3[%c0_156, %c0_157] : memref<1x64xf32, #tpu.memory_space<vmem>>, vector<1x64xf32>
    %128 = vector.broadcast %127 : vector<1x64xf32> to vector<48x64xf32>
    %129 = arith.addf %126, %128 : vector<48x64xf32>
    %cst_158 = arith.constant 0.000000e+00 : f32
    %130 = vector.broadcast %cst_158 : f32 to vector<48x64xf32>
    %131 = arith.maximumf %129, %130 : vector<48x64xf32>
    %c0_159 = arith.constant 0 : index
    %c0_160 = arith.constant 0 : index
    %c0_161 = arith.constant 0 : index
    %132 = vector.load %arg4[%c0_159, %c0_160, %c0_161] : memref<1x48x64xf32, #tpu.memory_space<vmem>>, vector<1x48x64xf32>
    %133 = vector.shape_cast %132 : vector<1x48x64xf32> to vector<48x64xf32>
    %134 = vector.shape_cast %131 : vector<48x64xf32> to vector<1x48x64xf32>
    tpu.vector_store %arg4[%c0_159, %c0_160, %c0_161], %134 {strides = array<i32>} : memref<1x48x64xf32, #tpu.memory_space<vmem>>, vector<1x48x64xf32>,
    return
  }
  func.func @transform_0(%arg0: i32) -> (i32, i32, i32, i32) {
    %c0_i32 = arith.constant 0 : i32
    %c0_i32_0 = arith.constant 0 : i32
    %c0_i32_1 = arith.constant 0 : i32
    %c0_i32_2 = arith.constant 0 : i32
    return %arg0, %c0_i32, %c0_i32_0, %c0_i32_1 : i32, i32, i32, i32
  }
  func.func @transform_1(%arg0: i32) -> (i32, i32, i32) {
    %c0_i32 = arith.constant 0 : i32
    %c0_i32_0 = arith.constant 0 : i32
    %c0_i32_1 = arith.constant 0 : i32
    %c0_i32_2 = arith.constant 0 : i32
    return %c0_i32, %c0_i32_0, %c0_i32_1 : i32, i32, i32
  }
  func.func @transform_2(%arg0: i32) -> (i32, i32) {
    %c0_i32 = arith.constant 0 : i32
    %c0_i32_0 = arith.constant 0 : i32
    %c0_i32_1 = arith.constant 0 : i32
    return %c0_i32, %c0_i32_0 : i32, i32
  }
  func.func @transform_3(%arg0: i32) -> (i32, i32, i32) {
    %c0_i32 = arith.constant 0 : i32
    %c0_i32_0 = arith.constant 0 : i32
    %c0_i32_1 = arith.constant 0 : i32
    return %arg0, %c0_i32, %c0_i32_0 : i32, i32, i32
  }
}

module attributes {stable_mosaic.version = 11 : i64} {
  func.func @_mlp_kernel(%arg0: i32, %arg1: memref<2x3072xf32, #tpu.memory_space<vmem>>, %arg2: memref<3072x32xf32, #tpu.memory_space<vmem>>, %arg3: memref<1x32xf32, #tpu.memory_space<vmem>>, %arg4: memref<32x128xf32, #tpu.memory_space<vmem>>, %arg5: memref<1x128xf32, #tpu.memory_space<vmem>>, %arg6: memref<2x128xf32, #tpu.memory_space<vmem>>) attributes {dimension_semantics = [#tpu.dimension_semantics<parallel>], iteration_bounds = array<i64: 1>, scalar_prefetch = 0 : i64, scratch_operands = 0 : i64, tpu.core_type = #tpu.core_type<tc>, window_params = [{transform_indices = @transform_0, window_bounds = array<i64: 2, 3072>}, {pipeline_mode = #tpu.pipeline_mode<synchronous>, transform_indices = @transform_1, window_bounds = array<i64: 3072, 32>}, {pipeline_mode = #tpu.pipeline_mode<synchronous>, transform_indices = @transform_2, window_bounds = array<i64: 1, 32>}, {pipeline_mode = #tpu.pipeline_mode<synchronous>, transform_indices = @transform_3, window_bounds = array<i64: 32, 128>}, {pipeline_mode = #tpu.pipeline_mode<synchronous>, transform_indices = @transform_4, window_bounds = array<i64: 1, 128>}, {transform_indices = @transform_5, window_bounds = array<i64: 2, 128>}]} {
    %c0 = arith.constant 0 : index
    %c0_0 = arith.constant 0 : index
    %0 = vector.load %arg1[%c0, %c0_0] : memref<2x3072xf32, #tpu.memory_space<vmem>>, vector<2x3072xf32>
    %c0_1 = arith.constant 0 : index
    %c0_2 = arith.constant 0 : index
    %1 = vector.load %arg2[%c0_1, %c0_2] : memref<3072x32xf32, #tpu.memory_space<vmem>>, vector<3072x32xf32>
    %cst = arith.constant dense<0.000000e+00> : vector<2x32xf32>
    %2 = tpu.matmul %0, %1, %cst {dimension_numbers = #tpu.dot_dimension_numbers<[1], [0], [0], [1], [0, 0, 1, 1], [], []>} : vector<2x3072xf32>, vector<3072x32xf32>, vector<2x32xf32> -> vector<2x32xf32>
    %c0_3 = arith.constant 0 : index
    %c0_4 = arith.constant 0 : index
    %3 = vector.load %arg3[%c0_3, %c0_4] : memref<1x32xf32, #tpu.memory_space<vmem>>, vector<1x32xf32>
    %4 = vector.broadcast %3 : vector<1x32xf32> to vector<2x32xf32>
    %5 = arith.addf %2, %4 : vector<2x32xf32>
    %cst_5 = arith.constant 0.000000e+00 : f32
    %6 = vector.broadcast %cst_5 : f32 to vector<2x32xf32>
    %7 = arith.maximumf %5, %6 : vector<2x32xf32>
    %c0_6 = arith.constant 0 : index
    %c0_7 = arith.constant 0 : index
    %8 = vector.load %arg4[%c0_6, %c0_7] : memref<32x128xf32, #tpu.memory_space<vmem>>, vector<32x128xf32>
    %cst_8 = arith.constant dense<0.000000e+00> : vector<2x128xf32>
    %9 = tpu.matmul %7, %8, %cst_8 {dimension_numbers = #tpu.dot_dimension_numbers<[1], [0], [0], [1], [0, 0, 1, 1], [], []>} : vector<2x32xf32>, vector<32x128xf32>, vector<2x128xf32> -> vector<2x128xf32>
    %c0_9 = arith.constant 0 : index
    %c0_10 = arith.constant 0 : index
    %10 = vector.load %arg5[%c0_9, %c0_10] : memref<1x128xf32, #tpu.memory_space<vmem>>, vector<1x128xf32>
    %11 = vector.broadcast %10 : vector<1x128xf32> to vector<2x128xf32>
    %12 = arith.addf %9, %11 : vector<2x128xf32>
    %c0_11 = arith.constant 0 : index
    %c0_12 = arith.constant 0 : index
    %13 = vector.load %arg6[%c0_11, %c0_12] : memref<2x128xf32, #tpu.memory_space<vmem>>, vector<2x128xf32>
    tpu.vector_store %arg6[%c0_11, %c0_12], %12 {strides = array<i32>} : memref<2x128xf32, #tpu.memory_space<vmem>>, vector<2x128xf32>,
    return
  }
  func.func @transform_0(%arg0: i32) -> (i32, i32) {
    %c0_i32 = arith.constant 0 : i32
    %c0_i32_0 = arith.constant 0 : i32
    return %arg0, %c0_i32 : i32, i32
  }
  func.func @transform_1(%arg0: i32) -> (i32, i32) {
    %c0_i32 = arith.constant 0 : i32
    %c0_i32_0 = arith.constant 0 : i32
    %c0_i32_1 = arith.constant 0 : i32
    return %c0_i32, %c0_i32_0 : i32, i32
  }
  func.func @transform_2(%arg0: i32) -> (i32, i32) {
    %c0_i32 = arith.constant 0 : i32
    %c0_i32_0 = arith.constant 0 : i32
    %c0_i32_1 = arith.constant 0 : i32
    return %c0_i32, %c0_i32_0 : i32, i32
  }
  func.func @transform_3(%arg0: i32) -> (i32, i32) {
    %c0_i32 = arith.constant 0 : i32
    %c0_i32_0 = arith.constant 0 : i32
    %c0_i32_1 = arith.constant 0 : i32
    return %c0_i32, %c0_i32_0 : i32, i32
  }
  func.func @transform_4(%arg0: i32) -> (i32, i32) {
    %c0_i32 = arith.constant 0 : i32
    %c0_i32_0 = arith.constant 0 : i32
    %c0_i32_1 = arith.constant 0 : i32
    return %c0_i32, %c0_i32_0 : i32, i32
  }
  func.func @transform_5(%arg0: i32) -> (i32, i32) {
    %c0_i32 = arith.constant 0 : i32
    %c0_i32_0 = arith.constant 0 : i32
    return %arg0, %c0_i32 : i32, i32
  }
}

</mosaic_0001>

<bundles_post_ra>
// kernel: cnn_regressor_forward.3
= control target key start
LH: loop header
LB: loop body
LE: loop exit
PB: predicated region body
PF: predicated region fallthrough
CT: control target
= control target key end

     0   :  { %s3785_s12 = smov 0   ;;  %s5932_s0 = inlined_call_operand.vmem [shape: f32[2,2,224,6], index: 0, kind: input, shape index: {}]   ;;  %s5933_s1 = inlined_call_operand.vmem [shape: f32[10,6,32], index: 1, kind: input, shape index: {}]   ;;  %s5934_s2 = inlined_call_operand.vmem [shape: f32[1,32], index: 2, kind: input, shape index: {}]   ;;  %s5935_s3 = inlined_call_operand.vmem [shape: f32[2,192,32], index: 3, kind: output, shape index: {}]  }
   0x1 LB: > { %s3071_s13 = sadd.s32 4294967295, %s3763_s12   ;;  %p3075_p0 = scmp.ge.s32.totalorder %s3763_s12, 1  ;;  %s3763_s12 = sphi %s3785_s12, %s13_s12  }
   0x2   : > { %p137_p1 = scmp.lt.s32.totalorder %s3763_s12, 3 }
   0x4   : > { %p138_p2 = pnand %p3075_p0, %p137_p1 }
   0x6   : > { %141 = sbr.rel (%p138_p2) target bundleno = 1113 (0x459), region = 32 }
   0xb   : > { %v3102_v0 = vld [vmem:[%s5933_s1 + $0x8] sm:$0x3f]  ;;  %vm296_vm0 = vcmask 1045504   ;;  %v3799_v1 = vld [vmem:[%s5933_s1 + $0x10] sm:$0x3f]  ;;  %p161_p3 = scmp.lt.s32.totalorder %s3071_s13, 1 }
   0xc   : > { %3103 = vmatpush.msk.msra.mxu0 %vm296_vm0, %v3102_v0  ;;  %3154 = vmatpush.msk.msra.mxu2 %vm296_vm0, %v3799_v1  ;;  %v3807_v2 = vld [vmem:[%s5933_s1 + $0x18] sm:$0x3f]  ;;  %v3812_v3 = vld [vmem:[%s5933_s1 + $0x28] sm:$0x3f]  ;;  %v195_v4 = vld [vmem:[%s5933_s1] sm:$0x3f] }
   0xd   : > { %6023 = vst [vmem:[#allocation2_spill] sm:$0xff] %v3812_v3  ;;  %3204 = vmatpush.msk.msra.mxu3 %vm296_vm0, %v3807_v2  ;;  %s6294_s13 = smov (!%p161_p3, %s3071_s13), 1  ;;  %v3826_v5 = vld [vmem:[%s5933_s1 + $0x20] sm:$0x3f]  ;;  %3128 = vmatpush.msk.msra.mxu1 %vm296_vm0, %v195_v4  ;;  %v3834_v6 = vld [vmem:[%s5933_s1 + $0x38] sm:$0x3f] }
   0xe   : > { %3282 = vmatpush.msk.msrb.mxu2 %vm296_vm0, %v3812_v3  ;;  %3230 = vmatpush.msk.msrb.mxu0 %vm296_vm0, %v3826_v5  ;;  %6024 = vst [vmem:[#allocation3_spill] sm:$0xff] %v3834_v6  ;;  %v3839_v7 = vld [vmem:[%s5933_s1 + $0x30] sm:$0x3f]  ;;  %s3661_s30 = smul.u32 448, %s6294_s13  ;;  %vm223_vm1 = vcmask 48128   ;;  %vm2991_vm2 = vcmask 261120  }
   0xf   : > { %3308 = vmatpush.msk.msrb.mxu3 %vm296_vm0, %v3834_v6  ;;  %3257 = vmatpush.msk.msrb.mxu1 %vm296_vm0, %v3839_v7  ;;  %s3662_s15 = smul.u32 192, %s6294_s13 }
  0x10   : > { %s3849_s6 = scalar_lea.vmem %s5932_s0, %s3661_s30 }
  0x11   : > { %v3852_v8 = vld [vmem:[%s3849_s6 + $0xe0] sm:$0xff]  ;;  %v3855_v9 = vld [vmem:[%s3849_s6 + $0x10] sm:$0xff]  ;;  %v3874_v12 = vld [vmem:[%s3849_s6 + $0xe8] sm:$0xff]  ;;  %s5769_s13 = scalar_lea.vmem %s5935_s3, %s3662_s15 }
  0x12   : > { %v3858_v10 = vld [vmem:[%s3849_s6 + $0xf0] sm:$0xff]  ;;  %3104 = vmatmul.msk.f32.vlgmr.msra.gmra.mxu0 %vm223_vm1, %v3852_v8  ;;  %3155 = vmatmul.msk.f32.vlgmr.msra.gmra.mxu2 %vm223_vm1, %v3855_v9  ;;  %v3865_v11 = vld [vmem:[%s3849_s6] sm:$0xff]  ;;  %v3877_v13 = vld [vmem:[%s3849_s6 + $0x18] sm:$0xff] }
  0x13   : > { %3205 = vmatmul.msk.f32.vlgmr.msra.gmra.mxu3 %vm223_vm1, %v3858_v10  ;;  %3129 = vmatmul.msk.f32.vlgmr.msra.gmra.mxu1 %vm223_vm1, %v3865_v11  ;;  %v3880_v14 = vld [vmem:[%s3849_s6 + $0xf8] sm:$0xff]  ;;  %v3883_v15 = vld [vmem:[%s3849_s6 + $0x8] sm:$0xff]  ;;  %v3894_v16 = vld [vmem:[%s3849_s6 + $0x20] sm:$0xff] }
  0x14   : > { %3385 = vmatpush.msk.msra.mxu2 %vm296_vm0, %v3102_v0  ;;  %3410 = vmatpush.msk.msra.mxu3 %vm296_vm0, %v195_v4  ;;  %v3897_v17 = vld [vmem:[%s3849_s6 + $0x100] sm:$0xff]  ;;  %v3908_v18 = vld [vmem:[%s3849_s6 + $0x28] sm:$0xff]  ;;  %v3922_v20 = vld [vmem:[%s3849_s6 + $0x30] sm:$0xff] }
  0x15   : > { %v3911_v19 = vld [vmem:[%s3849_s6 + $0x108] sm:$0xff]  ;;  %v3925_v21 = vld [vmem:[%s3849_s6 + $0x110] sm:$0xff]  ;;  %v3936_v22 = vld [vmem:[%s3849_s6 + $0x38] sm:$0xff] }
  0x16   : > { %v3939_v23 = vld [vmem:[%s3849_s6 + $0x118] sm:$0xff]  ;;  %v3950_v24 = vld [vmem:[%s3849_s6 + $0x40] sm:$0xff]  ;;  %v3964_v26 = vld [vmem:[%s3849_s6 + $0x48] sm:$0xff] }
  0x17   : > { %v3953_v25 = vld [vmem:[%s3849_s6 + $0x120] sm:$0xff]  ;;  %v3967_v27 = vld [vmem:[%s3849_s6 + $0x128] sm:$0xff]  ;;  %v3978_v28 = vld [vmem:[%s3849_s6 + $0x50] sm:$0xff] }
  0x18   : > { %v3981_v29 = vld [vmem:[%s3849_s6 + $0x130] sm:$0xff]  ;;  %v3992_v30 = vld [vmem:[%s3849_s6 + $0x58] sm:$0xff]  ;;  %v4006_v32 = vld [vmem:[%s3849_s6 + $0x60] sm:$0xff] }
  0x19   : > { %v3995_v31 = vld [vmem:[%s3849_s6 + $0x138] sm:$0xff]  ;;  %v4009_v33 = vld [vmem:[%s3849_s6 + $0x140] sm:$0xff]  ;;  %v4020_v34 = vld [vmem:[%s3849_s6 + $0x68] sm:$0xff] }
  0x1a   : > { %3105 = vmatmul.msk.f32.gmra.mxu0 %vm223_vm1, %v3874_v12  ;;  %3156 = vmatmul.msk.f32.gmra.mxu2 %vm223_vm1, %v3877_v13  ;;  %v4023_v35 = vld [vmem:[%s3849_s6 + $0x148] sm:$0xff]  ;;  %v4034_v36 = vld [vmem:[%s3849_s6 + $0x70] sm:$0xff]  ;;  %v4048_v38 = vld [vmem:[%s3849_s6 + $0x78] sm:$0xff] }
  0x1b   : > { %3206 = vmatmul.msk.f32.gmra.mxu3 %vm223_vm1, %v3880_v14  ;;  %3130 = vmatmul.msk.f32.gmra.mxu1 %vm223_vm1, %v3883_v15  ;;  %v4037_v37 = vld [vmem:[%s3849_s6 + $0x150] sm:$0xff]  ;;  %v4051_v39 = vld [vmem:[%s3849_s6 + $0x158] sm:$0xff]  ;;  %v4062_v40 = vld [vmem:[%s3849_s6 + $0x80] sm:$0xff] }
  0x1c   : > { %v4065_v41 = vld [vmem:[%s3849_s6 + $0x160] sm:$0xff]  ;;  %v4076_v42 = vld [vmem:[%s3849_s6 + $0x88] sm:$0xff]  ;;  %v4090_v45 = vld [vmem:[%s3849_s6 + $0x90] sm:$0xff] }
  0x1d   : > { %v4079_v43 = vld [vmem:[%s3849_s6 + $0x168] sm:$0xff]  ;;  %v4093_v47 = vld [vmem:[%s3849_s6 + $0x170] sm:$0xff]  ;;  %v4104_v53 = vld [vmem:[%s3849_s6 + $0x98] sm:$0xff] }
  0x1e   : > { %v4109_v56 = vld [vmem:[%s3849_s6 + $0x178] sm:$0xff]  ;;  %v4120_v62 = vld [vmem:[%s3849_s6 + $0xa0] sm:$0xff] }
  0x1f   : > { %v4125_v4 = vld [vmem:[%s3849_s6 + $0x180] sm:$0xff] }
  0x20   : > { %v3201_v3 = vld [vmem:[%s3849_s6 + $0x1a0] sm:$0xff] }
  0x22   : > { %3106 = vmatmul.msk.f32.gmra.mxu0 %vm223_vm1, %v3858_v10  ;;  %3157 = vmatmul.msk.f32.gmra.mxu2 %vm223_vm1, %v3894_v16 }
  0x23   : > { %3207 = vmatmul.msk.f32.gmra.mxu3 %vm223_vm1, %v3897_v17  ;;  %3131 = vmatmul.msk.f32.gmra.mxu1 %vm223_vm1, %v3855_v9 }
  0x2a   : > { %3107 = vmatmul.msk.f32.gmra.mxu0 %vm223_vm1, %v3880_v14  ;;  %3158 = vmatmul.msk.f32.gmra.mxu2 %vm223_vm1, %v3908_v18 }
  0x2b   : > { %3208 = vmatmul.msk.f32.gmra.mxu3 %vm223_vm1, %v3911_v19  ;;  %3132 = vmatmul.msk.f32.gmra.mxu1 %vm223_vm1, %v3877_v13 }
  0x32   : > { %3108 = vmatmul.msk.f32.gmra.mxu0 %vm223_vm1, %v3897_v17  ;;  %3159 = vmatmul.msk.f32.gmra.mxu2 %vm223_vm1, %v3922_v20 }
  0x33   : > { %3209 = vmatmul.msk.f32.gmra.mxu3 %vm223_vm1, %v3925_v21  ;;  %3133 = vmatmul.msk.f32.gmra.mxu1 %vm223_vm1, %v3894_v16 }
  0x3a   : > { %3109 = vmatmul.msk.f32.gmra.mxu0 %vm223_vm1, %v3911_v19  ;;  %3160 = vmatmul.msk.f32.gmra.mxu2 %vm223_vm1, %v3936_v22 }
  0x3b   : > { %3210 = vmatmul.msk.f32.gmra.mxu3 %vm223_vm1, %v3939_v23  ;;  %3134 = vmatmul.msk.f32.gmra.mxu1 %vm223_vm1, %v3908_v18 }
  0x42   : > { %3110 = vmatmul.msk.f32.gmra.mxu0 %vm223_vm1, %v3925_v21  ;;  %3161 = vmatmul.msk.f32.gmra.mxu2 %vm223_vm1, %v3950_v24 }
  0x43   : > { %3211 = vmatmul.msk.f32.gmra.mxu3 %vm223_vm1, %v3953_v25  ;;  %3135 = vmatmul.msk.f32.gmra.mxu1 %vm223_vm1, %v3922_v20 }
  0x4a   : > { %3111 = vmatmul.msk.f32.gmra.mxu0 %vm223_vm1, %v3939_v23  ;;  %3162 = vmatmul.msk.f32.gmra.mxu2 %vm223_vm1, %v3964_v26 }
  0x4b   : > { %3212 = vmatmul.msk.f32.gmra.mxu3 %vm223_vm1, %v3967_v27  ;;  %3136 = vmatmul.msk.f32.gmra.mxu1 %vm223_vm1, %v3936_v22 }
  0x52   : > { %3112 = vmatmul.msk.f32.gmra.mxu0 %vm223_vm1, %v3953_v25  ;;  %3163 = vmatmul.msk.f32.gmra.mxu2 %vm223_vm1, %v3978_v28 }
  0x53   : > { %3213 = vmatmul.msk.f32.gmra.mxu3 %vm223_vm1, %v3981_v29  ;;  %3137 = vmatmul.msk.f32.gmra.mxu1 %vm223_vm1, %v3950_v24 }
  0x5a   : > { %3113 = vmatmul.msk.f32.gmra.mxu0 %vm223_vm1, %v3967_v27  ;;  %3164 = vmatmul.msk.f32.gmra.mxu2 %vm223_vm1, %v3992_v30 }
  0x5b   : > { %3214 = vmatmul.msk.f32.gmra.mxu3 %vm223_vm1, %v3995_v31  ;;  %3138 = vmatmul.msk.f32.gmra.mxu1 %vm223_vm1, %v3964_v26 }
  0x62   : > { %3114 = vmatmul.msk.f32.gmra.mxu0 %vm223_vm1, %v3981_v29  ;;  %3165 = vmatmul.msk.f32.gmra.mxu2 %vm223_vm1, %v4006_v32 }
  0x63   : > { %3215 = vmatmul.msk.f32.gmra.mxu3 %vm223_vm1, %v4009_v33  ;;  %3139 = vmatmul.msk.f32.gmra.mxu1 %vm223_vm1, %v3978_v28 }
  0x6a   : > { %3115 = vmatmul.msk.f32.gmra.mxu0 %vm223_vm1, %v3995_v31  ;;  %3166 = vmatmul.msk.f32.gmra.mxu2 %vm223_vm1, %v4020_v34 }
  0x6b   : > { %3216 = vmatmul.msk.f32.gmra.mxu3 %vm223_vm1, %v4023_v35  ;;  %3140 = vmatmul.msk.f32.gmra.mxu1 %vm223_vm1, %v3992_v30 }
  0x72   : > { %3116 = vmatmul.msk.f32.gmra.mxu0 %vm223_vm1, %v4009_v33  ;;  %3167 = vmatmul.msk.f32.gmra.mxu2 %vm223_vm1, %v4034_v36 }
  0x73   : > { %3217 = vmatmul.msk.f32.gmra.mxu3 %vm223_vm1, %v4037_v37  ;;  %3141 = vmatmul.msk.f32.gmra.mxu1 %vm223_vm1, %v4006_v32 }
  0x7a   : > { %3117 = vmatmul.msk.f32.gmra.mxu0 %vm223_vm1, %v4023_v35  ;;  %3168 = vmatmul.msk.f32.gmra.mxu2 %vm223_vm1, %v4048_v38 }
  0x7b   : > { %3218 = vmatmul.msk.f32.gmra.mxu3 %vm223_vm1, %v4051_v39  ;;  %3142 = vmatmul.msk.f32.gmra.mxu1 %vm223_vm1, %v4020_v34 }
  0x82   : > { %3118 = vmatmul.msk.f32.gmra.mxu0 %vm223_vm1, %v4037_v37  ;;  %3169 = vmatmul.msk.f32.gmra.mxu2 %vm223_vm1, %v4062_v40 }
  0x83   : > { %3219 = vmatmul.msk.f32.gmra.mxu3 %vm223_vm1, %v4065_v41  ;;  %3143 = vmatmul.msk.f32.gmra.mxu1 %vm223_vm1, %v4034_v36 }
  0x8a   : > { %3119 = vmatmul.msk.f32.gmra.mxu0 %vm223_vm1, %v4051_v39  ;;  %3170 = vmatmul.msk.f32.gmra.mxu2 %vm223_vm1, %v4076_v42 }
  0x8b   : > { %3220 = vmatmul.msk.f32.gmra.mxu3 %vm223_vm1, %v4079_v43  ;;  %3144 = vmatmul.msk.f32.gmra.mxu1 %vm223_vm1, %v4048_v38 }
  0x8f   : > { %v317_v44 = vpop.f32.mrf.mxu0 }
  0x90   : > { %v481_v46 = vpop.f32.mrf.mxu1 }
  0x91   : > { %v482_v48 = vadd.f32 %v481_v46, %v317_v44 }
  0x92   : > { %3120 = vmatmul.msk.f32.gmra.mxu0 %vm223_vm1, %v4065_v41  ;;  %3171 = vmatmul.msk.f32.gmra.mxu2 %vm223_vm1, %v4090_v45 }
  0x93   : > { %3221 = vmatmul.msk.f32.gmra.mxu3 %vm223_vm1, %v4093_v47  ;;  %3145 = vmatmul.msk.f32.gmra.mxu1 %vm223_vm1, %v4062_v40 }
  0x95   : > { %v671_v49 = vpop.f32.mrf.mxu2 }
  0x96   : > { %v743_v50 = vadd.f32 %v671_v49, %v482_v48  ;;  %v885_v51 = vpop.f32.mrf.mxu3 }
  0x97   : > { %v320_v52 = vpop.f32.mrf.mxu0 }
  0x98   : > { %v4106_v54 = vadd.f32 %v885_v51, %v743_v50  ;;  %v484_v55 = vpop.f32.mrf.mxu1  ;;  %v4136_v51 = vld [vmem:[%s3849_s6 + $0xa8] sm:$0xff] }
  0x99   : > { %v485_v57 = vadd.f32 %v484_v55, %v320_v52 }
  0x9a   : > { %6025 = vst [vmem:[#allocation4_spill] sm:$0xff] %v4106_v54  ;;  %3121 = vmatmul.msk.f32.gmra.mxu0 %vm223_vm1, %v4079_v43  ;;  %3172 = vmatmul.msk.f32.gmra.mxu2 %vm223_vm1, %v4104_v53  ;;  %v4180_v54 = vld [vmem:[%s3849_s6 + $0x198] sm:$0xff] }
  0x9b   : > { %3222 = vmatmul.msk.f32.gmra.mxu3 %vm223_vm1, %v4109_v56  ;;  %3146 = vmatmul.msk.f32.gmra.mxu1 %vm223_vm1, %v4076_v42 }
  0x9d   : > { %v674_v58 = vpop.f32.mrf.mxu2 }
  0x9e   : > { %v744_v59 = vadd.f32 %v674_v58, %v485_v57  ;;  %v888_v60 = vpop.f32.mrf.mxu3  ;;  %v4141_v57 = vld [vmem:[%s3849_s6 + $0x188] sm:$0xff] }
  0x9f   : > { %v323_v61 = vpop.f32.mrf.mxu0  ;;  %6028 = vst [vmem:[#allocation7_spill] sm:$0xff] %v4141_v57 }
  0xa0   : > { %v4122_v63 = vadd.f32 %v888_v60, %v744_v59  ;;  %v487_v0 = vpop.f32.mrf.mxu1 }
  0xa1   : > { %v488_v44 = vadd.f32 %v487_v0, %v323_v61 }
  0xa2   : > { %6026 = vst [vmem:[#allocation5_spill] sm:$0xff] %v4122_v63  ;;  %3122 = vmatmul.msk.f32.gmra.mxu0 %vm223_vm1, %v4093_v47  ;;  %3173 = vmatmul.msk.f32.gmra.mxu2 %vm223_vm1, %v4120_v62 }
  0xa3   : > { %3223 = vmatmul.msk.f32.gmra.mxu3 %vm223_vm1, %v4125_v4  ;;  %3147 = vmatmul.msk.f32.gmra.mxu1 %vm223_vm1, %v4090_v45 }
  0xa5   : > { %v677_v46 = vpop.f32.mrf.mxu2 }
  0xa6   : > { %v745_v48 = vadd.f32 %v677_v46, %v488_v44  ;;  %v891_v49 = vpop.f32.mrf.mxu3  ;;  %v4152_v44 = vld [vmem:[%s3849_s6 + $0xb0] sm:$0xff] }
  0xa7   : > { %v326_v50 = vpop.f32.mrf.mxu0 }
  0xa8   : > { %v4138_v52 = vadd.f32 %v891_v49, %v745_v48  ;;  %v490_v55 = vpop.f32.mrf.mxu1  ;;  %v4157_v49 = vld [vmem:[%s3849_s6 + $0x190] sm:$0xff] }
  0xa9   : > { %v491_v58 = vadd.f32 %v490_v55, %v326_v50  ;;  %v4170_v50 = vld [vmem:[%s5933_s1 + $0x40] sm:$0x3f] }
  0xaa   : > { %6027 = vst [vmem:[#allocation6_spill] sm:$0xff] %v4138_v52  ;;  %3123 = vmatmul.msk.f32.gmra.mxu0 %vm223_vm1, %v4109_v56  ;;  %3174 = vmatmul.msk.f32.gmra.mxu2 %vm223_vm1, %v4136_v51 }
  0xab   : > { %3224 = vmatmul.msk.f32.gmra.mxu3 %vm223_vm1, %v4141_v57  ;;  %3148 = vmatmul.msk.f32.gmra.mxu1 %vm223_vm1, %v4104_v53  ;;  %6030 = vst [vmem:[#allocation9_spill] sm:$0xff] %v4170_v50 }
  0xac   : > { %3334 = vmatpush.msk.msra.mxu0 %vm296_vm0, %v4170_v50 }
  0xad   : > { %v680_v59 = vpop.f32.mrf.mxu2 }
  0xae   : > { %v746_v60 = vadd.f32 %v680_v59, %v491_v58  ;;  %v894_v61 = vpop.f32.mrf.mxu3 }
  0xaf   : > { %v329_v0 = vpop.f32.mrf.mxu0 }
  0xb0   : > { %v4154_v46 = vadd.f32 %v894_v61, %v746_v60  ;;  %v493_v48 = vpop.f32.mrf.mxu1 }
  0xb1   : > { %v494_v55 = vadd.f32 %v493_v48, %v329_v0  ;;  %v4185_v0 = vld [vmem:[%s5933_s1 + $0x48] sm:$0x3f] }
  0xb2   : > { %6029 = vst [vmem:[#allocation8_spill] sm:$0xff] %v4154_v46  ;;  %3124 = vmatmul.msk.f32.gmra.mxu0 %vm223_vm1, %v4125_v4  ;;  %3175 = vmatmul.msk.f32.gmra.mxu2 %vm223_vm1, %v4152_v44  ;;  %v4175_v46 = vld [vmem:[%s3849_s6 + $0xb8] sm:$0xff] }
  0xb3   : > { %3225 = vmatmul.msk.f32.gmra.mxu3 %vm223_vm1, %v4157_v49  ;;  %3149 = vmatmul.msk.f32.gmra.mxu1 %vm223_vm1, %v4120_v62  ;;  %6032 = vst [vmem:[#allocation11_spill] sm:$0xff] %v4185_v0 }
  0xb4   : > { %3360 = vmatpush.msk.msra.mxu1 %vm296_vm0, %v4185_v0 }
  0xb5   : > { %v683_v58 = vpop.f32.mrf.mxu2 }
  0xb6   : > { %v747_v59 = vadd.f32 %v683_v58, %v494_v55  ;;  %v897_v60 = vpop.f32.mrf.mxu3 }
  0xb7   : > { %v332_v61 = vpop.f32.mrf.mxu0 }
  0xb8   : > { %v4177_v52 = vadd.f32 %v897_v60, %v747_v59  ;;  %v496_v63 = vpop.f32.mrf.mxu1 }
  0xb9   : > { %v497_v48 = vadd.f32 %v496_v63, %v332_v61 }
  0xba   : > { %6031 = vst [vmem:[#allocation10_spill] sm:$0xff] %v4177_v52  ;;  %3125 = vmatmul.msk.f32.gmra.mxu0 %vm223_vm1, %v4141_v57  ;;  %3176 = vmatmul.msk.f32.gmra.mxu2 %vm223_vm1, %v4175_v46  ;;  %v4198_v52 = vld [vmem:[%s3849_s6 + $0xc0] sm:$0xff]  ;;  %v3202_v57 = vld [vmem:[%s3849_s6 + $0x1a8] sm:$0xff] }
  0xbb   : > { %3226 = vmatmul.msk.f32.gmra.mxu3 %vm223_vm1, %v4180_v54  ;;  %3150 = vmatmul.msk.f32.gmra.mxu1 %vm223_vm1, %v4136_v51 }
  0xbd   : > { %v686_v55 = vpop.f32.mrf.mxu2 }
  0xbe   : > { %v748_v58 = vadd.f32 %v686_v55, %v497_v48  ;;  %v900_v59 = vpop.f32.mrf.mxu3 }
  0xbf   : > { %v335_v60 = vpop.f32.mrf.mxu0 }
  0xc0   : > { %v4200_v6 = vadd.f32 %v900_v59, %v748_v58  ;;  %v499_v0 = vpop.f32.mrf.mxu1  ;;  %v4211_v58 = vld [vmem:[%s3849_s6 + $0xc8] sm:$0xff] }
  0xc1   : > { %v500_v63 = vadd.f32 %v499_v0, %v335_v60 }
  0xc2   : > { %6033 = vst [vmem:[#allocation12_spill] sm:$0xff] %v4200_v6  ;;  %3126 = vmatmul.msk.f32.gmra.mxu0 %vm223_vm1, %v4157_v49  ;;  %3177 = vmatmul.msk.f32.gmra.mxu2 %vm223_vm1, %v4198_v52 }
  0xc3   : > { %3227 = vmatmul.msk.f32.gmra.mxu3 %vm223_vm1, %v3201_v3  ;;  %3151 = vmatmul.msk.f32.gmra.mxu1 %vm223_vm1, %v4152_v44 }
  0xc5   : > { %v689_v61 = vpop.f32.mrf.mxu2 }
  0xc6   : > { %v749_v48 = vadd.f32 %v689_v61, %v500_v63  ;;  %v903_v55 = vpop.f32.mrf.mxu3 }
  0xc7   : > { %v338_v50 = vpop.f32.mrf.mxu0 }
  0xc8   : > { %v4213_v59 = vadd.f32 %v903_v55, %v749_v48  ;;  %v502_v6 = vpop.f32.mrf.mxu1 }
  0xc9   : > { %v503_v3 = vadd.f32 %v502_v6, %v338_v50 }
  0xca   : > { %3127 = vmatmul.msk.f32.gmra.mxu0 %vm223_vm1, %v4180_v54  ;;  %3178 = vmatmul.msk.f32.gmra.mxu2 %vm223_vm1, %v4211_v58 }
  0xcb   : > { %3228 = vmatmul.msk.f32.gmra.mxu3 %vm223_vm1, %v3202_v57  ;;  %3152 = vmatmul.msk.f32.gmra.mxu1 %vm223_vm1, %v4175_v46 }
  0xcd   : > { %v692_v0 = vpop.f32.mrf.mxu2 }
  0xce   : > { %v750_v60 = vadd.f32 %v692_v0, %v503_v3  ;;  %v906_v63 = vpop.f32.mrf.mxu3 }
  0xcf   : > { %v341_v61 = vpop.f32.mrf.mxu0 }
  0xd0   : > { %v4223_v48 = vadd.f32 %v906_v63, %v750_v60  ;;  %v505_v55 = vpop.f32.mrf.mxu1 }
  0xd1   : > { %v506_v6 = vadd.f32 %v505_v55, %v341_v61 }
  0xd2   : > { %3231 = vmatmul.msk.f32.vlgmr.msrb.gmra.mxu0 %vm223_vm1, %v3894_v16  ;;  %3283 = vmatmul.msk.f32.vlgmr.msrb.gmra.mxu2 %vm223_vm1, %v3865_v11 }
  0xd3   : > { %3309 = vmatmul.msk.f32.vlgmr.msrb.gmra.mxu3 %vm223_vm1, %v3855_v9  ;;  %3258 = vmatmul.msk.f32.vlgmr.msrb.gmra.mxu1 %vm223_vm1, %v3852_v8 }
  0xd4   : > { %3509 = vmatpush.msk.msrb.mxu2 %vm296_vm0, %v3826_v5  ;;  %3435 = vmatpush.msk.msrb.mxu0 %vm296_vm0, %v3799_v1 }
  0xd5   : > { %v695_v57 = vpop.f32.mrf.mxu2  ;;  %3534 = vmatpush.msk.msrb.mxu3 %vm296_vm0, %v3839_v7  ;;  %3460 = vmatpush.msk.msrb.mxu1 %vm296_vm0, %v3807_v2 }
  0xd6   : > { %v751_v11 = vadd.f32 %v695_v57, %v506_v6  ;;  %v909_v50 = vpop.f32.mrf.mxu3 }
  0xd7   : > { %v344_v3 = vpop.f32.mrf.mxu0 }
  0xd8   : > { %v4241_v0 = vadd.f32 %v909_v50, %v751_v11  ;;  %v508_v60 = vpop.f32.mrf.mxu1 }
  0xd9   : > { %v509_v1 = vadd.f32 %v508_v60, %v344_v3 }
  0xda   : > { %3232 = vmatmul.msk.f32.gmra.mxu0 %vm223_vm1, %v3908_v18  ;;  %3284 = vmatmul.msk.f32.gmra.mxu2 %vm223_vm1, %v3883_v15 }
  0xdb   : > { %3310 = vmatmul.msk.f32.gmra.mxu3 %vm223_vm1, %v3877_v13  ;;  %3259 = vmatmul.msk.f32.gmra.mxu1 %vm223_vm1, %v3874_v12 }
  0xdd   : > { %v698_v2 = vpop.f32.mrf.mxu2 }
  0xde   : > { %v752_v5 = vadd.f32 %v698_v2, %v509_v1  ;;  %v912_v7 = vpop.f32.mrf.mxu3 }
  0xdf   : > { %v347_v63 = vpop.f32.mrf.mxu0 }
  0xe0   : > { %v4251_v61 = vadd.f32 %v912_v7, %v752_v5  ;;  %v511_v55 = vpop.f32.mrf.mxu1 }
  0xe1   : > { %v512_v15 = vadd.f32 %v511_v55, %v347_v63 }
  0xe2   : > { %3233 = vmatmul.msk.f32.gmra.mxu0 %vm223_vm1, %v3922_v20  ;;  %3285 = vmatmul.msk.f32.gmra.mxu2 %vm223_vm1, %v3855_v9 }
  0xe3   : > { %3311 = vmatmul.msk.f32.gmra.mxu3 %vm223_vm1, %v3894_v16  ;;  %3260 = vmatmul.msk.f32.gmra.mxu1 %vm223_vm1, %v3858_v10 }
  0xe5   : > { %v701_v6 = vpop.f32.mrf.mxu2 }
  0xe6   : > { %v753_v57 = vadd.f32 %v701_v6, %v512_v15  ;;  %v915_v11 = vpop.f32.mrf.mxu3 }
  0xe7   : > { %v350_v50 = vpop.f32.mrf.mxu0 }
  0xe8   : > { %v4261_v3 = vadd.f32 %v915_v11, %v753_v57  ;;  %v514_v60 = vpop.f32.mrf.mxu1 }
  0xe9   : > { %v515_v1 = vadd.f32 %v514_v60, %v350_v50 }
  0xea   : > { %3234 = vmatmul.msk.f32.gmra.mxu0 %vm223_vm1, %v3936_v22  ;;  %3286 = vmatmul.msk.f32.gmra.mxu2 %vm223_vm1, %v3877_v13 }
  0xeb   : > { %3312 = vmatmul.msk.f32.gmra.mxu3 %vm223_vm1, %v3908_v18  ;;  %3261 = vmatmul.msk.f32.gmra.mxu1 %vm223_vm1, %v3880_v14 }
  0xed   : > { %v704_v2 = vpop.f32.mrf.mxu2 }
  0xee   : > { %v754_v5 = vadd.f32 %v704_v2, %v515_v1  ;;  %v918_v7 = vpop.f32.mrf.mxu3 }
  0xef   : > { %v353_v63 = vpop.f32.mrf.mxu0 }
  0xf0   : > { %v4271_v55 = vadd.f32 %v918_v7, %v754_v5  ;;  %v517_v15 = vpop.f32.mrf.mxu1 }
  0xf1   : > { %v518_v6 = vadd.f32 %v517_v15, %v353_v63 }
  0xf2   : > { %3235 = vmatmul.msk.f32.gmra.mxu0 %vm223_vm1, %v3950_v24  ;;  %3287 = vmatmul.msk.f32.gmra.mxu2 %vm223_vm1, %v3894_v16 }
  0xf3   : > { %3313 = vmatmul.msk.f32.gmra.mxu3 %vm223_vm1, %v3922_v20  ;;  %3262 = vmatmul.msk.f32.gmra.mxu1 %vm223_vm1, %v3897_v17 }
  0xf5   : > { %v707_v57 = vpop.f32.mrf.mxu2 }
  0xf6   : > { %v755_v11 = vadd.f32 %v707_v57, %v518_v6  ;;  %v921_v50 = vpop.f32.mrf.mxu3 }
  0xf7   : > { %v356_v60 = vpop.f32.mrf.mxu0 }
  0xf8   : > { %v4281_v1 = vadd.f32 %v921_v50, %v755_v11  ;;  %v520_v2 = vpop.f32.mrf.mxu1 }
  0xf9   : > { %v521_v5 = vadd.f32 %v520_v2, %v356_v60 }
  0xfa   : > { %3236 = vmatmul.msk.f32.gmra.mxu0 %vm223_vm1, %v3964_v26  ;;  %3288 = vmatmul.msk.f32.gmra.mxu2 %vm223_vm1, %v3908_v18 }
  0xfb   : > { %3314 = vmatmul.msk.f32.gmra.mxu3 %vm223_vm1, %v3936_v22  ;;  %3263 = vmatmul.msk.f32.gmra.mxu1 %vm223_vm1, %v3911_v19 }
  0xfd   : > { %v710_v7 = vpop.f32.mrf.mxu2 }
  0xfe   : > { %v756_v63 = vadd.f32 %v710_v7, %v521_v5  ;;  %v924_v15 = vpop.f32.mrf.mxu3 }
  0xff   : > { %v359_v6 = vpop.f32.mrf.mxu0 }
 0x100   : > { %v4291_v57 = vadd.f32 %v924_v15, %v756_v63  ;;  %v523_v11 = vpop.f32.mrf.mxu1 }
 0x101   : > { %v524_v50 = vadd.f32 %v523_v11, %v359_v6 }
 0x102   : > { %6034 = vst [vmem:[#allocation13_spill] sm:$0xff] %v4291_v57  ;;  %3237 = vmatmul.msk.f32.gmra.mxu0 %vm223_vm1, %v3978_v28  ;;  %3289 = vmatmul.msk.f32.gmra.mxu2 %vm223_vm1, %v3922_v20 }
 0x103   : > { %3315 = vmatmul.msk.f32.gmra.mxu3 %vm223_vm1, %v3950_v24  ;;  %3264 = vmatmul.msk.f32.gmra.mxu1 %vm223_vm1, %v3925_v21 }
 0x105   : > { %v713_v60 = vpop.f32.mrf.mxu2 }
 0x106   : > { %v757_v2 = vadd.f32 %v713_v60, %v524_v50  ;;  %v927_v5 = vpop.f32.mrf.mxu3 }
 0x107   : > { %v362_v7 = vpop.f32.mrf.mxu0 }
 0x108   : > { %v4301_v63 = vadd.f32 %v927_v5, %v757_v2  ;;  %v526_v15 = vpop.f32.mrf.mxu1 }
 0x109   : > { %v527_v6 = vadd.f32 %v526_v15, %v362_v7 }
 0x10a   : > { %6035 = vst [vmem:[#allocation14_spill] sm:$0xff] %v4301_v63  ;;  %3238 = vmatmul.msk.f32.gmra.mxu0 %vm223_vm1, %v3992_v30  ;;  %3290 = vmatmul.msk.f32.gmra.mxu2 %vm223_vm1, %v3936_v22 }
 0x10b   : > { %3316 = vmatmul.msk.f32.gmra.mxu3 %vm223_vm1, %v3964_v26  ;;  %3265 = vmatmul.msk.f32.gmra.mxu1 %vm223_vm1, %v3939_v23 }
 0x10d   : > { %v716_v11 = vpop.f32.mrf.mxu2 }
 0x10e   : > { %v758_v50 = vadd.f32 %v716_v11, %v527_v6  ;;  %v930_v60 = vpop.f32.mrf.mxu3 }
 0x10f   : > { %v365_v57 = vpop.f32.mrf.mxu0 }
 0x110   : > { %v4311_v2 = vadd.f32 %v930_v60, %v758_v50  ;;  %v529_v5 = vpop.f32.mrf.mxu1 }
 0x111   : > { %v530_v7 = vadd.f32 %v529_v5, %v365_v57 }
 0x112   : > { %6036 = vst [vmem:[#allocation15_spill] sm:$0xff] %v4311_v2  ;;  %3239 = vmatmul.msk.f32.gmra.mxu0 %vm223_vm1, %v4006_v32  ;;  %3291 = vmatmul.msk.f32.gmra.mxu2 %vm223_vm1, %v3950_v24 }
 0x113   : > { %3317 = vmatmul.msk.f32.gmra.mxu3 %vm223_vm1, %v3978_v28  ;;  %3266 = vmatmul.msk.f32.gmra.mxu1 %vm223_vm1, %v3953_v25 }
 0x115   : > { %v719_v15 = vpop.f32.mrf.mxu2 }
 0x116   : > { %v759_v6 = vadd.f32 %v719_v15, %v530_v7  ;;  %v933_v11 = vpop.f32.mrf.mxu3 }
 0x117   : > { %v368_v63 = vpop.f32.mrf.mxu0 }
 0x118   : > { %v4321_v50 = vadd.f32 %v933_v11, %v759_v6  ;;  %v532_v60 = vpop.f32.mrf.mxu1 }
 0x119   : > { %v533_v57 = vadd.f32 %v532_v60, %v368_v63 }
 0x11a   : > { %6037 = vst [vmem:[#allocation16_spill] sm:$0xff] %v4321_v50  ;;  %3240 = vmatmul.msk.f32.gmra.mxu0 %vm223_vm1, %v4020_v34  ;;  %3292 = vmatmul.msk.f32.gmra.mxu2 %vm223_vm1, %v3964_v26 }
 0x11b   : > { %3318 = vmatmul.msk.f32.gmra.mxu3 %vm223_vm1, %v3992_v30  ;;  %3267 = vmatmul.msk.f32.gmra.mxu1 %vm223_vm1, %v3967_v27 }
 0x11d   : > { %v722_v5 = vpop.f32.mrf.mxu2 }
 0x11e   : > { %v760_v7 = vadd.f32 %v722_v5, %v533_v57  ;;  %v936_v15 = vpop.f32.mrf.mxu3 }
 0x11f   : > { %v371_v2 = vpop.f32.mrf.mxu0 }
 0x120   : > { %v4331_v6 = vadd.f32 %v936_v15, %v760_v7  ;;  %v535_v11 = vpop.f32.mrf.mxu1 }
 0x121   : > { %v536_v63 = vadd.f32 %v535_v11, %v371_v2 }
 0x122   : > { %6038 = vst [vmem:[#allocation17_spill] sm:$0xff] %v4331_v6  ;;  %3241 = vmatmul.msk.f32.gmra.mxu0 %vm223_vm1, %v4034_v36  ;;  %3293 = vmatmul.msk.f32.gmra.mxu2 %vm223_vm1, %v3978_v28 }
 0x123   : > { %3319 = vmatmul.msk.f32.gmra.mxu3 %vm223_vm1, %v4006_v32  ;;  %3268 = vmatmul.msk.f32.gmra.mxu1 %vm223_vm1, %v3981_v29 }
 0x125   : > { %v725_v60 = vpop.f32.mrf.mxu2 }
 0x126   : > { %v761_v57 = vadd.f32 %v725_v60, %v536_v63  ;;  %v939_v5 = vpop.f32.mrf.mxu3 }
 0x127   : > { %v374_v50 = vpop.f32.mrf.mxu0 }
 0x128   : > { %v4341_v7 = vadd.f32 %v939_v5, %v761_v57  ;;  %v538_v15 = vpop.f32.mrf.mxu1 }
 0x129   : > { %v539_v2 = vadd.f32 %v538_v15, %v374_v50 }
 0x12a   : > { %6039 = vst [vmem:[#allocation18_spill] sm:$0xff] %v4341_v7  ;;  %3242 = vmatmul.msk.f32.gmra.mxu0 %vm223_vm1, %v4048_v38  ;;  %3294 = vmatmul.msk.f32.gmra.mxu2 %vm223_vm1, %v3992_v30 }
 0x12b   : > { %3320 = vmatmul.msk.f32.gmra.mxu3 %vm223_vm1, %v4020_v34  ;;  %3269 = vmatmul.msk.f32.gmra.mxu1 %vm223_vm1, %v3995_v31 }
 0x12d   : > { %v728_v11 = vpop.f32.mrf.mxu2 }
 0x12e   : > { %v762_v63 = vadd.f32 %v728_v11, %v539_v2  ;;  %v942_v60 = vpop.f32.mrf.mxu3 }
 0x12f   : > { %v377_v6 = vpop.f32.mrf.mxu0 }
 0x130   : > { %v4351_v57 = vadd.f32 %v942_v60, %v762_v63  ;;  %v541_v5 = vpop.f32.mrf.mxu1 }
 0x131   : > { %v542_v50 = vadd.f32 %v541_v5, %v377_v6 }
 0x132   : > { %6040 = vst [vmem:[#allocation19_spill] sm:$0xff] %v4351_v57  ;;  %3243 = vmatmul.msk.f32.gmra.mxu0 %vm223_vm1, %v4062_v40  ;;  %3295 = vmatmul.msk.f32.gmra.mxu2 %vm223_vm1, %v4006_v32 }
 0x133   : > { %3321 = vmatmul.msk.f32.gmra.mxu3 %vm223_vm1, %v4034_v36  ;;  %3270 = vmatmul.msk.f32.gmra.mxu1 %vm223_vm1, %v4009_v33 }
 0x135   : > { %v731_v15 = vpop.f32.mrf.mxu2 }
 0x136   : > { %v763_v2 = vadd.f32 %v731_v15, %v542_v50  ;;  %v945_v11 = vpop.f32.mrf.mxu3 }
 0x137   : > { %v380_v7 = vpop.f32.mrf.mxu0 }
 0x138   : > { %v4361_v63 = vadd.f32 %v945_v11, %v763_v2  ;;  %v544_v60 = vpop.f32.mrf.mxu1 }
 0x139   : > { %v545_v6 = vadd.f32 %v544_v60, %v380_v7 }
 0x13a   : > { %6041 = vst [vmem:[#allocation20_spill] sm:$0xff] %v4361_v63  ;;  %3244 = vmatmul.msk.f32.gmra.mxu0 %vm223_vm1, %v4076_v42  ;;  %3296 = vmatmul.msk.f32.gmra.mxu2 %vm223_vm1, %v4020_v34 }
 0x13b   : > { %3322 = vmatmul.msk.f32.gmra.mxu3 %vm223_vm1, %v4048_v38  ;;  %3271 = vmatmul.msk.f32.gmra.mxu1 %vm223_vm1, %v4023_v35 }
 0x13d   : > { %v734_v5 = vpop.f32.mrf.mxu2 }
 0x13e   : > { %v764_v50 = vadd.f32 %v734_v5, %v545_v6  ;;  %v948_v15 = vpop.f32.mrf.mxu3 }
 0x13f   : > { %v383_v57 = vpop.f32.mrf.mxu0 }
 0x140   : > { %v4371_v2 = vadd.f32 %v948_v15, %v764_v50  ;;  %v547_v11 = vpop.f32.mrf.mxu1 }
 0x141   : > { %v548_v35 = vadd.f32 %v547_v11, %v383_v57 }
 0x142   : > { %6042 = vst [vmem:[#allocation21_spill] sm:$0xff] %v4371_v2  ;;  %3245 = vmatmul.msk.f32.gmra.mxu0 %vm223_vm1, %v4090_v45  ;;  %3297 = vmatmul.msk.f32.gmra.mxu2 %vm223_vm1, %v4034_v36 }
 0x143   : > { %3323 = vmatmul.msk.f32.gmra.mxu3 %vm223_vm1, %v4062_v40  ;;  %3272 = vmatmul.msk.f32.gmra.mxu1 %vm223_vm1, %v4037_v37 }
 0x145   : > { %v737_v7 = vpop.f32.mrf.mxu2 }
 0x146   : > { %v765_v60 = vadd.f32 %v737_v7, %v548_v35  ;;  %v951_v6 = vpop.f32.mrf.mxu3 }
 0x147   : > { %v386_v5 = vpop.f32.mrf.mxu0 }
 0x148   : > { %v4381_v50 = vadd.f32 %v951_v6, %v765_v60  ;;  %v550_v15 = vpop.f32.mrf.mxu1 }
 0x149   : > { %v551_v37 = vadd.f32 %v550_v15, %v386_v5 }
 0x14a   : > { %6043 = vst [vmem:[#allocation22_spill] sm:$0xff] %v4381_v50  ;;  %3246 = vmatmul.msk.f32.gmra.mxu0 %vm223_vm1, %v4104_v53  ;;  %3298 = vmatmul.msk.f32.gmra.mxu2 %vm223_vm1, %v4048_v38 }
 0x14b   : > { %3324 = vmatmul.msk.f32.gmra.mxu3 %vm223_vm1, %v4076_v42  ;;  %3273 = vmatmul.msk.f32.gmra.mxu1 %vm223_vm1, %v4051_v39 }
 0x14d   : > { %v740_v57 = vpop.f32.mrf.mxu2 }
 0x14e   : > { %v766_v11 = vadd.f32 %v740_v57, %v551_v37  ;;  %v954_v35 = vpop.f32.mrf.mxu3 }
 0x14f   : > { %v4391_v7 = vpop.f32.mrf.mxu0 }
 0x150   : > { %v4393_v60 = vadd.f32 %v954_v35, %v766_v11  ;;  %v1219_v6 = vpop.f32.mrf.mxu1 }
 0x152   : > { %6044 = vst [vmem:[#allocation23_spill] sm:$0xff] %v4393_v60  ;;  %3247 = vmatmul.msk.f32.gmra.mxu0 %vm223_vm1, %v4120_v62  ;;  %3299 = vmatmul.msk.f32.gmra.mxu2 %vm223_vm1, %v4062_v40 }
 0x153   : > { %3325 = vmatmul.msk.f32.gmra.mxu3 %vm223_vm1, %v4090_v45  ;;  %3274 = vmatmul.msk.f32.gmra.mxu1 %vm223_vm1, %v4065_v41 }
 0x155   : > { %v1311_v39 = vpop.f32.mrf.mxu2 }
 0x156   : > { %v1312_v5 = vadd.f32 %v1311_v39, %v1219_v6  ;;  %v1405_v15 = vpop.f32.mrf.mxu3 }
 0x157   : > { %v4403_v37 = vpop.f32.mrf.mxu0 }
 0x158   : > { %v4405_v57 = vadd.f32 %v1405_v15, %v1312_v5  ;;  %v1222_v11 = vpop.f32.mrf.mxu1 }
 0x15a   : > { %3248 = vmatmul.msk.f32.gmra.mxu0 %vm223_vm1, %v4136_v51  ;;  %3300 = vmatmul.msk.f32.gmra.mxu2 %vm223_vm1, %v4076_v42 }
 0x15b   : > { %3326 = vmatmul.msk.f32.gmra.mxu3 %vm223_vm1, %v4104_v53  ;;  %3275 = vmatmul.msk.f32.gmra.mxu1 %vm223_vm1, %v4079_v43 }
 0x15d   : > { %v1314_v41 = vpop.f32.mrf.mxu2 }
 0x15e   : > { %v1315_v35 = vadd.f32 %v1314_v41, %v1222_v11  ;;  %v1408_v6 = vpop.f32.mrf.mxu3 }
 0x15f   : > { %v4415_v39 = vpop.f32.mrf.mxu0 }
 0x160   : > { %v4417_v5 = vadd.f32 %v1408_v6, %v1315_v35  ;;  %v1225_v15 = vpop.f32.mrf.mxu1 }
 0x162   : > { %3249 = vmatmul.msk.f32.gmra.mxu0 %vm223_vm1, %v4152_v44  ;;  %3301 = vmatmul.msk.f32.gmra.mxu2 %vm223_vm1, %v4090_v45 }
 0x163   : > { %3327 = vmatmul.msk.f32.gmra.mxu3 %vm223_vm1, %v4120_v62  ;;  %3276 = vmatmul.msk.f32.gmra.mxu1 %vm223_vm1, %v4093_v47 }
 0x165   : > { %v1317_v42 = vpop.f32.mrf.mxu2 }
 0x166   : > { %v1318_v43 = vadd.f32 %v1317_v42, %v1225_v15  ;;  %v1411_v11 = vpop.f32.mrf.mxu3 }
 0x167   : > { %v4427_v41 = vpop.f32.mrf.mxu0 }
 0x168   : > { %v4429_v35 = vadd.f32 %v1411_v11, %v1318_v43  ;;  %v1228_v6 = vpop.f32.mrf.mxu1 }
 0x16a   : > { %3250 = vmatmul.msk.f32.gmra.mxu0 %vm223_vm1, %v4175_v46  ;;  %3302 = vmatmul.msk.f32.gmra.mxu2 %vm223_vm1, %v4104_v53 }
 0x16b   : > { %3328 = vmatmul.msk.f32.gmra.mxu3 %vm223_vm1, %v4136_v51  ;;  %3277 = vmatmul.msk.f32.gmra.mxu1 %vm223_vm1, %v4109_v56 }
 0x16d   : > { %v1320_v45 = vpop.f32.mrf.mxu2 }
 0x16e   : > { %v1321_v47 = vadd.f32 %v1320_v45, %v1228_v6  ;;  %v1414_v15 = vpop.f32.mrf.mxu3 }
 0x16f   : > { %v4439_v42 = vpop.f32.mrf.mxu0 }
 0x170   : > { %v4441_v43 = vadd.f32 %v1414_v15, %v1321_v47  ;;  %v1231_v11 = vpop.f32.mrf.mxu1 }
 0x172   : > { %3251 = vmatmul.msk.f32.gmra.mxu0 %vm223_vm1, %v4198_v52  ;;  %3303 = vmatmul.msk.f32.gmra.mxu2 %vm223_vm1, %v4120_v62  ;;  %v6045_v62 = vld [vmem:[#allocation7_spill] sm:$0xff] }
 0x173   : > { %3329 = vmatmul.msk.f32.gmra.mxu3 %vm223_vm1, %v4152_v44  ;;  %3278 = vmatmul.msk.f32.gmra.mxu1 %vm223_vm1, %v4125_v4 }
 0x175   : > { %v1323_v53 = vpop.f32.mrf.mxu2 }
 0x176   : > { %v1324_v56 = vadd.f32 %v1323_v53, %v1231_v11  ;;  %v1417_v6 = vpop.f32.mrf.mxu3 }
 0x177   : > { %v4451_v45 = vpop.f32.mrf.mxu0 }
 0x178   : > { %v4453_v47 = vadd.f32 %v1417_v6, %v1324_v56  ;;  %v1234_v15 = vpop.f32.mrf.mxu1  ;;  %v4466_v56 = vld [vmem:[%s3849_s6 + $0xd0] sm:$0xff] }
 0x17a   : > { %3252 = vmatmul.msk.f32.gmra.mxu0 %vm223_vm1, %v4211_v58  ;;  %3304 = vmatmul.msk.f32.gmra.mxu2 %vm223_vm1, %v4136_v51 }
 0x17b   : > { %3330 = vmatmul.msk.f32.gmra.mxu3 %vm223_vm1, %v4175_v46  ;;  %3279 = vmatmul.msk.f32.gmra.mxu1 %vm223_vm1, %v6045_v62 }
 0x17d   : > { %v1326_v4 = vpop.f32.mrf.mxu2 }
 0x17e   : > { %v1327_v11 = vadd.f32 %v1326_v4, %v1234_v15  ;;  %v1420_v53 = vpop.f32.mrf.mxu3 }
 0x17f   : > { %v4463_v60 = vpop.f32.mrf.mxu0 }
 0x180   : > { %v4468_v6 = vadd.f32 %v1420_v53, %v1327_v11  ;;  %v1237_v50 = vpop.f32.mrf.mxu1  ;;  %v4481_v11 = vld [vmem:[%s3849_s6 + $0xd8] sm:$0xff] }
 0x182   : > { %3253 = vmatmul.msk.f32.gmra.mxu0 %vm223_vm1, %v4466_v56  ;;  %3305 = vmatmul.msk.f32.gmra.mxu2 %vm223_vm1, %v4152_v44 }
 0x183   : > { %3331 = vmatmul.msk.f32.gmra.mxu3 %vm223_vm1, %v4198_v52  ;;  %3280 = vmatmul.msk.f32.gmra.mxu1 %vm223_vm1, %v4157_v49 }
 0x185   : > { %v1329_v51 = vpop.f32.mrf.mxu2 }
 0x186   : > { %v1330_v15 = vadd.f32 %v1329_v51, %v1237_v50  ;;  %v1423_v62 = vpop.f32.mrf.mxu3 }
 0x187   : > { %v4478_v4 = vpop.f32.mrf.mxu0 }
 0x188   : > { %v4483_v53 = vadd.f32 %v1423_v62, %v1330_v15  ;;  %v1240_v2 = vpop.f32.mrf.mxu1  ;;  %v6049_v62 = vld [vmem:[#allocation3_spill] sm:$0xff] }
 0x18a   : > { %3254 = vmatmul.msk.f32.gmra.mxu0 %vm223_vm1, %v4481_v11  ;;  %3306 = vmatmul.msk.f32.gmra.mxu2 %vm223_vm1, %v4175_v46  ;;  %v6047_v46 = vld [vmem:[#allocation2_spill] sm:$0xff] }
 0x18b   : > { %3332 = vmatmul.msk.f32.gmra.mxu3 %vm223_vm1, %v4211_v58  ;;  %3281 = vmatmul.msk.f32.gmra.mxu1 %vm223_vm1, %v4180_v54  ;;  %v6046_v54 = vld [vmem:[#allocation9_spill] sm:$0xff] }
 0x18d   : > { %v1332_v52 = vpop.f32.mrf.mxu2 }
 0x18e   : > { %v1333_v44 = vadd.f32 %v1332_v52, %v1240_v2  ;;  %v1426_v49 = vpop.f32.mrf.mxu3  ;;  %v6048_v2 = vld [vmem:[#allocation11_spill] sm:$0xff] }
 0x18f   : > { %v4493_v50 = vpop.f32.mrf.mxu0 }
 0x190   : > { %v4495_v51 = vadd.f32 %v1426_v49, %v1333_v44  ;;  %v1243_v15 = vpop.f32.mrf.mxu1 }
 0x192   : > { %3335 = vmatmul.msk.f32.vlgmr.msra.gmra.mxu0 %vm223_vm1, %v3858_v10  ;;  %3386 = vmatmul.msk.f32.vlgmr.msra.gmra.mxu2 %vm223_vm1, %v3855_v9 }
 0x193   : > { %3411 = vmatmul.msk.f32.vlgmr.msra.gmra.mxu3 %vm223_vm1, %v3852_v8  ;;  %3361 = vmatmul.msk.f32.vlgmr.msra.gmra.mxu1 %vm223_vm1, %v3894_v16 }
 0x194   : > { %3609 = vmatpush.msk.msra.mxu2 %vm296_vm0, %v6046_v54  ;;  %3559 = vmatpush.msk.msra.mxu0 %vm296_vm0, %v6047_v46 }
 0x195   : > { %v1335_v58 = vpop.f32.mrf.mxu2  ;;  %3634 = vmatpush.msk.msra.mxu3 %vm296_vm0, %v6048_v2  ;;  %3584 = vmatpush.msk.msra.mxu1 %vm296_vm0, %v6049_v62 }
 0x196   : > { %v1336_v9 = vadd.f32 %v1335_v58, %v1243_v15  ;;  %v1429_v52 = vpop.f32.mrf.mxu3 }
 0x197   : > { %v4513_v44 = vpop.f32.mrf.mxu0 }
 0x198   : > { %v4515_v8 = vadd.f32 %v1429_v52, %v1336_v9  ;;  %v1246_v49 = vpop.f32.mrf.mxu1 }
 0x19a   : > { %3336 = vmatmul.msk.f32.gmra.mxu0 %vm223_vm1, %v3880_v14  ;;  %3387 = vmatmul.msk.f32.gmra.mxu2 %vm223_vm1, %v3877_v13 }
 0x19b   : > { %3412 = vmatmul.msk.f32.gmra.mxu3 %vm223_vm1, %v3874_v12  ;;  %3362 = vmatmul.msk.f32.gmra.mxu1 %vm223_vm1, %v3908_v18 }
 0x19d   : > { %v1338_v54 = vpop.f32.mrf.mxu2 }
 0x19e   : > { %v1339_v15 = vadd.f32 %v1338_v54, %v1246_v49  ;;  %v1432_v46 = vpop.f32.mrf.mxu3 }
 0x19f   : > { %v4525_v58 = vpop.f32.mrf.mxu0 }
 0x1a0   : > { %v4527_v2 = vadd.f32 %v1432_v46, %v1339_v15  ;;  %v1249_v62 = vpop.f32.mrf.mxu1 }
 0x1a2   : > { %3337 = vmatmul.msk.f32.gmra.mxu0 %vm223_vm1, %v3897_v17  ;;  %3388 = vmatmul.msk.f32.gmra.mxu2 %vm223_vm1, %v3894_v16 }
 0x1a3   : > { %3413 = vmatmul.msk.f32.gmra.mxu3 %vm223_vm1, %v3858_v10  ;;  %3363 = vmatmul.msk.f32.gmra.mxu1 %vm223_vm1, %v3922_v20 }
 0x1a5   : > { %v1341_v12 = vpop.f32.mrf.mxu2 }
 0x1a6   : > { %v1342_v13 = vadd.f32 %v1341_v12, %v1249_v62  ;;  %v1435_v9 = vpop.f32.mrf.mxu3 }
 0x1a7   : > { %v4537_v52 = vpop.f32.mrf.mxu0 }
 0x1a8   : > { %v4539_v49 = vadd.f32 %v1435_v9, %v1342_v13  ;;  %v1252_v54 = vpop.f32.mrf.mxu1 }
 0x1aa   : > { %3338 = vmatmul.msk.f32.gmra.mxu0 %vm223_vm1, %v3911_v19  ;;  %3389 = vmatmul.msk.f32.gmra.mxu2 %vm223_vm1, %v3908_v18 }
 0x1ab   : > { %3414 = vmatmul.msk.f32.gmra.mxu3 %vm223_vm1, %v3880_v14  ;;  %3364 = vmatmul.msk.f32.gmra.mxu1 %vm223_vm1, %v3936_v22 }
 0x1ad   : > { %v1344_v10 = vpop.f32.mrf.mxu2 }
 0x1ae   : > { %v1345_v16 = vadd.f32 %v1344_v10, %v1252_v54  ;;  %v1438_v15 = vpop.f32.mrf.mxu3 }
 0x1af   : > { %v4549_v46 = vpop.f32.mrf.mxu0 }
 0x1b0   : > { %v4551_v62 = vadd.f32 %v1438_v15, %v1345_v16  ;;  %v1255_v12 = vpop.f32.mrf.mxu1 }
 0x1b2   : > { %3339 = vmatmul.msk.f32.gmra.mxu0 %vm223_vm1, %v3925_v21  ;;  %3390 = vmatmul.msk.f32.gmra.mxu2 %vm223_vm1, %v3922_v20 }
 0x1b3   : > { %3415 = vmatmul.msk.f32.gmra.mxu3 %vm223_vm1, %v3897_v17  ;;  %3365 = vmatmul.msk.f32.gmra.mxu1 %vm223_vm1, %v3950_v24 }
 0x1b5   : > { %v1347_v14 = vpop.f32.mrf.mxu2 }
 0x1b6   : > { %v1348_v18 = vadd.f32 %v1347_v14, %v1255_v12  ;;  %v1441_v13 = vpop.f32.mrf.mxu3 }
 0x1b7   : > { %v4561_v9 = vpop.f32.mrf.mxu0 }
 0x1b8   : > { %v4563_v54 = vadd.f32 %v1441_v13, %v1348_v18  ;;  %v1258_v10 = vpop.f32.mrf.mxu1 }
 0x1ba   : > { %3340 = vmatmul.msk.f32.gmra.mxu0 %vm223_vm1, %v3939_v23  ;;  %3391 = vmatmul.msk.f32.gmra.mxu2 %vm223_vm1, %v3936_v22 }
 0x1bb   : > { %3416 = vmatmul.msk.f32.gmra.mxu3 %vm223_vm1, %v3911_v19  ;;  %3366 = vmatmul.msk.f32.gmra.mxu1 %vm223_vm1, %v3964_v26 }
 0x1bd   : > { %v1350_v17 = vpop.f32.mrf.mxu2 }
 0x1be   : > { %v1351_v20 = vadd.f32 %v1350_v17, %v1258_v10  ;;  %v1444_v16 = vpop.f32.mrf.mxu3 }
 0x1bf   : > { %v4573_v15 = vpop.f32.mrf.mxu0 }
 0x1c0   : > { %v4575_v12 = vadd.f32 %v1444_v16, %v1351_v20  ;;  %v1261_v14 = vpop.f32.mrf.mxu1 }
 0x1c2   : > { %3341 = vmatmul.msk.f32.gmra.mxu0 %vm223_vm1, %v3953_v25  ;;  %3392 = vmatmul.msk.f32.gmra.mxu2 %vm223_vm1, %v3950_v24  ;;  %v4594_v24 = vld [vmem:[%s3849_s6 + $0x118] sm:$0xff] }
 0x1c3   : > { %3417 = vmatmul.msk.f32.gmra.mxu3 %vm223_vm1, %v3925_v21  ;;  %3367 = vmatmul.msk.f32.gmra.mxu1 %vm223_vm1, %v3978_v28 }
 0x1c5   : > { %v1353_v19 = vpop.f32.mrf.mxu2 }
 0x1c6   : > { %v1354_v22 = vadd.f32 %v1353_v19, %v1261_v14  ;;  %v1447_v23 = vpop.f32.mrf.mxu3 }
 0x1c7   : > { %v4585_v18 = vpop.f32.mrf.mxu0 }
 0x1c8   : > { %v4587_v13 = vadd.f32 %v1447_v23, %v1354_v22  ;;  %v1264_v10 = vpop.f32.mrf.mxu1 }
 0x1ca   : > { %3342 = vmatmul.msk.f32.gmra.mxu0 %vm223_vm1, %v3967_v27  ;;  %3393 = vmatmul.msk.f32.gmra.mxu2 %vm223_vm1, %v3964_v26  ;;  %v4609_v26 = vld [vmem:[%s3849_s6 + $0x120] sm:$0xff] }
 0x1cb   : > { %3418 = vmatmul.msk.f32.gmra.mxu3 %vm223_vm1, %v4594_v24  ;;  %3368 = vmatmul.msk.f32.gmra.mxu1 %vm223_vm1, %v3992_v30 }
 0x1cd   : > { %v1356_v21 = vpop.f32.mrf.mxu2 }
 0x1ce   : > { %v1357_v25 = vadd.f32 %v1356_v21, %v1264_v10  ;;  %v1450_v17 = vpop.f32.mrf.mxu3 }
 0x1cf   : > { %v4600_v20 = vpop.f32.mrf.mxu0 }
 0x1d0   : > { %v4602_v16 = vadd.f32 %v1450_v17, %v1357_v25  ;;  %v1267_v27 = vpop.f32.mrf.mxu1 }
 0x1d2   : > { %3343 = vmatmul.msk.f32.gmra.mxu0 %vm223_vm1, %v3981_v29  ;;  %3394 = vmatmul.msk.f32.gmra.mxu2 %vm223_vm1, %v3978_v28  ;;  %v4624_v28 = vld [vmem:[%s3849_s6 + $0x128] sm:$0xff] }
 0x1d3   : > { %3419 = vmatmul.msk.f32.gmra.mxu3 %vm223_vm1, %v4609_v26  ;;  %3369 = vmatmul.msk.f32.gmra.mxu1 %vm223_vm1, %v4006_v32 }
 0x1d5   : > { %v1359_v14 = vpop.f32.mrf.mxu2 }
 0x1d6   : > { %v1360_v19 = vadd.f32 %v1359_v14, %v1267_v27  ;;  %v1453_v22 = vpop.f32.mrf.mxu3 }
 0x1d7   : > { %v4615_v23 = vpop.f32.mrf.mxu0 }
 0x1d8   : > { %6050 = vst [vmem:[#allocation7_spill] sm:$0xff] %v4615_v23  ;;  %v4617_v10 = vadd.f32 %v1453_v22, %v1360_v19  ;;  %v1270_v29 = vpop.f32.mrf.mxu1  ;;  %v6075_v23 = vld [vmem:[#allocation4_spill] sm:$0xff] }
 0x1da   : > { %3344 = vmatmul.msk.f32.gmra.mxu0 %vm223_vm1, %v3995_v31  ;;  %3395 = vmatmul.msk.f32.gmra.mxu2 %vm223_vm1, %v3992_v30  ;;  %v4637_v30 = vld [vmem:[%s3849_s6 + $0x60] sm:$0xff] }
 0x1db   : > { %3420 = vmatmul.msk.f32.gmra.mxu3 %vm223_vm1, %v4624_v28  ;;  %3370 = vmatmul.msk.f32.gmra.mxu1 %vm223_vm1, %v4020_v34  ;;  %v4642_v34 = vld [vmem:[%s3849_s6 + $0x130] sm:$0xff] }
 0x1dd   : > { %v1362_v32 = vpop.f32.mrf.mxu2 }
 0x1de   : > { %v1363_v21 = vadd.f32 %v1362_v32, %v1270_v29  ;;  %v1456_v25 = vpop.f32.mrf.mxu3 }
 0x1df   : > { %v4630_v17 = vpop.f32.mrf.mxu0 }
 0x1e0   : > { %6051 = vst [vmem:[#allocation9_spill] sm:$0xff] %v4630_v17  ;;  %v4632_v27 = vadd.f32 %v1456_v25, %v1363_v21  ;;  %v1273_v31 = vpop.f32.mrf.mxu1  ;;  %v4653_v21 = vld [vmem:[%s3849_s6 + $0x148] sm:$0xff]  ;;  %v4674_v17 = vld [vmem:[%s3849_s6 + $0x150] sm:$0xff] }
 0x1e1   : > { %6055 = vst [vmem:[#allocation24_spill] sm:$0xff] %v4653_v21  ;;  %v4658_v25 = vld [vmem:[%s3849_s6 + $0x68] sm:$0xff] }
 0x1e2   : > { %6052 = vst [vmem:[#allocation2_spill] sm:$0xff] %v4632_v27  ;;  %3345 = vmatmul.msk.f32.gmra.mxu0 %vm223_vm1, %v4009_v33  ;;  %3396 = vmatmul.msk.f32.gmra.mxu2 %vm223_vm1, %v4637_v30  ;;  %v4760_v27 = vld [vmem:[%s3849_s6 + $0x170] sm:$0xff] }
 0x1e3   : > { %3421 = vmatmul.msk.f32.gmra.mxu3 %vm223_vm1, %v4642_v34  ;;  %3371 = vmatmul.msk.f32.gmra.mxu1 %vm223_vm1, %v4034_v36  ;;  %6056 = vst [vmem:[#allocation25_spill] sm:$0xff] %v4658_v25  ;;  %v4663_v36 = vld [vmem:[%s3849_s6 + $0x138] sm:$0xff] }
 0x1e4   : > { %6057 = vst [vmem:[#allocation26_spill] sm:$0xff] %v4663_v36 }
 0x1e5   : > { %v1365_v14 = vpop.f32.mrf.mxu2  ;;  %6060 = vst [vmem:[#allocation29_spill] sm:$0xff] %v4674_v17 }
 0x1e6   : > { %v1366_v19 = vadd.f32 %v1365_v14, %v1273_v31  ;;  %v1459_v22 = vpop.f32.mrf.mxu3 }
 0x1e7   : > { %v4648_v29 = vpop.f32.mrf.mxu0 }
 0x1e8   : > { %6053 = vst [vmem:[#allocation11_spill] sm:$0xff] %v4648_v29  ;;  %v4650_v33 = vadd.f32 %v1459_v22, %v1366_v19  ;;  %v1276_v32 = vpop.f32.mrf.mxu1 }
 0x1ea   : > { %6054 = vst [vmem:[#allocation3_spill] sm:$0xff] %v4650_v33  ;;  %3346 = vmatmul.msk.f32.gmra.mxu0 %vm223_vm1, %v4653_v21  ;;  %3397 = vmatmul.msk.f32.gmra.mxu2 %vm223_vm1, %v4658_v25  ;;  %v4679_v33 = vld [vmem:[%s3849_s6 + $0x70] sm:$0xff]  ;;  %v4695_v25 = vld [vmem:[%s3849_s6 + $0x158] sm:$0xff] }
 0x1eb   : > { %3422 = vmatmul.msk.f32.gmra.mxu3 %vm223_vm1, %v4663_v36  ;;  %3372 = vmatmul.msk.f32.gmra.mxu1 %vm223_vm1, %v4048_v38  ;;  %6061 = vst [vmem:[#allocation30_spill] sm:$0xff] %v4679_v33  ;;  %v4684_v38 = vld [vmem:[%s3849_s6 + $0x140] sm:$0xff]  ;;  %v4737_v36 = vld [vmem:[%s3849_s6 + $0x168] sm:$0xff] }
 0x1ec   : > { %6062 = vst [vmem:[#allocation31_spill] sm:$0xff] %v4684_v38 }
 0x1ed   : > { %v1368_v31 = vpop.f32.mrf.mxu2  ;;  %6065 = vst [vmem:[#allocation34_spill] sm:$0xff] %v4695_v25 }
 0x1ee   : > { %v1369_v14 = vadd.f32 %v1368_v31, %v1276_v32  ;;  %v1462_v19 = vpop.f32.mrf.mxu3 }
 0x1ef   : > { %v4669_v22 = vpop.f32.mrf.mxu0 }
 0x1f0   : > { %6058 = vst [vmem:[#allocation27_spill] sm:$0xff] %v4669_v22  ;;  %v4671_v63 = vadd.f32 %v1462_v19, %v1369_v14  ;;  %v1279_v29 = vpop.f32.mrf.mxu1 }
 0x1f2   : > { %6059 = vst [vmem:[#allocation28_spill] sm:$0xff] %v4671_v63  ;;  %3347 = vmatmul.msk.f32.gmra.mxu0 %vm223_vm1, %v4674_v17  ;;  %3398 = vmatmul.msk.f32.gmra.mxu2 %vm223_vm1, %v4679_v33  ;;  %v4700_v33 = vld [vmem:[%s3849_s6 + $0x78] sm:$0xff] }
 0x1f3   : > { %3423 = vmatmul.msk.f32.gmra.mxu3 %vm223_vm1, %v4684_v38  ;;  %3373 = vmatmul.msk.f32.gmra.mxu1 %vm223_vm1, %v4062_v40  ;;  %6066 = vst [vmem:[#allocation35_spill] sm:$0xff] %v4700_v33  ;;  %v4707_v40 = vld [vmem:[%s3849_s6 + $0x88] sm:$0xff]  ;;  %v4716_v38 = vld [vmem:[%s3849_s6 + $0x160] sm:$0xff] }
 0x1f4   : > { %6067 = vst [vmem:[#allocation36_spill] sm:$0xff] %v4707_v40 }
 0x1f5   : > { %v1371_v32 = vpop.f32.mrf.mxu2 }
 0x1f6   : > { %v1372_v31 = vadd.f32 %v1371_v32, %v1279_v29  ;;  %v1465_v14 = vpop.f32.mrf.mxu3 }
 0x1f7   : > { %v4690_v19 = vpop.f32.mrf.mxu0 }
 0x1f8   : > { %6063 = vst [vmem:[#allocation32_spill] sm:$0xff] %v4690_v19  ;;  %v4692_v22 = vadd.f32 %v1465_v14, %v1372_v31  ;;  %v1282_v63 = vpop.f32.mrf.mxu1 }
 0x1fa   : > { %6064 = vst [vmem:[#allocation33_spill] sm:$0xff] %v4692_v22  ;;  %3348 = vmatmul.msk.f32.gmra.mxu0 %vm223_vm1, %v4695_v25  ;;  %3399 = vmatmul.msk.f32.gmra.mxu2 %vm223_vm1, %v4700_v33  ;;  %v4721_v33 = vld [vmem:[%s3849_s6 + $0x80] sm:$0xff] }
 0x1fb   : > { %3424 = vmatmul.msk.f32.gmra.mxu3 %vm223_vm1, %v4653_v21  ;;  %3374 = vmatmul.msk.f32.gmra.mxu1 %vm223_vm1, %v4707_v40  ;;  %6070 = vst [vmem:[#allocation39_spill] sm:$0xff] %v4721_v33 }
 0x1fd   : > { %v1374_v29 = vpop.f32.mrf.mxu2 }
 0x1fe   : > { %v1375_v32 = vadd.f32 %v1374_v29, %v1282_v63  ;;  %v1468_v31 = vpop.f32.mrf.mxu3  ;;  %v4728_v63 = vld [vmem:[%s3849_s6 + $0x90] sm:$0xff] }
 0x1ff   : > { %v4711_v14 = vpop.f32.mrf.mxu0  ;;  %6071 = vst [vmem:[#allocation40_spill] sm:$0xff] %v4728_v63 }
 0x200   : > { %6068 = vst [vmem:[#allocation37_spill] sm:$0xff] %v4711_v14  ;;  %v4713_v19 = vadd.f32 %v1468_v31, %v1375_v32  ;;  %v1285_v22 = vpop.f32.mrf.mxu1 }
 0x202   : > { %6069 = vst [vmem:[#allocation38_spill] sm:$0xff] %v4713_v19  ;;  %3349 = vmatmul.msk.f32.gmra.mxu0 %vm223_vm1, %v4716_v38  ;;  %3400 = vmatmul.msk.f32.gmra.mxu2 %vm223_vm1, %v4721_v33 }
 0x203   : > { %3425 = vmatmul.msk.f32.gmra.mxu3 %vm223_vm1, %v4674_v17  ;;  %3375 = vmatmul.msk.f32.gmra.mxu1 %vm223_vm1, %v4728_v63 }
 0x205   : > { %v1377_v29 = vpop.f32.mrf.mxu2 }
 0x206   : > { %v1378_v32 = vadd.f32 %v1377_v29, %v1285_v22  ;;  %v1471_v31 = vpop.f32.mrf.mxu3  ;;  %v4746_v22 = vld [vmem:[%s3849_s6 + $0x98] sm:$0xff] }
 0x207   : > { %v4732_v14 = vpop.f32.mrf.mxu0 }
 0x208   : > { %6072 = vst [vmem:[#allocation41_spill] sm:$0xff] %v4732_v14  ;;  %v4734_v19 = vadd.f32 %v1471_v31, %v1378_v32  ;;  %v1288_v21 = vpop.f32.mrf.mxu1 }
 0x20a   : > { %6073 = vst [vmem:[#allocation42_spill] sm:$0xff] %v4734_v19  ;;  %3350 = vmatmul.msk.f32.gmra.mxu0 %vm223_vm1, %v4737_v36  ;;  %3401 = vmatmul.msk.f32.gmra.mxu2 %vm223_vm1, %v4707_v40  ;;  %v4755_v40 = vadd.f32 %v4391_v7, %v6075_v23  ;;  %v6083_v7 = vld [vmem:[#allocation6_spill] sm:$0xff] }
 0x20b   : > { %3426 = vmatmul.msk.f32.gmra.mxu3 %vm223_vm1, %v4695_v25  ;;  %3376 = vmatmul.msk.f32.gmra.mxu1 %vm223_vm1, %v4746_v22 }
 0x20c   : > { %6076 = vst [vmem:[#allocation4_spill] sm:$0xff] %v4755_v40 }
 0x20d   : > { %v1380_v29 = vpop.f32.mrf.mxu2 }
 0x20e   : > { %v1381_v32 = vadd.f32 %v1380_v29, %v1288_v21  ;;  %v1474_v31 = vpop.f32.mrf.mxu3 }
 0x20f   : > { %v1523_v14 = vpop.f32.mrf.mxu0 }
 0x210   : > { %v4750_v19 = vadd.f32 %v1474_v31, %v1381_v32  ;;  %v1595_v33 = vadd.f32 %v1523_v14, %v4405_v57  ;;  %v1641_v17 = vpop.f32.mrf.mxu1  ;;  %v4769_v57 = vld [vmem:[%s3849_s6 + $0xa0] sm:$0xff]  ;;  %v6079_v32 = vld [vmem:[#allocation5_spill] sm:$0xff] }
 0x211   : > { %v4780_v31 = vadd.f32 %v4403_v37, %v6079_v32  ;;  %v6087_v37 = vld [vmem:[#allocation8_spill] sm:$0xff] }
 0x212   : > { %6074 = vst [vmem:[#allocation43_spill] sm:$0xff] %v4750_v19  ;;  %v4757_v25 = vadd.f32 %v1641_v17, %v1595_v33  ;;  %3351 = vmatmul.msk.f32.gmra.mxu0 %vm223_vm1, %v4760_v27  ;;  %3402 = vmatmul.msk.f32.gmra.mxu2 %vm223_vm1, %v4728_v63  ;;  %v4785_v63 = vld [vmem:[%s3849_s6 + $0x178] sm:$0xff] }
 0x213   : > { %3427 = vmatmul.msk.f32.gmra.mxu3 %vm223_vm1, %v4716_v38  ;;  %3377 = vmatmul.msk.f32.gmra.mxu1 %vm223_vm1, %v4769_v57  ;;  %6080 = vst [vmem:[#allocation5_spill] sm:$0xff] %v4780_v31 }
 0x214   : > { %6077 = vst [vmem:[#allocation44_spill] sm:$0xff] %v4757_v25  ;;  %v4805_v25 = vadd.f32 %v4415_v39, %v6083_v7  ;;  %v6091_v39 = vld [vmem:[#allocation10_spill] sm:$0xff] }
 0x215   : > { %v1778_v23 = vpop.f32.mrf.mxu2 }
 0x216   : > { %v1867_v17 = vpop.f32.mrf.mxu3  ;;  %6084 = vst [vmem:[#allocation6_spill] sm:$0xff] %v4805_v25 }
 0x217   : > { %v4775_v33 = vadd.f32 %v1867_v17, %v1778_v23  ;;  %v1526_v21 = vpop.f32.mrf.mxu0 }
 0x218   : > { %v1596_v14 = vadd.f32 %v1526_v21, %v4417_v5  ;;  %v1644_v29 = vpop.f32.mrf.mxu1  ;;  %v4794_v5 = vld [vmem:[%s3849_s6 + $0xa8] sm:$0xff] }
 0x219   : > { %6078 = vst [vmem:[#allocation45_spill] sm:$0xff] %v4775_v33  ;;  %v4810_v33 = vld [vmem:[%s3849_s6 + $0x180] sm:$0xff] }
 0x21a   : > { %v4782_v19 = vadd.f32 %v1644_v29, %v1596_v14  ;;  %3352 = vmatmul.msk.f32.gmra.mxu0 %vm223_vm1, %v4785_v63  ;;  %3403 = vmatmul.msk.f32.gmra.mxu2 %vm223_vm1, %v4746_v22 }
 0x21b   : > { %3428 = vmatmul.msk.f32.gmra.mxu3 %vm223_vm1, %v4737_v36  ;;  %3378 = vmatmul.msk.f32.gmra.mxu1 %vm223_vm1, %v4794_v5 }
 0x21c   : > { %6081 = vst [vmem:[#allocation46_spill] sm:$0xff] %v4782_v19  ;;  %v4830_v19 = vadd.f32 %v4427_v41, %v6087_v37  ;;  %v6094_v41 = vld [vmem:[#allocation12_spill] sm:$0xff] }
 0x21d   : > { %v1781_v23 = vpop.f32.mrf.mxu2 }
 0x21e   : > { %v1870_v17 = vpop.f32.mrf.mxu3  ;;  %6088 = vst [vmem:[#allocation8_spill] sm:$0xff] %v4830_v19 }
 0x21f   : > { %v4800_v21 = vadd.f32 %v1870_v17, %v1781_v23  ;;  %v1529_v14 = vpop.f32.mrf.mxu0 }
 0x220   : > { %v1597_v29 = vadd.f32 %v1529_v14, %v4429_v35  ;;  %v1647_v32 = vpop.f32.mrf.mxu1  ;;  %v4819_v35 = vld [vmem:[%s3849_s6 + $0xb0] sm:$0xff] }
 0x221   : > { %6082 = vst [vmem:[#allocation47_spill] sm:$0xff] %v4800_v21  ;;  %v4835_v21 = vld [vmem:[%s3849_s6 + $0x188] sm:$0xff] }
 0x222   : > { %v4807_v40 = vadd.f32 %v1647_v32, %v1597_v29  ;;  %3353 = vmatmul.msk.f32.gmra.mxu0 %vm223_vm1, %v4810_v33  ;;  %3404 = vmatmul.msk.f32.gmra.mxu2 %vm223_vm1, %v4769_v57 }
 0x223   : > { %3429 = vmatmul.msk.f32.gmra.mxu3 %vm223_vm1, %v4760_v27  ;;  %3379 = vmatmul.msk.f32.gmra.mxu1 %vm223_vm1, %v4819_v35 }
 0x224   : > { %6085 = vst [vmem:[#allocation48_spill] sm:$0xff] %v4807_v40  ;;  %v4855_v40 = vadd.f32 %v4439_v42, %v6091_v39  ;;  %v4905_v42 = vadd.f32 %v4463_v60, %v4213_v59  ;;  %v4952_v59 = vadd.f32 %v4493_v50, %v4241_v0 }
 0x225   : > { %v1784_v7 = vpop.f32.mrf.mxu2 }
 0x226   : > { %v1873_v23 = vpop.f32.mrf.mxu3  ;;  %6092 = vst [vmem:[#allocation10_spill] sm:$0xff] %v4855_v40  ;;  %v4910_v40 = vld [vmem:[%s3849_s6 + $0x1a0] sm:$0xff] }
 0x227   : > { %v4825_v17 = vadd.f32 %v1873_v23, %v1784_v7  ;;  %v1532_v14 = vpop.f32.mrf.mxu0 }
 0x228   : > { %v1598_v29 = vadd.f32 %v1532_v14, %v4441_v43  ;;  %v1650_v32 = vpop.f32.mrf.mxu1  ;;  %v4844_v43 = vld [vmem:[%s3849_s6 + $0xb8] sm:$0xff] }
 0x229   : > { %6086 = vst [vmem:[#allocation49_spill] sm:$0xff] %v4825_v17  ;;  %v4860_v17 = vld [vmem:[%s3849_s6 + $0x190] sm:$0xff] }
 0x22a   : > { %v4832_v31 = vadd.f32 %v1650_v32, %v1598_v29  ;;  %3354 = vmatmul.msk.f32.gmra.mxu0 %vm223_vm1, %v4835_v21  ;;  %3405 = vmatmul.msk.f32.gmra.mxu2 %vm223_vm1, %v4794_v5 }
 0x22b   : > { %3430 = vmatmul.msk.f32.gmra.mxu3 %vm223_vm1, %v4785_v63  ;;  %3380 = vmatmul.msk.f32.gmra.mxu1 %vm223_vm1, %v4844_v43 }
 0x22c   : > { %6089 = vst [vmem:[#allocation50_spill] sm:$0xff] %v4832_v31  ;;  %v4880_v31 = vadd.f32 %v4451_v45, %v6094_v41 }
 0x22d   : > { %v1787_v37 = vpop.f32.mrf.mxu2 }
 0x22e   : > { %v1876_v7 = vpop.f32.mrf.mxu3 }
 0x22f   : > { %v4850_v23 = vadd.f32 %v1876_v7, %v1787_v37  ;;  %v1535_v14 = vpop.f32.mrf.mxu0 }
 0x230   : > { %v1599_v29 = vadd.f32 %v1535_v14, %v4453_v47  ;;  %v1653_v32 = vpop.f32.mrf.mxu1  ;;  %v4869_v47 = vld [vmem:[%s3849_s6 + $0xc0] sm:$0xff] }
 0x231   : > { %6090 = vst [vmem:[#allocation51_spill] sm:$0xff] %v4850_v23  ;;  %v4885_v23 = vld [vmem:[%s3849_s6 + $0x198] sm:$0xff] }
 0x232   : > { %v4857_v25 = vadd.f32 %v1653_v32, %v1599_v29  ;;  %3355 = vmatmul.msk.f32.gmra.mxu0 %vm223_vm1, %v4860_v17  ;;  %3406 = vmatmul.msk.f32.gmra.mxu2 %vm223_vm1, %v4819_v35 }
 0x233   : > { %3431 = vmatmul.msk.f32.gmra.mxu3 %vm223_vm1, %v4810_v33  ;;  %3381 = vmatmul.msk.f32.gmra.mxu1 %vm223_vm1, %v4869_v47 }
 0x234   : > { %6093 = vst [vmem:[#allocation52_spill] sm:$0xff] %v4857_v25 }
 0x235   : > { %v1790_v39 = vpop.f32.mrf.mxu2 }
 0x236   : > { %v1879_v37 = vpop.f32.mrf.mxu3 }
 0x237   : > { %v4875_v7 = vadd.f32 %v1879_v37, %v1790_v39  ;;  %v1538_v14 = vpop.f32.mrf.mxu0 }
 0x238   : > { %v1600_v29 = vadd.f32 %v1538_v14, %v4468_v6  ;;  %v1656_v32 = vpop.f32.mrf.mxu1  ;;  %v4894_v6 = vld [vmem:[%s3849_s6 + $0xc8] sm:$0xff] }
 0x23a   : > { %v4882_v19 = vadd.f32 %v1656_v32, %v1600_v29  ;;  %3356 = vmatmul.msk.f32.gmra.mxu0 %vm223_vm1, %v4885_v23  ;;  %3407 = vmatmul.msk.f32.gmra.mxu2 %vm223_vm1, %v4844_v43 }
 0x23b   : > { %3432 = vmatmul.msk.f32.gmra.mxu3 %vm223_vm1, %v4835_v21  ;;  %3382 = vmatmul.msk.f32.gmra.mxu1 %vm223_vm1, %v4894_v6 }
 0x23d   : > { %v1793_v41 = vpop.f32.mrf.mxu2 }
 0x23e   : > { %v1882_v39 = vpop.f32.mrf.mxu3 }
 0x23f   : > { %v4900_v37 = vadd.f32 %v1882_v39, %v1793_v41  ;;  %v1541_v14 = vpop.f32.mrf.mxu0 }
 0x240   : > { %v1601_v29 = vadd.f32 %v1541_v14, %v4483_v53  ;;  %v1659_v32 = vpop.f32.mrf.mxu1 }
 0x242   : > { %v4907_v25 = vadd.f32 %v1659_v32, %v1601_v29  ;;  %3357 = vmatmul.msk.f32.gmra.mxu0 %vm223_vm1, %v4910_v40  ;;  %3408 = vmatmul.msk.f32.gmra.mxu2 %vm223_vm1, %v4869_v47  ;;  %v4927_v32 = vadd.f32 %v4478_v4, %v4223_v48 }
 0x243   : > { %3433 = vmatmul.msk.f32.gmra.mxu3 %vm223_vm1, %v4860_v17  ;;  %3383 = vmatmul.msk.f32.gmra.mxu1 %vm223_vm1, %v4466_v56  ;;  %v4932_v56 = vld [vmem:[%s3849_s6 + $0x1a8] sm:$0xff] }
 0x244   : > { %6096 = vst [vmem:[#allocation53_spill] sm:$0xff] %v4932_v56 }
 0x245   : > { %v1796_v60 = vpop.f32.mrf.mxu2 }
 0x246   : > { %v1885_v53 = vpop.f32.mrf.mxu3 }
 0x247   : > { %v4922_v41 = vadd.f32 %v1885_v53, %v1796_v60  ;;  %v1544_v39 = vpop.f32.mrf.mxu0 }
 0x248   : > { %v1602_v14 = vadd.f32 %v1544_v39, %v4495_v51  ;;  %v1662_v29 = vpop.f32.mrf.mxu1  ;;  %v4947_v39 = vld [vmem:[%s3849_s6 + $0x100] sm:$0xff] }
 0x249   : > { %6097 = vst [vmem:[#allocation54_spill] sm:$0xff] %v4947_v39 }
 0x24a   : > { %v4929_v45 = vadd.f32 %v1662_v29, %v1602_v14  ;;  %3358 = vmatmul.msk.f32.gmra.mxu0 %vm223_vm1, %v4932_v56  ;;  %3409 = vmatmul.msk.f32.gmra.mxu2 %vm223_vm1, %v4894_v6  ;;  %v4957_v56 = vld [vmem:[%s3849_s6 + $0xf0] sm:$0xff] }
 0x24b   : > { %3434 = vmatmul.msk.f32.gmra.mxu3 %vm223_vm1, %v4885_v23  ;;  %3384 = vmatmul.msk.f32.gmra.mxu1 %vm223_vm1, %v4481_v11  ;;  %6099 = vst [vmem:[#allocation56_spill] sm:$0xff] %v4957_v56 }
 0x24c   : > { %6095 = vst [vmem:[#allocation12_spill] sm:$0xff] %v4929_v45  ;;  %v4985_v45 = vld [vmem:[%s3849_s6 + $0xf8] sm:$0xff] }
 0x24d   : > { %v1799_v4 = vpop.f32.mrf.mxu2  ;;  %6102 = vst [vmem:[#allocation59_spill] sm:$0xff] %v4985_v45 }
 0x24e   : > { %v1888_v51 = vpop.f32.mrf.mxu3 }
 0x24f   : > { %v4944_v60 = vadd.f32 %v1888_v51, %v1799_v4  ;;  %v1547_v53 = vpop.f32.mrf.mxu0  ;;  %v4964_v4 = vld [vmem:[%s3849_s6 + $0x20] sm:$0xff] }
 0x250   : > { %v1603_v14 = vadd.f32 %v1547_v53, %v4515_v8  ;;  %v1665_v29 = vpop.f32.mrf.mxu1  ;;  %v3707_v8 = vld [vmem:[%s3849_s6 + $0x10] sm:$0xff] }
 0x252   : > { %v4954_v11 = vadd.f32 %v1665_v29, %v1603_v14  ;;  %3436 = vmatmul.msk.f32.vlgmr.msrb.gmra.mxu0 %vm223_vm1, %v4957_v56  ;;  %3510 = vmatmul.msk.f32.vlgmr.msrb.gmra.mxu2 %vm223_vm1, %v4947_v39  ;;  %v4975_v29 = vld [vmem:[%s3849_s6 + $0x108] sm:$0xff]  ;;  %v4980_v56 = vadd.f32 %v4513_v44, %v4251_v61 }
 0x253   : > { %3461 = vmatmul.msk.f32.vlgmr.msrb.gmra.mxu1 %vm223_vm1, %v4964_v4  ;;  %3535 = vmatmul.msk.f32.vlgmr.msrb.gmra.mxu3 %vm223_vm1, %v3707_v8  ;;  %6100 = vst [vmem:[#allocation57_spill] sm:$0xff] %v4975_v29 }
 0x254   : > { %6098 = vst [vmem:[#allocation55_spill] sm:$0xff] %v4954_v11 }
 0x255   : > { %v1802_v50 = vpop.f32.mrf.mxu2 }
 0x256   : > { %v1891_v51 = vpop.f32.mrf.mxu3 }
 0x257   : > { %v4972_v53 = vadd.f32 %v1891_v51, %v1802_v50  ;;  %v1550_v14 = vpop.f32.mrf.mxu0  ;;  %v4992_v50 = vld [vmem:[%s3849_s6 + $0x28] sm:$0xff] }
 0x258   : > { %v1604_v48 = vadd.f32 %v1550_v14, %v4527_v2  ;;  %v1668_v39 = vpop.f32.mrf.mxu1  ;;  %v3710_v2 = vld [vmem:[%s3849_s6 + $0x18] sm:$0xff]  ;;  %v5003_v14 = vld [vmem:[%s3849_s6 + $0x110] sm:$0xff] }
 0x259   : > { %6103 = vst [vmem:[#allocation60_spill] sm:$0xff] %v5003_v14 }
 0x25a   : > { %v4982_v8 = vadd.f32 %v1668_v39, %v1604_v48  ;;  %3437 = vmatmul.msk.f32.gmra.mxu0 %vm223_vm1, %v4985_v45  ;;  %3511 = vmatmul.msk.f32.gmra.mxu2 %vm223_vm1, %v4975_v29  ;;  %v5008_v45 = vadd.f32 %v4525_v58, %v4261_v3 }
 0x25b   : > { %3462 = vmatmul.msk.f32.gmra.mxu1 %vm223_vm1, %v4992_v50  ;;  %3536 = vmatmul.msk.f32.gmra.mxu3 %vm223_vm1, %v3710_v2  ;;  %v5013_v2 = vld [vmem:[%s3849_s6 + $0x100] sm:$0xff] }
 0x25c   : > { %6101 = vst [vmem:[#allocation58_spill] sm:$0xff] %v4982_v8  ;;  %v5041_v8 = vld [vmem:[%s3849_s6 + $0x108] sm:$0xff] }
 0x25d   : > { %v1805_v44 = vpop.f32.mrf.mxu2  ;;  %6105 = vst [vmem:[#allocation62_spill] sm:$0xff] %v5013_v2 }
 0x25e   : > { %v1894_v48 = vpop.f32.mrf.mxu3  ;;  %6108 = vst [vmem:[#allocation65_spill] sm:$0xff] %v5041_v8 }
 0x25f   : > { %v5000_v39 = vadd.f32 %v1894_v48, %v1805_v44  ;;  %v1553_v51 = vpop.f32.mrf.mxu0  ;;  %v5020_v44 = vld [vmem:[%s3849_s6 + $0x30] sm:$0xff]  ;;  %v5031_v48 = vld [vmem:[%s3849_s6 + $0x118] sm:$0xff] }
 0x260   : > { %v1605_v0 = vadd.f32 %v1553_v51, %v4539_v49  ;;  %v1671_v29 = vpop.f32.mrf.mxu1  ;;  %6106 = vst [vmem:[#allocation63_spill] sm:$0xff] %v5031_v48 }
 0x262   : > { %v5010_v11 = vadd.f32 %v1671_v29, %v1605_v0  ;;  %3438 = vmatmul.msk.f32.gmra.mxu0 %vm223_vm1, %v5013_v2  ;;  %3512 = vmatmul.msk.f32.gmra.mxu2 %vm223_vm1, %v5003_v14  ;;  %v5036_v14 = vadd.f32 %v4537_v52, %v4271_v55 }
 0x263   : > { %3463 = vmatmul.msk.f32.gmra.mxu1 %vm223_vm1, %v5020_v44  ;;  %3537 = vmatmul.msk.f32.gmra.mxu3 %vm223_vm1, %v4964_v4 }
 0x264   : > { %6104 = vst [vmem:[#allocation61_spill] sm:$0xff] %v5010_v11  ;;  %v5069_v11 = vld [vmem:[%s3849_s6 + $0x110] sm:$0xff] }
 0x265   : > { %v1808_v58 = vpop.f32.mrf.mxu2  ;;  %6111 = vst [vmem:[#allocation68_spill] sm:$0xff] %v5069_v11 }
 0x266   : > { %v1897_v49 = vpop.f32.mrf.mxu3 }
 0x267   : > { %v5028_v0 = vadd.f32 %v1897_v49, %v1808_v58  ;;  %v1556_v29 = vpop.f32.mrf.mxu0  ;;  %v5048_v58 = vld [vmem:[%s3849_s6 + $0x38] sm:$0xff] }
 0x268   : > { %v1606_v51 = vadd.f32 %v1556_v29, %v4551_v62  ;;  %v1674_v61 = vpop.f32.mrf.mxu1  ;;  %v5059_v29 = vld [vmem:[%s3849_s6 + $0x120] sm:$0xff] }
 0x269   : > { %6109 = vst [vmem:[#allocation66_spill] sm:$0xff] %v5059_v29 }
 0x26a   : > { %v5038_v2 = vadd.f32 %v1674_v61, %v1606_v51  ;;  %3439 = vmatmul.msk.f32.gmra.mxu0 %vm223_vm1, %v5041_v8  ;;  %3513 = vmatmul.msk.f32.gmra.mxu2 %vm223_vm1, %v5031_v48  ;;  %v5064_v48 = vadd.f32 %v4549_v46, %v4281_v1  ;;  %v6116_v1 = vld [vmem:[#allocation14_spill] sm:$0xff] }
 0x26b   : > { %3464 = vmatmul.msk.f32.gmra.mxu1 %vm223_vm1, %v5048_v58  ;;  %3538 = vmatmul.msk.f32.gmra.mxu3 %vm223_vm1, %v4992_v50 }
 0x26c   : > { %6107 = vst [vmem:[#allocation64_spill] sm:$0xff] %v5038_v2 }
 0x26d   : > { %v1811_v52 = vpop.f32.mrf.mxu2 }
 0x26e   : > { %v1900_v62 = vpop.f32.mrf.mxu3 }
 0x26f   : > { %v5056_v61 = vadd.f32 %v1900_v62, %v1811_v52  ;;  %v1559_v49 = vpop.f32.mrf.mxu0  ;;  %v5076_v52 = vld [vmem:[%s3849_s6 + $0x40] sm:$0xff] }
 0x270   : > { %v1607_v51 = vadd.f32 %v1559_v49, %v4563_v54  ;;  %v1677_v3 = vpop.f32.mrf.mxu1  ;;  %v5087_v49 = vld [vmem:[%s3849_s6 + $0x128] sm:$0xff] }
 0x271   : > { %6112 = vst [vmem:[#allocation69_spill] sm:$0xff] %v5087_v49 }
 0x272   : > { %v5066_v8 = vadd.f32 %v1677_v3, %v1607_v51  ;;  %3440 = vmatmul.msk.f32.gmra.mxu0 %vm223_vm1, %v5069_v11  ;;  %3514 = vmatmul.msk.f32.gmra.mxu2 %vm223_vm1, %v5059_v29  ;;  %v6113_v29 = vld [vmem:[#allocation13_spill] sm:$0xff] }
 0x273   : > { %3465 = vmatmul.msk.f32.gmra.mxu1 %vm223_vm1, %v5076_v52  ;;  %3539 = vmatmul.msk.f32.gmra.mxu3 %vm223_vm1, %v5020_v44  ;;  %v5092_v11 = vadd.f32 %v4561_v9, %v6113_v29  ;;  %v6119_v9 = vld [vmem:[#allocation15_spill] sm:$0xff] }
 0x274   : > { %6110 = vst [vmem:[#allocation67_spill] sm:$0xff] %v5066_v8 }
 0x275   : > { %v1814_v46 = vpop.f32.mrf.mxu2 }
 0x276   : > { %v1903_v54 = vpop.f32.mrf.mxu3 }
 0x277   : > { %v5084_v3 = vadd.f32 %v1903_v54, %v1814_v46  ;;  %v1562_v62 = vpop.f32.mrf.mxu0  ;;  %v5101_v46 = vld [vmem:[%s3849_s6 + $0x48] sm:$0xff]  ;;  %v5112_v54 = vld [vmem:[%s3849_s6 + $0x130] sm:$0xff] }
 0x278   : > { %v1608_v51 = vadd.f32 %v1562_v62, %v4575_v12  ;;  %v1680_v55 = vpop.f32.mrf.mxu1  ;;  %6115 = vst [vmem:[#allocation70_spill] sm:$0xff] %v5112_v54 }
 0x27a   : > { %v5094_v2 = vadd.f32 %v1680_v55, %v1608_v51  ;;  %3441 = vmatmul.msk.f32.gmra.mxu0 %vm223_vm1, %v4594_v24  ;;  %3515 = vmatmul.msk.f32.gmra.mxu2 %vm223_vm1, %v5087_v49  ;;  %v5117_v49 = vadd.f32 %v4573_v15, %v6116_v1  ;;  %v6125_v15 = vld [vmem:[#allocation16_spill] sm:$0xff] }
 0x27b   : > { %3466 = vmatmul.msk.f32.gmra.mxu1 %vm223_vm1, %v5101_v46  ;;  %3540 = vmatmul.msk.f32.gmra.mxu3 %vm223_vm1, %v5048_v58 }
 0x27c   : > { %6114 = vst [vmem:[#allocation13_spill] sm:$0xff] %v5094_v2 }
 0x27d   : > { %v1817_v12 = vpop.f32.mrf.mxu2 }
 0x27e   : > { %v1906_v55 = vpop.f32.mrf.mxu3 }
 0x27f   : > { %v5109_v29 = vadd.f32 %v1906_v55, %v1817_v12  ;;  %v1565_v24 = vpop.f32.mrf.mxu0  ;;  %v5126_v12 = vld [vmem:[%s3849_s6 + $0x50] sm:$0xff] }
 0x280   : > { %v1609_v62 = vadd.f32 %v1565_v24, %v4587_v13  ;;  %v1683_v51 = vpop.f32.mrf.mxu1  ;;  %v5137_v24 = vld [vmem:[%s3849_s6 + $0x138] sm:$0xff] }
 0x281   : > { %6118 = vst [vmem:[#allocation71_spill] sm:$0xff] %v5137_v24 }
 0x282   : > { %v5119_v8 = vadd.f32 %v1683_v51, %v1609_v62  ;;  %3442 = vmatmul.msk.f32.gmra.mxu0 %vm223_vm1, %v4609_v26  ;;  %3516 = vmatmul.msk.f32.gmra.mxu2 %vm223_vm1, %v5112_v54  ;;  %v5142_v54 = vadd.f32 %v4585_v18, %v6119_v9  ;;  %v6131_v18 = vld [vmem:[#allocation17_spill] sm:$0xff] }
 0x283   : > { %3467 = vmatmul.msk.f32.gmra.mxu1 %vm223_vm1, %v5126_v12  ;;  %3541 = vmatmul.msk.f32.gmra.mxu3 %vm223_vm1, %v5076_v52 }
 0x284   : > { %6117 = vst [vmem:[#allocation14_spill] sm:$0xff] %v5119_v8 }
 0x285   : > { %v1820_v13 = vpop.f32.mrf.mxu2  ;;  %6120 = vst [vmem:[#allocation15_spill] sm:$0xff] %v5142_v54 }
 0x286   : > { %v1909_v1 = vpop.f32.mrf.mxu3 }
 0x287   : > { %v5134_v55 = vadd.f32 %v1909_v1, %v1820_v13  ;;  %v1568_v26 = vpop.f32.mrf.mxu0  ;;  %v5151_v13 = vld [vmem:[%s3849_s6 + $0x58] sm:$0xff] }
 0x288   : > { %v1610_v62 = vadd.f32 %v1568_v26, %v4602_v16  ;;  %v1686_v51 = vpop.f32.mrf.mxu1  ;;  %6122 = vst [vmem:[#allocation73_spill] sm:$0xff] %v5151_v13  ;;  %v5162_v26 = vld [vmem:[%s3849_s6 + $0x140] sm:$0xff] }
 0x289   : > { %6124 = vst [vmem:[#allocation75_spill] sm:$0xff] %v5162_v26 }
 0x28a   : > { %v5144_v2 = vadd.f32 %v1686_v51, %v1610_v62  ;;  %3443 = vmatmul.msk.f32.gmra.mxu0 %vm223_vm1, %v4624_v28  ;;  %3517 = vmatmul.msk.f32.gmra.mxu2 %vm223_vm1, %v5137_v24  ;;  %v5167_v24 = vadd.f32 %v4600_v20, %v6125_v15 }
 0x28b   : > { %3468 = vmatmul.msk.f32.gmra.mxu1 %vm223_vm1, %v5151_v13  ;;  %3542 = vmatmul.msk.f32.gmra.mxu3 %vm223_vm1, %v5101_v46 }
 0x28c   : > { %6121 = vst [vmem:[#allocation72_spill] sm:$0xff] %v5144_v2 }
 0x28d   : > { %v1823_v16 = vpop.f32.mrf.mxu2  ;;  %6126 = vst [vmem:[#allocation16_spill] sm:$0xff] %v5167_v24 }
 0x28e   : > { %v1912_v9 = vpop.f32.mrf.mxu3 }
 0x28f   : > { %v5159_v1 = vadd.f32 %v1912_v9, %v1823_v16  ;;  %v1571_v28 = vpop.f32.mrf.mxu0 }
 0x290   : > { %v1611_v62 = vadd.f32 %v1571_v28, %v4617_v10  ;;  %v1689_v51 = vpop.f32.mrf.mxu1  ;;  %v5184_v28 = vld [vmem:[%s3849_s6 + $0x148] sm:$0xff] }
 0x291   : > { %6123 = vst [vmem:[#allocation74_spill] sm:$0xff] %v5159_v1  ;;  %v6135_v1 = vld [vmem:[#allocation26_spill] sm:$0xff] }
 0x292   : > { %v5169_v8 = vadd.f32 %v1689_v51, %v1611_v62  ;;  %3444 = vmatmul.msk.f32.gmra.mxu0 %vm223_vm1, %v4642_v34  ;;  %3518 = vmatmul.msk.f32.gmra.mxu2 %vm223_vm1, %v5162_v26  ;;  %6129 = vst [vmem:[#allocation78_spill] sm:$0xff] %v5184_v28  ;;  %v6130_v34 = vld [vmem:[#allocation2_spill] sm:$0xff]  ;;  %v6132_v26 = vld [vmem:[#allocation7_spill] sm:$0xff] }
 0x293   : > { %3469 = vmatmul.msk.f32.gmra.mxu1 %vm223_vm1, %v4637_v30  ;;  %3543 = vmatmul.msk.f32.gmra.mxu3 %vm223_vm1, %v5126_v12  ;;  %v5189_v2 = vadd.f32 %v6132_v26, %v6131_v18 }
 0x294   : > { %6127 = vst [vmem:[#allocation76_spill] sm:$0xff] %v5169_v8  ;;  %v6141_v8 = vld [vmem:[#allocation9_spill] sm:$0xff] }
 0x295   : > { %v1826_v16 = vpop.f32.mrf.mxu2  ;;  %6133 = vst [vmem:[#allocation2_spill] sm:$0xff] %v5189_v2 }
 0x296   : > { %v1915_v20 = vpop.f32.mrf.mxu3 }
 0x297   : > { %v5181_v15 = vadd.f32 %v1915_v20, %v1826_v16  ;;  %v1574_v9 = vpop.f32.mrf.mxu0  ;;  %v6136_v16 = vld [vmem:[#allocation25_spill] sm:$0xff] }
 0x298   : > { %v1612_v62 = vadd.f32 %v1574_v9, %v6130_v34  ;;  %v1692_v51 = vpop.f32.mrf.mxu1 }
 0x299   : > { %6128 = vst [vmem:[#allocation77_spill] sm:$0xff] %v5181_v15 }
 0x29a   : > { %v5191_v54 = vadd.f32 %v1692_v51, %v1612_v62  ;;  %3445 = vmatmul.msk.f32.gmra.mxu0 %vm223_vm1, %v6135_v1  ;;  %3519 = vmatmul.msk.f32.gmra.mxu2 %vm223_vm1, %v5184_v28  ;;  %v5206_v62 = vld [vmem:[%s3849_s6 + $0x150] sm:$0xff]  ;;  %v6139_v1 = vld [vmem:[#allocation3_spill] sm:$0xff]  ;;  %v6140_v28 = vld [vmem:[#allocation18_spill] sm:$0xff] }
 0x29b   : > { %3470 = vmatmul.msk.f32.gmra.mxu1 %vm223_vm1, %v6136_v16  ;;  %3544 = vmatmul.msk.f32.gmra.mxu3 %vm223_vm1, %v5151_v13  ;;  %6138 = vst [vmem:[#allocation26_spill] sm:$0xff] %v5206_v62  ;;  %v5211_v24 = vadd.f32 %v6141_v8, %v6140_v28  ;;  %v6144_v13 = vld [vmem:[#allocation31_spill] sm:$0xff] }
 0x29c   : > { %6134 = vst [vmem:[#allocation17_spill] sm:$0xff] %v5191_v54  ;;  %v6150_v54 = vld [vmem:[#allocation11_spill] sm:$0xff] }
 0x29d   : > { %v1829_v9 = vpop.f32.mrf.mxu2  ;;  %6142 = vst [vmem:[#allocation25_spill] sm:$0xff] %v5211_v24 }
 0x29e   : > { %v1918_v18 = vpop.f32.mrf.mxu3 }
 0x29f   : > { %v5203_v26 = vadd.f32 %v1918_v18, %v1829_v9  ;;  %v1577_v34 = vpop.f32.mrf.mxu0  ;;  %v6145_v9 = vld [vmem:[#allocation30_spill] sm:$0xff] }
 0x2a0   : > { %v1613_v51 = vadd.f32 %v1577_v34, %v6139_v1  ;;  %v1695_v10 = vpop.f32.mrf.mxu1  ;;  %v5228_v1 = vld [vmem:[%s3849_s6 + $0x158] sm:$0xff] }
 0x2a1   : > { %6137 = vst [vmem:[#allocation7_spill] sm:$0xff] %v5203_v26 }
 0x2a2   : > { %v5213_v15 = vadd.f32 %v1695_v10, %v1613_v51  ;;  %3446 = vmatmul.msk.f32.gmra.mxu0 %vm223_vm1, %v6144_v13  ;;  %3520 = vmatmul.msk.f32.gmra.mxu2 %vm223_vm1, %v5206_v62  ;;  %6147 = vst [vmem:[#allocation9_spill] sm:$0xff] %v5228_v1  ;;  %v6148_v13 = vld [vmem:[#allocation28_spill] sm:$0xff]  ;;  %v6149_v62 = vld [vmem:[#allocation19_spill] sm:$0xff] }
 0x2a3   : > { %3471 = vmatmul.msk.f32.gmra.mxu1 %vm223_vm1, %v6145_v9  ;;  %3545 = vmatmul.msk.f32.gmra.mxu3 %vm223_vm1, %v4637_v30  ;;  %v5233_v2 = vadd.f32 %v6150_v54, %v6149_v62  ;;  %v6153_v30 = vld [vmem:[#allocation24_spill] sm:$0xff] }
 0x2a4   : > { %6143 = vst [vmem:[#allocation3_spill] sm:$0xff] %v5213_v15  ;;  %v6159_v15 = vld [vmem:[#allocation27_spill] sm:$0xff] }
 0x2a5   : > { %v1832_v34 = vpop.f32.mrf.mxu2  ;;  %6151 = vst [vmem:[#allocation31_spill] sm:$0xff] %v5233_v2 }
 0x2a6   : > { %v1921_v8 = vpop.f32.mrf.mxu3 }
 0x2a7   : > { %v5225_v28 = vadd.f32 %v1921_v8, %v1832_v34  ;;  %v1580_v10 = vpop.f32.mrf.mxu0  ;;  %v6154_v34 = vld [vmem:[#allocation35_spill] sm:$0xff] }
 0x2a8   : > { %v1614_v51 = vadd.f32 %v1580_v10, %v6148_v13  ;;  %v1698_v20 = vpop.f32.mrf.mxu1  ;;  %v5250_v13 = vld [vmem:[%s3849_s6 + $0x160] sm:$0xff] }
 0x2a9   : > { %6146 = vst [vmem:[#allocation18_spill] sm:$0xff] %v5225_v28 }
 0x2aa   : > { %v5235_v26 = vadd.f32 %v1698_v20, %v1614_v51  ;;  %3447 = vmatmul.msk.f32.gmra.mxu0 %vm223_vm1, %v6153_v30  ;;  %3521 = vmatmul.msk.f32.gmra.mxu2 %vm223_vm1, %v5228_v1  ;;  %6156 = vst [vmem:[#allocation19_spill] sm:$0xff] %v5250_v13  ;;  %v6157_v51 = vld [vmem:[#allocation33_spill] sm:$0xff]  ;;  %v6158_v1 = vld [vmem:[#allocation20_spill] sm:$0xff] }
 0x2ab   : > { %3472 = vmatmul.msk.f32.gmra.mxu1 %vm223_vm1, %v6154_v34  ;;  %3546 = vmatmul.msk.f32.gmra.mxu3 %vm223_vm1, %v6136_v16  ;;  %v5255_v24 = vadd.f32 %v6159_v15, %v6158_v1  ;;  %v6162_v16 = vld [vmem:[#allocation29_spill] sm:$0xff] }
 0x2ac   : > { %6152 = vst [vmem:[#allocation30_spill] sm:$0xff] %v5235_v26  ;;  %v6168_v26 = vld [vmem:[#allocation32_spill] sm:$0xff] }
 0x2ad   : > { %v1835_v10 = vpop.f32.mrf.mxu2  ;;  %6160 = vst [vmem:[#allocation11_spill] sm:$0xff] %v5255_v24 }
 0x2ae   : > { %v1924_v54 = vpop.f32.mrf.mxu3 }
 0x2af   : > { %v5247_v62 = vadd.f32 %v1924_v54, %v1835_v10  ;;  %v1583_v20 = vpop.f32.mrf.mxu0  ;;  %v6163_v10 = vld [vmem:[#allocation39_spill] sm:$0xff] }
 0x2b0   : > { %v1615_v30 = vadd.f32 %v1583_v20, %v6157_v51  ;;  %v1701_v18 = vpop.f32.mrf.mxu1  ;;  %v5272_v51 = vld [vmem:[%s3849_s6 + $0x168] sm:$0xff] }
 0x2b1   : > { %6155 = vst [vmem:[#allocation28_spill] sm:$0xff] %v5247_v62 }
 0x2b2   : > { %v5257_v28 = vadd.f32 %v1701_v18, %v1615_v30  ;;  %3448 = vmatmul.msk.f32.gmra.mxu0 %vm223_vm1, %v6162_v16  ;;  %3522 = vmatmul.msk.f32.gmra.mxu2 %vm223_vm1, %v5250_v13  ;;  %6165 = vst [vmem:[#allocation33_spill] sm:$0xff] %v5272_v51  ;;  %v6166_v30 = vld [vmem:[#allocation38_spill] sm:$0xff]  ;;  %v6167_v13 = vld [vmem:[#allocation21_spill] sm:$0xff] }
 0x2b3   : > { %3473 = vmatmul.msk.f32.gmra.mxu1 %vm223_vm1, %v6163_v10  ;;  %3547 = vmatmul.msk.f32.gmra.mxu3 %vm223_vm1, %v6145_v9  ;;  %v5277_v2 = vadd.f32 %v6168_v26, %v6167_v13  ;;  %v6171_v9 = vld [vmem:[#allocation34_spill] sm:$0xff] }
 0x2b4   : > { %6161 = vst [vmem:[#allocation24_spill] sm:$0xff] %v5257_v28  ;;  %v6176_v28 = vld [vmem:[#allocation37_spill] sm:$0xff] }
 0x2b5   : > { %v1838_v20 = vpop.f32.mrf.mxu2  ;;  %6169 = vst [vmem:[#allocation20_spill] sm:$0xff] %v5277_v2 }
 0x2b6   : > { %v1927_v15 = vpop.f32.mrf.mxu3 }
 0x2b7   : > { %v5269_v1 = vadd.f32 %v1927_v15, %v1838_v20  ;;  %v1586_v18 = vpop.f32.mrf.mxu0  ;;  %v6172_v20 = vld [vmem:[#allocation36_spill] sm:$0xff]  ;;  %v6180_v15 = vld [vmem:[#allocation23_spill] sm:$0xff] }
 0x2b8   : > { %v1616_v16 = vadd.f32 %v1586_v18, %v6166_v30  ;;  %v1704_v8 = vpop.f32.mrf.mxu1  ;;  %v5294_v30 = vld [vmem:[%s3849_s6 + $0x170] sm:$0xff] }
 0x2b9   : > { %6164 = vst [vmem:[#allocation35_spill] sm:$0xff] %v5269_v1 }
 0x2ba   : > { %v5279_v62 = vadd.f32 %v1704_v8, %v1616_v16  ;;  %3449 = vmatmul.msk.f32.gmra.mxu0 %vm223_vm1, %v6171_v9  ;;  %3523 = vmatmul.msk.f32.gmra.mxu2 %vm223_vm1, %v5272_v51  ;;  %6173 = vst [vmem:[#allocation29_spill] sm:$0xff] %v5294_v30  ;;  %v6174_v16 = vld [vmem:[#allocation42_spill] sm:$0xff] }
 0x2bb   : > { %3474 = vmatmul.msk.f32.gmra.mxu1 %vm223_vm1, %v6172_v20  ;;  %3548 = vmatmul.msk.f32.gmra.mxu3 %vm223_vm1, %v6154_v34  ;;  %v6175_v51 = vld [vmem:[#allocation22_spill] sm:$0xff]  ;;  %v6177_v34 = vld [vmem:[#allocation40_spill] sm:$0xff] }
 0x2bc   : > { %6170 = vst [vmem:[#allocation27_spill] sm:$0xff] %v5279_v62  ;;  %v5299_v24 = vadd.f32 %v6176_v28, %v6175_v51 }
 0x2bd   : > { %v1841_v18 = vpop.f32.mrf.mxu2 }
 0x2be   : > { %v1930_v26 = vpop.f32.mrf.mxu3 }
 0x2bf   : > { %v5291_v13 = vadd.f32 %v1930_v26, %v1841_v18  ;;  %v1589_v8 = vpop.f32.mrf.mxu0 }
 0x2c0   : > { %v1617_v9 = vadd.f32 %v1589_v8, %v6174_v16  ;;  %v1707_v54 = vpop.f32.mrf.mxu1  ;;  %v5316_v8 = vld [vmem:[%s3849_s6 + $0x178] sm:$0xff] }
 0x2c1   : > { %6178 = vst [vmem:[#allocation39_spill] sm:$0xff] %v5316_v8 }
 0x2c2   : > { %v5301_v1 = vadd.f32 %v1707_v54, %v1617_v9  ;;  %3450 = vmatmul.msk.f32.gmra.mxu0 %vm223_vm1, %v4716_v38  ;;  %3524 = vmatmul.msk.f32.gmra.mxu2 %vm223_vm1, %v5294_v30  ;;  %v6179_v38 = vld [vmem:[#allocation43_spill] sm:$0xff]  ;;  %v6181_v30 = vld [vmem:[#allocation41_spill] sm:$0xff] }
 0x2c3   : > { %3475 = vmatmul.msk.f32.gmra.mxu1 %vm223_vm1, %v6177_v34  ;;  %3549 = vmatmul.msk.f32.gmra.mxu3 %vm223_vm1, %v6163_v10  ;;  %v5321_v62 = vadd.f32 %v6181_v30, %v6180_v15  ;;  %v6187_v10 = vld [vmem:[#allocation4_spill] sm:$0xff] }
 0x2c5   : > { %v1844_v26 = vpop.f32.mrf.mxu2  ;;  %6182 = vst [vmem:[#allocation38_spill] sm:$0xff] %v5321_v62 }
 0x2c6   : > { %v1933_v28 = vpop.f32.mrf.mxu3 }
 0x2c7   : > { %v5313_v51 = vadd.f32 %v1933_v28, %v1844_v26  ;;  %v1592_v54 = vpop.f32.mrf.mxu0 }
 0x2c8   : > { %v1618_v16 = vadd.f32 %v1592_v54, %v6179_v38  ;;  %v1710_v9 = vpop.f32.mrf.mxu1  ;;  %v5338_v54 = vld [vmem:[%s3849_s6 + $0x180] sm:$0xff] }
 0x2c9   : > { %6184 = vst [vmem:[#allocation32_spill] sm:$0xff] %v5338_v54 }
 0x2ca   : > { %v5323_v2 = vadd.f32 %v1710_v9, %v1618_v16  ;;  %3451 = vmatmul.msk.f32.gmra.mxu0 %vm223_vm1, %v4737_v36  ;;  %3525 = vmatmul.msk.f32.gmra.mxu2 %vm223_vm1, %v5316_v8  ;;  %v6185_v36 = vld [vmem:[#allocation45_spill] sm:$0xff] }
 0x2cb   : > { %3476 = vmatmul.msk.f32.gmra.mxu1 %vm223_vm1, %v4746_v22  ;;  %3550 = vmatmul.msk.f32.gmra.mxu3 %vm223_vm1, %v6172_v20 }
 0x2cc   : > { %6183 = vst [vmem:[#allocation21_spill] sm:$0xff] %v5323_v2 }
 0x2cd   : > { %v1847_v26 = vpop.f32.mrf.mxu2 }
 0x2ce   : > { %v1936_v15 = vpop.f32.mrf.mxu3 }
 0x2cf   : > { %v5335_v30 = vadd.f32 %v1936_v15, %v1847_v26  ;;  %v1956_v28 = vpop.f32.mrf.mxu0 }
 0x2d0   : > { %v2028_v38 = vadd.f32 %v1956_v28, %v6185_v36  ;;  %v2069_v16 = vpop.f32.mrf.mxu1  ;;  %v5352_v36 = vld [vmem:[%s3849_s6 + $0x188] sm:$0xff] }
 0x2d1   : > { %6186 = vst [vmem:[#allocation34_spill] sm:$0xff] %v5352_v36 }
 0x2d2   : > { %3452 = vmatmul.msk.f32.gmra.mxu0 %vm223_vm1, %v4760_v27  ;;  %3526 = vmatmul.msk.f32.gmra.mxu2 %vm223_vm1, %v5338_v54  ;;  %v2141_v20 = vadd.f32 %v2069_v16, %v2028_v38  ;;  %v6188_v27 = vld [vmem:[#allocation44_spill] sm:$0xff]  ;;  %v6190_v54 = vld [vmem:[#allocation47_spill] sm:$0xff] }
 0x2d3   : > { %3477 = vmatmul.msk.f32.gmra.mxu1 %vm223_vm1, %v4769_v57  ;;  %3551 = vmatmul.msk.f32.gmra.mxu3 %vm223_vm1, %v6177_v34  ;;  %v6189_v18 = vmax.f32 %v6187_v10, %v6188_v27  ;;  %v5371_v16 = vld [vmem:[%s3849_s6 + $0x190] sm:$0xff] }
 0x2d4   : > { %6191 = vst [vmem:[#allocation36_spill] sm:$0xff] %v5371_v16 }
 0x2d5   : > { %v2278_v9 = vpop.f32.mrf.mxu2 }
 0x2d6   : > { %v2350_v26 = vadd.f32 %v2278_v9, %v2141_v20  ;;  %v5349_v15 = vpop.f32.mrf.mxu3  ;;  %v6192_v20 = vld [vmem:[#allocation5_spill] sm:$0xff] }
 0x2d7   : > { %v1959_v28 = vpop.f32.mrf.mxu0 }
 0x2d8   : > { %v5357_v2 = vmax.f32 %v6189_v18, %v2350_v26  ;;  %v2029_v62 = vadd.f32 %v1959_v28, %v6190_v54  ;;  %v2072_v8 = vpop.f32.mrf.mxu1  ;;  %v6195_v28 = vld [vmem:[#allocation49_spill] sm:$0xff] }
 0x2da   : > { %3453 = vmatmul.msk.f32.gmra.mxu0 %vm223_vm1, %v4785_v63  ;;  %3527 = vmatmul.msk.f32.gmra.mxu2 %vm223_vm1, %v5352_v36  ;;  %v2142_v34 = vadd.f32 %v2072_v8, %v2029_v62  ;;  %v6193_v63 = vld [vmem:[#allocation46_spill] sm:$0xff] }
 0x2db   : > { %3478 = vmatmul.msk.f32.gmra.mxu1 %vm223_vm1, %v4794_v5  ;;  %3552 = vmatmul.msk.f32.gmra.mxu3 %vm223_vm1, %v4746_v22  ;;  %v6194_v9 = vmax.f32 %v6192_v20, %v6193_v63 }
 0x2dd   : > { %v2281_v38 = vpop.f32.mrf.mxu2 }
 0x2de   : > { %v2351_v10 = vadd.f32 %v2281_v38, %v2142_v34  ;;  %v5368_v18 = vpop.f32.mrf.mxu3 }
 0x2df   : > { %v1962_v54 = vpop.f32.mrf.mxu0 }
 0x2e0   : > { %v5376_v26 = vmax.f32 %v6194_v9, %v2351_v10  ;;  %v2030_v27 = vadd.f32 %v1962_v54, %v6195_v28  ;;  %v2075_v36 = vpop.f32.mrf.mxu1  ;;  %v5390_v10 = vld [vmem:[%s3849_s6 + $0x198] sm:$0xff]  ;;  %v6196_v54 = vld [vmem:[#allocation6_spill] sm:$0xff]  ;;  %v6199_v9 = vld [vmem:[#allocation51_spill] sm:$0xff] }
 0x2e2   : > { %3454 = vmatmul.msk.f32.gmra.mxu0 %vm223_vm1, %v4810_v33  ;;  %3528 = vmatmul.msk.f32.gmra.mxu2 %vm223_vm1, %v5371_v16  ;;  %v2143_v22 = vadd.f32 %v2075_v36, %v2030_v27  ;;  %v6197_v33 = vld [vmem:[#allocation48_spill] sm:$0xff] }
 0x2e3   : > { %3479 = vmatmul.msk.f32.gmra.mxu1 %vm223_vm1, %v4819_v35  ;;  %3553 = vmatmul.msk.f32.gmra.mxu3 %vm223_vm1, %v4769_v57  ;;  %v6198_v20 = vmax.f32 %v6196_v54, %v6197_v33 }
 0x2e5   : > { %v2284_v62 = vpop.f32.mrf.mxu2 }
 0x2e6   : > { %v2352_v8 = vadd.f32 %v2284_v62, %v2143_v22  ;;  %v5387_v34 = vpop.f32.mrf.mxu3 }
 0x2e7   : > { %v1965_v38 = vpop.f32.mrf.mxu0 }
 0x2e8   : > { %v5395_v63 = vmax.f32 %v6198_v20, %v2352_v8  ;;  %v2031_v28 = vadd.f32 %v1965_v38, %v6199_v9  ;;  %v2078_v16 = vpop.f32.mrf.mxu1  ;;  %v5409_v8 = vld [vmem:[%s3849_s6 + $0x1a0] sm:$0xff]  ;;  %v6200_v38 = vld [vmem:[#allocation8_spill] sm:$0xff] }
 0x2ea   : > { %3455 = vmatmul.msk.f32.gmra.mxu0 %vm223_vm1, %v4835_v21  ;;  %3529 = vmatmul.msk.f32.gmra.mxu2 %vm223_vm1, %v5390_v10  ;;  %v2144_v57 = vadd.f32 %v2078_v16, %v2031_v28  ;;  %v6201_v21 = vld [vmem:[#allocation50_spill] sm:$0xff] }
 0x2eb   : > { %3480 = vmatmul.msk.f32.gmra.mxu1 %vm223_vm1, %v4844_v43  ;;  %3554 = vmatmul.msk.f32.gmra.mxu3 %vm223_vm1, %v4794_v5  ;;  %v6202_v54 = vmax.f32 %v6200_v38, %v6201_v21 }
 0x2ed   : > { %v2287_v36 = vpop.f32.mrf.mxu2 }
 0x2ee   : > { %v2353_v27 = vadd.f32 %v2287_v36, %v2144_v57  ;;  %v5406_v22 = vpop.f32.mrf.mxu3  ;;  %v5428_v36 = vld [vmem:[%s3849_s6 + $0x1a8] sm:$0xff] }
 0x2ef   : > { %v1968_v62 = vpop.f32.mrf.mxu0 }
 0x2f0   : > { %v5414_v33 = vmax.f32 %v6202_v54, %v2353_v27  ;;  %v2032_v20 = vadd.f32 %v1968_v62, %v4875_v7  ;;  %v2081_v9 = vpop.f32.mrf.mxu1  ;;  %v6203_v27 = vld [vmem:[#allocation10_spill] sm:$0xff] }
 0x2f2   : > { %3456 = vmatmul.msk.f32.gmra.mxu0 %vm223_vm1, %v4860_v17  ;;  %3530 = vmatmul.msk.f32.gmra.mxu2 %vm223_vm1, %v5409_v8  ;;  %v2145_v5 = vadd.f32 %v2081_v9, %v2032_v20  ;;  %v6204_v17 = vld [vmem:[#allocation52_spill] sm:$0xff] }
 0x2f3   : > { %3481 = vmatmul.msk.f32.gmra.mxu1 %vm223_vm1, %v4869_v47  ;;  %3555 = vmatmul.msk.f32.gmra.mxu3 %vm223_vm1, %v4819_v35  ;;  %v6205_v62 = vmax.f32 %v6203_v27, %v6204_v17 }
 0x2f5   : > { %v2290_v16 = vpop.f32.mrf.mxu2 }
 0x2f6   : > { %v2354_v28 = vadd.f32 %v2290_v16, %v2145_v5  ;;  %v5425_v57 = vpop.f32.mrf.mxu3  ;;  %v5447_v16 = vld [vmem:[%s3849_s6 + $0x1b0] sm:$0xff] }
 0x2f7   : > { %v1971_v7 = vpop.f32.mrf.mxu0 }
 0x2f8   : > { %v5433_v38 = vmax.f32 %v6205_v62, %v2354_v28  ;;  %v2033_v21 = vadd.f32 %v1971_v7, %v4900_v37  ;;  %v2084_v54 = vpop.f32.mrf.mxu1 }
 0x2fa   : > { %3457 = vmatmul.msk.f32.gmra.mxu0 %vm223_vm1, %v4885_v23  ;;  %3531 = vmatmul.msk.f32.gmra.mxu2 %vm223_vm1, %v5428_v36  ;;  %v2146_v35 = vadd.f32 %v2084_v54, %v2033_v21  ;;  %v6206_v23 = vmax.f32 %v4880_v31, %v4882_v19  ;;  %v5469_v21 = vld [vmem:[%s3849_s6 + $0x1b8] sm:$0xff] }
 0x2fb   : > { %3482 = vmatmul.msk.f32.gmra.mxu1 %vm223_vm1, %v4894_v6  ;;  %3556 = vmatmul.msk.f32.gmra.mxu3 %vm223_vm1, %v4844_v43  ;;  %v5460_v43 = vld [vmem:[%s3849_s6 + $0xd0] sm:$0xff] }
 0x2fd   : > { %v2293_v20 = vpop.f32.mrf.mxu2 }
 0x2fe   : > { %v2355_v9 = vadd.f32 %v2293_v20, %v2146_v35  ;;  %v5444_v5 = vpop.f32.mrf.mxu3 }
 0x2ff   : > { %v1974_v37 = vpop.f32.mrf.mxu0 }
 0x300   : > { %v5452_v28 = vmax.f32 %v6206_v23, %v2355_v9  ;;  %v2034_v7 = vadd.f32 %v1974_v37, %v4922_v41  ;;  %v2087_v27 = vpop.f32.mrf.mxu1  ;;  %v6208_v9 = vld [vmem:[#allocation53_spill] sm:$0xff] }
 0x302   : > { %3458 = vmatmul.msk.f32.gmra.mxu0 %vm223_vm1, %v4910_v40  ;;  %3532 = vmatmul.msk.f32.gmra.mxu2 %vm223_vm1, %v5447_v16  ;;  %v2147_v19 = vadd.f32 %v2087_v27, %v2034_v7  ;;  %v6207_v40 = vmax.f32 %v4905_v42, %v4907_v25  ;;  %v6209_v7 = vld [vmem:[#allocation12_spill] sm:$0xff] }
 0x303   : > { %3483 = vmatmul.msk.f32.gmra.mxu1 %vm223_vm1, %v5460_v43  ;;  %3557 = vmatmul.msk.f32.gmra.mxu3 %vm223_vm1, %v4869_v47  ;;  %v5482_v47 = vld [vmem:[%s3849_s6 + $0xd8] sm:$0xff]  ;;  %v6210_v27 = vmax.f32 %v4927_v32, %v6209_v7  ;;  %v3723_v7 = vld [vmem:[%s3849_s6 + $0xe8] sm:$0xff] }
 0x305   : > { %v2296_v31 = vpop.f32.mrf.mxu2 }
 0x306   : > { %v2356_v17 = vadd.f32 %v2296_v31, %v2147_v19  ;;  %v5466_v41 = vpop.f32.mrf.mxu3 }
 0x307   : > { %v1977_v62 = vpop.f32.mrf.mxu0 }
 0x308   : > { %v5474_v54 = vmax.f32 %v6207_v40, %v2356_v17  ;;  %v2035_v35 = vadd.f32 %v1977_v62, %v4944_v60  ;;  %v2090_v20 = vpop.f32.mrf.mxu1  ;;  %v3722_v62 = vld [vmem:[%s3849_s6 + $0xe0] sm:$0xff] }
 0x309   : > { %v6212_v40 = vld [vmem:[#allocation54_spill] sm:$0xff] }
 0x30a   : > { %3459 = vmatmul.msk.f32.gmra.mxu0 %vm223_vm1, %v6208_v9  ;;  %3533 = vmatmul.msk.f32.gmra.mxu2 %vm223_vm1, %v5469_v21  ;;  %v2148_v25 = vadd.f32 %v2090_v20, %v2035_v35 }
 0x30b   : > { %3484 = vmatmul.msk.f32.gmra.mxu1 %vm223_vm1, %v5482_v47  ;;  %3558 = vmatmul.msk.f32.gmra.mxu3 %vm223_vm1, %v4894_v6  ;;  %v6211_v6 = vld [vmem:[#allocation56_spill] sm:$0xff] }
 0x30d   : > { %v2299_v42 = vpop.f32.mrf.mxu2 }
 0x30e   : > { %v2357_v37 = vadd.f32 %v2299_v42, %v2148_v25  ;;  %v5488_v23 = vpop.f32.mrf.mxu3 }
 0x30f   : > { %v1980_v60 = vpop.f32.mrf.mxu0 }
 0x310   : > { %v5493_v19 = vmax.f32 %v6210_v27, %v2357_v37  ;;  %v2036_v31 = vadd.f32 %v1980_v60, %v4972_v53  ;;  %v2093_v17 = vpop.f32.mrf.mxu1  ;;  %v6213_v53 = vld [vmem:[#allocation55_spill] sm:$0xff] }
 0x311   : > { %v6214_v42 = vmax.f32 %v4952_v59, %v6213_v53  ;;  %v6215_v27 = vld [vmem:[#allocation59_spill] sm:$0xff]  ;;  %v6219_v53 = vld [vmem:[#allocation62_spill] sm:$0xff] }
 0x312   : > { %3560 = vmatmul.msk.f32.vlgmr.msra.gmra.mxu0 %vm223_vm1, %v3722_v62  ;;  %3610 = vmatmul.msk.f32.vlgmr.msra.gmra.mxu2 %vm223_vm1, %v4964_v4  ;;  %v2149_v35 = vadd.f32 %v2093_v17, %v2036_v31  ;;  %v6216_v31 = vld [vmem:[#allocation57_spill] sm:$0xff] }
 0x313   : > { %3585 = vmatmul.msk.f32.vlgmr.msra.gmra.mxu1 %vm223_vm1, %v6211_v6  ;;  %3635 = vmatmul.msk.f32.vlgmr.msra.gmra.mxu3 %vm223_vm1, %v6212_v40 }
 0x315   : > { %v2302_v32 = vpop.f32.mrf.mxu2 }
 0x316   : > { %v2358_v20 = vadd.f32 %v2302_v32, %v2149_v35  ;;  %v5504_v9 = vpop.f32.mrf.mxu3 }
 0x317   : > { %v1983_v25 = vpop.f32.mrf.mxu0 }
 0x318   : > { %v5509_v37 = vmax.f32 %v6214_v42, %v2358_v20  ;;  %v2037_v60 = vadd.f32 %v1983_v25, %v5000_v39  ;;  %v2096_v4 = vpop.f32.mrf.mxu1  ;;  %v6217_v39 = vld [vmem:[#allocation58_spill] sm:$0xff]  ;;  %v6220_v42 = vld [vmem:[#allocation60_spill] sm:$0xff] }
 0x319   : > { %v6218_v32 = vmax.f32 %v4980_v56, %v6217_v39 }
 0x31a   : > { %3561 = vmatmul.msk.f32.gmra.mxu0 %vm223_vm1, %v3723_v7  ;;  %3611 = vmatmul.msk.f32.gmra.mxu2 %vm223_vm1, %v4992_v50  ;;  %v2150_v17 = vadd.f32 %v2096_v4, %v2037_v60 }
 0x31b   : > { %3586 = vmatmul.msk.f32.gmra.mxu1 %vm223_vm1, %v6215_v27  ;;  %3636 = vmatmul.msk.f32.gmra.mxu3 %vm223_vm1, %v6216_v31 }
 0x31d   : > { %v2305_v62 = vpop.f32.mrf.mxu2 }
 0x31e   : > { %v2359_v59 = vadd.f32 %v2305_v62, %v2150_v17  ;;  %v5520_v40 = vpop.f32.mrf.mxu3 }
 0x31f   : > { %v1986_v35 = vpop.f32.mrf.mxu0 }
 0x320   : > { %v5525_v20 = vmax.f32 %v6218_v32, %v2359_v59  ;;  %v2038_v25 = vadd.f32 %v1986_v35, %v5028_v0  ;;  %v2099_v50 = vpop.f32.mrf.mxu1  ;;  %v6221_v0 = vld [vmem:[#allocation61_spill] sm:$0xff]  ;;  %v6224_v35 = vld [vmem:[#allocation63_spill] sm:$0xff] }
 0x321   : > { %v6222_v17 = vmax.f32 %v5008_v45, %v6221_v0  ;;  %v6223_v59 = vld [vmem:[#allocation65_spill] sm:$0xff] }
 0x322   : > { %3562 = vmatmul.msk.f32.gmra.mxu0 %vm223_vm1, %v6211_v6  ;;  %3612 = vmatmul.msk.f32.gmra.mxu2 %vm223_vm1, %v5020_v44  ;;  %v2151_v60 = vadd.f32 %v2099_v50, %v2038_v25 }
 0x323   : > { %3587 = vmatmul.msk.f32.gmra.mxu1 %vm223_vm1, %v6219_v53  ;;  %3637 = vmatmul.msk.f32.gmra.mxu3 %vm223_vm1, %v6220_v42 }
 0x325   : > { %v2308_v4 = vpop.f32.mrf.mxu2 }
 0x326   : > { %v2360_v56 = vadd.f32 %v2308_v4, %v2151_v60  ;;  %v5536_v7 = vpop.f32.mrf.mxu3  ;;  %v6227_v4 = vld [vmem:[#allocation68_spill] sm:$0xff] }
 0x327   : > { %v1989_v31 = vpop.f32.mrf.mxu0 }
 0x328   : > { %v5541_v62 = vmax.f32 %v6222_v17, %v2360_v56  ;;  %v2039_v6 = vadd.f32 %v1989_v31, %v5056_v61  ;;  %v2102_v44 = vpop.f32.mrf.mxu1  ;;  %v6225_v61 = vld [vmem:[#allocation64_spill] sm:$0xff]  ;;  %v6228_v56 = vld [vmem:[#allocation66_spill] sm:$0xff] }
 0x329   : > { %v6226_v42 = vmax.f32 %v5036_v14, %v6225_v61 }
 0x32a   : > { %3563 = vmatmul.msk.f32.gmra.mxu0 %vm223_vm1, %v6215_v27  ;;  %3613 = vmatmul.msk.f32.gmra.mxu2 %vm223_vm1, %v5048_v58  ;;  %v2152_v39 = vadd.f32 %v2102_v44, %v2039_v6  ;;  %v6229_v6 = vld [vmem:[#allocation67_spill] sm:$0xff] }
 0x32b   : > { %3588 = vmatmul.msk.f32.gmra.mxu1 %vm223_vm1, %v6223_v59  ;;  %3638 = vmatmul.msk.f32.gmra.mxu3 %vm223_vm1, %v6224_v35  ;;  %v6230_v44 = vmax.f32 %v5064_v48, %v6229_v6  ;;  %v6235_v6 = vld [vmem:[#allocation14_spill] sm:$0xff] }
 0x32d   : > { %v2311_v32 = vpop.f32.mrf.mxu2 }
 0x32e   : > { %v2361_v45 = vadd.f32 %v2311_v32, %v2152_v39  ;;  %v5552_v25 = vpop.f32.mrf.mxu3  ;;  %v3724_v39 = vld [vmem:[%s3849_s6 + $0x118] sm:$0xff] }
 0x32f   : > { %v1992_v50 = vpop.f32.mrf.mxu0  ;;  %v6231_v32 = vld [vmem:[#allocation69_spill] sm:$0xff] }
 0x330   : > { %v5557_v60 = vmax.f32 %v6226_v42, %v2361_v45  ;;  %v2040_v27 = vadd.f32 %v1992_v50, %v5084_v3  ;;  %v2105_v58 = vpop.f32.mrf.mxu1  ;;  %v6232_v42 = vld [vmem:[#allocation13_spill] sm:$0xff] }
 0x332   : > { %3564 = vmatmul.msk.f32.gmra.mxu0 %vm223_vm1, %v6219_v53  ;;  %3614 = vmatmul.msk.f32.gmra.mxu2 %vm223_vm1, %v5076_v52  ;;  %v2153_v31 = vadd.f32 %v2105_v58, %v2040_v27  ;;  %v6233_v27 = vmax.f32 %v5092_v11, %v6232_v42 }
 0x333   : > { %3589 = vmatmul.msk.f32.gmra.mxu1 %vm223_vm1, %v6227_v4  ;;  %3639 = vmatmul.msk.f32.gmra.mxu3 %vm223_vm1, %v6228_v56  ;;  %v3725_v56 = vld [vmem:[%s3849_s6 + $0x120] sm:$0xff] }
 0x335   : > { %v2314_v14 = vpop.f32.mrf.mxu2 }
 0x336   : > { %v2362_v0 = vadd.f32 %v2314_v14, %v2153_v31  ;;  %v5568_v17 = vpop.f32.mrf.mxu3  ;;  %v6234_v31 = vld [vmem:[#allocation70_spill] sm:$0xff] }
 0x337   : > { %v1995_v3 = vpop.f32.mrf.mxu0 }
 0x338   : > { %v5573_v35 = vmax.f32 %v6230_v44, %v2362_v0  ;;  %v2041_v53 = vadd.f32 %v1995_v3, %v5109_v29  ;;  %v2108_v52 = vpop.f32.mrf.mxu1  ;;  %v6236_v44 = vmax.f32 %v5117_v49, %v6235_v6  ;;  %v3728_v6 = vld [vmem:[%s3849_s6 + $0x130] sm:$0xff] }
 0x33a   : > { %3565 = vmatmul.msk.f32.gmra.mxu0 %vm223_vm1, %v6223_v59  ;;  %3615 = vmatmul.msk.f32.gmra.mxu2 %vm223_vm1, %v5101_v46  ;;  %v2154_v45 = vadd.f32 %v2108_v52, %v2041_v53 }
 0x33b   : > { %3590 = vmatmul.msk.f32.gmra.mxu1 %vm223_vm1, %v3724_v39  ;;  %3640 = vmatmul.msk.f32.gmra.mxu3 %vm223_vm1, %v6231_v32  ;;  %v6238_v32 = vld [vmem:[#allocation73_spill] sm:$0xff] }
 0x33d   : > { %v2317_v48 = vpop.f32.mrf.mxu2 }
 0x33e   : > { %v2363_v50 = vadd.f32 %v2317_v48, %v2154_v45  ;;  %v5584_v61 = vpop.f32.mrf.mxu3  ;;  %v3726_v45 = vld [vmem:[%s3849_s6 + $0x128] sm:$0xff] }
 0x33f   : > { %v1998_v29 = vpop.f32.mrf.mxu0  ;;  %v6239_v48 = vld [vmem:[#allocation71_spill] sm:$0xff] }
 0x340   : > { %v5589_v58 = vmax.f32 %v6233_v27, %v2363_v50  ;;  %v2042_v59 = vadd.f32 %v1998_v29, %v5134_v55  ;;  %v2111_v46 = vpop.f32.mrf.mxu1 }
 0x342   : > { %3566 = vmatmul.msk.f32.gmra.mxu0 %vm223_vm1, %v6227_v4  ;;  %3616 = vmatmul.msk.f32.gmra.mxu2 %vm223_vm1, %v5126_v12  ;;  %v2155_v14 = vadd.f32 %v2111_v46, %v2042_v59  ;;  %v6237_v4 = vld [vmem:[#allocation74_spill] sm:$0xff]  ;;  %v6240_v59 = vld [vmem:[#allocation15_spill] sm:$0xff]  ;;  %v6241_v46 = vld [vmem:[#allocation72_spill] sm:$0xff] }
 0x343   : > { %3591 = vmatmul.msk.f32.gmra.mxu1 %vm223_vm1, %v3725_v56  ;;  %3641 = vmatmul.msk.f32.gmra.mxu3 %vm223_vm1, %v6234_v31  ;;  %v6242_v31 = vmax.f32 %v6240_v59, %v6241_v46 }
 0x345   : > { %v2320_v11 = vpop.f32.mrf.mxu2 }
 0x346   : > { %v2364_v0 = vadd.f32 %v2320_v11, %v2155_v14  ;;  %v5600_v3 = vpop.f32.mrf.mxu3  ;;  %v6243_v14 = vld [vmem:[#allocation77_spill] sm:$0xff] }
 0x347   : > { %v2001_v55 = vpop.f32.mrf.mxu0 }
 0x348   : > { %v5605_v53 = vmax.f32 %v6236_v44, %v2364_v0  ;;  %v2043_v52 = vadd.f32 %v2001_v55, %v6237_v4  ;;  %v2114_v12 = vpop.f32.mrf.mxu1  ;;  %v3727_v55 = vld [vmem:[%s3849_s6 + $0x60] sm:$0xff]  ;;  %v6244_v44 = vld [vmem:[#allocation75_spill] sm:$0xff] }
 0x34a   : > { %3567 = vmatmul.msk.f32.gmra.mxu0 %vm223_vm1, %v3724_v39  ;;  %3617 = vmatmul.msk.f32.gmra.mxu2 %vm223_vm1, %v6238_v32  ;;  %v2156_v50 = vadd.f32 %v2114_v12, %v2043_v52 }
 0x34b   : > { %3592 = vmatmul.msk.f32.gmra.mxu1 %vm223_vm1, %v3726_v45  ;;  %3642 = vmatmul.msk.f32.gmra.mxu3 %vm223_vm1, %v6239_v48 }
 0x34d   : > { %v2323_v49 = vpop.f32.mrf.mxu2 }
 0x34e   : > { %v2365_v29 = vadd.f32 %v2323_v49, %v2156_v50  ;;  %v5615_v42 = vpop.f32.mrf.mxu3  ;;  %v6245_v50 = vld [vmem:[#allocation16_spill] sm:$0xff] }
 0x34f   : > { %v2004_v27 = vpop.f32.mrf.mxu0  ;;  %v6246_v49 = vld [vmem:[#allocation76_spill] sm:$0xff] }
 0x350   : > { %v5620_v39 = vmax.f32 %v6242_v31, %v2365_v29  ;;  %v2044_v11 = vadd.f32 %v2004_v27, %v6243_v14  ;;  %v2117_v0 = vpop.f32.mrf.mxu1  ;;  %v6247_v29 = vmax.f32 %v6245_v50, %v6246_v49  ;;  %v6249_v27 = vld [vmem:[#allocation7_spill] sm:$0xff]  ;;  %v3730_v14 = vld [vmem:[%s3849_s6 + $0x138] sm:$0xff]  ;;  %v6255_v49 = vld [vmem:[#allocation18_spill] sm:$0xff] }
 0x351   : > { %v3729_v31 = vld [vmem:[%s3849_s6 + $0x68] sm:$0xff] }
 0x352   : > { %3568 = vmatmul.msk.f32.gmra.mxu0 %vm223_vm1, %v3725_v56  ;;  %3618 = vmatmul.msk.f32.gmra.mxu2 %vm223_vm1, %v3727_v55  ;;  %v2157_v4 = vadd.f32 %v2117_v0, %v2044_v11  ;;  %v6250_v11 = vld [vmem:[#allocation78_spill] sm:$0xff] }
 0x353   : > { %3593 = vmatmul.msk.f32.gmra.mxu1 %vm223_vm1, %v3728_v6  ;;  %3643 = vmatmul.msk.f32.gmra.mxu3 %vm223_vm1, %v6244_v44 }
 0x355   : > { %v2326_v52 = vpop.f32.mrf.mxu2 }
 0x356   : > { %v2366_v12 = vadd.f32 %v2326_v52, %v2157_v4  ;;  %v5630_v32 = vpop.f32.mrf.mxu3 }
 0x357   : > { %v2007_v48 = vpop.f32.mrf.mxu0 }
 0x358   : > { %v5635_v56 = vmax.f32 %v6247_v29, %v2366_v12  ;;  %v2045_v59 = vadd.f32 %v2007_v48, %v6249_v27  ;;  %v2120_v46 = vpop.f32.mrf.mxu1  ;;  %v6251_v12 = vld [vmem:[#allocation2_spill] sm:$0xff]  ;;  %v6252_v48 = vld [vmem:[#allocation17_spill] sm:$0xff] }
 0x359   : > { %v6253_v50 = vmax.f32 %v6251_v12, %v6252_v48  ;;  %v6258_v12 = vld [vmem:[#allocation25_spill] sm:$0xff]  ;;  %v6259_v48 = vld [vmem:[#allocation3_spill] sm:$0xff] }
 0x35a   : > { %6248 = vst [vmem:[#allocation42_spill] sm:$0xff] %v5635_v56  ;;  %3569 = vmatmul.msk.f32.gmra.mxu0 %vm223_vm1, %v3726_v45  ;;  %3619 = vmatmul.msk.f32.gmra.mxu2 %vm223_vm1, %v3729_v31  ;;  %v2158_v0 = vadd.f32 %v2120_v46, %v2045_v59  ;;  %v3731_v31 = vld [vmem:[%s3849_s6 + $0x70] sm:$0xff]  ;;  %v3732_v59 = vld [vmem:[%s3849_s6 + $0x140] sm:$0xff]  ;;  %v3733_v56 = vld [vmem:[%s3849_s6 + $0x78] sm:$0xff] }
 0x35b   : > { %3594 = vmatmul.msk.f32.gmra.mxu1 %vm223_vm1, %v3730_v14  ;;  %3644 = vmatmul.msk.f32.gmra.mxu3 %vm223_vm1, %v6250_v11  ;;  %v6256_v46 = vld [vmem:[#allocation26_spill] sm:$0xff] }
 0x35d   : > { %v2329_v55 = vpop.f32.mrf.mxu2 }
 0x35e   : > { %v2367_v44 = vadd.f32 %v2329_v55, %v2158_v0  ;;  %v5645_v4 = vpop.f32.mrf.mxu3 }
 0x35f   : > { %v2010_v52 = vpop.f32.mrf.mxu0 }
 0x360   : > { %v5650_v45 = vmax.f32 %v6253_v50, %v2367_v44  ;;  %v2046_v29 = vadd.f32 %v2010_v52, %v6255_v49  ;;  %v2123_v27 = vpop.f32.mrf.mxu1  ;;  %v6260_v50 = vmax.f32 %v6258_v12, %v6259_v48  ;;  %v6262_v49 = vld [vmem:[#allocation28_spill] sm:$0xff]  ;;  %v6264_v12 = vld [vmem:[#allocation31_spill] sm:$0xff]  ;;  %v6265_v48 = vld [vmem:[#allocation30_spill] sm:$0xff] }
 0x362   : > { %6254 = vst [vmem:[#allocation22_spill] sm:$0xff] %v5650_v45  ;;  %3570 = vmatmul.msk.f32.gmra.mxu0 %vm223_vm1, %v3728_v6  ;;  %3620 = vmatmul.msk.f32.gmra.mxu2 %vm223_vm1, %v3731_v31  ;;  %v2159_v11 = vadd.f32 %v2123_v27, %v2046_v29  ;;  %v3734_v29 = vld [vmem:[%s3849_s6 + $0x148] sm:$0xff]  ;;  %v6263_v27 = vld [vmem:[#allocation9_spill] sm:$0xff] }
 0x363   : > { %3595 = vmatmul.msk.f32.gmra.mxu1 %vm223_vm1, %v3732_v59  ;;  %3645 = vmatmul.msk.f32.gmra.mxu3 %vm223_vm1, %v6256_v46 }
 0x365   : > { %v2332_v0 = vpop.f32.mrf.mxu2 }
 0x366   : > { %v2368_v55 = vadd.f32 %v2332_v0, %v2159_v11  ;;  %v5660_v44 = vpop.f32.mrf.mxu3 }
 0x367   : > { %6257 = vst [vmem:[#allocation37_spill] sm:$0xff] %v5660_v44  ;;  %v2013_v52 = vpop.f32.mrf.mxu0  ;;  %v3735_v44 = vld [vmem:[%s3849_s6 + $0x80] sm:$0xff] }
 0x368   : > { %v5665_v6 = vmax.f32 %v6260_v50, %v2368_v55  ;;  %v2047_v45 = vadd.f32 %v2013_v52, %v6262_v49  ;;  %v2126_v31 = vpop.f32.mrf.mxu1  ;;  %v6266_v50 = vmax.f32 %v6264_v12, %v6265_v48  ;;  %v6268_v49 = vld [vmem:[#allocation35_spill] sm:$0xff]  ;;  %v6271_v48 = vld [vmem:[#allocation24_spill] sm:$0xff] }
 0x369   : > { %v6270_v12 = vld [vmem:[#allocation11_spill] sm:$0xff] }
 0x36a   : > { %6261 = vst [vmem:[#allocation40_spill] sm:$0xff] %v5665_v6  ;;  %3571 = vmatmul.msk.f32.gmra.mxu0 %vm223_vm1, %v3730_v14  ;;  %3621 = vmatmul.msk.f32.gmra.mxu2 %vm223_vm1, %v3733_v56  ;;  %v2160_v46 = vadd.f32 %v2126_v31, %v2047_v45  ;;  %v3736_v45 = vld [vmem:[%s3849_s6 + $0x150] sm:$0xff]  ;;  %v6269_v31 = vld [vmem:[#allocation19_spill] sm:$0xff] }
 0x36b   : > { %3596 = vmatmul.msk.f32.gmra.mxu1 %vm223_vm1, %v3734_v29  ;;  %3646 = vmatmul.msk.f32.gmra.mxu3 %vm223_vm1, %v6263_v27 }
 0x36d   : > { %v2335_v11 = vpop.f32.mrf.mxu2 }
 0x36e   : > { %v2369_v0 = vadd.f32 %v2335_v11, %v2160_v46  ;;  %v5675_v55 = vpop.f32.mrf.mxu3 }
 0x36f   : > { %v2016_v52 = vpop.f32.mrf.mxu0 }
 0x370   : > { %v5680_v14 = vmax.f32 %v6266_v50, %v2369_v0  ;;  %v2048_v6 = vadd.f32 %v2016_v52, %v6268_v49  ;;  %v2129_v56 = vpop.f32.mrf.mxu1  ;;  %v6272_v50 = vmax.f32 %v6270_v12, %v6271_v48  ;;  %v6276_v12 = vld [vmem:[#allocation27_spill] sm:$0xff] }
 0x372   : > { %6267 = vst [vmem:[#allocation43_spill] sm:$0xff] %v5680_v14  ;;  %3572 = vmatmul.msk.f32.gmra.mxu0 %vm223_vm1, %v3732_v59  ;;  %3622 = vmatmul.msk.f32.gmra.mxu2 %vm223_vm1, %v3735_v44  ;;  %v2161_v27 = vadd.f32 %v2129_v56, %v2048_v6  ;;  %v3737_v14 = vld [vmem:[%s3849_s6 + $0x88] sm:$0xff]  ;;  %v3738_v6 = vld [vmem:[%s3849_s6 + $0x158] sm:$0xff] }
 0x373   : > { %3597 = vmatmul.msk.f32.gmra.mxu1 %vm223_vm1, %v3736_v45  ;;  %3647 = vmatmul.msk.f32.gmra.mxu3 %vm223_vm1, %v6269_v31  ;;  %v6274_v56 = vld [vmem:[#allocation33_spill] sm:$0xff] }
 0x375   : > { %v2338_v46 = vpop.f32.mrf.mxu2 }
 0x376   : > { %v2370_v11 = vadd.f32 %v2338_v46, %v2161_v27  ;;  %v5690_v0 = vpop.f32.mrf.mxu3 }
 0x377   : > { %v2019_v52 = vpop.f32.mrf.mxu0 }
 0x378   : > { %v5695_v59 = vmax.f32 %v6272_v50, %v2370_v11  ;;  %v2049_v49 = vadd.f32 %v2019_v52, %v5291_v13  ;;  %v2132_v44 = vpop.f32.mrf.mxu1  ;;  %v6275_v52 = vld [vmem:[#allocation20_spill] sm:$0xff] }
 0x379   : > { %v6277_v48 = vmax.f32 %v6275_v52, %v6276_v12  ;;  %v3741_v12 = vld [vmem:[%s3849_s6 + $0x98] sm:$0xff] }
 0x37a   : > { %6273 = vst [vmem:[#allocation23_spill] sm:$0xff] %v5695_v59  ;;  %3573 = vmatmul.msk.f32.gmra.mxu0 %vm223_vm1, %v3734_v29  ;;  %3623 = vmatmul.msk.f32.gmra.mxu2 %vm223_vm1, %v3737_v14  ;;  %v2162_v31 = vadd.f32 %v2132_v44, %v2049_v49  ;;  %v3739_v59 = vld [vmem:[%s3849_s6 + $0x90] sm:$0xff]  ;;  %v3740_v49 = vld [vmem:[%s3849_s6 + $0x160] sm:$0xff]  ;;  %v6278_v44 = vld [vmem:[#allocation29_spill] sm:$0xff] }
 0x37b   : > { %3598 = vmatmul.msk.f32.gmra.mxu1 %vm223_vm1, %v3738_v6  ;;  %3648 = vmatmul.msk.f32.gmra.mxu3 %vm223_vm1, %v6274_v56 }
 0x37d   : > { %v2341_v27 = vpop.f32.mrf.mxu2 }
 0x37e   : > { %v2371_v46 = vadd.f32 %v2341_v27, %v2162_v31  ;;  %v5705_v11 = vpop.f32.mrf.mxu3 }
 0x37f   : > { %v2022_v13 = vpop.f32.mrf.mxu0 }
 0x380   : > { %v5710_v29 = vmax.f32 %v6277_v48, %v2371_v46  ;;  %v2050_v50 = vadd.f32 %v2022_v13, %v5313_v51  ;;  %v2135_v14 = vpop.f32.mrf.mxu1  ;;  %v6279_v13 = vmax.f32 %v5299_v24, %v5301_v1  ;;  %v3742_v48 = vld [vmem:[%s3849_s6 + $0x168] sm:$0xff] }
 0x382   : > { %3574 = vmatmul.msk.f32.gmra.mxu0 %vm223_vm1, %v3736_v45  ;;  %3624 = vmatmul.msk.f32.gmra.mxu2 %vm223_vm1, %v3739_v59  ;;  %v2163_v56 = vadd.f32 %v2135_v14, %v2050_v50  ;;  %v6280_v50 = vld [vmem:[#allocation39_spill] sm:$0xff] }
 0x383   : > { %3599 = vmatmul.msk.f32.gmra.mxu1 %vm223_vm1, %v3740_v49  ;;  %3649 = vmatmul.msk.f32.gmra.mxu3 %vm223_vm1, %v6278_v44 }
 0x385   : > { %v2344_v31 = vpop.f32.mrf.mxu2 }
 0x386   : > { %v2372_v27 = vadd.f32 %v2344_v31, %v2163_v56  ;;  %v5720_v46 = vpop.f32.mrf.mxu3  ;;  %v6281_v56 = vld [vmem:[#allocation38_spill] sm:$0xff]  ;;  %v6282_v31 = vld [vmem:[#allocation21_spill] sm:$0xff] }
 0x387   : > { %v2025_v51 = vpop.f32.mrf.mxu0 }
 0x388   : > { %v5725_v45 = vmax.f32 %v6279_v13, %v2372_v27  ;;  %v2051_v52 = vadd.f32 %v2025_v51, %v5335_v30  ;;  %v2138_v59 = vpop.f32.mrf.mxu1  ;;  %v6283_v27 = vmax.f32 %v6281_v56, %v6282_v31 }
 0x38a   : > { %3575 = vmatmul.msk.f32.gmra.mxu0 %vm223_vm1, %v3738_v6  ;;  %3625 = vmatmul.msk.f32.gmra.mxu2 %vm223_vm1, %v3741_v12  ;;  %v2164_v14 = vadd.f32 %v2138_v59, %v2051_v52  ;;  %v3743_v12 = vld [vmem:[%s3849_s6 + $0xa0] sm:$0xff]  ;;  %v3744_v52 = vld [vmem:[%s3849_s6 + $0x170] sm:$0xff] }
 0x38b   : > { %3600 = vmatmul.msk.f32.gmra.mxu1 %vm223_vm1, %v3742_v48  ;;  %3650 = vmatmul.msk.f32.gmra.mxu3 %vm223_vm1, %v6280_v50  ;;  %v6284_v59 = vld [vmem:[#allocation32_spill] sm:$0xff] }
 0x38d   : > { %v2347_v24 = vpop.f32.mrf.mxu2 }
 0x38e   : > { %v2373_v1 = vadd.f32 %v2347_v24, %v2164_v14  ;;  %v5735_v44 = vpop.f32.mrf.mxu3 }
 0x38f   : > { %v2504_v30 = vpop.f32.mrf.mxu0 }
 0x390   : > { %v5740_v6 = vmax.f32 %v6283_v27, %v2373_v1  ;;  %v2505_v51 = vadd.f32 %v2504_v30, %v5349_v15  ;;  %v2593_v13 = vpop.f32.mrf.mxu1 }
 0x392   : > { %3576 = vmatmul.msk.f32.gmra.mxu0 %vm223_vm1, %v3740_v49  ;;  %3626 = vmatmul.msk.f32.gmra.mxu2 %vm223_vm1, %v3743_v12  ;;  %v2665_v50 = vadd.f32 %v2593_v13, %v2505_v51  ;;  %v5754_v49 = vld [vmem:[%s5934_s2] ss:$0 sm:$0xff]  ;;  %v3745_v12 = vld [vmem:[%s3849_s6 + $0xa8] sm:$0xff]  ;;  %v3746_v51 = vld [vmem:[%s3849_s6 + $0x178] sm:$0xff] }
 0x393   : > { %3601 = vmatmul.msk.f32.gmra.mxu1 %vm223_vm1, %v3744_v52  ;;  %3651 = vmatmul.msk.f32.gmra.mxu3 %vm223_vm1, %v6284_v59  ;;  %v6285_v13 = vld [vmem:[#allocation34_spill] sm:$0xff] }
 0x395   : > { %v2706_v14 = vpop.f32.mrf.mxu2 }
 0x396   : > { %v2778_v24 = vadd.f32 %v2706_v14, %v2665_v50  ;;  %v2819_v1 = vpop.f32.mrf.mxu3 }
 0x397   : > { %v2507_v15 = vpop.f32.mrf.mxu0 }
 0x398   : > { %v2508_v30 = vadd.f32 %v2507_v15, %v5368_v18  ;;  %v2891_v56 = vadd.f32 %v2819_v1, %v2778_v24  ;;  %v2596_v31 = vpop.f32.mrf.mxu1 }
 0x39a   : > { %v2915_v27 = vmax.f32 %v5357_v2, %v2891_v56  ;;  %3577 = vmatmul.msk.f32.gmra.mxu0 %vm223_vm1, %v3742_v48  ;;  %3627 = vmatmul.msk.f32.gmra.mxu2 %vm223_vm1, %v3745_v12  ;;  %v2666_v59 = vadd.f32 %v2596_v31, %v2508_v30  ;;  %v3747_v31 = vld [vmem:[%s3849_s6 + $0xb0] sm:$0xff] }
 0x39b   : > { %3602 = vmatmul.msk.f32.gmra.mxu1 %vm223_vm1, %v3746_v51  ;;  %3652 = vmatmul.msk.f32.gmra.mxu3 %vm223_vm1, %v6285_v13  ;;  %v6286_v12 = vld [vmem:[#allocation36_spill] sm:$0xff] }
 0x39c   : > { %v2943_v18 = vadd.f32 %v5754_v49, %v2915_v27  ;;  %v3748_v27 = vld [vmem:[%s3849_s6 + $0x180] sm:$0xff] }
 0x39d   : > { %v2709_v2 = vpop.f32.mrf.mxu2 }
 0x39e   : > { %v2967_v48 = vmax.f32 %v2943_v18, 0.0  ;;  %v2779_v50 = vadd.f32 %v2709_v2, %v2666_v59  ;;  %v2822_v14 = vpop.f32.mrf.mxu3 }
 0x39f   : > { %v2510_v24 = vpop.f32.mrf.mxu0 }
 0x3a0   : > { %2992 = vst.msk [vmem:[%s5769_s13] sm:$0xff] %vm2991_vm2, %v2967_v48  ;;  %v2511_v1 = vadd.f32 %v2510_v24, %v5387_v34  ;;  %v2892_v15 = vadd.f32 %v2822_v14, %v2779_v50  ;;  %v2599_v30 = vpop.f32.mrf.mxu1 }
 0x3a2   : > { %v2916_v56 = vmax.f32 %v5376_v26, %v2892_v15  ;;  %3578 = vmatmul.msk.f32.gmra.mxu0 %vm223_vm1, %v3744_v52  ;;  %3628 = vmatmul.msk.f32.gmra.mxu2 %vm223_vm1, %v3747_v31  ;;  %v2667_v13 = vadd.f32 %v2599_v30, %v2511_v1  ;;  %v3749_v15 = vld [vmem:[%s3849_s6 + $0xb8] sm:$0xff]  ;;  %v3750_v1 = vld [vmem:[%s3849_s6 + $0x188] sm:$0xff] }
 0x3a3   : > { %3603 = vmatmul.msk.f32.gmra.mxu1 %vm223_vm1, %v3748_v27  ;;  %3653 = vmatmul.msk.f32.gmra.mxu3 %vm223_vm1, %v6286_v12 }
 0x3a4   : > { %v2944_v34 = vadd.f32 %v5754_v49, %v2916_v56 }
 0x3a5   : > { %v2712_v18 = vpop.f32.mrf.mxu2 }
 0x3a6   : > { %v2968_v59 = vmax.f32 %v2944_v34, 0.0  ;;  %v2780_v2 = vadd.f32 %v2712_v18, %v2667_v13  ;;  %v2825_v26 = vpop.f32.mrf.mxu3 }
 0x3a7   : > { %v2513_v48 = vpop.f32.mrf.mxu0 }
 0x3a8   : > { %2993 = vst.msk [vmem:[%s5769_s13 + $0x8] sm:$0xff] %vm2991_vm2, %v2968_v59  ;;  %v2514_v52 = vadd.f32 %v2513_v48, %v5406_v22  ;;  %v2893_v50 = vadd.f32 %v2825_v26, %v2780_v2  ;;  %v2602_v14 = vpop.f32.mrf.mxu1  ;;  %v3752_v2 = vld [vmem:[%s3849_s6 + $0x190] sm:$0xff] }
 0x3aa   : > { %v2917_v24 = vmax.f32 %v5395_v63, %v2893_v50  ;;  %3579 = vmatmul.msk.f32.gmra.mxu0 %vm223_vm1, %v3746_v51  ;;  %3629 = vmatmul.msk.f32.gmra.mxu2 %vm223_vm1, %v3749_v15  ;;  %v2668_v30 = vadd.f32 %v2602_v14, %v2514_v52 }
 0x3ab   : > { %3604 = vmatmul.msk.f32.gmra.mxu1 %vm223_vm1, %v3750_v1  ;;  %3654 = vmatmul.msk.f32.gmra.mxu3 %vm223_vm1, %v5390_v10  ;;  %v3751_v10 = vld [vmem:[%s3849_s6 + $0xc0] sm:$0xff] }
 0x3ac   : > { %v2945_v22 = vadd.f32 %v5754_v49, %v2917_v24 }
 0x3ad   : > { %v2715_v56 = vpop.f32.mrf.mxu2 }
 0x3ae   : > { %v2969_v31 = vmax.f32 %v2945_v22, 0.0  ;;  %v2781_v12 = vadd.f32 %v2715_v56, %v2668_v30  ;;  %v2828_v63 = vpop.f32.mrf.mxu3  ;;  %v3754_v30 = vld [vmem:[%s3849_s6 + $0x198] sm:$0xff] }
 0x3af   : > { %v2516_v34 = vpop.f32.mrf.mxu0 }
 0x3b0   : > { %2994 = vst.msk [vmem:[%s5769_s13 + $0x10] sm:$0xff] %vm2991_vm2, %v2969_v31  ;;  %v2517_v51 = vadd.f32 %v2516_v34, %v5425_v57  ;;  %v2894_v13 = vadd.f32 %v2828_v63, %v2781_v12  ;;  %v2605_v18 = vpop.f32.mrf.mxu1 }
 0x3b2   : > { %v2918_v59 = vmax.f32 %v5414_v33, %v2894_v13  ;;  %3580 = vmatmul.msk.f32.gmra.mxu0 %vm223_vm1, %v3748_v27  ;;  %3630 = vmatmul.msk.f32.gmra.mxu2 %vm223_vm1, %v3751_v10  ;;  %v2669_v26 = vadd.f32 %v2605_v18, %v2517_v51 }
 0x3b3   : > { %3605 = vmatmul.msk.f32.gmra.mxu1 %vm223_vm1, %v3752_v2  ;;  %3655 = vmatmul.msk.f32.gmra.mxu3 %vm223_vm1, %v5409_v8  ;;  %v3753_v8 = vld [vmem:[%s3849_s6 + $0xc8] sm:$0xff] }
 0x3b4   : > { %v2946_v57 = vadd.f32 %v5754_v49, %v2918_v59 }
 0x3b5   : > { %v2718_v48 = vpop.f32.mrf.mxu2 }
 0x3b6   : > { %v2970_v52 = vmax.f32 %v2946_v57, 0.0  ;;  %v2782_v50 = vadd.f32 %v2718_v48, %v2669_v26  ;;  %v2831_v33 = vpop.f32.mrf.mxu3 }
 0x3b7   : > { %v2519_v14 = vpop.f32.mrf.mxu0 }
 0x3b8   : > { %2995 = vst.msk [vmem:[%s5769_s13 + $0x18] sm:$0xff] %vm2991_vm2, %v2970_v52  ;;  %v2520_v27 = vadd.f32 %v2519_v14, %v5444_v5  ;;  %v2895_v24 = vadd.f32 %v2831_v33, %v2782_v50  ;;  %v2608_v15 = vpop.f32.mrf.mxu1 }
 0x3ba   : > { %v2919_v22 = vmax.f32 %v5433_v38, %v2895_v24  ;;  %3581 = vmatmul.msk.f32.gmra.mxu0 %vm223_vm1, %v3750_v1  ;;  %3631 = vmatmul.msk.f32.gmra.mxu2 %vm223_vm1, %v3753_v8  ;;  %v2670_v5 = vadd.f32 %v2608_v15, %v2520_v27 }
 0x3bb   : > { %3606 = vmatmul.msk.f32.gmra.mxu1 %vm223_vm1, %v3754_v30  ;;  %3656 = vmatmul.msk.f32.gmra.mxu3 %vm223_vm1, %v5428_v36  ;;  %v3755_v36 = vld [vmem:[%s3849_s6 + $0x1a0] sm:$0xff] }
 0x3bc   : > { %v2947_v56 = vadd.f32 %v5754_v49, %v2919_v22 }
 0x3bd   : > { %v2721_v31 = vpop.f32.mrf.mxu2 }
 0x3be   : > { %v2971_v12 = vmax.f32 %v2947_v56, 0.0  ;;  %v2783_v63 = vadd.f32 %v2721_v31, %v2670_v5  ;;  %v2834_v34 = vpop.f32.mrf.mxu3 }
 0x3bf   : > { %v2522_v38 = vpop.f32.mrf.mxu0 }
 0x3c0   : > { %2996 = vst.msk [vmem:[%s5769_s13 + $0x20] sm:$0xff] %vm2991_vm2, %v2971_v12  ;;  %v2523_v1 = vadd.f32 %v2522_v38, %v5466_v41  ;;  %v2896_v51 = vadd.f32 %v2834_v34, %v2783_v63  ;;  %v2611_v13 = vpop.f32.mrf.mxu1 }
 0x3c2   : > { %v2920_v18 = vmax.f32 %v5452_v28, %v2896_v51  ;;  %3582 = vmatmul.msk.f32.gmra.mxu0 %vm223_vm1, %v3752_v2  ;;  %3632 = vmatmul.msk.f32.gmra.mxu2 %vm223_vm1, %v5460_v43  ;;  %v2671_v41 = vadd.f32 %v2611_v13, %v2523_v1 }
 0x3c3   : > { %3607 = vmatmul.msk.f32.gmra.mxu1 %vm223_vm1, %v3755_v36  ;;  %3657 = vmatmul.msk.f32.gmra.mxu3 %vm223_vm1, %v5447_v16  ;;  %v3756_v16 = vld [vmem:[%s3849_s6 + $0x1a8] sm:$0xff] }
 0x3c4   : > { %v2948_v59 = vadd.f32 %v5754_v49, %v2920_v18 }
 0x3c5   : > { %v2724_v10 = vpop.f32.mrf.mxu2 }
 0x3c6   : > { %v2972_v57 = vmax.f32 %v2948_v59, 0.0  ;;  %v2784_v26 = vadd.f32 %v2724_v10, %v2671_v41  ;;  %v2837_v48 = vpop.f32.mrf.mxu3 }
 0x3c7   : > { %v2525_v28 = vpop.f32.mrf.mxu0 }
 0x3c8   : > { %2997 = vst.msk [vmem:[%s5769_s13 + $0x28] sm:$0xff] %vm2991_vm2, %v2972_v57  ;;  %v2526_v2 = vadd.f32 %v2525_v28, %v5488_v23  ;;  %v2897_v43 = vadd.f32 %v2837_v48, %v2784_v26  ;;  %v2614_v52 = vpop.f32.mrf.mxu1 }
 0x3ca   : > { %v2921_v50 = vmax.f32 %v5474_v54, %v2897_v43  ;;  %3583 = vmatmul.msk.f32.gmra.mxu0 %vm223_vm1, %v3754_v30  ;;  %3633 = vmatmul.msk.f32.gmra.mxu2 %vm223_vm1, %v5482_v47  ;;  %v2672_v14 = vadd.f32 %v2614_v52, %v2526_v2 }
 0x3cb   : > { %3608 = vmatmul.msk.f32.gmra.mxu1 %vm223_vm1, %v3756_v16  ;;  %3658 = vmatmul.msk.f32.gmra.mxu3 %vm223_vm1, %v5469_v21 }
 0x3cc   : > { %v2949_v33 = vadd.f32 %v5754_v49, %v2921_v50 }
 0x3cd   : > { %v2727_v23 = vpop.f32.mrf.mxu2 }
 0x3ce   : > { %v2973_v27 = vmax.f32 %v2949_v33, 0.0  ;;  %v2785_v24 = vadd.f32 %v2727_v23, %v2672_v14  ;;  %v2840_v15 = vpop.f32.mrf.mxu3 }
 0x3cf   : > { %v2528_v54 = vpop.f32.mrf.mxu0 }
 0x3d0   : > { %2998 = vst.msk [vmem:[%s5769_s13 + $0x30] sm:$0xff] %vm2991_vm2, %v2973_v27  ;;  %v2529_v22 = vadd.f32 %v2528_v54, %v5504_v9  ;;  %v2898_v47 = vadd.f32 %v2840_v15, %v2785_v24  ;;  %v2617_v8 = vpop.f32.mrf.mxu1 }
 0x3d2   : > { %v2922_v30 = vmax.f32 %v5493_v19, %v2898_v47  ;;  %v2673_v21 = vadd.f32 %v2617_v8, %v2529_v22 }
 0x3d4   : > { %v2950_v56 = vadd.f32 %v5754_v49, %v2922_v30 }
 0x3d5   : > { %v2730_v5 = vpop.f32.mrf.mxu2 }
 0x3d6   : > { %v2974_v31 = vmax.f32 %v2950_v56, 0.0  ;;  %v2786_v12 = vadd.f32 %v2730_v5, %v2673_v21  ;;  %v2843_v63 = vpop.f32.mrf.mxu3 }
 0x3d7   : > { %v2531_v34 = vpop.f32.mrf.mxu0 }
 0x3d8   : > { %2999 = vst.msk [vmem:[%s5769_s13 + $0x38] sm:$0xff] %vm2991_vm2, %v2974_v31  ;;  %v2532_v38 = vadd.f32 %v2531_v34, %v5520_v40  ;;  %v2899_v1 = vadd.f32 %v2843_v63, %v2786_v12  ;;  %v2620_v51 = vpop.f32.mrf.mxu1 }
 0x3da   : > { %v2923_v9 = vmax.f32 %v5509_v37, %v2899_v1  ;;  %v2674_v19 = vadd.f32 %v2620_v51, %v2532_v38 }
 0x3dc   : > { %v2951_v13 = vadd.f32 %v5754_v49, %v2923_v9 }
 0x3dd   : > { %v2733_v18 = vpop.f32.mrf.mxu2 }
 0x3de   : > { %v2975_v36 = vmax.f32 %v2951_v13, 0.0  ;;  %v2787_v59 = vadd.f32 %v2733_v18, %v2674_v19  ;;  %v2846_v41 = vpop.f32.mrf.mxu3 }
 0x3df   : > { %v2534_v10 = vpop.f32.mrf.mxu0 }
 0x3e0   : > { %3000 = vst.msk [vmem:[%s5769_s13 + $0x40] sm:$0xff] %vm2991_vm2, %v2975_v36  ;;  %v2535_v57 = vadd.f32 %v2534_v10, %v5536_v7  ;;  %v2900_v26 = vadd.f32 %v2846_v41, %v2787_v59  ;;  %v2623_v48 = vpop.f32.mrf.mxu1 }
 0x3e2   : > { %v2924_v40 = vmax.f32 %v5525_v20, %v2900_v26  ;;  %v2675_v37 = vadd.f32 %v2623_v48, %v2535_v57 }
 0x3e4   : > { %v2952_v28 = vadd.f32 %v5754_v49, %v2924_v40 }
 0x3e5   : > { %v2736_v2 = vpop.f32.mrf.mxu2 }
 0x3e6   : > { %v2976_v43 = vmax.f32 %v2952_v28, 0.0  ;;  %v2788_v52 = vadd.f32 %v2736_v2, %v2675_v37  ;;  %v2849_v50 = vpop.f32.mrf.mxu3 }
 0x3e7   : > { %v2537_v16 = vpop.f32.mrf.mxu0 }
 0x3e8   : > { %3001 = vst.msk [vmem:[%s5769_s13 + $0x48] sm:$0xff] %vm2991_vm2, %v2976_v43  ;;  %v2538_v33 = vadd.f32 %v2537_v16, %v5552_v25  ;;  %v2901_v14 = vadd.f32 %v2849_v50, %v2788_v52  ;;  %v2626_v23 = vpop.f32.mrf.mxu1 }
 0x3ea   : > { %v2925_v7 = vmax.f32 %v5541_v62, %v2901_v14  ;;  %v2676_v20 = vadd.f32 %v2626_v23, %v2538_v33 }
 0x3ec   : > { %v2953_v27 = vadd.f32 %v5754_v49, %v2925_v7 }
 0x3ed   : > { %v2739_v24 = vpop.f32.mrf.mxu2 }
 0x3ee   : > { %v2977_v15 = vmax.f32 %v2953_v27, 0.0  ;;  %v2789_v54 = vadd.f32 %v2739_v24, %v2676_v20  ;;  %v2852_v22 = vpop.f32.mrf.mxu3 }
 0x3ef   : > { %v2540_v47 = vpop.f32.mrf.mxu0 }
 0x3f0   : > { %3002 = vst.msk [vmem:[%s5769_s13 + $0x50] sm:$0xff] %vm2991_vm2, %v2977_v15  ;;  %v2541_v8 = vadd.f32 %v2540_v47, %v5568_v17  ;;  %v2902_v30 = vadd.f32 %v2852_v22, %v2789_v54  ;;  %v2629_v56 = vpop.f32.mrf.mxu1 }
 0x3f2   : > { %v2926_v25 = vmax.f32 %v5557_v60, %v2902_v30  ;;  %v2677_v62 = vadd.f32 %v2629_v56, %v2541_v8 }
 0x3f4   : > { %v2954_v21 = vadd.f32 %v5754_v49, %v2926_v25 }
 0x3f5   : > { %v2742_v5 = vpop.f32.mrf.mxu2 }
 0x3f6   : > { %v2978_v31 = vmax.f32 %v2954_v21, 0.0  ;;  %v2790_v12 = vadd.f32 %v2742_v5, %v2677_v62  ;;  %v2855_v63 = vpop.f32.mrf.mxu3 }
 0x3f7   : > { %v2543_v34 = vpop.f32.mrf.mxu0 }
 0x3f8   : > { %3003 = vst.msk [vmem:[%s5769_s13 + $0x58] sm:$0xff] %vm2991_vm2, %v2978_v31  ;;  %v2544_v38 = vadd.f32 %v2543_v34, %v5584_v61  ;;  %v2903_v1 = vadd.f32 %v2855_v63, %v2790_v12  ;;  %v2632_v51 = vpop.f32.mrf.mxu1 }
 0x3fa   : > { %v2927_v17 = vmax.f32 %v5573_v35, %v2903_v1  ;;  %v2678_v60 = vadd.f32 %v2632_v51, %v2544_v38  ;;  %v6288_v51 = vld [vmem:[#allocation37_spill] sm:$0xff] }
 0x3fc   : > { %v2955_v9 = vadd.f32 %v5754_v49, %v2927_v17 }
 0x3fd   : > { %v2745_v13 = vpop.f32.mrf.mxu2 }
 0x3fe   : > { %v2979_v19 = vmax.f32 %v2955_v9, 0.0  ;;  %v2791_v18 = vadd.f32 %v2745_v13, %v2678_v60  ;;  %v2858_v36 = vpop.f32.mrf.mxu3 }
 0x3ff   : > { %v2546_v59 = vpop.f32.mrf.mxu0 }
 0x400   : > { %3004 = vst.msk [vmem:[%s5769_s13 + $0x60] sm:$0xff] %vm2991_vm2, %v2979_v19  ;;  %v2547_v41 = vadd.f32 %v2546_v59, %v5600_v3  ;;  %v2904_v10 = vadd.f32 %v2858_v36, %v2791_v18  ;;  %v2635_v57 = vpop.f32.mrf.mxu1 }
 0x402   : > { %v2928_v61 = vmax.f32 %v5589_v58, %v2904_v10  ;;  %v2679_v35 = vadd.f32 %v2635_v57, %v2547_v41 }
 0x404   : > { %v2956_v26 = vadd.f32 %v5754_v49, %v2928_v61 }
 0x405   : > { %v2748_v48 = vpop.f32.mrf.mxu2 }
 0x406   : > { %v2980_v40 = vmax.f32 %v2956_v26, 0.0  ;;  %v2792_v28 = vadd.f32 %v2748_v48, %v2679_v35  ;;  %v2861_v37 = vpop.f32.mrf.mxu3  ;;  %v6290_v48 = vld [vmem:[#allocation40_spill] sm:$0xff] }
 0x407   : > { %v2549_v2 = vpop.f32.mrf.mxu0 }
 0x408   : > { %3005 = vst.msk [vmem:[%s5769_s13 + $0x68] sm:$0xff] %vm2991_vm2, %v2980_v40  ;;  %v2550_v43 = vadd.f32 %v2549_v2, %v5615_v42  ;;  %v2905_v52 = vadd.f32 %v2861_v37, %v2792_v28  ;;  %v2638_v50 = vpop.f32.mrf.mxu1 }
 0x40a   : > { %v2929_v3 = vmax.f32 %v5605_v53, %v2905_v52  ;;  %v2680_v58 = vadd.f32 %v2638_v50, %v2550_v43 }
 0x40c   : > { %v2957_v16 = vadd.f32 %v5754_v49, %v2929_v3 }
 0x40d   : > { %v2751_v33 = vpop.f32.mrf.mxu2 }
 0x40e   : > { %v2981_v14 = vmax.f32 %v2957_v16, 0.0  ;;  %v2793_v23 = vadd.f32 %v2751_v33, %v2680_v58  ;;  %v2864_v7 = vpop.f32.mrf.mxu3 }
 0x40f   : > { %v2552_v27 = vpop.f32.mrf.mxu0 }
 0x410   : > { %3006 = vst.msk [vmem:[%s5769_s13 + $0x70] sm:$0xff] %vm2991_vm2, %v2981_v14  ;;  %v2553_v20 = vadd.f32 %v2552_v27, %v5630_v32  ;;  %v2906_v24 = vadd.f32 %v2864_v7, %v2793_v23  ;;  %v2641_v15 = vpop.f32.mrf.mxu1  ;;  %v6287_v32 = vld [vmem:[#allocation42_spill] sm:$0xff] }
 0x412   : > { %v2930_v42 = vmax.f32 %v5620_v39, %v2906_v24  ;;  %v2681_v53 = vadd.f32 %v2641_v15, %v2553_v20 }
 0x414   : > { %v2958_v54 = vadd.f32 %v5754_v49, %v2930_v42 }
 0x415   : > { %v2754_v22 = vpop.f32.mrf.mxu2 }
 0x416   : > { %v2982_v47 = vmax.f32 %v2958_v54, 0.0  ;;  %v2794_v8 = vadd.f32 %v2754_v22, %v2681_v53  ;;  %v2867_v30 = vpop.f32.mrf.mxu3 }
 0x417   : > { %v2555_v56 = vpop.f32.mrf.mxu0 }
 0x418   : > { %3007 = vst.msk [vmem:[%s5769_s13 + $0x78] sm:$0xff] %vm2991_vm2, %v2982_v47  ;;  %v2556_v25 = vadd.f32 %v2555_v56, %v5645_v4  ;;  %v2907_v21 = vadd.f32 %v2867_v30, %v2794_v8  ;;  %v2644_v62 = vpop.f32.mrf.mxu1  ;;  %v6289_v4 = vld [vmem:[#allocation22_spill] sm:$0xff] }
 0x41a   : > { %v2931_v5 = vmax.f32 %v6287_v32, %v2907_v21  ;;  %v2682_v39 = vadd.f32 %v2644_v62, %v2556_v25 }
 0x41c   : > { %v2959_v31 = vadd.f32 %v5754_v49, %v2931_v5 }
 0x41d   : > { %v2757_v12 = vpop.f32.mrf.mxu2 }
 0x41e   : > { %v2983_v63 = vmax.f32 %v2959_v31, 0.0  ;;  %v2795_v34 = vadd.f32 %v2757_v12, %v2682_v39  ;;  %v2870_v38 = vpop.f32.mrf.mxu3 }
 0x41f   : > { %v2558_v1 = vpop.f32.mrf.mxu0 }
 0x420   : > { %3008 = vst.msk [vmem:[%s5769_s13 + $0x80] sm:$0xff] %vm2991_vm2, %v2983_v63  ;;  %v2559_v17 = vadd.f32 %v2558_v1, %v6288_v51  ;;  %v2908_v9 = vadd.f32 %v2870_v38, %v2795_v34  ;;  %v2647_v60 = vpop.f32.mrf.mxu1 }
 0x422   : > { %v2932_v13 = vmax.f32 %v6289_v4, %v2908_v9  ;;  %v2683_v18 = vadd.f32 %v2647_v60, %v2559_v17 }
 0x424   : > { %v2960_v19 = vadd.f32 %v5754_v49, %v2932_v13 }
 0x425   : > { %v2760_v36 = vpop.f32.mrf.mxu2 }
 0x426   : > { %v2984_v59 = vmax.f32 %v2960_v19, 0.0  ;;  %v2796_v41 = vadd.f32 %v2760_v36, %v2683_v18  ;;  %v2873_v10 = vpop.f32.mrf.mxu3 }
 0x427   : > { %v2561_v57 = vpop.f32.mrf.mxu0 }
 0x428   : > { %3009 = vst.msk [vmem:[%s5769_s13 + $0x88] sm:$0xff] %vm2991_vm2, %v2984_v59  ;;  %v2562_v61 = vadd.f32 %v2561_v57, %v5675_v55  ;;  %v2909_v26 = vadd.f32 %v2873_v10, %v2796_v41  ;;  %v2650_v35 = vpop.f32.mrf.mxu1  ;;  %v6291_v55 = vld [vmem:[#allocation43_spill] sm:$0xff] }
 0x42a   : > { %v2933_v40 = vmax.f32 %v6290_v48, %v2909_v26  ;;  %v2684_v37 = vadd.f32 %v2650_v35, %v2562_v61 }
 0x42c   : > { %v2961_v28 = vadd.f32 %v5754_v49, %v2933_v40 }
 0x42d   : > { %v2763_v2 = vpop.f32.mrf.mxu2 }
 0x42e   : > { %v2985_v43 = vmax.f32 %v2961_v28, 0.0  ;;  %v2797_v52 = vadd.f32 %v2763_v2, %v2684_v37  ;;  %v2876_v50 = vpop.f32.mrf.mxu3 }
 0x42f   : > { %v2564_v3 = vpop.f32.mrf.mxu0 }
 0x430   : > { %3010 = vst.msk [vmem:[%s5769_s13 + $0x90] sm:$0xff] %vm2991_vm2, %v2985_v43  ;;  %v2565_v16 = vadd.f32 %v2564_v3, %v5690_v0  ;;  %v2910_v58 = vadd.f32 %v2876_v50, %v2797_v52  ;;  %v2653_v33 = vpop.f32.mrf.mxu1  ;;  %v6292_v0 = vld [vmem:[#allocation23_spill] sm:$0xff] }
 0x432   : > { %v2934_v14 = vmax.f32 %v6291_v55, %v2910_v58  ;;  %v2685_v7 = vadd.f32 %v2653_v33, %v2565_v16 }
 0x434   : > { %v2962_v23 = vadd.f32 %v5754_v49, %v2934_v14 }
 0x435   : > { %v2766_v27 = vpop.f32.mrf.mxu2 }
 0x436   : > { %v2986_v20 = vmax.f32 %v2962_v23, 0.0  ;;  %v2798_v24 = vadd.f32 %v2766_v27, %v2685_v7  ;;  %v2879_v15 = vpop.f32.mrf.mxu3 }
 0x437   : > { %v2567_v42 = vpop.f32.mrf.mxu0 }
 0x438   : > { %3011 = vst.msk [vmem:[%s5769_s13 + $0x98] sm:$0xff] %vm2991_vm2, %v2986_v20  ;;  %v2568_v54 = vadd.f32 %v2567_v42, %v5705_v11  ;;  %v2911_v53 = vadd.f32 %v2879_v15, %v2798_v24  ;;  %v2656_v22 = vpop.f32.mrf.mxu1 }
 0x43a   : > { %v2935_v47 = vmax.f32 %v6292_v0, %v2911_v53  ;;  %v2686_v30 = vadd.f32 %v2656_v22, %v2568_v54 }
 0x43c   : > { %v2963_v8 = vadd.f32 %v5754_v49, %v2935_v47 }
 0x43d   : > { %v2769_v56 = vpop.f32.mrf.mxu2 }
 0x43e   : > { %v2987_v25 = vmax.f32 %v2963_v8, 0.0  ;;  %v2799_v21 = vadd.f32 %v2769_v56, %v2686_v30  ;;  %v2882_v62 = vpop.f32.mrf.mxu3 }
 0x43f   : > { %v2570_v32 = vpop.f32.mrf.mxu0 }
 0x440   : > { %3012 = vst.msk [vmem:[%s5769_s13 + $0xa0] sm:$0xff] %vm2991_vm2, %v2987_v25  ;;  %v2571_v5 = vadd.f32 %v2570_v32, %v5720_v46  ;;  %v2912_v31 = vadd.f32 %v2882_v62, %v2799_v21  ;;  %v2659_v39 = vpop.f32.mrf.mxu1 }
 0x442   : > { %v2936_v11 = vmax.f32 %v5710_v29, %v2912_v31  ;;  %v2687_v63 = vadd.f32 %v2659_v39, %v2571_v5 }
 0x444   : > { %v2964_v12 = vadd.f32 %v5754_v49, %v2936_v11 }
 0x445   : > { %v2772_v34 = vpop.f32.mrf.mxu2 }
 0x446   : > { %v2988_v38 = vmax.f32 %v2964_v12, 0.0  ;;  %v2800_v1 = vadd.f32 %v2772_v34, %v2687_v63  ;;  %v2885_v51 = vpop.f32.mrf.mxu3 }
 0x447   : > { %v2573_v17 = vpop.f32.mrf.mxu0 }
 0x448   : > { %3013 = vst.msk [vmem:[%s5769_s13 + $0xa8] sm:$0xff] %vm2991_vm2, %v2988_v38  ;;  %v2574_v9 = vadd.f32 %v2573_v17, %v5735_v44  ;;  %v2913_v60 = vadd.f32 %v2885_v51, %v2800_v1  ;;  %v2662_v46 = vpop.f32.mrf.mxu1 }
 0x44a   : > { %v2937_v4 = vmax.f32 %v5725_v45, %v2913_v60  ;;  %v2688_v13 = vadd.f32 %v2662_v46, %v2574_v9 }
 0x44c   : > { %v2965_v29 = vadd.f32 %v5754_v49, %v2937_v4 }
 0x44d   : > { %v2775_v19 = vpop.f32.mrf.mxu2 }
 0x44e   : > { %v2989_v18 = vmax.f32 %v2965_v29, 0.0  ;;  %v2801_v36 = vadd.f32 %v2775_v19, %v2688_v13  ;;  %v2888_v59 = vpop.f32.mrf.mxu3 }
 0x450   : > { %3014 = vst.msk [vmem:[%s5769_s13 + $0xb0] sm:$0xff] %vm2991_vm2, %v2989_v18  ;;  %v2914_v41 = vadd.f32 %v2888_v59, %v2801_v36 }
 0x452   : > { %v2938_v10 = vmax.f32 %v5740_v6, %v2914_v41 }
 0x454   : > { %v2966_v57 = vadd.f32 %v5754_v49, %v2938_v10 }
 0x456   : > { %v2990_v61 = vmax.f32 %v2966_v57, 0.0 }
 0x458   : > { %3015 = vst.msk [vmem:[%s5769_s13 + $0xb8] sm:$0xff] %vm2991_vm2, %v2990_v61 }
 0x459 PF: > { %s13_s12 = sadd.s32 1, %s3763_s12  }
 0x45a   : > { %p10_p4 = scmp.ge.s32.totalorder %s13_s12, 4  }
 0x45c   :  { %12 = sbr.rel (!%p10_p4) target bundleno = 1 (0x1), region = 72 }

// kernel: cnn_regressor_forward.4
= control target key start
LH: loop header
LB: loop body
LE: loop exit
PB: predicated region body
PF: predicated region fallthrough
CT: control target
= control target key end

     0   :  { %s2734_s12 = smov 0   ;;  %s4733_s0 = inlined_call_operand.vmem [shape: f32[2,4,64,160], index: 0, kind: input, shape index: {}]   ;;  %s4734_s1 = inlined_call_operand.vmem [shape: f32[5,160,64], index: 1, kind: input, shape index: {}]   ;;  %s4735_s2 = inlined_call_operand.vmem [shape: f32[1,64], index: 2, kind: input, shape index: {}]   ;;  %s4736_s3 = inlined_call_operand.vmem [shape: f32[2,48,64], index: 3, kind: output, shape index: {}]  }
   0x1 LB: > { %s2207_s13 = sadd.s32 4294967295, %s2712_s12   ;;  %p2211_p0 = scmp.ge.s32.totalorder %s2712_s12, 1  ;;  %s2712_s12 = sphi %s2734_s12, %s13_s12  }
   0x2   : > { %p137_p1 = scmp.lt.s32.totalorder %s2712_s12, 3 }
   0x4   : > { %p138_p2 = pnand %p2211_p0, %p137_p1 }
   0x6   : > { %141 = sbr.rel (%p138_p2) target bundleno = 658 (0x292), region = 32 }
   0xb   : > { %v2745_v0 = vld [vmem:[%s4734_s1 + $0x118] sm:$0xff]  ;;  %p161_p3 = scmp.lt.s32.totalorder %s2207_s13, 1  ;;  %v2767_v4 = vld [vmem:[%s4734_s1 + $0x110] sm:$0xff]  ;;  %v2789_v8 = vld [vmem:[%s4734_s1 + $0x108] sm:$0xff]  ;;  %vm237_vm0 = vcmask 261120   ;;  %vm2145_vm1 = vcmask 523264  }
   0xc   : > { %4859 = vst [vmem:[#allocation2_spill] sm:$0xff] %v2745_v0  ;;  %v2750_v1 = vld [vmem:[%s4734_s1 + $0x138] sm:$0xff]  ;;  %256 = vmatpush.msra.mxu0 %v2745_v0  ;;  %v2772_v5 = vld [vmem:[%s4734_s1 + $0x130] sm:$0xff]  ;;  %v2798_v9 = vld [vmem:[%s4734_s1 + $0x128] sm:$0xff] }
   0xd   : > { %4860 = vst [vmem:[#allocation3_spill] sm:$0xff] %v2750_v1  ;;  %v2755_v2 = vld [vmem:[%s4734_s1 + $0x78] sm:$0xff]  ;;  %303 = vmatpush.msra.mxu1 %v2750_v1  ;;  %v2779_v6 = vld [vmem:[%s4734_s1 + $0x70] sm:$0xff]  ;;  %s5054_s13 = smov (!%p161_p3, %s2207_s13), 1  ;;  %v2803_v10 = vld [vmem:[%s4734_s1 + $0x68] sm:$0xff] }
   0xe   : > { %v2762_v3 = vld [vmem:[%s4734_s1 + $0x98] sm:$0xff]  ;;  %4861 = vst [vmem:[#allocation4_spill] sm:$0xff] %v2772_v5  ;;  %344 = vmatpush.msra.mxu2 %v2755_v2  ;;  %v2784_v7 = vld [vmem:[%s4734_s1 + $0x90] sm:$0xff]  ;;  %257 = vmatpush.msra.mxu0 %v2767_v4  ;;  %v2808_v11 = vld [vmem:[%s4734_s1 + $0x88] sm:$0xff]  ;;  %s2525_s17 = sshll.u32 %s5054_s13, 9  ;;  %s2546_s7 = smul.u32 48, %s5054_s13 }
   0xf   : > { %391 = vmatpush.msra.mxu3 %v2762_v3  ;;  %304 = vmatpush.msra.mxu1 %v2772_v5  ;;  %4862 = vst [vmem:[#allocation5_spill] sm:$0xff] %v2798_v9  ;;  %v2815_v12 = vld [vmem:[%s4734_s1 + $0x100] sm:$0xff]  ;;  %s2838_s24 = scalar_lea.vmem %s4733_s0, %s2525_s17  ;;  %v2849_v18 = vld [vmem:[%s4734_s1 + $0xf8] sm:$0xff]  ;;  %v2868_v21 = vld [vmem:[%s4734_s1 + $0xf0] sm:$0xff] }
  0x10   : > { %345 = vmatpush.msra.mxu2 %v2779_v6  ;;  %v2820_v13 = vld [vmem:[%s4734_s1 + $0x120] sm:$0xff]  ;;  %258 = vmatpush.msra.mxu0 %v2789_v8  ;;  %v2216_v16 = vld [vmem:[%s2838_s24 + $0x108] sm:$0xff]  ;;  %v2854_v19 = vld [vmem:[%s4734_s1 + $0x58] sm:$0xff]  ;;  %s4692_s10 = scalar_lea.vmem %s4736_s3, %s2546_s7 }
  0x11   : > { %392 = vmatpush.msra.mxu3 %v2784_v7  ;;  %4863 = vst [vmem:[#allocation6_spill] sm:$0xff] %v2820_v13  ;;  %305 = vmatpush.msra.mxu1 %v2798_v9  ;;  %v2828_v14 = vld [vmem:[%s4734_s1 + $0x60] sm:$0xff]  ;;  %v172_v17 = vld [vmem:[%s2838_s24 + $0x8] sm:$0xff]  ;;  %v2861_v20 = vld [vmem:[%s4734_s1 + $0x1d8] sm:$0xff] }
  0x12   : > { %v2833_v15 = vld [vmem:[%s4734_s1 + $0x80] sm:$0xff]  ;;  %346 = vmatpush.msra.mxu2 %v2803_v10  ;;  %259 = vmatpush.msra.mxu0 %v2815_v12  ;;  %v2873_v22 = vld [vmem:[%s4734_s1 + $0x50] sm:$0xff]  ;;  %v2880_v23 = vld [vmem:[%s4734_s1 + $0xe8] sm:$0xff] }
  0x13   : > { %393 = vmatpush.msra.mxu3 %v2808_v11  ;;  %306 = vmatpush.msra.mxu1 %v2820_v13  ;;  %v2885_v24 = vld [vmem:[%s4734_s1 + $0x48] sm:$0xff]  ;;  %v2891_v25 = vld [vmem:[%s4734_s1 + $0x1b8] sm:$0xff]  ;;  %v2898_v26 = vld [vmem:[%s4734_s1 + $0xe0] sm:$0xff] }
  0x14   : > { %347 = vmatpush.msra.mxu2 %v2828_v14  ;;  %2247 = vmatmul.msk.f32.vlgmr.msra.gmra.mxu1 %vm237_vm0, %v2216_v16  ;;  %v2903_v27 = vld [vmem:[%s4734_s1 + $0x40] sm:$0xff]  ;;  %v2906_v28 = vld [vmem:[%s2838_s24 + $0x118] sm:$0xff]  ;;  %v2917_v30 = vld [vmem:[%s4734_s1 + $0x1b0] sm:$0xff] }
  0x15   : > { %394 = vmatpush.msra.mxu3 %v2833_v15  ;;  %260 = vmatpush.msra.mxu0 %v2849_v18  ;;  %v2912_v29 = vld [vmem:[%s2838_s24 + $0x18] sm:$0xff]  ;;  %v2922_v31 = vld [vmem:[%s4734_s1 + $0x1d0] sm:$0xff]  ;;  %v2941_v34 = vld [vmem:[%s4734_s1 + $0x1a8] sm:$0xff] }
  0x16   : > { %2253 = vmatmul.msk.f32.vlgmr.msra.gmra.mxu3 %vm237_vm0, %v172_v17  ;;  %348 = vmatpush.msra.mxu2 %v2854_v19  ;;  %4864 = vst [vmem:[#allocation7_spill] sm:$0xff] %v2922_v31  ;;  %v2927_v32 = vld [vmem:[%s4734_s1 + $0xd8] sm:$0xff]  ;;  %v2950_v35 = vld [vmem:[%s4734_s1 + $0xd0] sm:$0xff]  ;;  %v2962_v37 = vld [vmem:[%s4734_s1 + $0x1a0] sm:$0xff] }
  0x17   : > { %512 = vmatpush.msrb.mxu3 %v2861_v20  ;;  %261 = vmatpush.msra.mxu0 %v2868_v21  ;;  %v2932_v33 = vld [vmem:[%s4734_s1 + $0x38] sm:$0xff]  ;;  %4865 = vst [vmem:[#allocation8_spill] sm:$0xff] %v2941_v34  ;;  %v2955_v36 = vld [vmem:[%s4734_s1 + $0x30] sm:$0xff]  ;;  %v2967_v38 = vld [vmem:[%s4734_s1 + $0xc8] sm:$0xff] }
  0x18   : > { %349 = vmatpush.msra.mxu2 %v2873_v22  ;;  %465 = vmatpush.msrb.mxu1 %v2891_v25  ;;  %4866 = vst [vmem:[#allocation9_spill] sm:$0xff] %v2955_v36  ;;  %v2972_v39 = vld [vmem:[%s4734_s1 + $0x28] sm:$0xff]  ;;  %v2980_v40 = vld [vmem:[%s4734_s1 + $0x198] sm:$0xff]  ;;  %v2990_v42 = vld [vmem:[%s4734_s1 + $0xc0] sm:$0xff] }
  0x19   : > { %262 = vmatpush.msra.mxu0 %v2880_v23  ;;  %513 = vmatpush.msrb.mxu3 %v2922_v31  ;;  %4867 = vst [vmem:[#allocation10_spill] sm:$0xff] %v2962_v37  ;;  %v2985_v41 = vld [vmem:[%s4734_s1 + $0x1c8] sm:$0xff]  ;;  %v2995_v43 = vld [vmem:[%s4734_s1 + $0x20] sm:$0xff]  ;;  %v3010_v46 = vld [vmem:[%s4734_s1 + $0xb8] sm:$0xff] }
  0x1a   : > { %350 = vmatpush.msra.mxu2 %v2885_v24  ;;  %466 = vmatpush.msrb.mxu1 %v2917_v30  ;;  %4868 = vst [vmem:[#allocation11_spill] sm:$0xff] %v2972_v39  ;;  %v3002_v44 = vld [vmem:[%s2838_s24 + $0x128] sm:$0xff]  ;;  %v3015_v47 = vld [vmem:[%s4734_s1 + $0x18] sm:$0xff]  ;;  %v3023_v48 = vld [vmem:[%s4734_s1 + $0x190] sm:$0xff] }
  0x1b   : > { %263 = vmatpush.msra.mxu0 %v2898_v26  ;;  %4869 = vst [vmem:[#allocation12_spill] sm:$0xff] %v2980_v40  ;;  %514 = vmatpush.msrb.mxu3 %v2985_v41  ;;  %v3005_v45 = vld [vmem:[%s2838_s24 + $0x28] sm:$0xff]  ;;  %v3032_v49 = vld [vmem:[%s4734_s1 + $0xb0] sm:$0xff]  ;;  %v3049_v52 = vld [vmem:[%s4734_s1 + $0x1c0] sm:$0xff] }
  0x1c   : > { %351 = vmatpush.msra.mxu2 %v2903_v27  ;;  %2248 = vmatmul.msk.f32.gmra.mxu1 %vm237_vm0, %v2906_v28  ;;  %4870 = vst [vmem:[#allocation13_spill] sm:$0xff] %v2995_v43  ;;  %v3037_v50 = vld [vmem:[%s4734_s1 + $0x10] sm:$0xff]  ;;  %v3044_v51 = vld [vmem:[%s4734_s1 + $0x188] sm:$0xff]  ;;  %v3068_v55 = vld [vmem:[%s4734_s1 + $0x278] sm:$0xff] }
  0x1d   : > { %264 = vmatpush.msra.mxu0 %v2927_v32  ;;  %467 = vmatpush.msrb.mxu1 %v2941_v34  ;;  %4871 = vst [vmem:[#allocation14_spill] sm:$0xff] %v3015_v47  ;;  %v3054_v53 = vld [vmem:[%s4734_s1 + $0xa8] sm:$0xff]  ;;  %v3073_v56 = vld [vmem:[%s4734_s1 + $0x180] sm:$0xff]  ;;  %v3091_v60 = vld [vmem:[%s2838_s24 + $0x138] sm:$0xff] }
  0x1e   : > { %2254 = vmatmul.msk.f32.gmra.mxu3 %vm237_vm0, %v2912_v29  ;;  %352 = vmatpush.msra.mxu2 %v2932_v33  ;;  %4872 = vst [vmem:[#allocation15_spill] sm:$0xff] %v3023_v48  ;;  %v3059_v54 = vld [vmem:[%s4734_s1 + $0x8] sm:$0xff]  ;;  %v3078_v57 = vld [vmem:[%s4734_s1 + $0xa0] sm:$0xff]  ;;  %v3096_v61 = vld [vmem:[%s4734_s1 + $0x270] sm:$0xff] }
  0x1f   : > { %265 = vmatpush.msra.mxu0 %v2950_v35  ;;  %468 = vmatpush.msrb.mxu1 %v2962_v37  ;;  %4873 = vst [vmem:[#allocation16_spill] sm:$0xff] %v3037_v50  ;;  %v3083_v58 = vld [vmem:[%s4734_s1] sm:$0xff]  ;;  %v3100_v63 = vld [vmem:[%s2838_s24 + $0x38] sm:$0xff] }
  0x20   : > { %353 = vmatpush.msra.mxu2 %v2955_v36  ;;  %4874 = vst [vmem:[#allocation17_spill] sm:$0xff] %v3044_v51  ;;  %515 = vmatpush.msrb.mxu3 %v3049_v52  ;;  %v2215_v59 = vld [vmem:[%s2838_s24 + $0x100] sm:$0xff]  ;;  %v3109_v16 = vld [vmem:[%s4734_s1 + $0x258] sm:$0xff] }
  0x21   : > { %266 = vmatpush.msra.mxu0 %v2967_v38  ;;  %469 = vmatpush.msrb.mxu1 %v2980_v40  ;;  %4875 = vst [vmem:[#allocation18_spill] sm:$0xff] %v3049_v52  ;;  %v171_v62 = vld [vmem:[%s2838_s24] sm:$0xff]  ;;  %v3116_v17 = vld [vmem:[%s4734_s1 + $0x178] sm:$0xff]  ;;  %v3204_v40 = vld [vmem:[%s4734_s1 + $0x150] sm:$0xff] }
  0x22   : > { %354 = vmatpush.msra.mxu2 %v2972_v39  ;;  %4876 = vst [vmem:[#allocation19_spill] sm:$0xff] %v3059_v54  ;;  %2526 = vmatpush.msra.mxu3 %v3068_v55  ;;  %v3225_v37 = vld [vmem:[%s2838_s24 + $0x58] sm:$0xff] }
  0x23   : > { %267 = vmatpush.msra.mxu0 %v2990_v42  ;;  %470 = vmatpush.msrb.mxu1 %v3023_v48  ;;  %4877 = vst [vmem:[#allocation20_spill] sm:$0xff] %v3068_v55  ;;  %v3168_v48 = vld [vmem:[%s2838_s24 + $0x48] sm:$0xff] }
  0x24   : > { %355 = vmatpush.msra.mxu2 %v2995_v43  ;;  %2249 = vmatmul.msk.f32.gmra.mxu1 %vm237_vm0, %v3002_v44  ;;  %4878 = vst [vmem:[#allocation21_spill] sm:$0xff] %v3073_v56  ;;  %v3376_v43 = vld [vmem:[%s2838_s24 + $0x50] sm:$0xff] }
  0x25   : > { %268 = vmatpush.msra.mxu0 %v3010_v46  ;;  %4879 = vst [vmem:[#allocation22_spill] sm:$0xff] %v3083_v58  ;;  %471 = vmatpush.msrb.mxu1 %v3044_v51  ;;  %v3157_v51 = vld [vmem:[%s2838_s24 + $0x110] sm:$0xff] }
  0x26   : > { %2255 = vmatmul.msk.f32.gmra.mxu3 %vm237_vm0, %v3005_v45  ;;  %356 = vmatpush.msra.mxu2 %v3015_v47  ;;  %4880 = vst [vmem:[#allocation23_spill] sm:$0xff] %v3096_v61  ;;  %v3209_v47 = vld [vmem:[%s4734_s1 + $0x230] sm:$0xff] }
  0x27   : > { %269 = vmatpush.msra.mxu0 %v3032_v49  ;;  %472 = vmatpush.msrb.mxu1 %v3073_v56  ;;  %4881 = vst [vmem:[#allocation24_spill] sm:$0xff] %v3109_v16  ;;  %v3123_v56 = vld [vmem:[%s4734_s1 + $0x250] sm:$0xff] }
  0x28   : > { %357 = vmatpush.msra.mxu2 %v3037_v50  ;;  %2527 = vmatpush.msra.mxu3 %v3096_v61  ;;  %4882 = vst [vmem:[#allocation25_spill] sm:$0xff] %v3116_v17  ;;  %v3176_v50 = vld [vmem:[%s4734_s1 + $0x160] sm:$0xff] }
  0x29   : > { %270 = vmatpush.msra.mxu0 %v3054_v53  ;;  %4883 = vst [vmem:[#allocation26_spill] sm:$0xff] %v3123_v56  ;;  %473 = vmatpush.msrb.mxu1 %v3116_v17  ;;  %v3154_v17 = vld [vmem:[%s4734_s1 + $0x260] sm:$0xff] }
  0x2a   : > { %358 = vmatpush.msra.mxu2 %v3059_v54  ;;  %4888 = vst [vmem:[#allocation31_spill] sm:$0xff] %v3154_v17  ;;  %v3160_v54 = vld [vmem:[%s2838_s24 + $0x148] sm:$0xff] }
  0x2b   : > { %271 = vmatpush.msra.mxu0 %v3078_v57  ;;  %4890 = vst [vmem:[#allocation33_spill] sm:$0xff] %v3176_v50 }
  0x2c   : > { %359 = vmatpush.msra.mxu2 %v3083_v58  ;;  %272 = vmatmul.f32.vlgmr.msra.gmra.mxu0 %v2215_v59  ;;  %v3130_v59 = vld [vmem:[%s4734_s1 + $0x170] sm:$0xff]  ;;  %v3141_v58 = vld [vmem:[%s4734_s1 + $0x248] sm:$0xff]  ;;  %4894 = vst [vmem:[#allocation37_spill] sm:$0xff] %v3204_v40 }
  0x2d   : > { %2250 = vmatmul.msk.f32.gmra.mxu1 %vm237_vm0, %v3091_v60  ;;  %360 = vmatmul.f32.vlgmr.msra.gmra.mxu2 %v171_v62  ;;  %4884 = vst [vmem:[#allocation27_spill] sm:$0xff] %v3130_v59  ;;  %v3135_v62 = vld [vmem:[%s4734_s1 + $0x268] sm:$0xff] }
  0x2e   : > { %2256 = vmatmul.msk.f32.gmra.mxu3 %vm237_vm0, %v3100_v63  ;;  %639 = vmatpush.msrb.mxu2 %v3068_v55  ;;  %4885 = vst [vmem:[#allocation28_spill] sm:$0xff] %v3135_v62 }
  0x2f   : > { %592 = vmatpush.msrb.mxu0 %v3109_v16  ;;  %4886 = vst [vmem:[#allocation29_spill] sm:$0xff] %v3141_v58  ;;  %2528 = vmatpush.msra.mxu3 %v3135_v62  ;;  %v3149_v16 = vld [vmem:[%s4734_s1 + $0x168] sm:$0xff] }
  0x30   : > { %640 = vmatpush.msrb.mxu2 %v3096_v61  ;;  %4887 = vst [vmem:[#allocation30_spill] sm:$0xff] %v3149_v16  ;;  %474 = vmatpush.msrb.mxu1 %v3130_v59  ;;  %v3181_v59 = vld [vmem:[%s4734_s1 + $0x240] sm:$0xff] }
  0x31   : > { %593 = vmatpush.msrb.mxu0 %v3123_v56  ;;  %2529 = vmatpush.msra.mxu3 %v3154_v17  ;;  %v3165_v56 = vld [vmem:[%s2838_s24 + $0x10] sm:$0xff]  ;;  %4891 = vst [vmem:[#allocation34_spill] sm:$0xff] %v3181_v59 }
  0x32   : > { %4889 = vst [vmem:[#allocation32_spill] sm:$0xff] %v3165_v56  ;;  %641 = vmatpush.msrb.mxu2 %v3135_v62  ;;  %475 = vmatpush.msrb.mxu1 %v3149_v16  ;;  %v3192_v16 = vld [vmem:[%s4734_s1 + $0x158] sm:$0xff]  ;;  %v3215_v62 = vld [vmem:[%s2838_s24 + $0x120] sm:$0xff] }
  0x33   : > { %594 = vmatpush.msrb.mxu0 %v3141_v58  ;;  %4892 = vst [vmem:[#allocation35_spill] sm:$0xff] %v3192_v16  ;;  %v3197_v58 = vld [vmem:[%s4734_s1 + $0x238] sm:$0xff] }
  0x34   : > { %275 = vmatmul.f32.gmra.mxu0 %v3157_v51  ;;  %4893 = vst [vmem:[#allocation36_spill] sm:$0xff] %v3197_v58  ;;  %476 = vmatpush.msrb.mxu1 %v3176_v50  ;;  %v3218_v50 = vld [vmem:[%s2838_s24 + $0x158] sm:$0xff] }
  0x35   : > { %2251 = vmatmul.msk.f32.gmra.mxu1 %vm237_vm0, %v3160_v54  ;;  %363 = vmatmul.f32.gmra.mxu2 %v3165_v56  ;;  %4895 = vst [vmem:[#allocation38_spill] sm:$0xff] %v3209_v47 }
  0x36   : > { %2257 = vmatmul.msk.f32.gmra.mxu3 %vm237_vm0, %v3168_v48  ;;  %595 = vmatpush.msrb.mxu0 %v3181_v59  ;;  %v3222_v59 = vld [vmem:[%s2838_s24 + $0x20] sm:$0xff]  ;;  %4918 = vst [vmem:[#allocation61_spill] sm:$0xff] %v3376_v43 }
  0x37   : > { %642 = vmatpush.msrb.mxu2 %v3154_v17  ;;  %477 = vmatpush.msrb.mxu1 %v3192_v16  ;;  %4896 = vst [vmem:[#allocation39_spill] sm:$0xff] %v3222_v59  ;;  %v3232_v16 = vld [vmem:[%s4734_s1 + $0x148] sm:$0xff]  ;;  %v3282_v17 = vld [vmem:[%s2838_s24 + $0x30] sm:$0xff] }
  0x38   : > { %596 = vmatpush.msrb.mxu0 %v3197_v58  ;;  %4897 = vst [vmem:[#allocation40_spill] sm:$0xff] %v3232_v16  ;;  %v3237_v58 = vld [vmem:[%s4734_s1 + $0x228] sm:$0xff] }
  0x39   : > { %886 = vmatpush.msra.mxu2 %v2750_v1  ;;  %478 = vmatpush.msrb.mxu1 %v3204_v40  ;;  %4898 = vst [vmem:[#allocation41_spill] sm:$0xff] %v3237_v58  ;;  %v3249_v1 = vld [vmem:[%s4734_s1 + $0x140] sm:$0xff]  ;;  %v3261_v40 = vld [vmem:[%s4734_s1 + $0x2f8] sm:$0xff] }
  0x3a   : > { %597 = vmatpush.msrb.mxu0 %v3209_v47  ;;  %4899 = vst [vmem:[#allocation42_spill] sm:$0xff] %v3249_v1  ;;  %v3266_v47 = vld [vmem:[%s4734_s1 + $0x218] sm:$0xff] }
  0x3b   : > { %887 = vmatpush.msra.mxu2 %v2772_v5  ;;  %v3254_v5 = vld [vmem:[%s4734_s1 + $0x220] sm:$0xff]  ;;  %479 = vmatpush.msrb.mxu1 %v3232_v16  ;;  %4901 = vst [vmem:[#allocation44_spill] sm:$0xff] %v3261_v40  ;;  %v3274_v16 = vld [vmem:[%s4734_s1 + $0x2f0] sm:$0xff] }
  0x3c   : > { %278 = vmatmul.f32.gmra.mxu0 %v3215_v62  ;;  %4900 = vst [vmem:[#allocation43_spill] sm:$0xff] %v3254_v5 }
  0x3d   : > { %2252 = vmatmul.msk.f32.gmra.mxu1 %vm237_vm0, %v3218_v50  ;;  %366 = vmatmul.f32.gmra.mxu2 %v3222_v59  ;;  %4902 = vst [vmem:[#allocation45_spill] sm:$0xff] %v3266_v47 }
  0x3e   : > { %2258 = vmatmul.msk.f32.gmra.mxu3 %vm237_vm0, %v3225_v37  ;;  %598 = vmatpush.msrb.mxu0 %v3237_v58  ;;  %4903 = vst [vmem:[#allocation46_spill] sm:$0xff] %v3274_v16  ;;  %v3277_v58 = vld [vmem:[%s2838_s24 + $0x130] sm:$0xff] }
  0x3f   : > { %888 = vmatpush.msra.mxu2 %v2798_v9  ;;  %480 = vmatpush.msrb.mxu1 %v3249_v1  ;;  %4904 = vst [vmem:[#allocation47_spill] sm:$0xff] %v3282_v17  ;;  %v3288_v9 = vld [vmem:[%s4734_s1 + $0x210] sm:$0xff]  ;;  %v3294_v1 = vld [vmem:[%s4734_s1 + $0x2e8] sm:$0xff] }
  0x40   : > { %599 = vmatpush.msrb.mxu0 %v3254_v5  ;;  %4905 = vst [vmem:[#allocation48_spill] sm:$0xff] %v3288_v9  ;;  %v3373_v5 = vld [vmem:[%s2838_s24 + $0x150] sm:$0xff] }
  0x41   : > { %719 = vmatpush.msra.mxu1 %v3261_v40  ;;  %889 = vmatpush.msra.mxu2 %v2820_v13  ;;  %4906 = vst [vmem:[#allocation49_spill] sm:$0xff] %v3294_v1  ;;  %v3304_v13 = vld [vmem:[%s4734_s1 + $0x208] sm:$0xff]  ;;  %v3326_v40 = vld [vmem:[%s2838_s24 + $0x140] sm:$0xff] }
  0x42   : > { %600 = vmatpush.msrb.mxu0 %v3266_v47  ;;  %4907 = vst [vmem:[#allocation50_spill] sm:$0xff] %v3304_v13  ;;  %v3329_v47 = vld [vmem:[%s2838_s24 + $0x40] sm:$0xff] }
  0x43   : > { %720 = vmatpush.msra.mxu1 %v3274_v16  ;;  %v3309_v16 = vld [vmem:[%s4734_s1 + $0x2e0] sm:$0xff]  ;;  %4911 = vst [vmem:[#allocation54_spill] sm:$0xff] %v3329_v47 }
  0x44   : > { %281 = vmatmul.f32.gmra.mxu0 %v3277_v58  ;;  %4908 = vst [vmem:[#allocation51_spill] sm:$0xff] %v3309_v16 }
  0x45   : > { %481 = vmatmul.f32.vlgmr.msrb.gmra.mxu1 %v3165_v56  ;;  %369 = vmatmul.f32.gmra.mxu2 %v3282_v17  ;;  %v3316_v56 = vld [vmem:[%s4734_s1 + $0x200] sm:$0xff] }
  0x46   : > { %2279 = vmatmul.msk.f32.vlgmr.msrb.gmra.mxu3 %vm237_vm0, %v2912_v29  ;;  %601 = vmatpush.msrb.mxu0 %v3288_v9  ;;  %4909 = vst [vmem:[#allocation52_spill] sm:$0xff] %v3316_v56  ;;  %v3321_v29 = vld [vmem:[%s4734_s1 + $0x2d8] sm:$0xff]  ;;  %v3368_v9 = vld [vmem:[%s4734_s1 + $0x2c0] sm:$0xff] }
  0x47   : > { %721 = vmatpush.msra.mxu1 %v3294_v1  ;;  %4910 = vst [vmem:[#allocation53_spill] sm:$0xff] %v3321_v29  ;;  %v3336_v1 = vld [vmem:[%s4734_s1 + $0x1f8] sm:$0xff] }
  0x48   : > { %602 = vmatpush.msrb.mxu0 %v3304_v13  ;;  %4912 = vst [vmem:[#allocation55_spill] sm:$0xff] %v3336_v1  ;;  %v3341_v13 = vld [vmem:[%s4734_s1 + $0x2d0] sm:$0xff] }
  0x49   : > { %722 = vmatpush.msra.mxu1 %v3309_v16  ;;  %4913 = vst [vmem:[#allocation56_spill] sm:$0xff] %v3341_v13  ;;  %v3356_v16 = vld [vmem:[%s4734_s1 + $0x2c8] sm:$0xff] }
  0x4a   : > { %603 = vmatpush.msrb.mxu0 %v3316_v56  ;;  %4915 = vst [vmem:[#allocation58_spill] sm:$0xff] %v3356_v16  ;;  %v3363_v56 = vld [vmem:[%s4734_s1 + $0x1e8] sm:$0xff] }
  0x4b   : > { %723 = vmatpush.msra.mxu1 %v3321_v29  ;;  %v3351_v29 = vld [vmem:[%s4734_s1 + $0x1f0] sm:$0xff]  ;;  %4916 = vst [vmem:[#allocation59_spill] sm:$0xff] %v3363_v56 }
  0x4c   : > { %284 = vmatmul.f32.gmra.mxu0 %v3326_v40  ;;  %4914 = vst [vmem:[#allocation57_spill] sm:$0xff] %v3351_v29 }
  0x4d   : > { %484 = vmatmul.f32.gmra.mxu1 %v3222_v59  ;;  %372 = vmatmul.f32.gmra.mxu2 %v3329_v47  ;;  %4917 = vst [vmem:[#allocation60_spill] sm:$0xff] %v3368_v9 }
  0x4e   : > { %2280 = vmatmul.msk.f32.gmra.mxu3 %vm237_vm0, %v3005_v45  ;;  %604 = vmatpush.msrb.mxu0 %v3336_v1  ;;  %v3388_v1 = vld [vmem:[%s4734_s1 + $0x2b8] sm:$0xff] }
  0x4f   : > { %724 = vmatpush.msra.mxu1 %v3341_v13  ;;  %v3383_v13 = vld [vmem:[%s4734_s1 + $0x1e0] sm:$0xff]  ;;  %4919 = vst [vmem:[#allocation62_spill] sm:$0xff] %v3388_v1 }
  0x50   : > { %605 = vmatpush.msrb.mxu0 %v3351_v29  ;;  %v3416_v29 = vld [vmem:[%s4734_s1 + $0x2a8] sm:$0xff] }
  0x51   : > { %725 = vmatpush.msra.mxu1 %v3356_v16  ;;  %v3403_v16 = vld [vmem:[%s4734_s1 + $0x318] sm:$0xff]  ;;  %4923 = vst [vmem:[#allocation66_spill] sm:$0xff] %v3416_v29 }
  0x52   : > { %606 = vmatpush.msrb.mxu0 %v3363_v56  ;;  %4921 = vst [vmem:[#allocation64_spill] sm:$0xff] %v3403_v16  ;;  %v3410_v56 = vld [vmem:[%s4734_s1 + $0x310] sm:$0xff]  ;;  %766 = vmatpush.msrb.mxu3 %v3403_v16 }
  0x53   : > { %726 = vmatpush.msra.mxu1 %v3368_v9  ;;  %v3398_v9 = vld [vmem:[%s4734_s1 + $0x2b0] sm:$0xff]  ;;  %4922 = vst [vmem:[#allocation65_spill] sm:$0xff] %v3410_v56 }
  0x54   : > { %287 = vmatmul.f32.gmra.mxu0 %v3373_v5  ;;  %4920 = vst [vmem:[#allocation63_spill] sm:$0xff] %v3398_v9  ;;  %767 = vmatpush.msrb.mxu3 %v3410_v56 }
  0x55   : > { %487 = vmatmul.f32.gmra.mxu1 %v3282_v17  ;;  %375 = vmatmul.f32.gmra.mxu2 %v3376_v43 }
  0x56   : > { %2281 = vmatmul.msk.f32.gmra.mxu3 %vm237_vm0, %v3100_v63  ;;  %607 = vmatpush.msrb.mxu0 %v3383_v13 }
  0x57   : > { %727 = vmatpush.msra.mxu1 %v3388_v1  ;;  %v3423_v1 = vld [vmem:[%s4734_s1 + $0x308] sm:$0xff] }
  0x58   : > { %839 = vmatpush.msra.mxu0 %v2745_v0  ;;  %4924 = vst [vmem:[#allocation67_spill] sm:$0xff] %v3423_v1  ;;  %v3432_v0 = vld [vmem:[%s4734_s1 + $0x2a0] sm:$0xff]  ;;  %768 = vmatpush.msrb.mxu3 %v3423_v1 }
  0x59   : > { %728 = vmatpush.msra.mxu1 %v3398_v9  ;;  %v3440_v9 = vld [vmem:[%s4734_s1 + $0x300] sm:$0xff] }
  0x5a   : > { %840 = vmatpush.msra.mxu0 %v2767_v4  ;;  %4925 = vst [vmem:[#allocation68_spill] sm:$0xff] %v3440_v9  ;;  %769 = vmatpush.msrb.mxu3 %v3440_v9 }
  0x5b   : > { %729 = vmatpush.msra.mxu1 %v3416_v29  ;;  %v3449_v29 = vld [vmem:[%s4734_s1 + $0x298] sm:$0xff] }
  0x5c   : > { %841 = vmatpush.msra.mxu0 %v2789_v8 }
  0x5d   : > { %490 = vmatmul.f32.gmra.mxu1 %v3329_v47  ;;  %608 = vmatmul.f32.vlgmr.msrb.gmra.mxu0 %v3157_v51  ;;  %v3456_v51 = vld [vmem:[%s4734_s1 + $0x290] sm:$0xff] }
  0x5e   : > { %2282 = vmatmul.msk.f32.gmra.mxu3 %vm237_vm0, %v3168_v48  ;;  %2317 = vmatmul.msk.f32.vlgmr.msrb.gmra.mxu2 %vm237_vm0, %v2906_v28  ;;  %v3468_v28 = vld [vmem:[%s4734_s1 + $0x288] sm:$0xff] }
  0x5f   : > { %730 = vmatpush.msra.mxu1 %v3432_v0  ;;  %842 = vmatpush.msra.mxu0 %v2815_v12 }
  0x60   : > { %1074 = vmatpush.msrb.mxu2 %v2861_v20 }
  0x61   : > { %731 = vmatpush.msra.mxu1 %v3449_v29  ;;  %843 = vmatpush.msra.mxu0 %v2849_v18 }
  0x62   : > { %1075 = vmatpush.msrb.mxu2 %v2922_v31  ;;  %v3480_v31 = vld [vmem:[%s4734_s1 + $0x280] sm:$0xff] }
  0x63   : > { %732 = vmatpush.msra.mxu1 %v3456_v51  ;;  %844 = vmatpush.msra.mxu0 %v2868_v21 }
  0x64   : > { %1076 = vmatpush.msrb.mxu2 %v2985_v41 }
  0x65   : > { %493 = vmatmul.f32.gmra.mxu1 %v3376_v43  ;;  %611 = vmatmul.f32.gmra.mxu0 %v3215_v62  ;;  %v3488_v62 = vld [vmem:[%s2838_s24 + $0x60] sm:$0xff] }
  0x66   : > { %2283 = vmatmul.msk.f32.gmra.mxu3 %vm237_vm0, %v3225_v37  ;;  %2318 = vmatmul.msk.f32.gmra.mxu2 %vm237_vm0, %v3002_v44  ;;  %4926 = vst [vmem:[#allocation69_spill] sm:$0xff] %v3488_v62  ;;  %v3492_v44 = vld [vmem:[%s2838_s24 + $0x68] sm:$0xff] }
  0x67   : > { %733 = vmatpush.msra.mxu1 %v3468_v28  ;;  %845 = vmatpush.msra.mxu0 %v2880_v23  ;;  %4927 = vst [vmem:[#allocation70_spill] sm:$0xff] %v3492_v44 }
  0x68   : > { %1077 = vmatpush.msrb.mxu2 %v3049_v52  ;;  %v2296_v52 = vld [vmem:[%s2838_s24 + $0x168] sm:$0xff] }
  0x69   : > { %734 = vmatpush.msra.mxu1 %v3480_v31  ;;  %846 = vmatpush.msra.mxu0 %v2898_v26 }
  0x6b   : > { %927 = vmatpush.msrb.mxu1 %v2755_v2  ;;  %847 = vmatpush.msra.mxu0 %v2927_v32 }
  0x6d   : > { %928 = vmatpush.msrb.mxu1 %v2779_v6  ;;  %614 = vmatmul.f32.gmra.mxu0 %v3277_v58  ;;  %v4932_v58 = vld [vmem:[#allocation12_spill] sm:$0xff] }
  0x6e   : > { %496 = vmatmul.f32.gmra.mxu1 %v3488_v62  ;;  %2284 = vmatmul.msk.f32.gmra.mxu3 %vm237_vm0, %v3492_v44 }
  0x6f   : > { %2319 = vmatmul.msk.f32.gmra.mxu2 %vm237_vm0, %v3091_v60  ;;  %848 = vmatpush.msra.mxu0 %v2950_v35  ;;  %v2361_v60 = vld [vmem:[%s2838_s24 + $0x180] sm:$0xff] }
  0x70   : > { %929 = vmatpush.msrb.mxu1 %v2803_v10 }
  0x71   : > { %849 = vmatpush.msra.mxu0 %v2967_v38 }
  0x72   : > { %930 = vmatpush.msrb.mxu1 %v2828_v14 }
  0x73   : > { %850 = vmatpush.msra.mxu0 %v2990_v42 }
  0x74   : > { %931 = vmatpush.msrb.mxu1 %v2854_v19 }
  0x75   : > { %617 = vmatmul.f32.gmra.mxu0 %v3326_v40  ;;  %v2362_v40 = vld [vmem:[%s2838_s24 + $0x188] sm:$0xff] }
  0x76   : > { %735 = vmatmul.f32.vlgmr.msra.gmra.mxu1 %v3222_v59  ;;  %2322 = vmatmul.msk.f32.vlgmr.msra.gmra.mxu3 %vm237_vm0, %v2296_v52  ;;  %v4930_v52 = vld [vmem:[#allocation28_spill] sm:$0xff]  ;;  %v4939_v59 = vld [vmem:[#allocation21_spill] sm:$0xff] }
  0x77   : > { %2320 = vmatmul.msk.f32.gmra.mxu2 %vm237_vm0, %v3160_v54  ;;  %974 = vmatpush.msra.mxu3 %v2762_v3  ;;  %v4931_v54 = vld [vmem:[#allocation14_spill] sm:$0xff] }
  0x78   : > { %851 = vmatpush.msra.mxu0 %v3010_v46  ;;  %932 = vmatpush.msrb.mxu1 %v2873_v22 }
  0x79   : > { %975 = vmatpush.msra.mxu3 %v2784_v7 }
  0x7a   : > { %852 = vmatpush.msra.mxu0 %v3032_v49  ;;  %933 = vmatpush.msrb.mxu1 %v2885_v24 }
  0x7b   : > { %976 = vmatpush.msra.mxu3 %v2808_v11 }
  0x7c   : > { %853 = vmatpush.msra.mxu0 %v3054_v53  ;;  %934 = vmatpush.msrb.mxu1 %v2903_v27 }
  0x7d   : > { %620 = vmatmul.f32.gmra.mxu0 %v3373_v5  ;;  %977 = vmatpush.msra.mxu3 %v2833_v15  ;;  %v2295_v5 = vld [vmem:[%s2838_s24 + $0x160] sm:$0xff] }
  0x7e   : > { %738 = vmatmul.f32.gmra.mxu1 %v3282_v17  ;;  %2343 = vmatmul.msk.f32.vlgmr.msrb.gmra.mxu3 %vm237_vm0, %v3005_v45  ;;  %v4928_v45 = vld [vmem:[#allocation13_spill] sm:$0xff]  ;;  %v4936_v17 = vld [vmem:[#allocation19_spill] sm:$0xff] }
  0x7f   : > { %2321 = vmatmul.msk.f32.gmra.mxu2 %vm237_vm0, %v3218_v50  ;;  %854 = vmatpush.msra.mxu0 %v3078_v57  ;;  %v4929_v50 = vld [vmem:[#allocation10_spill] sm:$0xff] }
  0x80   : > { %935 = vmatpush.msrb.mxu1 %v2932_v33  ;;  %1180 = vmatpush.msrb.mxu3 %v3068_v55 }
  0x81   : > { %1027 = vmatpush.msrb.mxu0 %v2891_v25 }
  0x82   : > { %936 = vmatpush.msrb.mxu1 %v2955_v36  ;;  %1181 = vmatpush.msrb.mxu3 %v3096_v61  ;;  %v3646_v61 = vld [vmem:[%s2838_s24 + $0x1d8] sm:$0xff] }
  0x83   : > { %1028 = vmatpush.msrb.mxu0 %v2917_v30  ;;  %4965 = vst [vmem:[#allocation76_spill] sm:$0xff] %v3646_v61 }
  0x84   : > { %937 = vmatpush.msrb.mxu1 %v2972_v39  ;;  %1182 = vmatpush.msrb.mxu3 %v4930_v52  ;;  %v4962_v52 = vld [vmem:[#allocation48_spill] sm:$0xff]  ;;  %v4970_v39 = vld [vmem:[#allocation3_spill] sm:$0xff] }
  0x85   : > { %1029 = vmatpush.msrb.mxu0 %v2941_v34  ;;  %v4971_v34 = vld [vmem:[#allocation55_spill] sm:$0xff] }
  0x86   : > { %623 = vmatmul.f32.gmra.mxu0 %v2295_v5  ;;  %741 = vmatmul.f32.gmra.mxu1 %v3329_v47  ;;  %v4933_v5 = vld [vmem:[#allocation31_spill] sm:$0xff] }
  0x87   : > { %2344 = vmatmul.msk.f32.gmra.mxu3 %vm237_vm0, %v3100_v63  ;;  %2373 = vmatmul.msk.f32.vlgmr.msra.gmra.mxu2 %vm237_vm0, %v2362_v40  ;;  %v3555_v63 = vld [vmem:[%s2838_s24 + $0x198] sm:$0xff]  ;;  %v4934_v40 = vld [vmem:[#allocation16_spill] sm:$0xff]  ;;  %v4935_v47 = vld [vmem:[#allocation15_spill] sm:$0xff] }
  0x88   : > { %938 = vmatpush.msrb.mxu1 %v4928_v45  ;;  %1030 = vmatpush.msrb.mxu0 %v4929_v50  ;;  %v2351_v50 = vld [vmem:[%s2838_s24 + $0x90] sm:$0xff] }
  0x89   : > { %1286 = vmatpush.msra.mxu2 %v3403_v16  ;;  %1183 = vmatpush.msrb.mxu3 %v4933_v5  ;;  %v4938_v16 = vld [vmem:[#allocation22_spill] sm:$0xff]  ;;  %v4949_v5 = vld [vmem:[#allocation33_spill] sm:$0xff] }
  0x8a   : > { %939 = vmatpush.msrb.mxu1 %v4931_v54  ;;  %1031 = vmatpush.msrb.mxu0 %v4932_v58  ;;  %v2349_v54 = vld [vmem:[%s2838_s24 + $0x80] sm:$0xff] }
  0x8b   : > { %1287 = vmatpush.msra.mxu2 %v3410_v56  ;;  %v4937_v56 = vld [vmem:[#allocation17_spill] sm:$0xff] }
  0x8c   : > { %940 = vmatpush.msrb.mxu1 %v4934_v40  ;;  %1032 = vmatpush.msrb.mxu0 %v4935_v47  ;;  %v4942_v40 = vld [vmem:[#allocation25_spill] sm:$0xff] }
  0x8d   : > { %1288 = vmatpush.msra.mxu2 %v3423_v1  ;;  %v4953_v47 = vld [vmem:[#allocation37_spill] sm:$0xff] }
  0x8e   : > { %744 = vmatmul.f32.gmra.mxu1 %v3376_v43  ;;  %855 = vmatmul.f32.vlgmr.msra.gmra.mxu0 %v2361_v60  ;;  %v3571_v43 = vld [vmem:[%s2838_s24 + $0x190] sm:$0xff] }
  0x8f   : > { %2345 = vmatmul.msk.f32.gmra.mxu3 %vm237_vm0, %v3168_v48  ;;  %2374 = vmatmul.msk.f32.gmra.mxu2 %vm237_vm0, %v3555_v63  ;;  %v4940_v60 = vld [vmem:[#allocation24_spill] sm:$0xff]  ;;  %v3575_v48 = vld [vmem:[%s2838_s24 + $0x1a8] sm:$0xff] }
  0x90   : > { %941 = vmatpush.msrb.mxu1 %v4936_v17  ;;  %1033 = vmatpush.msrb.mxu0 %v4937_v56  ;;  %4941 = vst [vmem:[#allocation71_spill] sm:$0xff] %v3575_v48  ;;  %v4943_v17 = vld [vmem:[#allocation26_spill] sm:$0xff] }
  0x91   : > { %1289 = vmatpush.msra.mxu2 %v3440_v9  ;;  %v308_v1 = vpop.f32.mrf.mxu1  ;;  %v4944_v9 = vld [vmem:[#allocation27_spill] sm:$0xff]  ;;  %v3595_v56 = vld [vmem:[%s2838_s24 + $0x1a0] sm:$0xff] }
  0x92   : > { %942 = vmatpush.msrb.mxu1 %v4938_v16  ;;  %1034 = vmatpush.msrb.mxu0 %v4939_v59  ;;  %v4946_v59 = vld [vmem:[#allocation30_spill] sm:$0xff] }
  0x94   : > { %1133 = vmatpush.msra.mxu1 %v4940_v60  ;;  %1035 = vmatpush.msrb.mxu0 %v4942_v40  ;;  %v4945_v60 = vld [vmem:[#allocation29_spill] sm:$0xff]  ;;  %v4947_v40 = vld [vmem:[#allocation34_spill] sm:$0xff] }
  0x96   : > { %1134 = vmatpush.msra.mxu1 %v4943_v17  ;;  %858 = vmatmul.f32.gmra.mxu0 %v3571_v43 }
  0x97   : > { %747 = vmatmul.f32.gmra.mxu1 %v3488_v62  ;;  %2346 = vmatmul.msk.f32.gmra.mxu3 %vm237_vm0, %v3225_v37  ;;  %v678_v62 = vld [vmem:[%s2838_s24 + $0x70] sm:$0xff]  ;;  %v3598_v37 = vld [vmem:[%s2838_s24 + $0x1b8] sm:$0xff] }
  0x98   : > { %2375 = vmatmul.msk.f32.gmra.mxu2 %vm237_vm0, %v3575_v48  ;;  %1036 = vmatpush.msrb.mxu0 %v4944_v9  ;;  %4948 = vst [vmem:[#allocation72_spill] sm:$0xff] %v3598_v37  ;;  %v3665_v48 = vld [vmem:[%s2838_s24 + $0x1d0] sm:$0xff] }
  0x99   : > { %1135 = vmatpush.msra.mxu1 %v4945_v60  ;;  %v3587_v16 = vpop.f32.mrf.mxu3  ;;  %v3591_v17 = vpop.f32.mrf.mxu1  ;;  %v4950_v60 = vld [vmem:[#allocation36_spill] sm:$0xff] }
  0x9a   : > { %1037 = vmatpush.msrb.mxu0 %v4946_v59  ;;  %v4952_v59 = vld [vmem:[#allocation38_spill] sm:$0xff] }
  0x9b   : > { %1136 = vmatpush.msra.mxu1 %v4947_v40  ;;  %v4951_v40 = vld [vmem:[#allocation35_spill] sm:$0xff] }
  0x9c   : > { %1038 = vmatpush.msrb.mxu0 %v4949_v5  ;;  %v4954_v5 = vld [vmem:[#allocation41_spill] sm:$0xff] }
  0x9d   : > { %1137 = vmatpush.msra.mxu1 %v4950_v60 }
  0x9e   : > { %861 = vmatmul.f32.gmra.mxu0 %v3595_v56 }
  0x9f   : > { %750 = vmatmul.f32.gmra.mxu1 %v678_v62  ;;  %2347 = vmatmul.msk.f32.gmra.mxu3 %vm237_vm0, %v3492_v44  ;;  %v3616_v62 = vld [vmem:[%s2838_s24 + $0x1b0] sm:$0xff]  ;;  %v3620_v44 = vld [vmem:[%s2838_s24 + $0x78] sm:$0xff] }
  0xa0   : > { %2376 = vmatmul.msk.f32.gmra.mxu2 %vm237_vm0, %v3598_v37  ;;  %1039 = vmatpush.msrb.mxu0 %v4951_v40  ;;  %4955 = vst [vmem:[#allocation73_spill] sm:$0xff] %v3620_v44  ;;  %v3623_v37 = vld [vmem:[%s2838_s24 + $0x1c8] sm:$0xff]  ;;  %v4957_v40 = vld [vmem:[#allocation40_spill] sm:$0xff] }
  0xa1   : > { %1138 = vmatpush.msra.mxu1 %v4952_v59  ;;  %v3609_v9 = vpop.f32.mrf.mxu3  ;;  %v3613_v60 = vpop.f32.mrf.mxu1  ;;  %4956 = vst [vmem:[#allocation74_spill] sm:$0xff] %v3623_v37  ;;  %v4958_v59 = vld [vmem:[#allocation43_spill] sm:$0xff] }
  0xa2   : > { %1040 = vmatpush.msrb.mxu0 %v4953_v47  ;;  %v4960_v47 = vld [vmem:[#allocation45_spill] sm:$0xff] }
  0xa3   : > { %1139 = vmatpush.msra.mxu1 %v4954_v5  ;;  %v4959_v5 = vld [vmem:[#allocation42_spill] sm:$0xff] }
  0xa4   : > { %1041 = vmatpush.msrb.mxu0 %v4957_v40  ;;  %v4961_v40 = vld [vmem:[#allocation44_spill] sm:$0xff] }
  0xa5   : > { %1140 = vmatpush.msra.mxu1 %v4958_v59 }
  0xa6   : > { %864 = vmatmul.f32.gmra.mxu0 %v3616_v62 }
  0xa7   : > { %943 = vmatmul.f32.vlgmr.msrb.gmra.mxu1 %v2349_v54  ;;  %2348 = vmatmul.msk.f32.gmra.mxu3 %vm237_vm0, %v3620_v44  ;;  %v3641_v54 = vld [vmem:[%s2838_s24 + $0x1c0] sm:$0xff] }
  0xa8   : > { %2377 = vmatmul.msk.f32.gmra.mxu2 %vm237_vm0, %v3623_v37  ;;  %1042 = vmatpush.msrb.mxu0 %v4959_v5  ;;  %4963 = vst [vmem:[#allocation75_spill] sm:$0xff] %v3641_v54  ;;  %v4964_v44 = vld [vmem:[#allocation46_spill] sm:$0xff]  ;;  %v2350_v37 = vld [vmem:[%s2838_s24 + $0x88] sm:$0xff] }
  0xa9   : > { %1141 = vmatpush.msra.mxu1 %v4960_v47  ;;  %v3634_v58 = vpop.f32.mrf.mxu3  ;;  %v273_v59 = vpop.f32.mrf.mxu0  ;;  %v4966_v5 = vld [vmem:[#allocation50_spill] sm:$0xff]  ;;  %v4967_v47 = vld [vmem:[#allocation49_spill] sm:$0xff] }
  0xaa   : > { %1239 = vmatpush.msra.mxu0 %v4961_v40  ;;  %v3638_v45 = vpop.f32.mrf.mxu1  ;;  %v309_v40 = vadd.f32 %v308_v1, %v273_v59  ;;  %v3672_v1 = vld [vmem:[%s2838_s24 + $0x98] sm:$0xff]  ;;  %v4976_v59 = vld [vmem:[#allocation56_spill] sm:$0xff] }
  0xab   : > { %1142 = vmatpush.msra.mxu1 %v4962_v52  ;;  %v4968_v52 = vld [vmem:[#allocation52_spill] sm:$0xff]  ;;  %4974 = vst [vmem:[#allocation3_spill] sm:$0xff] %v3672_v1 }
  0xac   : > { %1240 = vmatpush.msra.mxu0 %v4964_v44  ;;  %v4969_v44 = vld [vmem:[#allocation51_spill] sm:$0xff] }
  0xad   : > { %1143 = vmatpush.msra.mxu1 %v4966_v5 }
  0xae   : > { %1241 = vmatpush.msra.mxu0 %v4967_v47 }
  0xaf   : > { %867 = vmatmul.f32.gmra.mxu0 %v3641_v54  ;;  %946 = vmatmul.f32.gmra.mxu1 %v2351_v50  ;;  %v4972_v54 = vld [vmem:[#allocation53_spill] sm:$0xff] }
  0xb0   : > { %2378 = vmatmul.msk.f32.gmra.mxu2 %vm237_vm0, %v3646_v61  ;;  %2379 = vmatmul.msk.f32.vlgmr.msra.gmra.mxu3 %vm237_vm0, %v2350_v37  ;;  %v361_v5 = vpop.f32.mrf.mxu2  ;;  %v3668_v37 = vld [vmem:[%s2838_s24 + $0xa0] sm:$0xff] }
  0xb1   : > { %1144 = vmatpush.msra.mxu1 %v4968_v52  ;;  %1242 = vmatpush.msra.mxu0 %v4969_v44  ;;  %v3658_v47 = vpop.f32.mrf.mxu3  ;;  %v362_v55 = vadd.f32 %v361_v5, %v309_v40  ;;  %v276_v36 = vpop.f32.mrf.mxu0  ;;  %v4973_v52 = vld [vmem:[#allocation4_spill] sm:$0xff]  ;;  %v4979_v5 = vld [vmem:[#allocation58_spill] sm:$0xff] }
  0xb2   : > { %1368 = vmatpush.msra.mxu3 %v4970_v39  ;;  %v3662_v61 = vpop.f32.mrf.mxu1  ;;  %v4975_v39 = vld [vmem:[#allocation57_spill] sm:$0xff] }
  0xb3   : > { %1145 = vmatpush.msra.mxu1 %v4971_v34  ;;  %1243 = vmatpush.msra.mxu0 %v4972_v54  ;;  %v3677_v34 = vadd.f32 %v3587_v16, %v362_v55  ;;  %v4977_v54 = vld [vmem:[#allocation5_spill] sm:$0xff]  ;;  %v312_v55 = vadd.f32 %v3591_v17, %v276_v36  ;;  %v4980_v16 = vld [vmem:[#allocation6_spill] sm:$0xff] }
  0xb4   : > { %1369 = vmatpush.msra.mxu3 %v4973_v52  ;;  %v4978_v52 = vld [vmem:[#allocation59_spill] sm:$0xff]  ;;  %v4983_v36 = vld [vmem:[#allocation62_spill] sm:$0xff] }
  0xb5   : > { %1146 = vmatpush.msra.mxu1 %v4975_v39  ;;  %1244 = vmatpush.msra.mxu0 %v4976_v59  ;;  %v4981_v39 = vld [vmem:[#allocation60_spill] sm:$0xff] }
  0xb6   : > { %1370 = vmatpush.msra.mxu3 %v4977_v54 }
  0xb7   : > { %870 = vmatmul.f32.gmra.mxu0 %v3665_v48  ;;  %949 = vmatmul.f32.gmra.mxu1 %v3668_v37 }
  0xb8   : > { %2380 = vmatmul.msk.f32.gmra.mxu3 %vm237_vm0, %v3672_v1  ;;  %2397 = vmatmul.msk.f32.vlgmr.msrb.gmra.mxu2 %vm237_vm0, %v3672_v1  ;;  %v364_v40 = vpop.f32.mrf.mxu2 }
  0xb9   : > { %1147 = vmatpush.msra.mxu1 %v4978_v52  ;;  %1245 = vmatpush.msra.mxu0 %v4979_v5  ;;  %v3691_v54 = vpop.f32.mrf.mxu3  ;;  %v365_v59 = vadd.f32 %v364_v40, %v312_v55  ;;  %v279_v1 = vpop.f32.mrf.mxu0  ;;  %v3698_v52 = vld [vmem:[%s2838_s24 + $0xb0] sm:$0xff]  ;;  %v4982_v5 = vld [vmem:[#allocation2_spill] sm:$0xff]  ;;  %v3728_v40 = vld [vmem:[%s2838_s24 + $0xb8] sm:$0xff] }
  0xba   : > { %1438 = vmatpush.msrb.mxu2 %v2762_v3  ;;  %1371 = vmatpush.msra.mxu3 %v4980_v16  ;;  %v3695_v44 = vpop.f32.mrf.mxu1  ;;  %v3703_v3 = vld [vmem:[%s2838_s24 + $0xa8] sm:$0xff]  ;;  %v3725_v16 = vld [vmem:[%s2838_s24 + $0xc0] sm:$0xff] }
  0xbb   : > { %1148 = vmatpush.msra.mxu1 %v3383_v13  ;;  %1246 = vmatpush.msra.mxu0 %v4981_v39  ;;  %v3707_v17 = vadd.f32 %v3609_v9, %v365_v59  ;;  %v315_v9 = vadd.f32 %v3613_v60, %v279_v1  ;;  %v4985_v59 = vld [vmem:[#allocation66_spill] sm:$0xff] }
  0xbc   : > { %1439 = vmatpush.msrb.mxu2 %v2784_v7  ;;  %v4984_v7 = vld [vmem:[#allocation63_spill] sm:$0xff] }
  0xbd   : > { %1321 = vmatpush.msrb.mxu1 %v4982_v5  ;;  %1247 = vmatpush.msra.mxu0 %v4983_v36 }
  0xbe   : > { %1440 = vmatpush.msrb.mxu2 %v2808_v11 }
  0xbf   : > { %1322 = vmatpush.msrb.mxu1 %v2767_v4  ;;  %1043 = vmatmul.f32.vlgmr.msrb.gmra.mxu0 %v2351_v50 }
  0xc0   : > { %952 = vmatmul.f32.gmra.mxu1 %v3698_v52  ;;  %2381 = vmatmul.msk.f32.gmra.mxu3 %vm237_vm0, %v3703_v3  ;;  %v367_v4 = vpop.f32.mrf.mxu2 }
  0xc1   : > { %2398 = vmatmul.msk.f32.gmra.mxu2 %vm237_vm0, %v3703_v3  ;;  %1248 = vmatpush.msra.mxu0 %v4984_v7  ;;  %v3720_v11 = vpop.f32.mrf.mxu3  ;;  %v368_v50 = vadd.f32 %v367_v4, %v315_v9  ;;  %v282_v5 = vpop.f32.mrf.mxu0  ;;  %v3745_v4 = vld [vmem:[%s2838_s24 + $0xd0] sm:$0xff] }
  0xc2   : > { %1323 = vmatpush.msrb.mxu1 %v2789_v8  ;;  %1441 = vmatpush.msrb.mxu2 %v2833_v15  ;;  %v482_v55 = vpop.f32.mrf.mxu1 }
  0xc3   : > { %1249 = vmatpush.msra.mxu0 %v4985_v59  ;;  %v403_v8 = vadd.f32 %v3634_v58, %v368_v50  ;;  %v3748_v50 = vld [vmem:[%s2838_s24 + $0xc8] sm:$0xff] }
  0xc4   : > { %1324 = vmatpush.msrb.mxu1 %v2815_v12  ;;  %v318_v12 = vadd.f32 %v3638_v45, %v282_v5 }
  0xc5   : > { %1250 = vmatpush.msra.mxu0 %v3432_v0 }
  0xc6   : > { %1325 = vmatpush.msrb.mxu1 %v2849_v18 }
  0xc7   : > { %1046 = vmatmul.f32.gmra.mxu0 %v3668_v37 }
  0xc8   : > { %955 = vmatmul.f32.gmra.mxu1 %v3725_v16  ;;  %2382 = vmatmul.msk.f32.gmra.mxu3 %vm237_vm0, %v3728_v40  ;;  %v370_v15 = vpop.f32.mrf.mxu2 }
  0xc9   : > { %2399 = vmatmul.msk.f32.gmra.mxu2 %vm237_vm0, %v3728_v40  ;;  %1251 = vmatpush.msra.mxu0 %v3449_v29  ;;  %v517_v18 = vpop.f32.mrf.mxu3  ;;  %v371_v58 = vadd.f32 %v370_v15, %v318_v12  ;;  %v285_v1 = vpop.f32.mrf.mxu0  ;;  %v3767_v15 = vld [vmem:[%s2838_s24 + $0xd8] sm:$0xff] }
  0xca   : > { %1326 = vmatpush.msrb.mxu1 %v2868_v21  ;;  %v518_v60 = vadd.f32 %v517_v18, %v482_v55  ;;  %v485_v9 = vpop.f32.mrf.mxu1  ;;  %v4993_v18 = vld [vmem:[#allocation23_spill] sm:$0xff] }
  0xcb   : > { %1252 = vmatpush.msra.mxu0 %v3456_v51  ;;  %v406_v21 = vadd.f32 %v3658_v47, %v371_v58 }
  0xcc   : > { %1327 = vmatpush.msrb.mxu1 %v2880_v23  ;;  %v535_v45 = vadd.f32 %v518_v60, %v3677_v34  ;;  %v321_v23 = vadd.f32 %v3662_v61, %v285_v1 }
  0xcd   : > { %1253 = vmatpush.msra.mxu0 %v3468_v28 }
  0xce   : > { %1328 = vmatpush.msrb.mxu1 %v2898_v26 }
  0xcf   : > { %1049 = vmatmul.f32.gmra.mxu0 %v3698_v52 }
  0xd0   : > { %958 = vmatmul.f32.gmra.mxu1 %v3745_v4  ;;  %2383 = vmatmul.msk.f32.gmra.mxu3 %vm237_vm0, %v3748_v50  ;;  %v373_v26 = vpop.f32.mrf.mxu2 }
  0xd1   : > { %2400 = vmatmul.msk.f32.gmra.mxu2 %vm237_vm0, %v3748_v50  ;;  %1254 = vmatpush.msra.mxu0 %v3480_v31  ;;  %v520_v34 = vpop.f32.mrf.mxu3  ;;  %v374_v47 = vadd.f32 %v373_v26, %v321_v23  ;;  %v288_v55 = vpop.f32.mrf.mxu0 }
  0xd2   : > { %1329 = vmatpush.msrb.mxu1 %v2927_v32  ;;  %v521_v5 = vadd.f32 %v520_v34, %v485_v9  ;;  %v488_v12 = vpop.f32.mrf.mxu1  ;;  %v4994_v9 = vld [vmem:[#allocation10_spill] sm:$0xff]  ;;  %v4997_v34 = vld [vmem:[#allocation12_spill] sm:$0xff] }
  0xd3   : > { %1391 = vmatpush.msrb.mxu0 %v2755_v2  ;;  %v3771_v32 = vadd.f32 %v3691_v54, %v374_v47  ;;  %v324_v2 = vadd.f32 %v3695_v44, %v288_v55  ;;  %v4998_v47 = vld [vmem:[#allocation75_spill] sm:$0xff]  ;;  %v5000_v55 = vld [vmem:[#allocation14_spill] sm:$0xff] }
  0xd4   : > { %1330 = vmatpush.msrb.mxu1 %v2950_v35  ;;  %v3774_v61 = vadd.f32 %v521_v5, %v3707_v17  ;;  %v3789_v17 = vld [vmem:[%s2838_s24 + $0xe8] sm:$0xff]  ;;  %v4999_v5 = vld [vmem:[#allocation72_spill] sm:$0xff] }
  0xd5   : > { %1392 = vmatpush.msrb.mxu0 %v2779_v6 }
  0xd6   : > { %1331 = vmatpush.msrb.mxu1 %v2967_v38 }
  0xd7   : > { %1393 = vmatpush.msrb.mxu0 %v2803_v10 }
  0xd8   : > { %1052 = vmatmul.f32.gmra.mxu0 %v3725_v16  ;;  %1149 = vmatmul.f32.vlgmr.msra.gmra.mxu1 %v3571_v43  ;;  %v376_v6 = vpop.f32.mrf.mxu2 }
  0xd9   : > { %2384 = vmatmul.msk.f32.gmra.mxu3 %vm237_vm0, %v3767_v15  ;;  %2401 = vmatmul.msk.f32.gmra.mxu2 %vm237_vm0, %v3767_v15  ;;  %v523_v35 = vpop.f32.mrf.mxu3  ;;  %v377_v10 = vadd.f32 %v376_v6, %v324_v2  ;;  %v5003_v6 = vld [vmem:[#allocation16_spill] sm:$0xff] }
  0xda   : > { %1332 = vmatpush.msrb.mxu1 %v2990_v42  ;;  %1394 = vmatpush.msrb.mxu0 %v2828_v14  ;;  %v524_v38 = vadd.f32 %v523_v35, %v488_v12  ;;  %v491_v43 = vpop.f32.mrf.mxu1  ;;  %v609_v54 = vpop.f32.mrf.mxu0  ;;  %v5001_v12 = vld [vmem:[#allocation15_spill] sm:$0xff]  ;;  %v5004_v35 = vld [vmem:[#allocation17_spill] sm:$0xff] }
  0xdb   : > { %v3794_v14 = vadd.f32 %v3720_v11, %v377_v10  ;;  %v3810_v11 = vld [vmem:[%s2838_s24 + $0xe0] sm:$0xff] }
  0xdc   : > { %1333 = vmatpush.msrb.mxu1 %v3010_v46  ;;  %1395 = vmatpush.msrb.mxu0 %v2854_v19  ;;  %v3796_v42 = vadd.f32 %v524_v38, %v403_v8  ;;  %v4992_v8 = vld [vmem:[#allocation11_spill] sm:$0xff] }
  0xde   : > { %1334 = vmatpush.msrb.mxu1 %v3032_v49  ;;  %1396 = vmatpush.msrb.mxu0 %v2873_v22 }
  0xe0   : > { %1055 = vmatmul.f32.gmra.mxu0 %v3745_v4  ;;  %1152 = vmatmul.f32.gmra.mxu1 %v3595_v56 }
  0xe1   : > { %2402 = vmatmul.msk.f32.gmra.mxu2 %vm237_vm0, %v3789_v17  ;;  %2415 = vmatmul.msk.f32.vlgmr.msrb.gmra.mxu3 %vm237_vm0, %v3555_v63  ;;  %v526_v19 = vpop.f32.mrf.mxu3  ;;  %v644_v22 = vpop.f32.mrf.mxu2  ;;  %v4986_v63 = vld [vmem:[#allocation7_spill] sm:$0xff] }
  0xe2   : > { %1335 = vmatpush.msrb.mxu1 %v3054_v53  ;;  %1397 = vmatpush.msrb.mxu0 %v2885_v24  ;;  %v527_v46 = vadd.f32 %v526_v19, %v491_v43  ;;  %v645_v49 = vadd.f32 %v644_v22, %v609_v54  ;;  %v494_v56 = vpop.f32.mrf.mxu1  ;;  %v612_v44 = vpop.f32.mrf.mxu0  ;;  %v4990_v53 = vld [vmem:[#allocation8_spill] sm:$0xff]  ;;  %v5005_v54 = vld [vmem:[#allocation19_spill] sm:$0xff]  ;;  %v5006_v19 = vld [vmem:[#allocation21_spill] sm:$0xff] }
  0xe3   : > { %1508 = vmatpush.msrb.mxu3 %v2861_v20 }
  0xe4   : > { %1336 = vmatpush.msrb.mxu1 %v3078_v57  ;;  %1398 = vmatpush.msrb.mxu0 %v2903_v27  ;;  %v538_v24 = vadd.f32 %v527_v46, %v406_v21  ;;  %v3815_v20 = vadd.f32 %v645_v49, %v535_v45  ;;  %v4987_v27 = vld [vmem:[#allocation71_spill] sm:$0xff]  ;;  %v4991_v57 = vld [vmem:[#allocation18_spill] sm:$0xff]  ;;  %v4995_v21 = vld [vmem:[#allocation13_spill] sm:$0xff] }
  0xe5   : > { %1509 = vmatpush.msrb.mxu3 %v4986_v63  ;;  %v4996_v45 = vld [vmem:[#allocation28_spill] sm:$0xff]  ;;  %v5007_v49 = vld [vmem:[#allocation74_spill] sm:$0xff] }
  0xe6   : > { %1461 = vmatpush.msra.mxu1 %v2891_v25  ;;  %1399 = vmatpush.msrb.mxu0 %v2932_v33  ;;  %v4988_v25 = vld [vmem:[#allocation9_spill] sm:$0xff]  ;;  %v4989_v33 = vld [vmem:[#allocation20_spill] sm:$0xff] }
  0xe7   : > { %1510 = vmatpush.msrb.mxu3 %v2985_v41  ;;  %v5010_v63 = vld [vmem:[#allocation24_spill] sm:$0xff] }
  0xe8   : > { %1462 = vmatpush.msra.mxu1 %v2917_v30  ;;  %1058 = vmatmul.f32.gmra.mxu0 %v3810_v11 }
  0xe9   : > { %1155 = vmatmul.f32.gmra.mxu1 %v3616_v62  ;;  %2416 = vmatmul.msk.f32.gmra.mxu3 %vm237_vm0, %v4987_v27  ;;  %v529_v30 = vpop.f32.mrf.mxu3  ;;  %v647_v41 = vpop.f32.mrf.mxu2 }
  0xea   : > { %2433 = vmatmul.msk.f32.vlgmr.msra.gmra.mxu2 %vm237_vm0, %v3703_v3  ;;  %1400 = vmatpush.msrb.mxu0 %v4988_v25  ;;  %v530_v62 = vadd.f32 %v529_v30, %v494_v56  ;;  %v648_v58 = vadd.f32 %v647_v41, %v612_v44  ;;  %v615_v1 = vpop.f32.mrf.mxu0  ;;  %v5008_v56 = vld [vmem:[#allocation22_spill] sm:$0xff]  ;;  %v5009_v44 = vld [vmem:[#allocation25_spill] sm:$0xff] }
  0xeb   : > { %1584 = vmatpush.msra.mxu2 %v4989_v33  ;;  %1463 = vmatpush.msra.mxu1 %v4990_v53  ;;  %v497_v60 = vpop.f32.mrf.mxu1  ;;  %v5012_v53 = vld [vmem:[#allocation26_spill] sm:$0xff]  ;;  %v5014_v41 = vld [vmem:[#allocation29_spill] sm:$0xff] }
  0xec   : > { %1511 = vmatpush.msrb.mxu3 %v4991_v57  ;;  %1401 = vmatpush.msrb.mxu0 %v4992_v8  ;;  %v539_v23 = vadd.f32 %v530_v62, %v3771_v32  ;;  %v3836_v26 = vadd.f32 %v648_v58, %v3774_v61  ;;  %v5002_v32 = vld [vmem:[#allocation31_spill] sm:$0xff]  ;;  %v5013_v57 = vld [vmem:[#allocation30_spill] sm:$0xff]  ;;  %v5015_v8 = vld [vmem:[#allocation76_spill] sm:$0xff] }
  0xed   : > { %1585 = vmatpush.msra.mxu2 %v4993_v18  ;;  %1464 = vmatpush.msra.mxu1 %v4994_v9  ;;  %v5016_v18 = vld [vmem:[#allocation33_spill] sm:$0xff]  ;;  %v5017_v62 = vld [vmem:[#allocation34_spill] sm:$0xff] }
  0xee   : > { %1402 = vmatpush.msrb.mxu0 %v4995_v21 }
  0xef   : > { %1586 = vmatpush.msra.mxu2 %v4996_v45  ;;  %1465 = vmatpush.msra.mxu1 %v4997_v34 }
  0xf0   : > { %1255 = vmatmul.f32.vlgmr.msra.gmra.mxu0 %v3668_v37 }
  0xf1   : > { %1158 = vmatmul.f32.gmra.mxu1 %v4998_v47  ;;  %2417 = vmatmul.msk.f32.gmra.mxu3 %vm237_vm0, %v4999_v5  ;;  %v532_v61 = vpop.f32.mrf.mxu3  ;;  %v3885_v47 = vld [vmem:[%s2838_s24 + $0x1e8] sm:$0xff]  ;;  %v5020_v5 = vld [vmem:[#allocation37_spill] sm:$0xff] }
  0xf2   : > { %2434 = vmatmul.msk.f32.gmra.mxu2 %vm237_vm0, %v3728_v40  ;;  %1403 = vmatpush.msrb.mxu0 %v5000_v55  ;;  %v650_v2 = vpop.f32.mrf.mxu2  ;;  %v533_v10 = vadd.f32 %v532_v61, %v497_v60  ;;  %v618_v38 = vpop.f32.mrf.mxu0  ;;  %v5018_v60 = vld [vmem:[#allocation35_spill] sm:$0xff]  ;;  %v5021_v55 = vld [vmem:[#allocation38_spill] sm:$0xff] }
  0xf3   : > { %1466 = vmatpush.msra.mxu1 %v5001_v12  ;;  %1587 = vmatpush.msra.mxu2 %v5002_v32  ;;  %v651_v37 = vadd.f32 %v650_v2, %v615_v1  ;;  %v736_v43 = vpop.f32.mrf.mxu1  ;;  %v5019_v1 = vld [vmem:[#allocation36_spill] sm:$0xff] }
  0xf4   : > { %1404 = vmatpush.msrb.mxu0 %v5003_v6  ;;  %v540_v22 = vadd.f32 %v533_v10, %v3794_v14  ;;  %v5022_v2 = vld [vmem:[#allocation32_spill] sm:$0xff]  ;;  %v5025_v10 = vld [vmem:[#allocation42_spill] sm:$0xff] }
  0xf5   : > { %1467 = vmatpush.msra.mxu1 %v5004_v35  ;;  %v3854_v46 = vadd.f32 %v651_v37, %v3796_v42  ;;  %v5011_v42 = vld [vmem:[#allocation27_spill] sm:$0xff]  ;;  %v5023_v6 = vld [vmem:[#allocation40_spill] sm:$0xff] }
  0xf6   : > { %1405 = vmatpush.msrb.mxu0 %v5005_v54  ;;  %v5026_v37 = vld [vmem:[#allocation43_spill] sm:$0xff]  ;;  %v5027_v54 = vld [vmem:[#allocation44_spill] sm:$0xff] }
  0xf7   : > { %1468 = vmatpush.msra.mxu1 %v5006_v19  ;;  %v2432_v19 = vld [vmem:[%s2838_s24 + $0xf8] sm:$0xff] }
  0xf8   : > { %1258 = vmatmul.f32.gmra.mxu0 %v3698_v52  ;;  %v3867_v52 = vld [vmem:[%s2838_s24 + $0x1e0] sm:$0xff] }
  0xf9   : > { %1161 = vmatmul.f32.gmra.mxu1 %v3665_v48  ;;  %2418 = vmatmul.msk.f32.gmra.mxu3 %vm237_vm0, %v5007_v49  ;;  %v659_v27 = vpop.f32.mrf.mxu3 }
  0xfa   : > { %2435 = vmatmul.msk.f32.gmra.mxu2 %vm237_vm0, %v3748_v50  ;;  %1406 = vmatpush.msrb.mxu0 %v5008_v56  ;;  %v653_v14 = vpop.f32.mrf.mxu2  ;;  %v621_v48 = vpop.f32.mrf.mxu0  ;;  %v5029_v56 = vld [vmem:[#allocation46_spill] sm:$0xff] }
  0xfb   : > { %1469 = vmatpush.msra.mxu1 %v5009_v44  ;;  %v654_v25 = vadd.f32 %v653_v14, %v618_v38  ;;  %v739_v33 = vpop.f32.mrf.mxu1  ;;  %v5030_v44 = vld [vmem:[#allocation39_spill] sm:$0xff]  ;;  %v5031_v14 = vld [vmem:[#allocation48_spill] sm:$0xff] }
  0xfc   : > { %1537 = vmatpush.msra.mxu0 %v5010_v63  ;;  %v2556_v63 = vld [vmem:[%s2838_s24 + $0x18] sm:$0xff] }
  0xfd   : > { %1470 = vmatpush.msra.mxu1 %v5011_v42  ;;  %v3871_v30 = vadd.f32 %v654_v25, %v538_v24  ;;  %v5033_v42 = vld [vmem:[#allocation49_spill] sm:$0xff] }
  0xfe   : > { %1538 = vmatpush.msra.mxu0 %v5012_v53 }
  0xff   : > { %1471 = vmatpush.msra.mxu1 %v5013_v57 }
 0x100   : > { %1539 = vmatpush.msra.mxu0 %v5014_v41 }
 0x101   : > { %1164 = vmatmul.f32.gmra.mxu1 %v3867_v52  ;;  %1261 = vmatmul.f32.gmra.mxu0 %v3725_v16  ;;  %v771_v24 = vpop.f32.mrf.mxu3 }
 0x102   : > { %2419 = vmatmul.msk.f32.gmra.mxu3 %vm237_vm0, %v5015_v8  ;;  %2436 = vmatmul.msk.f32.gmra.mxu2 %vm237_vm0, %v3767_v15  ;;  %v656_v58 = vpop.f32.mrf.mxu2  ;;  %v772_v21 = vadd.f32 %v771_v24, %v736_v43  ;;  %v3932_v8 = vld [vmem:[%s2838_s24 + $0xf0] sm:$0xff] }
 0x103   : > { %1472 = vmatpush.msra.mxu1 %v5016_v18  ;;  %1540 = vmatpush.msra.mxu0 %v5017_v62  ;;  %v657_v9 = vadd.f32 %v656_v58, %v621_v48  ;;  %v624_v45 = vpop.f32.mrf.mxu0  ;;  %v742_v16 = vpop.f32.mrf.mxu1  ;;  %v5034_v48 = vld [vmem:[#allocation50_spill] sm:$0xff]  ;;  %v5036_v18 = vld [vmem:[#allocation51_spill] sm:$0xff]  ;;  %v5037_v62 = vld [vmem:[#allocation52_spill] sm:$0xff] }
 0x104   : > { %v660_v34 = vadd.f32 %v659_v27, %v624_v45  ;;  %v3892_v32 = vadd.f32 %v772_v21, %v3815_v20  ;;  %v5032_v27 = vld [vmem:[#allocation64_spill] sm:$0xff]  ;;  %v5038_v58 = vld [vmem:[#allocation67_spill] sm:$0xff]  ;;  %v2559_v45 = vld [vmem:[%s4734_s1 + $0x138] sm:$0xff] }
 0x105   : > { %1473 = vmatpush.msra.mxu1 %v5018_v60  ;;  %1541 = vmatpush.msra.mxu0 %v5019_v1  ;;  %v3889_v12 = vadd.f32 %v657_v9, %v539_v23  ;;  %v5024_v23 = vld [vmem:[#allocation41_spill] sm:$0xff]  ;;  %v5040_v1 = vld [vmem:[#allocation47_spill] sm:$0xff] }
 0x106   : > { %v3894_v61 = vadd.f32 %v660_v34, %v540_v22  ;;  %v5028_v22 = vld [vmem:[#allocation45_spill] sm:$0xff]  ;;  %v3944_v9 = vld [vmem:[%s2838_s24 + $0x28] sm:$0xff]  ;;  %v5043_v34 = vld [vmem:[#allocation68_spill] sm:$0xff] }
 0x107   : > { %1474 = vmatpush.msra.mxu1 %v5020_v5  ;;  %1542 = vmatpush.msra.mxu0 %v5021_v55  ;;  %v5039_v60 = vld [vmem:[#allocation53_spill] sm:$0xff]  ;;  %v2558_v21 = vld [vmem:[%s2838_s24 + $0x108] sm:$0xff] }
 0x109   : > { %1264 = vmatmul.f32.gmra.mxu0 %v3745_v4  ;;  %1337 = vmatmul.f32.vlgmr.msrb.gmra.mxu1 %v5022_v2  ;;  %v5044_v2 = vld [vmem:[#allocation57_spill] sm:$0xff] }
 0x10a   : > { %2420 = vmatmul.msk.f32.gmra.mxu3 %vm237_vm0, %v3885_v47  ;;  %2437 = vmatmul.msk.f32.gmra.mxu2 %vm237_vm0, %v3789_v17  ;;  %v774_v20 = vpop.f32.mrf.mxu3  ;;  %v3904_v35 = vpop.f32.mrf.mxu2 }
 0x10b   : > { %1475 = vmatpush.msra.mxu1 %v5023_v6  ;;  %1543 = vmatpush.msra.mxu0 %v5024_v23  ;;  %v775_v4 = vadd.f32 %v774_v20, %v739_v33  ;;  %v745_v38 = vpop.f32.mrf.mxu1  ;;  %v3908_v43 = vpop.f32.mrf.mxu0  ;;  %v5035_v33 = vld [vmem:[#allocation65_spill] sm:$0xff]  ;;  %v2560_v6 = vld [vmem:[%s4734_s1 + $0x130] sm:$0xff] }
 0x10d   : > { %1476 = vmatpush.msra.mxu1 %v5025_v10  ;;  %1544 = vmatpush.msra.mxu0 %v5026_v37  ;;  %v3914_v49 = vadd.f32 %v775_v4, %v3836_v26  ;;  %v5045_v37 = vld [vmem:[#allocation58_spill] sm:$0xff]  ;;  %v5046_v4 = vld [vmem:[#allocation59_spill] sm:$0xff] }
 0x10f   : > { %1643 = vmatpush.msrb.mxu1 %v5027_v54  ;;  %1545 = vmatpush.msra.mxu0 %v5028_v22  ;;  %v2561_v54 = vld [vmem:[%s4734_s1 + $0x128] sm:$0xff]  ;;  %v5047_v22 = vld [vmem:[#allocation54_spill] sm:$0xff] }
 0x111   : > { %1644 = vmatpush.msrb.mxu1 %v5029_v56  ;;  %1267 = vmatmul.f32.gmra.mxu0 %v3810_v11  ;;  %v3976_v56 = vld [vmem:[%s2838_s24 + $0x38] sm:$0xff] }
 0x112   : > { %1340 = vmatmul.f32.gmra.mxu1 %v5030_v44  ;;  %2438 = vmatmul.msk.f32.gmra.mxu2 %vm237_vm0, %v2432_v19  ;;  %v777_v26 = vpop.f32.mrf.mxu3  ;;  %v3925_v25 = vpop.f32.mrf.mxu2  ;;  %v3981_v44 = vld [vmem:[%s2838_s24 + $0x118] sm:$0xff] }
 0x113   : > { %2439 = vmatmul.msk.f32.vlgmr.msra.gmra.mxu3 %vm237_vm0, %v2556_v63  ;;  %1546 = vmatpush.msra.mxu0 %v5031_v14  ;;  %v778_v53 = vadd.f32 %v777_v26, %v742_v16  ;;  %v3929_v41 = vpop.f32.mrf.mxu0  ;;  %v5042_v16 = vld [vmem:[#allocation56_spill] sm:$0xff] }
 0x114   : > { %1690 = vmatpush.msra.mxu3 %v5032_v27  ;;  %1645 = vmatpush.msrb.mxu1 %v5033_v42  ;;  %v748_v57 = vpop.f32.mrf.mxu1  ;;  %v2567_v42 = vld [vmem:[%s4734_s1 + $0x110] sm:$0xff] }
 0x115   : > { %1547 = vmatpush.msra.mxu0 %v5034_v48  ;;  %v3938_v24 = vadd.f32 %v778_v53, %v3854_v46  ;;  %v5041_v46 = vld [vmem:[#allocation55_spill] sm:$0xff] }
 0x116   : > { %1691 = vmatpush.msra.mxu3 %v5035_v33  ;;  %1646 = vmatpush.msrb.mxu1 %v5036_v18  ;;  %v2568_v48 = vld [vmem:[%s4734_s1 + $0x108] sm:$0xff]  ;;  %v2569_v33 = vld [vmem:[%s2838_s24 + $0x110] sm:$0xff] }
 0x117   : > { %1548 = vmatpush.msra.mxu0 %v5037_v62  ;;  %v4011_v53 = vld [vmem:[%s2838_s24 + $0x48] sm:$0xff]  ;;  %v2573_v62 = vld [vmem:[%s4734_s1 + $0xf8] sm:$0xff] }
 0x118   : > { %1692 = vmatpush.msra.mxu3 %v5038_v58  ;;  %1647 = vmatpush.msrb.mxu1 %v5039_v60 }
 0x119   : > { %1270 = vmatmul.f32.gmra.mxu0 %v3932_v8 }
 0x11a   : > { %1343 = vmatmul.f32.gmra.mxu1 %v5040_v1  ;;  %2445 = vmatmul.msk.f32.vlgmr.msrb.gmra.mxu2 %vm237_vm0, %v2558_v21  ;;  %v780_v5 = vpop.f32.mrf.mxu3  ;;  %v2574_v1 = vld [vmem:[%s4734_s1 + $0xf0] sm:$0xff] }
 0x11b   : > { %2440 = vmatmul.msk.f32.gmra.mxu3 %vm237_vm0, %v3944_v9  ;;  %1772 = vmatpush.msrb.mxu2 %v2559_v45  ;;  %v3956_v55 = vpop.f32.mrf.mxu2  ;;  %v781_v23 = vadd.f32 %v780_v5, %v745_v38  ;;  %v3962_v10 = vpop.f32.mrf.mxu0  ;;  %v2562_v38 = vld [vmem:[%s2838_s24 + $0x100] sm:$0xff] }
 0x11c   : > { %1549 = vmatpush.msra.mxu0 %v5041_v46  ;;  %1648 = vmatpush.msrb.mxu1 %v5042_v16  ;;  %v751_v20 = vpop.f32.mrf.mxu1  ;;  %v2575_v45 = vld [vmem:[%s2838_s24 + $0x120] sm:$0xff]  ;;  %v892_v46 = vadd.f32 %v3904_v35, %v3908_v43  ;;  %v4044_v16 = vld [vmem:[%s2838_s24 + $0x58] sm:$0xff] }
 0x11d   : > { %1693 = vmatpush.msra.mxu3 %v5043_v34  ;;  %1773 = vmatpush.msrb.mxu2 %v2560_v6  ;;  %v3970_v19 = vadd.f32 %v781_v23, %v3871_v30  ;;  %v2566_v30 = vld [vmem:[%s4734_s1 + $0x120] sm:$0xff]  ;;  %v2580_v23 = vld [vmem:[%s4734_s1 + $0xd8] sm:$0xff] }
 0x11e   : > { %1550 = vmatpush.msra.mxu0 %v5044_v2  ;;  %1649 = vmatpush.msrb.mxu1 %v5045_v37  ;;  %v2579_v5 = vld [vmem:[%s4734_s1 + $0xe0] sm:$0xff] }
 0x11f   : > { %1774 = vmatpush.msrb.mxu2 %v2561_v54  ;;  %v5050_v37 = vld [vmem:[#allocation70_spill] sm:$0xff]  ;;  %v2583_v54 = vld [vmem:[%s4734_s1 + $0xd0] sm:$0xff] }
 0x120   : > { %1551 = vmatpush.msra.mxu0 %v5046_v4  ;;  %1650 = vmatpush.msrb.mxu1 %v4981_v39  ;;  %v2565_v39 = vld [vmem:[%s4734_s1 + $0x118] sm:$0xff]  ;;  %v4074_v4 = vld [vmem:[%s2838_s24 + $0x148] sm:$0xff] }
 0x121   : > { %1407 = vmatmul.f32.vlgmr.msrb.gmra.mxu0 %v2562_v38  ;;  %1775 = vmatpush.msrb.mxu2 %v2566_v30  ;;  %v2586_v30 = vld [vmem:[%s4734_s1 + $0x70] sm:$0xff] }
 0x122   : > { %1346 = vmatmul.f32.gmra.mxu1 %v5047_v22  ;;  %2446 = vmatmul.msk.f32.gmra.mxu2 %vm237_vm0, %v3981_v44  ;;  %v783_v63 = vpop.f32.mrf.mxu3  ;;  %v2584_v22 = vld [vmem:[%s4734_s1 + $0x78] sm:$0xff] }
 0x123   : > { %2441 = vmatmul.msk.f32.gmra.mxu3 %vm237_vm0, %v3976_v56  ;;  %1552 = vmatpush.msra.mxu0 %v3383_v13  ;;  %v3993_v14 = vpop.f32.mrf.mxu2  ;;  %v784_v13 = vadd.f32 %v783_v63, %v748_v57  ;;  %v4016_v57 = vld [vmem:[%s2838_s24 + $0x128] sm:$0xff] }
 0x124   : > { %1651 = vmatpush.msrb.mxu1 %v4983_v36  ;;  %v3996_v36 = vpop.f32.mrf.mxu0  ;;  %v944_v27 = vpop.f32.mrf.mxu1 }
 0x125   : > { %1725 = vmatpush.msrb.mxu0 %v2565_v39  ;;  %v4003_v26 = vadd.f32 %v784_v13, %v3889_v12  ;;  %v945_v34 = vadd.f32 %v944_v27, %v892_v46  ;;  %v2585_v39 = vld [vmem:[%s4734_s1 + $0xc8] sm:$0xff] }
 0x126   : > { %1652 = vmatpush.msrb.mxu1 %v4984_v7  ;;  %v5048_v7 = vld [vmem:[#allocation61_spill] sm:$0xff] }
 0x127   : > { %1726 = vmatpush.msrb.mxu0 %v2567_v42 }
 0x128   : > { %1653 = vmatpush.msrb.mxu1 %v4985_v59  ;;  %v2572_v59 = vld [vmem:[%s4734_s1 + $0x100] sm:$0xff] }
 0x129   : > { %1727 = vmatpush.msrb.mxu0 %v2568_v48  ;;  %v2587_v48 = vld [vmem:[%s4734_s1 + $0xc0] sm:$0xff] }
 0x12a   : > { %1349 = vmatmul.f32.gmra.mxu1 %v5048_v7  ;;  %1410 = vmatmul.f32.gmra.mxu0 %v2569_v33  ;;  %v786_v12 = vpop.f32.mrf.mxu3  ;;  %v2588_v7 = vld [vmem:[%s4734_s1 + $0x68] sm:$0xff] }
 0x12b   : > { %2442 = vmatmul.msk.f32.gmra.mxu3 %vm237_vm0, %v4011_v53  ;;  %2447 = vmatmul.msk.f32.gmra.mxu2 %vm237_vm0, %v4016_v57  ;;  %v4024_v18 = vpop.f32.mrf.mxu2  ;;  %v787_v58 = vadd.f32 %v786_v12, %v751_v20  ;;  %v2581_v20 = vld [vmem:[%s2838_s24 + $0x130] sm:$0xff]  ;;  %v898_v12 = vadd.f32 %v3956_v55, %v3962_v10  ;;  %v2593_v55 = vld [vmem:[%s4734_s1 + $0x60] sm:$0xff] }
 0x12c   : > { %1654 = vmatpush.msrb.mxu1 %v3432_v0  ;;  %1728 = vmatpush.msrb.mxu0 %v2572_v59  ;;  %v4030_v0 = vpop.f32.mrf.mxu0  ;;  %v947_v60 = vpop.f32.mrf.mxu1  ;;  %v4099_v59 = vld [vmem:[%s2838_s24 + $0x140] sm:$0xff] }
 0x12d   : > { %v4037_v21 = vadd.f32 %v787_v58, %v3894_v61  ;;  %v2578_v61 = vld [vmem:[%s4734_s1 + $0xe8] sm:$0xff]  ;;  %v2591_v58 = vld [vmem:[%s4734_s1 + $0x98] sm:$0xff] }
 0x12e   : > { %1655 = vmatpush.msrb.mxu1 %v3449_v29  ;;  %1729 = vmatpush.msrb.mxu0 %v2573_v62  ;;  %v5049_v29 = vld [vmem:[#allocation69_spill] sm:$0xff] }
 0x12f   : > { %v4105_v62 = vld [vmem:[%s2838_s24 + $0x158] sm:$0xff] }
 0x130   : > { %1656 = vmatpush.msrb.mxu1 %v3456_v51  ;;  %1730 = vmatpush.msrb.mxu0 %v2574_v1  ;;  %v4049_v51 = vld [vmem:[%s2838_s24 + $0x138] sm:$0xff] }
 0x132   : > { %1352 = vmatmul.f32.gmra.mxu1 %v5049_v29  ;;  %1413 = vmatmul.f32.gmra.mxu0 %v2575_v45 }
 0x133   : > { %2443 = vmatmul.msk.f32.gmra.mxu3 %vm237_vm0, %v4044_v16  ;;  %2448 = vmatmul.msk.f32.gmra.mxu2 %vm237_vm0, %v4049_v51  ;;  %v4057_v35 = vpop.f32.mrf.mxu2  ;;  %v979_v43 = vpop.f32.mrf.mxu3 }
 0x134   : > { %1657 = vmatpush.msrb.mxu1 %v3468_v28  ;;  %1731 = vmatpush.msrb.mxu0 %v2578_v61  ;;  %v980_v2 = vadd.f32 %v979_v43, %v945_v34  ;;  %v4063_v6 = vpop.f32.mrf.mxu0  ;;  %v950_v28 = vpop.f32.mrf.mxu1  ;;  %v2596_v43 = vld [vmem:[%s4734_s1 + $0x58] sm:$0xff] }
 0x135   : > { %v951_v1 = vadd.f32 %v950_v28, %v898_v12  ;;  %v2598_v28 = vld [vmem:[%s4734_s1 + $0x88] sm:$0xff]  ;;  %v904_v12 = vadd.f32 %v4024_v18, %v4030_v0  ;;  %v2612_v18 = vld [vmem:[%s4734_s1 + $0x1c0] sm:$0xff] }
 0x136   : > { %1658 = vmatpush.msrb.mxu1 %v3480_v31  ;;  %1732 = vmatpush.msrb.mxu0 %v2579_v5  ;;  %v895_v31 = vadd.f32 %v3925_v25, %v3929_v41 }
 0x138   : > { %1733 = vmatpush.msrb.mxu0 %v2580_v23  ;;  %v948_v38 = vadd.f32 %v947_v60, %v895_v31  ;;  %v2592_v60 = vld [vmem:[%s4734_s1 + $0xb8] sm:$0xff]  ;;  %v2599_v23 = vld [vmem:[%s4734_s1 + $0x50] sm:$0xff] }
 0x13a   : > { %1416 = vmatmul.f32.gmra.mxu0 %v2581_v20  ;;  %1477 = vmatmul.f32.vlgmr.msra.gmra.mxu1 %v2569_v33 }
 0x13b   : > { %2444 = vmatmul.msk.f32.gmra.mxu3 %vm237_vm0, %v5050_v37  ;;  %2449 = vmatmul.msk.f32.gmra.mxu2 %vm237_vm0, %v4074_v4  ;;  %v982_v25 = vpop.f32.mrf.mxu3  ;;  %v1079_v41 = vpop.f32.mrf.mxu2  ;;  %v2600_v37 = vld [vmem:[%s2838_s24 + $0x150] sm:$0xff] }
 0x13c   : > { %1734 = vmatpush.msrb.mxu0 %v2583_v54  ;;  %1795 = vmatpush.msra.mxu1 %v2584_v22  ;;  %v983_v63 = vadd.f32 %v982_v25, %v948_v38  ;;  %v1044_v27 = vpop.f32.mrf.mxu0  ;;  %v901_v54 = vadd.f32 %v3993_v14, %v3996_v36  ;;  %v2601_v22 = vld [vmem:[%s4734_s1 + $0x1d8] sm:$0xff]  ;;  %v2602_v38 = vld [vmem:[%s4734_s1 + $0xa0] sm:$0xff]  ;;  %v2603_v14 = vld [vmem:[%s4734_s1 + $0x48] sm:$0xff] }
 0x13d   : > { %v953_v13 = vpop.f32.mrf.mxu1  ;;  %v1080_v42 = vadd.f32 %v1079_v41, %v1044_v27  ;;  %v2605_v25 = vld [vmem:[%s4734_s1 + $0x1d0] sm:$0xff]  ;;  %v2607_v27 = vld [vmem:[%s4734_s1 + $0x1c8] sm:$0xff] }
 0x13e   : > { %1735 = vmatpush.msrb.mxu0 %v2585_v39  ;;  %1796 = vmatpush.msra.mxu1 %v2586_v30 }
 0x13f   : > { %v4096_v33 = vadd.f32 %v1080_v42, %v980_v2  ;;  %v2597_v2 = vld [vmem:[%s4734_s1 + $0xa8] sm:$0xff]  ;;  %v2608_v42 = vld [vmem:[%s4734_s1 + $0x38] sm:$0xff] }
 0x140   : > { %1736 = vmatpush.msrb.mxu0 %v2587_v48  ;;  %1797 = vmatpush.msra.mxu1 %v2588_v7  ;;  %v2609_v7 = vld [vmem:[%s2838_s24 + $0x20] sm:$0xff] }
 0x142   : > { %1419 = vmatmul.f32.gmra.mxu0 %v4099_v59  ;;  %1480 = vmatmul.f32.gmra.mxu1 %v2575_v45  ;;  %v2595_v45 = vld [vmem:[%s4734_s1 + $0x90] sm:$0xff] }
 0x143   : > { %2450 = vmatmul.msk.f32.gmra.mxu2 %vm237_vm0, %v4105_v62  ;;  %2451 = vmatmul.msk.f32.vlgmr.msrb.gmra.mxu3 %vm237_vm0, %v3981_v44  ;;  %v985_v10 = vpop.f32.mrf.mxu3  ;;  %v2594_v44 = vld [vmem:[%s4734_s1 + $0xb0] sm:$0xff] }
 0x144   : > { %1842 = vmatpush.msrb.mxu3 %v2591_v58  ;;  %1737 = vmatpush.msrb.mxu0 %v2592_v60  ;;  %v1082_v29 = vpop.f32.mrf.mxu2  ;;  %v986_v46 = vadd.f32 %v985_v10, %v951_v1  ;;  %v1047_v34 = vpop.f32.mrf.mxu0  ;;  %v2610_v58 = vld [vmem:[%s4734_s1 + $0x1b8] sm:$0xff]  ;;  %v2614_v1 = vld [vmem:[%s4734_s1 + $0x28] sm:$0xff] }
 0x145   : > { %1798 = vmatpush.msra.mxu1 %v2593_v55  ;;  %v956_v61 = vpop.f32.mrf.mxu1  ;;  %v1083_v5 = vadd.f32 %v1082_v29, %v1047_v34  ;;  %v2617_v34 = vld [vmem:[%s2838_s24 + $0x30] sm:$0xff] }
 0x146   : > { %1738 = vmatpush.msrb.mxu0 %v2594_v44  ;;  %1843 = vmatpush.msrb.mxu3 %v2595_v45  ;;  %v957_v60 = vadd.f32 %v956_v61, %v904_v12  ;;  %v2615_v45 = vld [vmem:[%s4734_s1 + $0x1a8] sm:$0xff] }
 0x147   : > { %1799 = vmatpush.msra.mxu1 %v2596_v43  ;;  %v4138_v31 = vadd.f32 %v1083_v5, %v983_v63  ;;  %v2606_v63 = vld [vmem:[%s4734_s1 + $0x40] sm:$0xff]  ;;  %v907_v43 = vadd.f32 %v4057_v35, %v4063_v6  ;;  %v2620_v6 = vld [vmem:[%s4734_s1 + $0x198] sm:$0xff] }
 0x148   : > { %1739 = vmatpush.msrb.mxu0 %v2597_v2  ;;  %1844 = vmatpush.msrb.mxu3 %v2598_v28  ;;  %v2618_v5 = vld [vmem:[%s4734_s1 + $0x1a0] sm:$0xff]  ;;  %v2619_v2 = vld [vmem:[%s4734_s1 + $0x18] sm:$0xff] }
 0x149   : > { %1800 = vmatpush.msra.mxu1 %v2599_v23 }
 0x14a   : > { %1422 = vmatmul.f32.gmra.mxu0 %v2600_v37  ;;  %1483 = vmatmul.f32.gmra.mxu1 %v2581_v20  ;;  %v954_v20 = vadd.f32 %v953_v13, %v901_v54 }
 0x14b   : > { %2452 = vmatmul.msk.f32.gmra.mxu3 %vm237_vm0, %v4016_v57  ;;  %2457 = vmatmul.msk.f32.vlgmr.msra.gmra.mxu2 %vm237_vm0, %v3944_v9  ;;  %v2604_v9 = vld [vmem:[%s4734_s1 + $0x80] sm:$0xff]  ;;  %v988_v36 = vpop.f32.mrf.mxu3 }
 0x14c   : > { %1912 = vmatpush.msra.mxu2 %v2601_v22  ;;  %1740 = vmatpush.msrb.mxu0 %v2602_v38  ;;  %v1085_v57 = vpop.f32.mrf.mxu2  ;;  %v989_v41 = vadd.f32 %v988_v36, %v954_v20  ;;  %v1050_v30 = vpop.f32.mrf.mxu0  ;;  %v2622_v38 = vld [vmem:[%s4734_s1 + $0x8] sm:$0xff]  ;;  %v2623_v20 = vld [vmem:[%s4734_s1 + $0x190] sm:$0xff]  ;;  %v2625_v36 = vld [vmem:[%s2838_s24 + $0x40] sm:$0xff] }
 0x14d   : > { %1801 = vmatpush.msra.mxu1 %v2603_v14  ;;  %1845 = vmatpush.msrb.mxu3 %v2604_v9  ;;  %v959_v39 = vpop.f32.mrf.mxu1  ;;  %v1086_v13 = vadd.f32 %v1085_v57, %v1050_v30  ;;  %v2624_v9 = vld [vmem:[%s2838_s24 + $0x160] sm:$0xff] }
 0x14e   : > { %1913 = vmatpush.msra.mxu2 %v2605_v25  ;;  %v960_v28 = vadd.f32 %v959_v39, %v907_v43  ;;  %v2626_v57 = vld [vmem:[%s4734_s1] sm:$0xff]  ;;  %v2627_v25 = vld [vmem:[%s4734_s1 + $0x188] sm:$0xff] }
 0x14f   : > { %1802 = vmatpush.msra.mxu1 %v2606_v63  ;;  %v4171_v48 = vadd.f32 %v1086_v13, %v986_v46  ;;  %v2616_v46 = vld [vmem:[%s4734_s1 + $0x20] sm:$0xff]  ;;  %v2638_v43 = vld [vmem:[%s4734_s1 + $0x248] sm:$0xff] }
 0x150   : > { %1914 = vmatpush.msra.mxu2 %v2607_v27  ;;  %v2463_v13 = vld [vmem:[%s2838_s24 + $0x120] sm:$0xff] }
 0x151   : > { %1803 = vmatpush.msra.mxu1 %v2608_v42  ;;  %v2629_v42 = vld [vmem:[%s4734_s1 + $0x178] sm:$0xff] }
 0x152   : > { %1486 = vmatmul.f32.gmra.mxu1 %v4099_v59  ;;  %1553 = vmatmul.f32.vlgmr.msra.gmra.mxu0 %v2609_v7  ;;  %v2611_v59 = vld [vmem:[%s4734_s1 + $0x30] sm:$0xff] }
 0x153   : > { %2453 = vmatmul.msk.f32.gmra.mxu3 %vm237_vm0, %v4049_v51  ;;  %2458 = vmatmul.msk.f32.gmra.mxu2 %vm237_vm0, %v3976_v56  ;;  %v991_v0 = vpop.f32.mrf.mxu3  ;;  %v2613_v56 = vld [vmem:[%s4734_s1 + $0x1b0] sm:$0xff] }
 0x154   : > { %1865 = vmatpush.msra.mxu0 %v2610_v58  ;;  %1804 = vmatpush.msra.mxu1 %v2611_v59  ;;  %v1088_v51 = vpop.f32.mrf.mxu2  ;;  %v992_v55 = vadd.f32 %v991_v0, %v957_v60  ;;  %v2630_v58 = vld [vmem:[%s2838_s24 + $0x50] sm:$0xff]  ;;  %v2631_v59 = vld [vmem:[%s2838_s24 + $0x168] sm:$0xff] }
 0x155   : > { %1915 = vmatpush.msra.mxu2 %v2612_v18  ;;  %v1053_v10 = vpop.f32.mrf.mxu0  ;;  %v1150_v29 = vpop.f32.mrf.mxu1  ;;  %v2632_v60 = vld [vmem:[%s2838_s24 + $0x68] sm:$0xff]  ;;  %v2633_v18 = vld [vmem:[%s4734_s1 + $0x170] sm:$0xff] }
 0x156   : > { %1866 = vmatpush.msra.mxu0 %v2613_v56  ;;  %1805 = vmatpush.msra.mxu1 %v2614_v1  ;;  %v1089_v44 = vadd.f32 %v1088_v51, %v1053_v10  ;;  %v2635_v56 = vld [vmem:[%s4734_s1 + $0x168] sm:$0xff]  ;;  %v2636_v1 = vld [vmem:[%s4734_s1 + $0x250] sm:$0xff] }
 0x158   : > { %1867 = vmatpush.msra.mxu0 %v2615_v45  ;;  %1806 = vmatpush.msra.mxu1 %v2616_v46  ;;  %v4202_v61 = vadd.f32 %v1089_v44, %v989_v41  ;;  %v2465_v44 = vld [vmem:[%s2838_s24 + $0x130] sm:$0xff]  ;;  %v2464_v46 = vld [vmem:[%s2838_s24 + $0x128] sm:$0xff] }
 0x15a   : > { %1489 = vmatmul.f32.gmra.mxu1 %v2600_v37  ;;  %1556 = vmatmul.f32.gmra.mxu0 %v2617_v34  ;;  %v2637_v34 = vld [vmem:[%s4734_s1 + $0x160] sm:$0xff] }
 0x15b   : > { %2454 = vmatmul.msk.f32.gmra.mxu3 %vm237_vm0, %v4074_v4  ;;  %2459 = vmatmul.msk.f32.gmra.mxu2 %vm237_vm0, %v4011_v53  ;;  %v2621_v53 = vld [vmem:[%s4734_s1 + $0x10] sm:$0xff] }
 0x15c   : > { %1868 = vmatpush.msra.mxu0 %v2618_v5  ;;  %1807 = vmatpush.msra.mxu1 %v2619_v2  ;;  %v994_v23 = vpop.f32.mrf.mxu3  ;;  %v1091_v35 = vpop.f32.mrf.mxu2 }
 0x15d   : > { %v995_v4 = vadd.f32 %v994_v23, %v960_v28  ;;  %v1056_v37 = vpop.f32.mrf.mxu0  ;;  %v1153_v54 = vpop.f32.mrf.mxu1  ;;  %v2639_v28 = vld [vmem:[%s2838_s24 + $0x60] sm:$0xff]  ;;  %v5051_v23 = vld [vmem:[#allocation73_spill] sm:$0xff] }
 0x15e   : > { %1869 = vmatpush.msra.mxu0 %v2620_v6  ;;  %1808 = vmatpush.msra.mxu1 %v2621_v53  ;;  %v1092_v22 = vadd.f32 %v1091_v35, %v1056_v37  ;;  %v2640_v6 = vld [vmem:[%s4734_s1 + $0x278] sm:$0xff]  ;;  %v2642_v53 = vld [vmem:[%s4734_s1 + $0x240] sm:$0xff] }
 0x160   : > { %1809 = vmatpush.msra.mxu1 %v2622_v38  ;;  %1870 = vmatpush.msra.mxu0 %v2623_v20  ;;  %v4229_v14 = vadd.f32 %v1092_v22, %v992_v55  ;;  %v2644_v22 = vld [vmem:[%s4734_s1 + $0x270] sm:$0xff] }
 0x162   : > { %1492 = vmatmul.f32.gmra.mxu1 %v2624_v9  ;;  %1559 = vmatmul.f32.gmra.mxu0 %v2625_v36  ;;  %v2467_v36 = vld [vmem:[%s2838_s24 + $0x140] sm:$0xff] }
 0x163   : > { %2455 = vmatmul.msk.f32.gmra.mxu3 %vm237_vm0, %v4105_v62  ;;  %2460 = vmatmul.msk.f32.gmra.mxu2 %vm237_vm0, %v4044_v16  ;;  %v2628_v62 = vld [vmem:[%s4734_s1 + $0x180] sm:$0xff] }
 0x164   : > { %1810 = vmatpush.msra.mxu1 %v2626_v57  ;;  %1871 = vmatpush.msra.mxu0 %v2627_v25  ;;  %v1094_v41 = vpop.f32.mrf.mxu2  ;;  %v1185_v39 = vpop.f32.mrf.mxu3  ;;  %v2645_v57 = vld [vmem:[%s4734_s1 + $0x238] sm:$0xff] }
 0x165   : > { %v1186_v16 = vadd.f32 %v1185_v39, %v1150_v29  ;;  %v1059_v30 = vpop.f32.mrf.mxu0  ;;  %v2646_v39 = vld [vmem:[%s4734_s1 + $0x148] sm:$0xff] }
 0x166   : > { %1872 = vmatpush.msra.mxu0 %v2628_v62  ;;  %v1156_v63 = vpop.f32.mrf.mxu1  ;;  %v1095_v27 = vadd.f32 %v1094_v41, %v1059_v30  ;;  %v2466_v41 = vld [vmem:[%s2838_s24 + $0x138] sm:$0xff]  ;;  %v2647_v62 = vld [vmem:[%s4734_s1 + $0x268] sm:$0xff]  ;;  %v2648_v30 = vld [vmem:[%s4734_s1 + $0x230] sm:$0xff] }
 0x167   : > { %v1203_v7 = vadd.f32 %v1186_v16, %v4096_v33  ;;  %v2634_v33 = vld [vmem:[%s4734_s1 + $0x258] sm:$0xff] }
 0x168   : > { %1873 = vmatpush.msra.mxu0 %v2629_v42  ;;  %v4251_v12 = vadd.f32 %v1095_v27, %v995_v4  ;;  %v5052_v27 = vld [vmem:[#allocation3_spill] sm:$0xff] }
 0x16a   : > { %1562 = vmatmul.f32.gmra.mxu0 %v2630_v58  ;;  %1659 = vmatmul.f32.vlgmr.msrb.gmra.mxu1 %v2463_v13  ;;  %v2649_v13 = vld [vmem:[%s2838_s24 + $0x70] sm:$0xff]  ;;  %v2652_v58 = vld [vmem:[%s4734_s1 + $0x228] sm:$0xff] }
 0x16b   : > { %2456 = vmatmul.msk.f32.gmra.mxu3 %vm237_vm0, %v2631_v59  ;;  %2461 = vmatmul.msk.f32.gmra.mxu2 %vm237_vm0, %v2632_v60  ;;  %v2653_v59 = vld [vmem:[%s4734_s1 + $0x260] sm:$0xff] }
 0x16c   : > { %1874 = vmatpush.msra.mxu0 %v2633_v18  ;;  %1941 = vmatpush.msrb.mxu1 %v2634_v33  ;;  %v1188_v0 = vpop.f32.mrf.mxu3  ;;  %v2654_v33 = vld [vmem:[%s4734_s1 + $0x310] sm:$0xff] }
 0x16d   : > { %v1291_v51 = vpop.f32.mrf.mxu2  ;;  %v1189_v55 = vadd.f32 %v1188_v0, %v1153_v54  ;;  %v1256_v29 = vpop.f32.mrf.mxu0  ;;  %v2643_v54 = vld [vmem:[%s4734_s1 + $0x150] sm:$0xff] }
 0x16e   : > { %1875 = vmatpush.msra.mxu0 %v2635_v56  ;;  %1942 = vmatpush.msrb.mxu1 %v2636_v1  ;;  %v4270_v10 = vpop.f32.mrf.mxu1  ;;  %v1292_v45 = vadd.f32 %v1291_v51, %v1256_v29  ;;  %v2469_v1 = vld [vmem:[%s2838_s24 + $0x150] sm:$0xff] }
 0x16f   : > { %v1204_v5 = vadd.f32 %v1189_v55, %v4138_v31  ;;  %v2641_v31 = vld [vmem:[%s4734_s1 + $0x158] sm:$0xff]  ;;  %v2655_v55 = vld [vmem:[%s4734_s1 + $0x220] sm:$0xff] }
 0x170   : > { %1876 = vmatpush.msra.mxu0 %v2637_v34  ;;  %1943 = vmatpush.msrb.mxu1 %v2638_v43  ;;  %v4281_v2 = vadd.f32 %v1292_v45, %v1203_v7  ;;  %v2651_v7 = vld [vmem:[%s4734_s1 + $0x140] sm:$0xff]  ;;  %v2656_v45 = vld [vmem:[%s4734_s1 + $0x308] sm:$0xff]  ;;  %v2658_v43 = vld [vmem:[%s2838_s24 + $0x90] sm:$0xff] }
 0x172   : > { %1565 = vmatmul.f32.gmra.mxu0 %v2639_v28  ;;  %1662 = vmatmul.f32.gmra.mxu1 %v2465_v44  ;;  %v1315_v35 = vmax.f32 %v3892_v32, %v4281_v2  ;;  %v2468_v44 = vld [vmem:[%s2838_s24 + $0x148] sm:$0xff]  ;;  %v2660_v28 = vld [vmem:[%s4734_s1 + $0x210] sm:$0xff] }
 0x173   : > { %2462 = vmatmul.msk.f32.gmra.mxu2 %vm237_vm0, %v5051_v23  ;;  %2475 = vmatmul.msk.f32.vlgmr.msra.gmra.mxu3 %vm237_vm0, %v2464_v46 }
 0x174   : > { %1988 = vmatpush.msra.mxu3 %v2640_v6  ;;  %1877 = vmatpush.msra.mxu0 %v2641_v31  ;;  %v1191_v4 = vpop.f32.mrf.mxu3  ;;  %v4380_v31 = vld [vmem:[%s4734_s1 + $0x2f0] sm:$0xff] }
 0x175   : > { %1944 = vmatpush.msrb.mxu1 %v2642_v53  ;;  %v1294_v37 = vpop.f32.mrf.mxu2  ;;  %v1192_v38 = vadd.f32 %v1191_v4, %v1156_v63  ;;  %v1259_v9 = vpop.f32.mrf.mxu0  ;;  %v2663_v53 = vld [vmem:[%s4734_s1 + $0x208] sm:$0xff] }
 0x176   : > { %1878 = vmatpush.msra.mxu0 %v2643_v54  ;;  %1989 = vmatpush.msra.mxu3 %v2644_v22  ;;  %v4304_v20 = vpop.f32.mrf.mxu1  ;;  %v1295_v25 = vadd.f32 %v1294_v37, %v1259_v9  ;;  %v2471_v22 = vld [vmem:[%s2838_s24 + $0x160] sm:$0xff]  ;;  %v2470_v9 = vld [vmem:[%s2838_s24 + $0x158] sm:$0xff] }
 0x177   : > { %1945 = vmatpush.msrb.mxu1 %v2645_v57  ;;  %v1205_v16 = vadd.f32 %v1192_v38, %v4171_v48  ;;  %v2650_v48 = vld [vmem:[%s4734_s1 + $0x318] sm:$0xff]  ;;  %v2665_v57 = vld [vmem:[%s4734_s1 + $0x200] sm:$0xff] }
 0x178   : > { %1879 = vmatpush.msra.mxu0 %v2646_v39  ;;  %1990 = vmatpush.msra.mxu3 %v2647_v62  ;;  %v4321_v63 = vadd.f32 %v1295_v25, %v1204_v5  ;;  %v2668_v62 = vld [vmem:[%s4734_s1 + $0x1f8] sm:$0xff] }
 0x179   : > { %1946 = vmatpush.msrb.mxu1 %v2648_v30 }
 0x17a   : > { %1568 = vmatmul.f32.gmra.mxu0 %v2649_v13  ;;  %1665 = vmatmul.f32.gmra.mxu1 %v2467_v36  ;;  %v1316_v42 = vmax.f32 %v3914_v49, %v4321_v63  ;;  %v4392_v36 = vld [vmem:[%s4734_s1 + $0x2e8] sm:$0xff]  ;;  %v2670_v13 = vld [vmem:[%s4734_s1 + $0x1f0] sm:$0xff] }
 0x17b   : > { %2476 = vmatmul.msk.f32.gmra.mxu3 %vm237_vm0, %v2466_v41  ;;  %2481 = vmatmul.msk.f32.vlgmr.msrb.gmra.mxu2 %vm237_vm0, %v5052_v27  ;;  %v4402_v41 = vld [vmem:[%s2838_s24 + $0xa0] sm:$0xff] }
 0x17c   : > { %2094 = vmatpush.msrb.mxu2 %v2650_v48  ;;  %1880 = vmatpush.msra.mxu0 %v2651_v7  ;;  %v1194_v60 = vpop.f32.mrf.mxu3 }
 0x17d   : > { %1947 = vmatpush.msrb.mxu1 %v2652_v58  ;;  %1991 = vmatpush.msra.mxu3 %v2653_v59  ;;  %v1297_v18 = vpop.f32.mrf.mxu2  ;;  %v1195_v0 = vadd.f32 %v1194_v60, %v4270_v10  ;;  %v2657_v10 = vld [vmem:[%s4734_s1 + $0x218] sm:$0xff]  ;;  %v2473_v58 = vld [vmem:[%s2838_s24 + $0x170] sm:$0xff]  ;;  %v2472_v60 = vld [vmem:[%s2838_s24 + $0x168] sm:$0xff] }
 0x17e   : > { %2095 = vmatpush.msrb.mxu2 %v2654_v33  ;;  %v1165_v51 = vpop.f32.mrf.mxu1  ;;  %v1262_v56 = vpop.f32.mrf.mxu0  ;;  %v2672_v33 = vld [vmem:[%s4734_s1 + $0x1e8] sm:$0xff] }
 0x17f   : > { %1948 = vmatpush.msrb.mxu1 %v2655_v55  ;;  %v1298_v29 = vadd.f32 %v1297_v18, %v1262_v56  ;;  %v1206_v46 = vadd.f32 %v1195_v0, %v4202_v61  ;;  %v4368_v61 = vld [vmem:[%s4734_s1 + $0x2f8] sm:$0xff]  ;;  %v4433_v18 = vld [vmem:[%s4734_s1 + $0x2d0] sm:$0xff]  ;;  %v2675_v55 = vld [vmem:[%s4734_s1 + $0x1e0] sm:$0xff] }
 0x180   : > { %2096 = vmatpush.msrb.mxu2 %v2656_v45  ;;  %v4443_v56 = vld [vmem:[%s2838_s24 + $0xb0] sm:$0xff] }
 0x181   : > { %1949 = vmatpush.msrb.mxu1 %v2657_v10  ;;  %v4357_v34 = vadd.f32 %v1298_v29, %v1205_v16 }
 0x182   : > { %1668 = vmatmul.f32.gmra.mxu1 %v2469_v1  ;;  %1741 = vmatmul.f32.vlgmr.msrb.gmra.mxu0 %v2658_v43 }
 0x183   : > { %2477 = vmatmul.msk.f32.gmra.mxu3 %vm237_vm0, %v2468_v44  ;;  %2482 = vmatmul.msk.f32.gmra.mxu2 %vm237_vm0, %v3703_v3  ;;  %v1317_v5 = vmax.f32 %v3938_v24, %v4357_v34  ;;  %v2661_v3 = vld [vmem:[%s4734_s1 + $0x300] sm:$0xff] }
 0x184   : > { %2047 = vmatpush.msrb.mxu0 %v4368_v61  ;;  %1950 = vmatpush.msrb.mxu1 %v2660_v28  ;;  %v2474_v28 = vld [vmem:[%s2838_s24 + $0x178] sm:$0xff] }
 0x185   : > { %2097 = vmatpush.msrb.mxu2 %v2661_v3  ;;  %v1197_v23 = vpop.f32.mrf.mxu3  ;;  %v1300_v6 = vpop.f32.mrf.mxu2  ;;  %v4470_v3 = vld [vmem:[%s4734_s1 + $0x2b8] sm:$0xff] }
 0x186   : > { %2048 = vmatpush.msrb.mxu0 %v4380_v31  ;;  %1951 = vmatpush.msrb.mxu1 %v2663_v53  ;;  %v1198_v4 = vadd.f32 %v1197_v23, %v4304_v20  ;;  %v1265_v37 = vpop.f32.mrf.mxu0  ;;  %v1338_v54 = vpop.f32.mrf.mxu1  ;;  %v2679_v53 = vld [vmem:[%s2838_s24 + $0x180] sm:$0xff] }
 0x187   : > { %v1301_v38 = vadd.f32 %v1300_v6, %v1265_v37  ;;  %v4476_v6 = vld [vmem:[%s2838_s24 + $0xc0] sm:$0xff]  ;;  %v4488_v37 = vld [vmem:[%s4734_s1 + $0x2b0] sm:$0xff] }
 0x188   : > { %2049 = vmatpush.msrb.mxu0 %v4392_v36  ;;  %1952 = vmatpush.msrb.mxu1 %v2665_v57  ;;  %v1207_v25 = vadd.f32 %v1198_v4, %v4229_v14  ;;  %v4413_v14 = vld [vmem:[%s4734_s1 + $0x2e0] sm:$0xff] }
 0x189   : > { %v4399_v20 = vadd.f32 %v1301_v38, %v1206_v46 }
 0x18a   : > { %1671 = vmatmul.f32.gmra.mxu1 %v2471_v22  ;;  %1744 = vmatmul.f32.gmra.mxu0 %v4402_v41 }
 0x18b   : > { %2478 = vmatmul.msk.f32.gmra.mxu3 %vm237_vm0, %v2470_v9  ;;  %2483 = vmatmul.msk.f32.gmra.mxu2 %vm237_vm0, %v3728_v40  ;;  %v1318_v39 = vmax.f32 %v3970_v19, %v4399_v20  ;;  %v4422_v40 = vld [vmem:[%s4734_s1 + $0x2d8] sm:$0xff] }
 0x18c   : > { %2050 = vmatpush.msrb.mxu0 %v4413_v14  ;;  %1953 = vmatpush.msrb.mxu1 %v2668_v62  ;;  %v2682_v62 = vld [vmem:[%s4734_s1 + $0x2a0] sm:$0xff] }
 0x18d   : > { %v1200_v16 = vpop.f32.mrf.mxu3  ;;  %v1303_v30 = vpop.f32.mrf.mxu2 }
 0x18e   : > { %2051 = vmatpush.msrb.mxu0 %v4422_v40  ;;  %1954 = vmatpush.msrb.mxu1 %v2670_v13  ;;  %v1201_v27 = vadd.f32 %v1200_v16, %v1165_v51  ;;  %v1268_v48 = vpop.f32.mrf.mxu0  ;;  %v4503_v16 = vld [vmem:[%s2838_s24 + $0xd0] sm:$0xff]  ;;  %v2686_v13 = vld [vmem:[%s4734_s1 + $0x298] sm:$0xff] }
 0x18f   : > { %v1341_v7 = vpop.f32.mrf.mxu1  ;;  %v1304_v59 = vadd.f32 %v1303_v30, %v1268_v48  ;;  %v2684_v30 = vld [vmem:[%s2838_s24 + $0x190] sm:$0xff] }
 0x190   : > { %2052 = vmatpush.msrb.mxu0 %v4433_v18  ;;  %1955 = vmatpush.msrb.mxu1 %v2672_v33  ;;  %v1208_v0 = vadd.f32 %v1201_v27, %v4251_v12  ;;  %v4454_v12 = vld [vmem:[%s4734_s1 + $0x2c8] sm:$0xff]  ;;  %v2687_v48 = vld [vmem:[%s4734_s1 + $0x290] sm:$0xff]  ;;  %v2689_v33 = vld [vmem:[%s2838_s24 + $0x1a0] sm:$0xff] }
 0x191   : > { %v4440_v51 = vadd.f32 %v1304_v59, %v1207_v25 }
 0x192   : > { %1674 = vmatmul.f32.gmra.mxu1 %v2473_v58  ;;  %1747 = vmatmul.f32.gmra.mxu0 %v4443_v56 }
 0x193   : > { %2479 = vmatmul.msk.f32.gmra.mxu3 %vm237_vm0, %v2472_v60  ;;  %2484 = vmatmul.msk.f32.gmra.mxu2 %vm237_vm0, %v3748_v50  ;;  %v1319_v1 = vmax.f32 %v4003_v26, %v4440_v51  ;;  %v4463_v50 = vld [vmem:[%s4734_s1 + $0x2c0] sm:$0xff]  ;;  %v2688_v60 = vld [vmem:[%s4734_s1 + $0x288] sm:$0xff] }
 0x194   : > { %2053 = vmatpush.msrb.mxu0 %v4454_v12  ;;  %1956 = vmatpush.msrb.mxu1 %v2675_v55 }
 0x195   : > { %v1306_v29 = vpop.f32.mrf.mxu2 }
 0x196   : > { %v1373_v44 = vpop.f32.mrf.mxu3  ;;  %2054 = vmatpush.msrb.mxu0 %v4463_v50  ;;  %v1271_v46 = vpop.f32.mrf.mxu0 }
 0x197   : > { %v1374_v45 = vadd.f32 %v1373_v44, %v1338_v54  ;;  %v1344_v10 = vpop.f32.mrf.mxu1  ;;  %v1307_v43 = vadd.f32 %v1306_v29, %v1271_v46 }
 0x198   : > { %2055 = vmatpush.msrb.mxu0 %v4470_v3 }
 0x199   : > { %v4473_v23 = vadd.f32 %v1307_v43, %v1208_v0  ;;  %v2690_v0 = vld [vmem:[%s2838_s24 + $0x198] sm:$0xff]  ;;  %v2693_v43 = vld [vmem:[%s2838_s24 + $0x1a8] sm:$0xff] }
 0x19a   : > { %1750 = vmatmul.f32.gmra.mxu0 %v4476_v6  ;;  %1811 = vmatmul.f32.vlgmr.msra.gmra.mxu1 %v2679_v53 }
 0x19b   : > { %2480 = vmatmul.msk.f32.gmra.mxu3 %vm237_vm0, %v2474_v28  ;;  %2485 = vmatmul.msk.f32.gmra.mxu2 %vm237_vm0, %v3767_v15  ;;  %v1320_v4 = vmax.f32 %v4037_v21, %v4473_v23  ;;  %v2681_v15 = vld [vmem:[%s4734_s1 + $0x2a8] sm:$0xff] }
 0x19c   : > { %2056 = vmatpush.msrb.mxu0 %v4488_v37  ;;  %2530 = vmatpush.msra.mxu1 %v4368_v61 }
 0x19d   : > { %v1443_v22 = vpop.f32.mrf.mxu2 }
 0x19e   : > { %v1376_v54 = vpop.f32.mrf.mxu3  ;;  %2057 = vmatpush.msrb.mxu0 %v2681_v15  ;;  %2531 = vmatpush.msra.mxu1 %v4380_v31  ;;  %v1408_v57 = vpop.f32.mrf.mxu0  ;;  %v2685_v31 = vld [vmem:[%s2838_s24 + $0x188] sm:$0xff] }
 0x19f   : > { %v1377_v38 = vadd.f32 %v1376_v54, %v1341_v7  ;;  %v1347_v9 = vpop.f32.mrf.mxu1  ;;  %v1409_v25 = vadd.f32 %v1408_v57, %v1374_v45 }
 0x1a0   : > { %2058 = vmatpush.msrb.mxu0 %v2682_v62  ;;  %2532 = vmatpush.msra.mxu1 %v4392_v36 }
 0x1a1   : > { %v4500_v61 = vadd.f32 %v1443_v22, %v1409_v25 }
 0x1a2   : > { %1753 = vmatmul.f32.gmra.mxu0 %v4503_v16  ;;  %1814 = vmatmul.f32.gmra.mxu1 %v2684_v30 }
 0x1a3   : > { %2486 = vmatmul.msk.f32.gmra.mxu2 %vm237_vm0, %v3789_v17  ;;  %2487 = vmatmul.msk.f32.vlgmr.msrb.gmra.mxu3 %vm237_vm0, %v2685_v31 }
 0x1a4   : > { %2059 = vmatpush.msrb.mxu0 %v2686_v13  ;;  %2533 = vmatpush.msra.mxu1 %v4413_v14 }
 0x1a5   : > { %v1446_v27 = vpop.f32.mrf.mxu2 }
 0x1a6   : > { %v1379_v36 = vpop.f32.mrf.mxu3  ;;  %2060 = vmatpush.msrb.mxu0 %v2687_v48  ;;  %2534 = vmatpush.msra.mxu1 %v4422_v40  ;;  %v2691_v40 = vld [vmem:[%s4734_s1 + $0x280] sm:$0xff] }
 0x1a7   : > { %v1380_v17 = vadd.f32 %v1379_v36, %v1344_v10  ;;  %v1350_v7 = vpop.f32.mrf.mxu1  ;;  %v1411_v58 = vpop.f32.mrf.mxu0  ;;  %v2692_v10 = vld [vmem:[%s2838_s24 + $0x1b0] sm:$0xff] }
 0x1a8   : > { %v1412_v59 = vadd.f32 %v1411_v58, %v1377_v38  ;;  %2061 = vmatpush.msrb.mxu0 %v2688_v60  ;;  %2535 = vmatpush.msra.mxu1 %v4433_v18  ;;  %v2694_v38 = vld [vmem:[%s2838_s24 + $0x1c0] sm:$0xff]  ;;  %v2696_v36 = vld [vmem:[%s2838_s24 + $0x1d0] sm:$0xff] }
 0x1aa   : > { %v4523_v14 = vadd.f32 %v1446_v27, %v1412_v59  ;;  %1756 = vmatmul.f32.gmra.mxu0 %v3810_v11  ;;  %1817 = vmatmul.f32.gmra.mxu1 %v2689_v33  ;;  %v2697_v27 = vld [vmem:[%s2838_s24 + $0x1c8] sm:$0xff] }
 0x1ab   : > { %2488 = vmatmul.msk.f32.gmra.mxu3 %vm237_vm0, %v2690_v0  ;;  %2493 = vmatmul.msk.f32.vlgmr.msra.gmra.mxu2 %vm237_vm0, %v2690_v0  ;;  %v2698_v0 = vld [vmem:[%s2838_s24 + $0x1d8] sm:$0xff] }
 0x1ac   : > { %2062 = vmatpush.msrb.mxu0 %v2691_v40  ;;  %2536 = vmatpush.msra.mxu1 %v4454_v12 }
 0x1ae   : > { %v1382_v18 = vpop.f32.mrf.mxu3  ;;  %v1449_v55 = vpop.f32.mrf.mxu2  ;;  %2537 = vmatpush.msra.mxu1 %v4463_v50 }
 0x1af   : > { %v1383_v11 = vadd.f32 %v1382_v18, %v1347_v9  ;;  %v1353_v29 = vpop.f32.mrf.mxu1  ;;  %v1414_v44 = vpop.f32.mrf.mxu0  ;;  %v2695_v9 = vld [vmem:[%s2838_s24 + $0x1b8] sm:$0xff] }
 0x1b0   : > { %v1415_v45 = vadd.f32 %v1414_v44, %v1380_v17  ;;  %2538 = vmatpush.msra.mxu1 %v4470_v3 }
 0x1b2   : > { %v4536_v46 = vadd.f32 %v1449_v55, %v1415_v45  ;;  %1820 = vmatmul.f32.gmra.mxu1 %v2692_v10  ;;  %1881 = vmatmul.f32.vlgmr.msra.gmra.mxu0 %v2684_v30 }
 0x1b3   : > { %2489 = vmatmul.msk.f32.gmra.mxu3 %vm237_vm0, %v2693_v43  ;;  %2494 = vmatmul.msk.f32.gmra.mxu2 %vm237_vm0, %v2693_v43 }
 0x1b4   : > { %2539 = vmatpush.msra.mxu1 %v4488_v37 }
 0x1b6   : > { %v1385_v12 = vpop.f32.mrf.mxu3  ;;  %v1452_v50 = vpop.f32.mrf.mxu2  ;;  %2540 = vmatpush.msra.mxu1 %v2681_v15 }
 0x1b7   : > { %v1386_v28 = vadd.f32 %v1385_v12, %v1350_v7  ;;  %v1417_v53 = vpop.f32.mrf.mxu0  ;;  %v1478_v3 = vpop.f32.mrf.mxu1 }
 0x1b8   : > { %v1418_v54 = vadd.f32 %v1417_v53, %v1383_v11  ;;  %2541 = vmatpush.msra.mxu1 %v2682_v62 }
 0x1ba   : > { %v4543_v22 = vadd.f32 %v1452_v50, %v1418_v54  ;;  %1823 = vmatmul.f32.gmra.mxu1 %v2694_v38  ;;  %1884 = vmatmul.f32.gmra.mxu0 %v2689_v33 }
 0x1bb   : > { %2490 = vmatmul.msk.f32.gmra.mxu3 %vm237_vm0, %v2695_v9  ;;  %2495 = vmatmul.msk.f32.gmra.mxu2 %vm237_vm0, %v2695_v9 }
 0x1bc   : > { %2542 = vmatpush.msra.mxu1 %v2686_v13 }
 0x1be   : > { %v1388_v37 = vpop.f32.mrf.mxu3  ;;  %v1455_v15 = vpop.f32.mrf.mxu2  ;;  %2543 = vmatpush.msra.mxu1 %v2687_v48 }
 0x1bf   : > { %v1389_v57 = vadd.f32 %v1388_v37, %v1353_v29  ;;  %v1420_v25 = vpop.f32.mrf.mxu0  ;;  %v1481_v30 = vpop.f32.mrf.mxu1 }
 0x1c0   : > { %v1421_v62 = vadd.f32 %v1420_v25, %v1386_v28  ;;  %2544 = vmatpush.msra.mxu1 %v2688_v60  ;;  %v2508_v25 = vld [vmem:[%s2838_s24 + $0x1b8] sm:$0xff] }
 0x1c2   : > { %v4549_v31 = vadd.f32 %v1455_v15, %v1421_v62  ;;  %1826 = vmatmul.f32.gmra.mxu1 %v2696_v36  ;;  %1887 = vmatmul.f32.gmra.mxu0 %v2692_v10 }
 0x1c3   : > { %2491 = vmatmul.msk.f32.gmra.mxu3 %vm237_vm0, %v2697_v27  ;;  %2496 = vmatmul.msk.f32.gmra.mxu2 %vm237_vm0, %v2697_v27 }
 0x1c4   : > { %2545 = vmatpush.msra.mxu1 %v2691_v40 }
 0x1c6   : > { %v1458_v13 = vpop.f32.mrf.mxu2  ;;  %v1513_v17 = vpop.f32.mrf.mxu3 }
 0x1c7   : > { %v1514_v48 = vadd.f32 %v1513_v17, %v1478_v3  ;;  %v1423_v7 = vpop.f32.mrf.mxu0  ;;  %v1484_v58 = vpop.f32.mrf.mxu1 }
 0x1c8   : > { %v1424_v59 = vadd.f32 %v1423_v7, %v1389_v57  ;;  %v2505_v57 = vld [vmem:[%s2838_s24 + $0x1a0] sm:$0xff]  ;;  %v2510_v7 = vld [vmem:[%s2838_s24 + $0x1c8] sm:$0xff] }
 0x1c9   : > { %v1531_v60 = vadd.f32 %v1514_v48, %v4500_v61  ;;  %v2507_v48 = vld [vmem:[%s2838_s24 + $0x1b0] sm:$0xff] }
 0x1ca   : > { %v4556_v33 = vadd.f32 %v1458_v13, %v1424_v59  ;;  %1890 = vmatmul.f32.gmra.mxu0 %v2694_v38  ;;  %1957 = vmatmul.f32.vlgmr.msrb.gmra.mxu1 %v4402_v41  ;;  %v2699_v41 = vld [vmem:[%s2838_s24 + $0xa8] sm:$0xff] }
 0x1cb   : > { %2492 = vmatmul.msk.f32.gmra.mxu3 %vm237_vm0, %v2698_v0  ;;  %2497 = vmatmul.msk.f32.gmra.mxu2 %vm237_vm0, %v2698_v0 }
 0x1ce   : > { %v1516_v40 = vpop.f32.mrf.mxu3  ;;  %v1589_v18 = vpop.f32.mrf.mxu2 }
 0x1cf   : > { %v1517_v55 = vadd.f32 %v1516_v40, %v1481_v30  ;;  %v1487_v11 = vpop.f32.mrf.mxu1  ;;  %v1554_v29 = vpop.f32.mrf.mxu0 }
 0x1d0   : > { %v1590_v44 = vadd.f32 %v1589_v18, %v1554_v29  ;;  %v2509_v29 = vld [vmem:[%s2838_s24 + $0x1c0] sm:$0xff] }
 0x1d1   : > { %v1532_v61 = vadd.f32 %v1517_v55, %v4523_v14  ;;  %v2506_v14 = vld [vmem:[%s2838_s24 + $0x1a8] sm:$0xff] }
 0x1d2   : > { %v4563_v45 = vadd.f32 %v1590_v44, %v1531_v60  ;;  %1893 = vmatmul.f32.gmra.mxu0 %v2696_v36  ;;  %1960 = vmatmul.f32.gmra.mxu1 %v4443_v56  ;;  %v2703_v60 = vld [vmem:[%s2838_s24 + $0xd8] sm:$0xff] }
 0x1d3   : > { %2498 = vmatmul.msk.f32.gmra.mxu2 %vm237_vm0, %v3885_v47  ;;  %2499 = vmatmul.msk.f32.vlgmr.msra.gmra.mxu3 %vm237_vm0, %v2699_v41  ;;  %v2700_v47 = vld [vmem:[%s2838_s24 + $0xb8] sm:$0xff] }
 0x1d4   : > { %v2512_v44 = vld [vmem:[%s2838_s24 + $0x1d8] sm:$0xff] }
 0x1d6   : > { %v1519_v10 = vpop.f32.mrf.mxu3  ;;  %v1592_v43 = vpop.f32.mrf.mxu2 }
 0x1d7   : > { %v1520_v12 = vadd.f32 %v1519_v10, %v1484_v58  ;;  %v1490_v50 = vpop.f32.mrf.mxu1  ;;  %v1557_v28 = vpop.f32.mrf.mxu0  ;;  %v2704_v10 = vld [vmem:[%s2838_s24 + $0xe8] sm:$0xff] }
 0x1d8   : > { %v1593_v53 = vadd.f32 %v1592_v43, %v1557_v28 }
 0x1d9   : > { %v1533_v3 = vadd.f32 %v1520_v12, %v4536_v46 }
 0x1da   : > { %v4572_v54 = vadd.f32 %v1593_v53, %v1532_v61  ;;  %1896 = vmatmul.f32.gmra.mxu0 %v3867_v52  ;;  %1963 = vmatmul.f32.gmra.mxu1 %v4476_v6  ;;  %v2701_v6 = vld [vmem:[%s2838_s24 + $0xc8] sm:$0xff] }
 0x1db   : > { %2500 = vmatmul.msk.f32.gmra.mxu3 %vm237_vm0, %v2700_v47  ;;  %2517 = vmatmul.msk.f32.vlgmr.msrb.gmra.mxu2 %vm237_vm0, %v2506_v14  ;;  %v2511_v14 = vld [vmem:[%s2838_s24 + $0x1d0] sm:$0xff] }
 0x1de   : > { %v1522_v56 = vpop.f32.mrf.mxu3  ;;  %v1595_v38 = vpop.f32.mrf.mxu2 }
 0x1df   : > { %v1523_v9 = vadd.f32 %v1522_v56, %v1487_v11  ;;  %v1493_v37 = vpop.f32.mrf.mxu1  ;;  %v1560_v15 = vpop.f32.mrf.mxu0 }
 0x1e0   : > { %v1596_v46 = vadd.f32 %v1595_v38, %v1560_v15 }
 0x1e1   : > { %v1534_v52 = vadd.f32 %v1523_v9, %v4543_v22  ;;  %v2705_v9 = vld [vmem:[%s2838_s24 + $0xf8] sm:$0xff] }
 0x1e2   : > { %v4582_v30 = vadd.f32 %v1596_v46, %v1533_v3  ;;  %2063 = vmatmul.f32.vlgmr.msrb.gmra.mxu0 %v2505_v57  ;;  %1966 = vmatmul.f32.gmra.mxu1 %v4503_v16  ;;  %v2702_v16 = vld [vmem:[%s2838_s24 + $0xe0] sm:$0xff]  ;;  %v2515_v3 = vld [vmem:[%s2838_s24 + $0x1f0] sm:$0xff] }
 0x1e3   : > { %2501 = vmatmul.msk.f32.gmra.mxu3 %vm237_vm0, %v2701_v6  ;;  %2518 = vmatmul.msk.f32.gmra.mxu2 %vm237_vm0, %v2508_v25  ;;  %v2516_v6 = vld [vmem:[%s2838_s24 + $0x1f8] sm:$0xff] }
 0x1e6   : > { %v1525_v62 = vpop.f32.mrf.mxu3  ;;  %v1598_v36 = vpop.f32.mrf.mxu2 }
 0x1e7   : > { %v1526_v27 = vadd.f32 %v1525_v62, %v1490_v50  ;;  %v1563_v13 = vpop.f32.mrf.mxu0  ;;  %v1660_v17 = vpop.f32.mrf.mxu1 }
 0x1e8   : > { %v1599_v22 = vadd.f32 %v1598_v36, %v1563_v13 }
 0x1e9   : > { %v1535_v58 = vadd.f32 %v1526_v27, %v4549_v31 }
 0x1ea   : > { %v4591_v59 = vadd.f32 %v1599_v22, %v1534_v52  ;;  %2066 = vmatmul.f32.gmra.mxu0 %v2507_v48  ;;  %1969 = vmatmul.f32.gmra.mxu1 %v2702_v16  ;;  %v2513_v52 = vld [vmem:[%s2838_s24 + $0x1e0] sm:$0xff] }
 0x1eb   : > { %2502 = vmatmul.msk.f32.gmra.mxu3 %vm237_vm0, %v2703_v60  ;;  %2519 = vmatmul.msk.f32.gmra.mxu2 %vm237_vm0, %v2510_v7 }
 0x1ee   : > { %v1528_v0 = vpop.f32.mrf.mxu3  ;;  %v1601_v40 = vpop.f32.mrf.mxu2 }
 0x1ef   : > { %v1529_v18 = vadd.f32 %v1528_v0, %v1493_v37  ;;  %v1566_v55 = vpop.f32.mrf.mxu0  ;;  %v1663_v11 = vpop.f32.mrf.mxu1 }
 0x1f0   : > { %v1602_v31 = vadd.f32 %v1601_v40, %v1566_v55 }
 0x1f1   : > { %v1536_v61 = vadd.f32 %v1529_v18, %v4556_v33  ;;  %v2514_v33 = vld [vmem:[%s2838_s24 + $0x1e8] sm:$0xff] }
 0x1f2   : > { %v1611_v41 = vadd.f32 %v1602_v31, %v1535_v58  ;;  %2069 = vmatmul.f32.gmra.mxu0 %v2509_v29  ;;  %1972 = vmatmul.f32.gmra.mxu1 %v3932_v8 }
 0x1f3   : > { %2503 = vmatmul.msk.f32.gmra.mxu3 %vm237_vm0, %v2704_v10  ;;  %2520 = vmatmul.msk.f32.gmra.mxu2 %vm237_vm0, %v2512_v44 }
 0x1f6   : > { %v1604_v43 = vpop.f32.mrf.mxu2  ;;  %v1695_v12 = vpop.f32.mrf.mxu3 }
 0x1f7   : > { %v1696_v50 = vadd.f32 %v1695_v12, %v1660_v17  ;;  %v1569_v28 = vpop.f32.mrf.mxu0  ;;  %v1666_v53 = vpop.f32.mrf.mxu1 }
 0x1f8   : > { %v1605_v47 = vadd.f32 %v1604_v43, %v1569_v28 }
 0x1f9   : > { %v1713_v56 = vadd.f32 %v1696_v50, %v4563_v45 }
 0x1fa   : > { %v1612_v8 = vadd.f32 %v1605_v47, %v1536_v61  ;;  %2072 = vmatmul.f32.gmra.mxu0 %v2511_v14  ;;  %2078 = vmatmul.f32.vlgmr.msra.gmra.mxu1 %v2515_v3 }
 0x1fb   : > { %v4611_v38 = vmax.f32 %v1315_v35, %v1713_v56  ;;  %2504 = vmatmul.msk.f32.gmra.mxu3 %vm237_vm0, %v2705_v9  ;;  %2521 = vmatmul.msk.f32.gmra.mxu2 %vm237_vm0, %v2514_v33 }
 0x1fe   : > { %v1698_v37 = vpop.f32.mrf.mxu3  ;;  %v1777_v15 = vpop.f32.mrf.mxu2 }
 0x1ff   : > { %v1699_v57 = vadd.f32 %v1698_v37, %v1663_v11  ;;  %v1669_v46 = vpop.f32.mrf.mxu1  ;;  %v1742_v25 = vpop.f32.mrf.mxu0 }
 0x200   : > { %v4617_v45 = vadd.f32 %v1777_v15, %v1742_v25 }
 0x201   : > { %v1714_v62 = vadd.f32 %v1699_v57, %v4572_v54 }
 0x202   : > { %2075 = vmatmul.f32.gmra.mxu0 %v2513_v52 }
 0x203   : > { %v4624_v32 = vmax.f32 %v1316_v42, %v1714_v62  ;;  %2522 = vmatmul.msk.f32.gmra.mxu2 %vm237_vm0, %v2516_v6 }
 0x206   : > { %v1701_v2 = vpop.f32.mrf.mxu3  ;;  %v1780_v35 = vpop.f32.mrf.mxu2 }
 0x207   : > { %v1702_v36 = vadd.f32 %v1701_v2, %v1666_v53  ;;  %v1672_v27 = vpop.f32.mrf.mxu1  ;;  %v1745_v13 = vpop.f32.mrf.mxu0 }
 0x208   : > { %v4627_v17 = vadd.f32 %v1780_v35, %v1745_v13 }
 0x209   : > { %v1715_v48 = vadd.f32 %v1702_v36, %v4582_v30 }
 0x20b   : > { %v4633_v54 = vmax.f32 %v1317_v5, %v1715_v48 }
 0x20e   : > { %v1704_v22 = vpop.f32.mrf.mxu3  ;;  %v1783_v49 = vpop.f32.mrf.mxu2 }
 0x20f   : > { %v1705_v63 = vadd.f32 %v1704_v22, %v1669_v46  ;;  %v1675_v42 = vpop.f32.mrf.mxu1  ;;  %v1748_v7 = vpop.f32.mrf.mxu0 }
 0x210   : > { %v4635_v58 = vadd.f32 %v1783_v49, %v1748_v7 }
 0x211   : > { %v1716_v16 = vadd.f32 %v1705_v63, %v4591_v59 }
 0x213   : > { %v4641_v60 = vmax.f32 %v1318_v39, %v1716_v16 }
 0x216   : > { %v1707_v30 = vpop.f32.mrf.mxu3  ;;  %v1786_v0 = vpop.f32.mrf.mxu2 }
 0x217   : > { %v1708_v40 = vadd.f32 %v1707_v30, %v1672_v27  ;;  %v1751_v24 = vpop.f32.mrf.mxu0  ;;  %v1812_v34 = vpop.f32.mrf.mxu1 }
 0x218   : > { %v4643_v5 = vadd.f32 %v1786_v0, %v1751_v24  ;;  %v1813_v62 = vadd.f32 %v1812_v34, %v4617_v45  ;;  %v4684_v0 = vld [vmem:[%s4735_s2] ss:$0 sm:$0xff] }
 0x219   : > { %v1717_v18 = vadd.f32 %v1708_v40, %v1611_v41 }
 0x21b   : > { %v4648_v55 = vmax.f32 %v1319_v1, %v1717_v18 }
 0x21e   : > { %v1710_v11 = vpop.f32.mrf.mxu3  ;;  %v1789_v59 = vpop.f32.mrf.mxu2 }
 0x21f   : > { %v1711_v29 = vadd.f32 %v1710_v11, %v1675_v42  ;;  %v1754_v31 = vpop.f32.mrf.mxu0  ;;  %v1815_v19 = vpop.f32.mrf.mxu1 }
 0x220   : > { %v4650_v20 = vadd.f32 %v1789_v59, %v1754_v31  ;;  %v1816_v7 = vadd.f32 %v1815_v19, %v4627_v17 }
 0x221   : > { %v1718_v39 = vadd.f32 %v1711_v29, %v1612_v8 }
 0x223   : > { %v4655_v44 = vmax.f32 %v1320_v4, %v1718_v39 }
 0x226   : > { %v1792_v61 = vpop.f32.mrf.mxu2  ;;  %v1847_v41 = vpop.f32.mrf.mxu3 }
 0x227   : > { %v1757_v10 = vpop.f32.mrf.mxu0  ;;  %v1818_v43 = vpop.f32.mrf.mxu1  ;;  %v1848_v36 = vadd.f32 %v1847_v41, %v1813_v62 }
 0x228   : > { %v4657_v26 = vadd.f32 %v1792_v61, %v1757_v10  ;;  %v1819_v61 = vadd.f32 %v1818_v43, %v4635_v58 }
 0x22e   : > { %v1850_v51 = vpop.f32.mrf.mxu3  ;;  %v1917_v1 = vpop.f32.mrf.mxu2 }
 0x22f   : > { %v4659_v12 = vpop.f32.mrf.mxu1  ;;  %v1882_v50 = vpop.f32.mrf.mxu0  ;;  %v1851_v45 = vadd.f32 %v1850_v51, %v1816_v7 }
 0x230   : > { %v1918_v2 = vadd.f32 %v1917_v1, %v1882_v50  ;;  %v1822_v58 = vadd.f32 %v4659_v12, %v4643_v5 }
 0x232   : > { %v1935_v13 = vadd.f32 %v1918_v2, %v1848_v36 }
 0x236   : > { %v1853_v28 = vpop.f32.mrf.mxu3  ;;  %v1920_v53 = vpop.f32.mrf.mxu2 }
 0x237   : > { %v4661_v14 = vpop.f32.mrf.mxu1  ;;  %v1885_v3 = vpop.f32.mrf.mxu0  ;;  %v1854_v10 = vadd.f32 %v1853_v28, %v1819_v61 }
 0x238   : > { %v1921_v16 = vadd.f32 %v1920_v53, %v1885_v3  ;;  %v1825_v5 = vadd.f32 %v4661_v14, %v4650_v20 }
 0x23a   : > { %v1936_v18 = vadd.f32 %v1921_v16, %v1851_v45 }
 0x23e   : > { %v4663_v47 = vpop.f32.mrf.mxu3  ;;  %v1923_v21 = vpop.f32.mrf.mxu2 }
 0x23f   : > { %v4665_v23 = vpop.f32.mrf.mxu1  ;;  %v1888_v4 = vpop.f32.mrf.mxu0 }
 0x246   : > { %v4667_v33 = vpop.f32.mrf.mxu3  ;;  %v1926_v56 = vpop.f32.mrf.mxu2 }
 0x247   : > { %v1891_v8 = vpop.f32.mrf.mxu0  ;;  %v1958_v9 = vpop.f32.mrf.mxu1 }
 0x248   : > { %v1927_v43 = vadd.f32 %v1926_v56, %v1891_v8  ;;  %v1860_v56 = vadd.f32 %v4667_v33, %v1825_v5 }
 0x24e   : > { %v4669_v37 = vpop.f32.mrf.mxu3  ;;  %v4671_v15 = vpop.f32.mrf.mxu2 }
 0x24f   : > { %v4673_v57 = vpop.f32.mrf.mxu0  ;;  %v1961_v46 = vpop.f32.mrf.mxu1 }
 0x250   : > { %v1930_v12 = vadd.f32 %v4671_v15, %v4673_v57  ;;  %v1828_v15 = vadd.f32 %v4665_v23, %v4657_v26 }
 0x252   : > { %v1939_v16 = vadd.f32 %v1930_v12, %v1860_v56 }
 0x256   : > { %v4675_v25 = vpop.f32.mrf.mxu2  ;;  %v1993_v52 = vpop.f32.mrf.mxu3 }
 0x257   : > { %v4677_v6 = vpop.f32.mrf.mxu0  ;;  %v1964_v35 = vpop.f32.mrf.mxu1  ;;  %v1994_v27 = vadd.f32 %v1993_v52, %v1958_v9 }
 0x258   : > { %v1933_v57 = vadd.f32 %v4675_v25, %v4677_v6 }
 0x259   : > { %v2011_v63 = vadd.f32 %v1994_v27, %v1935_v13 }
 0x25e   : > { %v1996_v48 = vpop.f32.mrf.mxu3  ;;  %v2099_v22 = vpop.f32.mrf.mxu2 }
 0x25f   : > { %v2064_v49 = vpop.f32.mrf.mxu0  ;;  %v1997_v40 = vadd.f32 %v1996_v48, %v1961_v46  ;;  %v1967_v34 = vpop.f32.mrf.mxu1 }
 0x260   : > { %v2100_v42 = vadd.f32 %v2099_v22, %v2064_v49 }
 0x261   : > { %v2012_v31 = vadd.f32 %v1997_v40, %v1936_v18 }
 0x262   : > { %v2117_v30 = vadd.f32 %v2100_v42, %v2011_v63 }
 0x264   : > { %v2123_v24 = vmax.f32 %v4611_v38, %v2117_v30  ;;  %v1924_v38 = vadd.f32 %v1923_v21, %v1888_v4 }
 0x266   : > { %v2133_v11 = vadd.f32 %v4684_v0, %v2123_v24  ;;  %v1999_v59 = vpop.f32.mrf.mxu3  ;;  %v2102_v29 = vpop.f32.mrf.mxu2  ;;  %v1937_v50 = vadd.f32 %v1924_v38, %v1854_v10 }
 0x267   : > { %v2067_v17 = vpop.f32.mrf.mxu0  ;;  %v2000_v51 = vadd.f32 %v1999_v59, %v1964_v35  ;;  %v1970_v36 = vpop.f32.mrf.mxu1 }
 0x268   : > { %v2139_v19 = vmax.f32 %v2133_v11, 0.0  ;;  %v2103_v39 = vadd.f32 %v2102_v29, %v2067_v17 }
 0x269   : > { %v2013_v52 = vadd.f32 %v2000_v51, %v1937_v50 }
 0x26a   : > { %2146 = vst.msk [vmem:[%s4692_s10] sm:$0xff] %vm2145_vm1, %v2139_v19  ;;  %v2118_v41 = vadd.f32 %v2103_v39, %v2012_v31 }
 0x26c   : > { %v2124_v1 = vmax.f32 %v4624_v32, %v2118_v41  ;;  %v1857_v32 = vadd.f32 %v4663_v47, %v1822_v58 }
 0x26e   : > { %v2134_v53 = vadd.f32 %v4684_v0, %v2124_v1  ;;  %v2002_v3 = vpop.f32.mrf.mxu3  ;;  %v2105_v9 = vpop.f32.mrf.mxu2  ;;  %v1938_v35 = vadd.f32 %v1927_v43, %v1857_v32 }
 0x26f   : > { %v2070_v46 = vpop.f32.mrf.mxu0  ;;  %v2003_v21 = vadd.f32 %v2002_v3, %v1967_v34 }
 0x270   : > { %v2140_v62 = vmax.f32 %v2134_v53, 0.0  ;;  %v2106_v2 = vadd.f32 %v2105_v9, %v2070_v46 }
 0x271   : > { %v2014_v49 = vadd.f32 %v2003_v21, %v1938_v35 }
 0x272   : > { %2147 = vst.msk [vmem:[%s4692_s10 + $0x8] sm:$0xff] %vm2145_vm1, %v2140_v62  ;;  %v2119_v28 = vadd.f32 %v2106_v2, %v2013_v52 }
 0x274   : > { %v2125_v4 = vmax.f32 %v4633_v54, %v2119_v28  ;;  %v1973_v54 = vpop.f32.mrf.mxu1 }
 0x276   : > { %v2135_v27 = vadd.f32 %v4684_v0, %v2125_v4  ;;  %v2005_v13 = vpop.f32.mrf.mxu3  ;;  %v2108_v48 = vpop.f32.mrf.mxu2 }
 0x277   : > { %v2073_v22 = vpop.f32.mrf.mxu0  ;;  %v2006_v8 = vadd.f32 %v2005_v13, %v1970_v36 }
 0x278   : > { %v2141_v63 = vmax.f32 %v2135_v27, 0.0  ;;  %v2109_v42 = vadd.f32 %v2108_v48, %v2073_v22 }
 0x279   : > { %v2015_v24 = vadd.f32 %v2006_v8, %v1939_v16 }
 0x27a   : > { %2148 = vst.msk [vmem:[%s4692_s10 + $0x10] sm:$0xff] %vm2145_vm1, %v2141_v63  ;;  %v2120_v47 = vadd.f32 %v2109_v42, %v2014_v49 }
 0x27c   : > { %v2126_v7 = vmax.f32 %v4641_v60, %v2120_v47  ;;  %v1863_v60 = vadd.f32 %v4669_v37, %v1828_v15  ;;  %v2079_v59 = vpop.f32.mrf.mxu1 }
 0x27e   : > { %v2136_v30 = vadd.f32 %v4684_v0, %v2126_v7  ;;  %v2111_v45 = vpop.f32.mrf.mxu2  ;;  %v2008_v14 = vpop.f32.mrf.mxu3  ;;  %v1940_v29 = vadd.f32 %v1933_v57, %v1863_v60 }
 0x27f   : > { %v2076_v40 = vpop.f32.mrf.mxu0  ;;  %v2009_v18 = vadd.f32 %v2008_v14, %v1973_v54 }
 0x280   : > { %v2142_v20 = vmax.f32 %v2136_v30, 0.0  ;;  %v2112_v34 = vadd.f32 %v2111_v45, %v2076_v40 }
 0x281   : > { %v2016_v19 = vadd.f32 %v2009_v18, %v1940_v29 }
 0x282   : > { %2149 = vst.msk [vmem:[%s4692_s10 + $0x18] sm:$0xff] %vm2145_vm1, %v2142_v20  ;;  %v2121_v33 = vadd.f32 %v2112_v34, %v2015_v24 }
 0x284   : > { %v2127_v11 = vmax.f32 %v4648_v55, %v2121_v33 }
 0x286   : > { %v2137_v17 = vadd.f32 %v4684_v0, %v2127_v11  ;;  %v2114_v31 = vpop.f32.mrf.mxu2 }
 0x287   : > { %v2115_v39 = vadd.f32 %v2114_v31, %v2079_v59 }
 0x288   : > { %v2143_v26 = vmax.f32 %v2137_v17, 0.0 }
 0x289   : > { %v2122_v23 = vadd.f32 %v2115_v39, %v2016_v19 }
 0x28a   : > { %2150 = vst.msk [vmem:[%s4692_s10 + $0x20] sm:$0xff] %vm2145_vm1, %v2143_v26 }
 0x28b   : > { %v2128_v25 = vmax.f32 %v4655_v44, %v2122_v23 }
 0x28d   : > { %v2138_v6 = vadd.f32 %v4684_v0, %v2128_v25 }
 0x28f   : > { %v2144_v61 = vmax.f32 %v2138_v6, 0.0 }
 0x291   : > { %2151 = vst.msk [vmem:[%s4692_s10 + $0x28] sm:$0xff] %vm2145_vm1, %v2144_v61 }
 0x292 PF: > { %s13_s12 = sadd.s32 1, %s2712_s12  }
 0x293   : > { %p10_p4 = scmp.ge.s32.totalorder %s13_s12, 4  }
 0x295   :  { %12 = sbr.rel (!%p10_p4) target bundleno = 1 (0x1), region = 69 }

// kernel: cnn_regressor_forward.5
= control target key start
LH: loop header
LB: loop body
LE: loop exit
PB: predicated region body
PF: predicated region fallthrough
CT: control target
= control target key end

     0   :  { %s2300_s0 = inlined_call_operand.vmem [shape: f32[2,3072], index: 0, kind: input, shape index: {}]   ;;  %s2301_s1 = inlined_call_operand.vmem [shape: f32[3072,32], index: 1, kind: input, shape index: {}]   ;;  %s2302_s2 = inlined_call_operand.vmem [shape: f32[1,32], index: 2, kind: input, shape index: {}]   ;;  %s2303_s3 = inlined_call_operand.vmem [shape: f32[32,128], index: 3, kind: input, shape index: {}]   ;;  %s2304_s4 = inlined_call_operand.vmem [shape: f32[1,128], index: 4, kind: input, shape index: {}]   ;;  %s2305_s5 = inlined_call_operand.hbm [shape: f32[2,128], index: 5, kind: output, shape index: {}]  }
   0x1   :  { %v42_v0 = vld [vmem:[%s2301_s1 + $0x78] sm:$0xff]  ;;  %v41_v2 = vld [vmem:[%s2301_s1 + $0x70] sm:$0xff]  ;;  %v40_v6 = vld [vmem:[%s2301_s1 + $0x68] sm:$0xff] }
   0x2   :  { %v74_v1 = vld [vmem:[%s2301_s1 + $0x178] sm:$0xff]  ;;  %476 = vmatpush.msra.mxu0 %v42_v0  ;;  %v73_v4 = vld [vmem:[%s2301_s1 + $0x170] sm:$0xff]  ;;  %v72_v8 = vld [vmem:[%s2301_s1 + $0x168] sm:$0xff] }
   0x3   :  { %516 = vmatpush.msra.mxu2 %v74_v1  ;;  %v58_v3 = vld [vmem:[%s2301_s1 + $0xf8] sm:$0xff]  ;;  %v57_v7 = vld [vmem:[%s2301_s1 + $0xf0] sm:$0xff]  ;;  %v56_v10 = vld [vmem:[%s2301_s1 + $0xe8] sm:$0xff] }
   0x4   :  { %v90_v5 = vld [vmem:[%s2301_s1 + $0x1f8] sm:$0xff]  ;;  %496 = vmatpush.msra.mxu1 %v58_v3  ;;  %477 = vmatpush.msra.mxu0 %v41_v2  ;;  %v89_v9 = vld [vmem:[%s2301_s1 + $0x1f0] sm:$0xff]  ;;  %v39_v11 = vld [vmem:[%s2301_s1 + $0x60] sm:$0xff] }
   0x5   :  { %536 = vmatpush.msra.mxu3 %v90_v5  ;;  %517 = vmatpush.msra.mxu2 %v73_v4  ;;  %v71_v12 = vld [vmem:[%s2301_s1 + $0x160] sm:$0xff]  ;;  %v88_v13 = vld [vmem:[%s2301_s1 + $0x1e8] sm:$0xff]  ;;  %v38_v16 = vld [vmem:[%s2301_s1 + $0x58] sm:$0xff] }
   0x6   :  { %497 = vmatpush.msra.mxu1 %v57_v7  ;;  %478 = vmatpush.msra.mxu0 %v40_v6  ;;  %v55_v14 = vld [vmem:[%s2301_s1 + $0xe0] sm:$0xff]  ;;  %v70_v17 = vld [vmem:[%s2301_s1 + $0x158] sm:$0xff]  ;;  %v37_v20 = vld [vmem:[%s2301_s1 + $0x50] sm:$0xff] }
   0x7   :  { %537 = vmatpush.msra.mxu3 %v89_v9  ;;  %518 = vmatpush.msra.mxu2 %v72_v8  ;;  %v87_v15 = vld [vmem:[%s2301_s1 + $0x1e0] sm:$0xff]  ;;  %v54_v18 = vld [vmem:[%s2301_s1 + $0xd8] sm:$0xff]  ;;  %v69_v21 = vld [vmem:[%s2301_s1 + $0x150] sm:$0xff] }
   0x8   :  { %498 = vmatpush.msra.mxu1 %v56_v10  ;;  %479 = vmatpush.msra.mxu0 %v39_v11  ;;  %v86_v19 = vld [vmem:[%s2301_s1 + $0x1d8] sm:$0xff]  ;;  %v53_v22 = vld [vmem:[%s2301_s1 + $0xd0] sm:$0xff]  ;;  %v36_v24 = vld [vmem:[%s2301_s1 + $0x48] sm:$0xff] }
   0x9   :  { %538 = vmatpush.msra.mxu3 %v88_v13  ;;  %519 = vmatpush.msra.mxu2 %v71_v12  ;;  %v85_v23 = vld [vmem:[%s2301_s1 + $0x1d0] sm:$0xff]  ;;  %v68_v25 = vld [vmem:[%s2301_s1 + $0x148] sm:$0xff]  ;;  %v35_v28 = vld [vmem:[%s2301_s1 + $0x40] sm:$0xff] }
   0xa   :  { %499 = vmatpush.msra.mxu1 %v55_v14  ;;  %480 = vmatpush.msra.mxu0 %v38_v16  ;;  %v52_v26 = vld [vmem:[%s2301_s1 + $0xc8] sm:$0xff]  ;;  %v67_v29 = vld [vmem:[%s2301_s1 + $0x140] sm:$0xff]  ;;  %v34_v32 = vld [vmem:[%s2301_s1 + $0x38] sm:$0xff] }
   0xb   :  { %539 = vmatpush.msra.mxu3 %v87_v15  ;;  %520 = vmatpush.msra.mxu2 %v70_v17  ;;  %v84_v27 = vld [vmem:[%s2301_s1 + $0x1c8] sm:$0xff]  ;;  %v51_v30 = vld [vmem:[%s2301_s1 + $0xc0] sm:$0xff]  ;;  %v66_v33 = vld [vmem:[%s2301_s1 + $0x138] sm:$0xff] }
   0xc   :  { %500 = vmatpush.msra.mxu1 %v54_v18  ;;  %481 = vmatpush.msra.mxu0 %v37_v20  ;;  %v83_v31 = vld [vmem:[%s2301_s1 + $0x1c0] sm:$0xff]  ;;  %v50_v34 = vld [vmem:[%s2301_s1 + $0xb8] sm:$0xff]  ;;  %v33_v36 = vld [vmem:[%s2301_s1 + $0x30] sm:$0xff] }
   0xd   :  { %540 = vmatpush.msra.mxu3 %v86_v19  ;;  %521 = vmatpush.msra.mxu2 %v69_v21  ;;  %v82_v35 = vld [vmem:[%s2301_s1 + $0x1b8] sm:$0xff]  ;;  %v65_v37 = vld [vmem:[%s2301_s1 + $0x130] sm:$0xff]  ;;  %v32_v40 = vld [vmem:[%s2301_s1 + $0x28] sm:$0xff] }
   0xe   :  { %501 = vmatpush.msra.mxu1 %v53_v22  ;;  %482 = vmatpush.msra.mxu0 %v36_v24  ;;  %v49_v38 = vld [vmem:[%s2301_s1 + $0xb0] sm:$0xff]  ;;  %v64_v41 = vld [vmem:[%s2301_s1 + $0x128] sm:$0xff]  ;;  %v31_v44 = vld [vmem:[%s2301_s1 + $0x20] sm:$0xff] }
   0xf   :  { %541 = vmatpush.msra.mxu3 %v85_v23  ;;  %522 = vmatpush.msra.mxu2 %v68_v25  ;;  %v81_v39 = vld [vmem:[%s2301_s1 + $0x1b0] sm:$0xff]  ;;  %v48_v42 = vld [vmem:[%s2301_s1 + $0xa8] sm:$0xff]  ;;  %v63_v45 = vld [vmem:[%s2301_s1 + $0x120] sm:$0xff] }
  0x10   :  { %502 = vmatpush.msra.mxu1 %v52_v26  ;;  %483 = vmatpush.msra.mxu0 %v35_v28  ;;  %v80_v43 = vld [vmem:[%s2301_s1 + $0x1a8] sm:$0xff]  ;;  %v47_v46 = vld [vmem:[%s2301_s1 + $0xa0] sm:$0xff]  ;;  %v30_v48 = vld [vmem:[%s2301_s1 + $0x18] sm:$0xff] }
  0x11   :  { %542 = vmatpush.msra.mxu3 %v84_v27  ;;  %523 = vmatpush.msra.mxu2 %v67_v29  ;;  %v79_v47 = vld [vmem:[%s2301_s1 + $0x1a0] sm:$0xff]  ;;  %v62_v49 = vld [vmem:[%s2301_s1 + $0x118] sm:$0xff]  ;;  %v29_v52 = vld [vmem:[%s2301_s1 + $0x10] sm:$0xff] }
  0x12   :  { %503 = vmatpush.msra.mxu1 %v51_v30  ;;  %484 = vmatpush.msra.mxu0 %v34_v32  ;;  %v46_v50 = vld [vmem:[%s2301_s1 + $0x98] sm:$0xff]  ;;  %v61_v53 = vld [vmem:[%s2301_s1 + $0x110] sm:$0xff]  ;;  %v28_v56 = vld [vmem:[%s2301_s1 + $0x8] sm:$0xff] }
  0x13   :  { %543 = vmatpush.msra.mxu3 %v83_v31  ;;  %524 = vmatpush.msra.mxu2 %v66_v33  ;;  %v78_v51 = vld [vmem:[%s2301_s1 + $0x198] sm:$0xff]  ;;  %v45_v54 = vld [vmem:[%s2301_s1 + $0x90] sm:$0xff]  ;;  %v60_v57 = vld [vmem:[%s2301_s1 + $0x108] sm:$0xff] }
  0x14   :  { %504 = vmatpush.msra.mxu1 %v50_v34  ;;  %485 = vmatpush.msra.mxu0 %v33_v36  ;;  %v77_v55 = vld [vmem:[%s2301_s1 + $0x190] sm:$0xff]  ;;  %v44_v58 = vld [vmem:[%s2301_s1 + $0x88] sm:$0xff]  ;;  %v27_v60 = vld [vmem:[%s2301_s1] sm:$0xff] }
  0x15   :  { %544 = vmatpush.msra.mxu3 %v82_v35  ;;  %525 = vmatpush.msra.mxu2 %v65_v37  ;;  %v76_v59 = vld [vmem:[%s2301_s1 + $0x188] sm:$0xff]  ;;  %v59_v61 = vld [vmem:[%s2301_s1 + $0x100] sm:$0xff]  ;;  %v106_v62 = vld [vmem:[%s2301_s1 + $0x278] sm:$0xff] }
  0x16   :  { %505 = vmatpush.msra.mxu1 %v49_v38  ;;  %486 = vmatpush.msra.mxu0 %v32_v40  ;;  %v138_v63 = vld [vmem:[%s2301_s1 + $0x378] sm:$0xff]  ;;  %v43_v0 = vld [vmem:[%s2301_s1 + $0x80] sm:$0xff]  ;;  %v105_v2 = vld [vmem:[%s2301_s1 + $0x270] sm:$0xff] }
  0x17   :  { %545 = vmatpush.msra.mxu3 %v81_v39  ;;  %526 = vmatpush.msra.mxu2 %v64_v41  ;;  %v75_v1 = vld [vmem:[%s2301_s1 + $0x180] sm:$0xff]  ;;  %v122_v3 = vld [vmem:[%s2301_s1 + $0x2f8] sm:$0xff]  ;;  %v137_v4 = vld [vmem:[%s2301_s1 + $0x370] sm:$0xff] }
  0x18   :  { %506 = vmatpush.msra.mxu1 %v48_v42  ;;  %487 = vmatpush.msra.mxu0 %v31_v44  ;;  %v154_v5 = vld [vmem:[%s2301_s1 + $0x3f8] sm:$0xff]  ;;  %v104_v6 = vld [vmem:[%s2301_s1 + $0x268] sm:$0xff]  ;;  %v121_v7 = vld [vmem:[%s2301_s1 + $0x2f0] sm:$0xff] }
  0x19   :  { %546 = vmatpush.msra.mxu3 %v80_v43  ;;  %527 = vmatpush.msra.mxu2 %v63_v45  ;;  %v136_v8 = vld [vmem:[%s2301_s1 + $0x368] sm:$0xff]  ;;  %v153_v9 = vld [vmem:[%s2301_s1 + $0x3f0] sm:$0xff]  ;;  %v103_v10 = vld [vmem:[%s2301_s1 + $0x260] sm:$0xff] }
  0x1a   :  { %507 = vmatpush.msra.mxu1 %v47_v46  ;;  %488 = vmatpush.msra.mxu0 %v30_v48  ;;  %v120_v11 = vld [vmem:[%s2301_s1 + $0x2e8] sm:$0xff]  ;;  %v135_v12 = vld [vmem:[%s2301_s1 + $0x360] sm:$0xff]  ;;  %v102_v14 = vld [vmem:[%s2301_s1 + $0x258] sm:$0xff] }
  0x1b   :  { %547 = vmatpush.msra.mxu3 %v79_v47  ;;  %528 = vmatpush.msra.mxu2 %v62_v49  ;;  %v152_v13 = vld [vmem:[%s2301_s1 + $0x3e8] sm:$0xff]  ;;  %v119_v15 = vld [vmem:[%s2301_s1 + $0x2e0] sm:$0xff]  ;;  %v134_v16 = vld [vmem:[%s2301_s1 + $0x358] sm:$0xff] }
  0x1c   :  { %508 = vmatpush.msra.mxu1 %v46_v50  ;;  %489 = vmatpush.msra.mxu0 %v29_v52  ;;  %v151_v17 = vld [vmem:[%s2301_s1 + $0x3e0] sm:$0xff]  ;;  %v101_v18 = vld [vmem:[%s2301_s1 + $0x250] sm:$0xff]  ;;  %v118_v19 = vld [vmem:[%s2301_s1 + $0x2d8] sm:$0xff] }
  0x1d   :  { %548 = vmatpush.msra.mxu3 %v78_v51  ;;  %529 = vmatpush.msra.mxu2 %v61_v53  ;;  %v133_v20 = vld [vmem:[%s2301_s1 + $0x350] sm:$0xff]  ;;  %v150_v21 = vld [vmem:[%s2301_s1 + $0x3d8] sm:$0xff]  ;;  %v100_v22 = vld [vmem:[%s2301_s1 + $0x248] sm:$0xff] }
  0x1e   :  { %509 = vmatpush.msra.mxu1 %v45_v54  ;;  %490 = vmatpush.msra.mxu0 %v28_v56  ;;  %v117_v23 = vld [vmem:[%s2301_s1 + $0x2d0] sm:$0xff]  ;;  %v132_v24 = vld [vmem:[%s2301_s1 + $0x348] sm:$0xff]  ;;  %v21_v26 = vld [vmem:[%s2300_s0] sm:$0xff] }
  0x1f   :  { %549 = vmatpush.msra.mxu3 %v77_v55  ;;  %530 = vmatpush.msra.mxu2 %v60_v57  ;;  %v149_v25 = vld [vmem:[%s2301_s1 + $0x3d0] sm:$0xff]  ;;  %v99_v27 = vld [vmem:[%s2301_s1 + $0x240] sm:$0xff]  ;;  %v116_v28 = vld [vmem:[%s2301_s1 + $0x2c8] sm:$0xff]  ;;  %421 = vst [vmem:[#allocation1] ss:$4 sm:$0xff] %v21_v26 }
  0x20   :  { %510 = vmatpush.msra.mxu1 %v44_v58  ;;  %491 = vmatpush.msra.mxu0 %v27_v60  ;;  %v131_v29 = vld [vmem:[%s2301_s1 + $0x340] sm:$0xff]  ;;  %v148_v30 = vld [vmem:[%s2301_s1 + $0x3c8] sm:$0xff]  ;;  %v98_v31 = vld [vmem:[%s2301_s1 + $0x238] sm:$0xff] }
  0x21   :  { %550 = vmatpush.msra.mxu3 %v76_v59  ;;  %531 = vmatpush.msra.mxu2 %v59_v61  ;;  %v115_v32 = vld [vmem:[%s2301_s1 + $0x2c0] sm:$0xff]  ;;  %v130_v33 = vld [vmem:[%s2301_s1 + $0x338] sm:$0xff]  ;;  %v97_v35 = vld [vmem:[%s2301_s1 + $0x230] sm:$0xff] }
  0x22   :  { %556 = vmatpush.msrb.mxu0 %v106_v62  ;;  %511 = vmatpush.msra.mxu1 %v43_v0  ;;  %v147_v34 = vld [vmem:[%s2301_s1 + $0x3c0] sm:$0xff]  ;;  %v114_v36 = vld [vmem:[%s2301_s1 + $0x2b8] sm:$0xff]  ;;  %v129_v37 = vld [vmem:[%s2301_s1 + $0x330] sm:$0xff] }
  0x23   :  { %596 = vmatpush.msrb.mxu2 %v138_v63  ;;  %551 = vmatpush.msra.mxu3 %v75_v1  ;;  %v146_v38 = vld [vmem:[%s2301_s1 + $0x3b8] sm:$0xff]  ;;  %v96_v39 = vld [vmem:[%s2301_s1 + $0x228] sm:$0xff]  ;;  %v113_v40 = vld [vmem:[%s2301_s1 + $0x2b0] sm:$0xff] }
  0x24   :  { %557 = vmatpush.msrb.mxu0 %v105_v2  ;;  %576 = vmatpush.msrb.mxu1 %v122_v3  ;;  %v128_v41 = vld [vmem:[%s2301_s1 + $0x328] sm:$0xff]  ;;  %v145_v42 = vld [vmem:[%s2301_s1 + $0x3b0] sm:$0xff]  ;;  %v95_v44 = vld [vmem:[%s2301_s1 + $0x220] sm:$0xff] }
  0x25   :  { %597 = vmatpush.msrb.mxu2 %v137_v4  ;;  %616 = vmatpush.msrb.mxu3 %v154_v5  ;;  %v22_v43 = vld [vmem:[%s2300_s0 + $0x8] sm:$0xff]  ;;  %v23_v46 = vld [vmem:[%s2300_s0 + $0x10] sm:$0xff]  ;;  %v127_v47 = vld [vmem:[%s2301_s1 + $0x320] sm:$0xff] }
  0x26   :  { %558 = vmatpush.msrb.mxu0 %v104_v6  ;;  %577 = vmatpush.msrb.mxu1 %v121_v7  ;;  %v112_v45 = vld [vmem:[%s2301_s1 + $0x2a8] sm:$0xff]  ;;  %423 = vst [vmem:[#allocation1 + $0x20] ss:$4 sm:$0xff] %v22_v43  ;;  %v424_v48 = vld.sshfl [vmem:[#allocation1] sm:$0xff pattern:$0x73625140] }
  0x27   :  { %598 = vmatpush.msrb.mxu2 %v136_v8  ;;  %617 = vmatpush.msrb.mxu3 %v153_v9  ;;  %v426_v49 = vld.sshfl [vmem:[#allocation1 + $0x10] sm:$0xff pattern:$0x73625140]  ;;  %v1403_v50 = vld.sshfl [vmem:[#allocation1 + $0x8] sm:$0xff pattern:$0x73625140] }
  0x28   :  { %559 = vmatpush.msrb.mxu0 %v103_v10  ;;  %578 = vmatpush.msrb.mxu1 %v120_v11  ;;  %v1405_v51 = vld.sshfl [vmem:[#allocation1 + $0x18] sm:$0xff pattern:$0x73625140]  ;;  %v144_v52 = vld [vmem:[%s2301_s1 + $0x3a8] sm:$0xff]  ;;  %v111_v54 = vld [vmem:[%s2301_s1 + $0x2a0] sm:$0xff] }
  0x29   :  { %599 = vmatpush.msrb.mxu2 %v135_v12  ;;  %618 = vmatpush.msrb.mxu3 %v152_v13  ;;  %v94_v53 = vld [vmem:[%s2301_s1 + $0x218] sm:$0xff]  ;;  %432 = vst [vmem:[#allocation1] ss:$4 sm:$0xff] %v23_v46  ;;  %v143_v56 = vld [vmem:[%s2301_s1 + $0x3a0] sm:$0xff]  ;;  %v93_v57 = vld [vmem:[%s2301_s1 + $0x210] sm:$0xff] }
  0x2a   :  { %560 = vmatpush.msrb.mxu0 %v102_v14  ;;  %579 = vmatpush.msrb.mxu1 %v119_v15  ;;  %v126_v55 = vld [vmem:[%s2301_s1 + $0x318] sm:$0xff]  ;;  %v125_v59 = vld [vmem:[%s2301_s1 + $0x310] sm:$0xff]  ;;  %v92_v61 = vld [vmem:[%s2301_s1 + $0x208] sm:$0xff] }
  0x2b   :  { %600 = vmatpush.msrb.mxu2 %v134_v16  ;;  %619 = vmatpush.msrb.mxu3 %v151_v17  ;;  %v110_v58 = vld [vmem:[%s2301_s1 + $0x298] sm:$0xff]  ;;  %v109_v62 = vld [vmem:[%s2301_s1 + $0x290] sm:$0xff]  ;;  %v124_v4 = vld [vmem:[%s2301_s1 + $0x308] sm:$0xff] }
  0x2c   :  { %561 = vmatpush.msrb.mxu0 %v101_v18  ;;  %580 = vmatpush.msrb.mxu1 %v118_v19  ;;  %v142_v60 = vld [vmem:[%s2301_s1 + $0x398] sm:$0xff]  ;;  %v141_v5 = vld [vmem:[%s2301_s1 + $0x390] sm:$0xff]  ;;  %v91_v6 = vld [vmem:[%s2301_s1 + $0x200] sm:$0xff] }
  0x2d   :  { %601 = vmatpush.msrb.mxu2 %v133_v20  ;;  %620 = vmatpush.msrb.mxu3 %v150_v21  ;;  %v24_v63 = vld [vmem:[%s2300_s0 + $0x18] sm:$0xff]  ;;  %v1443_v0 = vld.sshfl [vmem:[#allocation1 + $0x30] sm:$0xff pattern:$0x73625140]  ;;  %v108_v7 = vld [vmem:[%s2301_s1 + $0x288] sm:$0xff] }
  0x2e   :  { %562 = vmatpush.msrb.mxu0 %v100_v22  ;;  %581 = vmatpush.msrb.mxu1 %v117_v23  ;;  %v1445_v1 = vld.sshfl [vmem:[#allocation1 + $0x20] sm:$0xff pattern:$0x73625140]  ;;  %v1447_v2 = vld.sshfl [vmem:[#allocation1 + $0x38] sm:$0xff pattern:$0x73625140] }
  0x2f   :  { %602 = vmatpush.msrb.mxu2 %v132_v24  ;;  %621 = vmatpush.msrb.mxu3 %v149_v25  ;;  %v1449_v3 = vld.sshfl [vmem:[#allocation1 + $0x28] sm:$0xff pattern:$0x73625140]  ;;  %v123_v8 = vld [vmem:[%s2301_s1 + $0x300] sm:$0xff]  ;;  %v170_v10 = vld [vmem:[%s2301_s1 + $0x478] sm:$0xff] }
  0x30   :  { %563 = vmatpush.msrb.mxu0 %v99_v27  ;;  %582 = vmatpush.msrb.mxu1 %v116_v28  ;;  %433 = vst [vmem:[#allocation1 + $0x20] ss:$4 sm:$0xff] %v24_v63  ;;  %v140_v9 = vld [vmem:[%s2301_s1 + $0x388] sm:$0xff]  ;;  %v202_v11 = vld [vmem:[%s2301_s1 + $0x578] sm:$0xff]  ;;  %v107_v12 = vld [vmem:[%s2301_s1 + $0x280] sm:$0xff] }
  0x31   :  { %603 = vmatpush.msrb.mxu2 %v131_v29  ;;  %622 = vmatpush.msrb.mxu3 %v148_v30  ;;  %v139_v13 = vld [vmem:[%s2301_s1 + $0x380] sm:$0xff]  ;;  %v169_v14 = vld [vmem:[%s2301_s1 + $0x470] sm:$0xff]  ;;  %v186_v15 = vld [vmem:[%s2301_s1 + $0x4f8] sm:$0xff] }
  0x32   :  { %564 = vmatpush.msrb.mxu0 %v98_v31  ;;  %583 = vmatpush.msrb.mxu1 %v115_v32  ;;  %v201_v16 = vld [vmem:[%s2301_s1 + $0x570] sm:$0xff]  ;;  %v218_v17 = vld [vmem:[%s2301_s1 + $0x5f8] sm:$0xff]  ;;  %v168_v18 = vld [vmem:[%s2301_s1 + $0x468] sm:$0xff] }
  0x33   :  { %604 = vmatpush.msrb.mxu2 %v130_v33  ;;  %623 = vmatpush.msrb.mxu3 %v147_v34  ;;  %v185_v19 = vld [vmem:[%s2301_s1 + $0x4f0] sm:$0xff]  ;;  %v200_v20 = vld [vmem:[%s2301_s1 + $0x568] sm:$0xff]  ;;  %v167_v22 = vld [vmem:[%s2301_s1 + $0x460] sm:$0xff] }
  0x34   :  { %565 = vmatpush.msrb.mxu0 %v97_v35  ;;  %584 = vmatpush.msrb.mxu1 %v114_v36  ;;  %v217_v21 = vld [vmem:[%s2301_s1 + $0x5f0] sm:$0xff]  ;;  %v184_v23 = vld [vmem:[%s2301_s1 + $0x4e8] sm:$0xff]  ;;  %v199_v24 = vld [vmem:[%s2301_s1 + $0x560] sm:$0xff] }
  0x35   :  { %605 = vmatpush.msrb.mxu2 %v129_v37  ;;  %624 = vmatpush.msrb.mxu3 %v146_v38  ;;  %v216_v25 = vld [vmem:[%s2301_s1 + $0x5e8] sm:$0xff]  ;;  %v1519_v26 = vld.sshfl [vmem:[#allocation1] sm:$0xff pattern:$0x73625140]  ;;  %v166_v29 = vld [vmem:[%s2301_s1 + $0x458] sm:$0xff] }
  0x36   :  { %566 = vmatpush.msrb.mxu0 %v96_v39  ;;  %585 = vmatpush.msrb.mxu1 %v113_v40  ;;  %v1521_v27 = vld.sshfl [vmem:[#allocation1 + $0x10] sm:$0xff pattern:$0x73625140]  ;;  %v1523_v28 = vld.sshfl [vmem:[#allocation1 + $0x8] sm:$0xff pattern:$0x73625140] }
  0x37   :  { %606 = vmatpush.msrb.mxu2 %v128_v41  ;;  %625 = vmatpush.msrb.mxu3 %v145_v42  ;;  %v25_v30 = vld [vmem:[%s2300_s0 + $0x20] sm:$0xff]  ;;  %v1531_v31 = vld.sshfl [vmem:[#allocation1 + $0x18] sm:$0xff pattern:$0x73625140]  ;;  %v165_v35 = vld [vmem:[%s2301_s1 + $0x450] sm:$0xff] }
  0x38   :  { %567 = vmatpush.msrb.mxu0 %v95_v44  ;;  %586 = vmatpush.msrb.mxu1 %v112_v45  ;;  %v183_v32 = vld [vmem:[%s2301_s1 + $0x4e0] sm:$0xff]  ;;  %v198_v33 = vld [vmem:[%s2301_s1 + $0x558] sm:$0xff]  ;;  %442 = vst [vmem:[#allocation1] ss:$4 sm:$0xff] %v25_v30  ;;  %v197_v37 = vld [vmem:[%s2301_s1 + $0x550] sm:$0xff] }
  0x39   :  { %607 = vmatpush.msrb.mxu2 %v127_v47  ;;  %626 = vmatpush.msrb.mxu3 %v144_v52  ;;  %v215_v34 = vld [vmem:[%s2301_s1 + $0x5e0] sm:$0xff]  ;;  %v182_v36 = vld [vmem:[%s2301_s1 + $0x4d8] sm:$0xff] }
  0x3a   :  { %568 = vmatpush.msrb.mxu0 %v94_v53  ;;  %587 = vmatpush.msrb.mxu1 %v111_v54 }
  0x3b   :  { %608 = vmatpush.msrb.mxu2 %v126_v55  ;;  %627 = vmatpush.msrb.mxu3 %v143_v56 }
  0x3c   :  { %569 = vmatpush.msrb.mxu0 %v93_v57  ;;  %588 = vmatpush.msrb.mxu1 %v110_v58 }
  0x3d   :  { %609 = vmatpush.msrb.mxu2 %v125_v59  ;;  %628 = vmatpush.msrb.mxu3 %v142_v60 }
  0x3e   :  { %570 = vmatpush.msrb.mxu0 %v92_v61  ;;  %589 = vmatpush.msrb.mxu1 %v109_v62 }
  0x3f   :  { %610 = vmatpush.msrb.mxu2 %v124_v4  ;;  %629 = vmatpush.msrb.mxu3 %v141_v5 }
  0x40   :  { %571 = vmatpush.msrb.mxu0 %v91_v6  ;;  %590 = vmatpush.msrb.mxu1 %v108_v7 }
  0x41   :  { %611 = vmatpush.msrb.mxu2 %v123_v8  ;;  %630 = vmatpush.msrb.mxu3 %v140_v9 }
  0x42   :  { %492 = vmatmul.f32.vlgmr.msra.gmra.mxu0 %v424_v48  ;;  %532 = vmatmul.f32.vlgmr.msra.gmra.mxu2 %v426_v49 }
  0x43   :  { %636 = vmatpush.msra.mxu0 %v170_v10  ;;  %676 = vmatpush.msra.mxu2 %v202_v11 }
  0x44   :  { %591 = vmatpush.msrb.mxu1 %v107_v12  ;;  %631 = vmatpush.msrb.mxu3 %v139_v13 }
  0x45   :  { %512 = vmatmul.f32.vlgmr.msra.gmra.mxu1 %v1403_v50  ;;  %552 = vmatmul.f32.vlgmr.msra.gmra.mxu3 %v1405_v51 }
  0x46   :  { %637 = vmatpush.msra.mxu0 %v169_v14  ;;  %656 = vmatpush.msra.mxu1 %v186_v15 }
  0x47   :  { %677 = vmatpush.msra.mxu2 %v201_v16  ;;  %696 = vmatpush.msra.mxu3 %v218_v17 }
  0x48   :  { %638 = vmatpush.msra.mxu0 %v168_v18  ;;  %657 = vmatpush.msra.mxu1 %v185_v19 }
  0x49   :  { %678 = vmatpush.msra.mxu2 %v200_v20  ;;  %697 = vmatpush.msra.mxu3 %v217_v21 }
  0x4a   :  { %639 = vmatpush.msra.mxu0 %v167_v22  ;;  %658 = vmatpush.msra.mxu1 %v184_v23 }
  0x4b   :  { %679 = vmatpush.msra.mxu2 %v199_v24  ;;  %698 = vmatpush.msra.mxu3 %v216_v25 }
  0x4c   :  { %612 = vmatmul.f32.vlgmr.msrb.gmra.mxu2 %v1443_v0  ;;  %640 = vmatpush.msra.mxu0 %v166_v29 }
  0x4d   :  { %659 = vmatpush.msra.mxu1 %v183_v32  ;;  %680 = vmatpush.msra.mxu2 %v198_v33 }
  0x4e   :  { %10 = vsyncpa [#allocation3], 0  ;;  %699 = vmatpush.msra.mxu3 %v215_v34  ;;  %572 = vmatmul.f32.vlgmr.msrb.gmra.mxu0 %v1445_v1  ;;  %v214_v38 = vld [vmem:[%s2301_s1 + $0x5d8] sm:$0xff]  ;;  %v164_v39 = vld [vmem:[%s2301_s1 + $0x448] sm:$0xff]  ;;  %vm965_vm0 = vcmask 261120   ;;  %s1036_s18 = smov [#allocation2]  }
  0x4f   :  { %632 = vmatmul.f32.vlgmr.msrb.gmra.mxu3 %v1447_v2  ;;  %641 = vmatpush.msra.mxu0 %v165_v35  ;;  %v181_v40 = vld [vmem:[%s2301_s1 + $0x4d0] sm:$0xff]  ;;  %v196_v41 = vld [vmem:[%s2301_s1 + $0x548] sm:$0xff]  ;;  %v163_v43 = vld [vmem:[%s2301_s1 + $0x440] sm:$0xff]  ;;  %s997_s21 = sshll.u32 %s2305_s5, 4  ;;  %s998_s21 = int_to_ptr.hbm [resolvable:$true] %s997_s21 }
  0x50   :  { %660 = vmatpush.msra.mxu1 %v182_v36  ;;  %681 = vmatpush.msra.mxu2 %v197_v37  ;;  %v213_v42 = vld [vmem:[%s2301_s1 + $0x5d0] sm:$0xff]  ;;  %v180_v44 = vld [vmem:[%s2301_s1 + $0x4c8] sm:$0xff]  ;;  %v195_v45 = vld [vmem:[%s2301_s1 + $0x540] sm:$0xff] }
  0x51   :  { %700 = vmatpush.msra.mxu3 %v214_v38  ;;  %592 = vmatmul.f32.vlgmr.msrb.gmra.mxu1 %v1449_v3  ;;  %v212_v46 = vld [vmem:[%s2301_s1 + $0x5c8] sm:$0xff]  ;;  %v162_v47 = vld [vmem:[%s2301_s1 + $0x438] sm:$0xff]  ;;  %v179_v48 = vld [vmem:[%s2301_s1 + $0x4c0] sm:$0xff] }
  0x52   :  { %642 = vmatpush.msra.mxu0 %v164_v39  ;;  %661 = vmatpush.msra.mxu1 %v181_v40  ;;  %v194_v49 = vld [vmem:[%s2301_s1 + $0x538] sm:$0xff]  ;;  %v211_v50 = vld [vmem:[%s2301_s1 + $0x5c0] sm:$0xff]  ;;  %v161_v51 = vld [vmem:[%s2301_s1 + $0x430] sm:$0xff] }
  0x53   :  { %682 = vmatpush.msra.mxu2 %v196_v41  ;;  %701 = vmatpush.msra.mxu3 %v213_v42  ;;  %v178_v52 = vld [vmem:[%s2301_s1 + $0x4b8] sm:$0xff]  ;;  %v193_v53 = vld [vmem:[%s2301_s1 + $0x530] sm:$0xff]  ;;  %v160_v55 = vld [vmem:[%s2301_s1 + $0x428] sm:$0xff] }
  0x54   :  { %643 = vmatpush.msra.mxu0 %v163_v43  ;;  %662 = vmatpush.msra.mxu1 %v180_v44  ;;  %v210_v54 = vld [vmem:[%s2301_s1 + $0x5b8] sm:$0xff]  ;;  %v177_v56 = vld [vmem:[%s2301_s1 + $0x4b0] sm:$0xff]  ;;  %v192_v57 = vld [vmem:[%s2301_s1 + $0x528] sm:$0xff] }
  0x55   :  { %683 = vmatpush.msra.mxu2 %v195_v45  ;;  %702 = vmatpush.msra.mxu3 %v212_v46  ;;  %v209_v58 = vld [vmem:[%s2301_s1 + $0x5b0] sm:$0xff]  ;;  %v159_v59 = vld [vmem:[%s2301_s1 + $0x420] sm:$0xff]  ;;  %v176_v60 = vld [vmem:[%s2301_s1 + $0x4a8] sm:$0xff] }
  0x56   :  { %644 = vmatpush.msra.mxu0 %v162_v47  ;;  %663 = vmatpush.msra.mxu1 %v179_v48  ;;  %v191_v61 = vld [vmem:[%s2301_s1 + $0x520] sm:$0xff]  ;;  %v208_v62 = vld [vmem:[%s2301_s1 + $0x5a8] sm:$0xff]  ;;  %v158_v63 = vld [vmem:[%s2301_s1 + $0x418] sm:$0xff] }
  0x57   :  { %684 = vmatpush.msra.mxu2 %v194_v49  ;;  %703 = vmatpush.msra.mxu3 %v211_v50  ;;  %v175_v0 = vld [vmem:[%s2301_s1 + $0x4a0] sm:$0xff]  ;;  %v190_v1 = vld [vmem:[%s2301_s1 + $0x518] sm:$0xff]  ;;  %v157_v3 = vld [vmem:[%s2301_s1 + $0x410] sm:$0xff] }
  0x58   :  { %645 = vmatpush.msra.mxu0 %v161_v51  ;;  %664 = vmatpush.msra.mxu1 %v178_v52  ;;  %v207_v2 = vld [vmem:[%s2301_s1 + $0x5a0] sm:$0xff]  ;;  %v174_v4 = vld [vmem:[%s2301_s1 + $0x498] sm:$0xff]  ;;  %v189_v5 = vld [vmem:[%s2301_s1 + $0x510] sm:$0xff] }
  0x59   :  { %685 = vmatpush.msra.mxu2 %v193_v53  ;;  %704 = vmatpush.msra.mxu3 %v210_v54  ;;  %v206_v6 = vld [vmem:[%s2301_s1 + $0x598] sm:$0xff]  ;;  %v156_v7 = vld [vmem:[%s2301_s1 + $0x408] sm:$0xff]  ;;  %v173_v8 = vld [vmem:[%s2301_s1 + $0x490] sm:$0xff] }
  0x5a   :  { %646 = vmatpush.msra.mxu0 %v160_v55  ;;  %665 = vmatpush.msra.mxu1 %v177_v56  ;;  %v188_v9 = vld [vmem:[%s2301_s1 + $0x508] sm:$0xff]  ;;  %v205_v10 = vld [vmem:[%s2301_s1 + $0x590] sm:$0xff]  ;;  %v155_v11 = vld [vmem:[%s2301_s1 + $0x400] sm:$0xff] }
  0x5b   :  { %686 = vmatpush.msra.mxu2 %v192_v57  ;;  %705 = vmatpush.msra.mxu3 %v209_v58  ;;  %v172_v12 = vld [vmem:[%s2301_s1 + $0x488] sm:$0xff]  ;;  %v187_v13 = vld [vmem:[%s2301_s1 + $0x500] sm:$0xff]  ;;  %v234_v15 = vld [vmem:[%s2301_s1 + $0x678] sm:$0xff] }
  0x5c   :  { %647 = vmatpush.msra.mxu0 %v159_v59  ;;  %666 = vmatpush.msra.mxu1 %v176_v60  ;;  %v204_v14 = vld [vmem:[%s2301_s1 + $0x588] sm:$0xff]  ;;  %v266_v16 = vld [vmem:[%s2301_s1 + $0x778] sm:$0xff]  ;;  %v171_v17 = vld [vmem:[%s2301_s1 + $0x480] sm:$0xff] }
  0x5d   :  { %687 = vmatpush.msra.mxu2 %v191_v61  ;;  %706 = vmatpush.msra.mxu3 %v208_v62  ;;  %v203_v18 = vld [vmem:[%s2301_s1 + $0x580] sm:$0xff]  ;;  %v233_v19 = vld [vmem:[%s2301_s1 + $0x670] sm:$0xff]  ;;  %v250_v20 = vld [vmem:[%s2301_s1 + $0x6f8] sm:$0xff] }
  0x5e   :  { %648 = vmatpush.msra.mxu0 %v158_v63  ;;  %667 = vmatpush.msra.mxu1 %v175_v0  ;;  %v265_v21 = vld [vmem:[%s2301_s1 + $0x770] sm:$0xff]  ;;  %v282_v22 = vld [vmem:[%s2301_s1 + $0x7f8] sm:$0xff]  ;;  %v232_v23 = vld [vmem:[%s2301_s1 + $0x668] sm:$0xff] }
  0x5f   :  { %688 = vmatpush.msra.mxu2 %v190_v1  ;;  %707 = vmatpush.msra.mxu3 %v207_v2  ;;  %v249_v24 = vld [vmem:[%s2301_s1 + $0x6f0] sm:$0xff]  ;;  %v264_v25 = vld [vmem:[%s2301_s1 + $0x768] sm:$0xff]  ;;  %v1721_v29 = vld.sshfl [vmem:[#allocation1 + $0x20] sm:$0xff pattern:$0x73625140] }
  0x60   :  { %649 = vmatpush.msra.mxu0 %v157_v3  ;;  %668 = vmatpush.msra.mxu1 %v174_v4  ;;  %v1723_v30 = vld.sshfl [vmem:[#allocation1 + $0x30] sm:$0xff pattern:$0x73625140]  ;;  %v1725_v32 = vld.sshfl [vmem:[#allocation1 + $0x28] sm:$0xff pattern:$0x73625140] }
  0x61   :  { %689 = vmatpush.msra.mxu2 %v189_v5  ;;  %708 = vmatpush.msra.mxu3 %v206_v6  ;;  %v1733_v33 = vld.sshfl [vmem:[#allocation1 + $0x38] sm:$0xff pattern:$0x73625140]  ;;  %v263_v34 = vld [vmem:[%s2301_s1 + $0x760] sm:$0xff]  ;;  %v280_v35 = vld [vmem:[%s2301_s1 + $0x7e8] sm:$0xff] }
  0x62   :  { %650 = vmatpush.msra.mxu0 %v156_v7  ;;  %669 = vmatpush.msra.mxu1 %v173_v8  ;;  %v230_v36 = vld [vmem:[%s2301_s1 + $0x658] sm:$0xff]  ;;  %v247_v37 = vld [vmem:[%s2301_s1 + $0x6e0] sm:$0xff]  ;;  %v229_v40 = vld [vmem:[%s2301_s1 + $0x650] sm:$0xff] }
  0x63   :  { %690 = vmatpush.msra.mxu2 %v188_v9  ;;  %709 = vmatpush.msra.mxu3 %v205_v10  ;;  %v262_v38 = vld [vmem:[%s2301_s1 + $0x758] sm:$0xff]  ;;  %v279_v39 = vld [vmem:[%s2301_s1 + $0x7e0] sm:$0xff]  ;;  %v261_v42 = vld [vmem:[%s2301_s1 + $0x750] sm:$0xff] }
  0x64   :  { %651 = vmatpush.msra.mxu0 %v155_v11  ;;  %670 = vmatpush.msra.mxu1 %v172_v12  ;;  %v246_v41 = vld [vmem:[%s2301_s1 + $0x6d8] sm:$0xff]  ;;  %v228_v44 = vld [vmem:[%s2301_s1 + $0x648] sm:$0xff]  ;;  %v245_v45 = vld [vmem:[%s2301_s1 + $0x6d0] sm:$0xff] }
  0x65   :  { %691 = vmatpush.msra.mxu2 %v187_v13  ;;  %710 = vmatpush.msra.mxu3 %v204_v14  ;;  %v278_v43 = vld [vmem:[%s2301_s1 + $0x7d8] sm:$0xff]  ;;  %v260_v46 = vld [vmem:[%s2301_s1 + $0x748] sm:$0xff]  ;;  %v277_v47 = vld [vmem:[%s2301_s1 + $0x7d0] sm:$0xff] }
  0x66   :  { %652 = vmatmul.f32.vlgmr.msra.gmra.mxu0 %v1519_v26  ;;  %692 = vmatmul.f32.vlgmr.msra.gmra.mxu2 %v1521_v27  ;;  %v281_v26 = vld [vmem:[%s2301_s1 + $0x7f0] sm:$0xff]  ;;  %v231_v27 = vld [vmem:[%s2301_s1 + $0x660] sm:$0xff]  ;;  %v244_v49 = vld [vmem:[%s2301_s1 + $0x6c8] sm:$0xff] }
  0x67   :  { %716 = vmatpush.msrb.mxu0 %v234_v15  ;;  %756 = vmatpush.msrb.mxu2 %v266_v16  ;;  %v227_v48 = vld [vmem:[%s2301_s1 + $0x640] sm:$0xff]  ;;  %v276_v51 = vld [vmem:[%s2301_s1 + $0x7c8] sm:$0xff]  ;;  %v226_v52 = vld [vmem:[%s2301_s1 + $0x638] sm:$0xff] }
  0x68   :  { %671 = vmatpush.msra.mxu1 %v171_v17  ;;  %711 = vmatpush.msra.mxu3 %v203_v18  ;;  %v259_v50 = vld [vmem:[%s2301_s1 + $0x740] sm:$0xff]  ;;  %v258_v54 = vld [vmem:[%s2301_s1 + $0x738] sm:$0xff]  ;;  %v225_v56 = vld [vmem:[%s2301_s1 + $0x630] sm:$0xff] }
  0x69   :  { %672 = vmatmul.f32.vlgmr.msra.gmra.mxu1 %v1523_v28  ;;  %712 = vmatmul.f32.vlgmr.msra.gmra.mxu3 %v1531_v31  ;;  %v248_v28 = vld [vmem:[%s2301_s1 + $0x6e8] sm:$0xff]  ;;  %v243_v53 = vld [vmem:[%s2301_s1 + $0x6c0] sm:$0xff]  ;;  %v242_v57 = vld [vmem:[%s2301_s1 + $0x6b8] sm:$0xff] }
  0x6a   :  { %717 = vmatpush.msrb.mxu0 %v233_v19  ;;  %736 = vmatpush.msrb.mxu1 %v250_v20  ;;  %v26_v31 = vld [vmem:[%s2300_s0 + $0x28] sm:$0xff]  ;;  %v275_v55 = vld [vmem:[%s2301_s1 + $0x7c0] sm:$0xff]  ;;  %v257_v58 = vld [vmem:[%s2301_s1 + $0x730] sm:$0xff]  ;;  %s995_s0 = sshll.u32 %s1036_s18, 4  ;;  %s996_s0 = int_to_ptr.vmem [resolvable:$true] %s995_s0 }
  0x6b   :  { %757 = vmatpush.msrb.mxu2 %v265_v21  ;;  %776 = vmatpush.msrb.mxu3 %v282_v22  ;;  %443 = vst [vmem:[#allocation1 + $0x20] ss:$4 sm:$0xff] %v26_v31  ;;  %v274_v59 = vld [vmem:[%s2301_s1 + $0x7b8] sm:$0xff]  ;;  %v224_v60 = vld [vmem:[%s2301_s1 + $0x628] sm:$0xff]  ;;  %v241_v61 = vld [vmem:[%s2301_s1 + $0x6b0] sm:$0xff] }
  0x6c   :  { %718 = vmatpush.msrb.mxu0 %v232_v23  ;;  %737 = vmatpush.msrb.mxu1 %v249_v24  ;;  %v256_v62 = vld [vmem:[%s2301_s1 + $0x728] sm:$0xff]  ;;  %v273_v63 = vld [vmem:[%s2301_s1 + $0x7b0] sm:$0xff]  ;;  %v223_v0 = vld [vmem:[%s2301_s1 + $0x620] sm:$0xff] }
  0x6d   :  { %758 = vmatpush.msrb.mxu2 %v264_v25  ;;  %777 = vmatpush.msrb.mxu3 %v281_v26  ;;  %v240_v1 = vld [vmem:[%s2301_s1 + $0x6a8] sm:$0xff]  ;;  %v255_v2 = vld [vmem:[%s2301_s1 + $0x720] sm:$0xff]  ;;  %v222_v4 = vld [vmem:[%s2301_s1 + $0x618] sm:$0xff] }
  0x6e   :  { %719 = vmatpush.msrb.mxu0 %v231_v27  ;;  %738 = vmatpush.msrb.mxu1 %v248_v28  ;;  %v272_v3 = vld [vmem:[%s2301_s1 + $0x7a8] sm:$0xff]  ;;  %v239_v5 = vld [vmem:[%s2301_s1 + $0x6a0] sm:$0xff]  ;;  %v254_v6 = vld [vmem:[%s2301_s1 + $0x718] sm:$0xff] }
  0x6f   :  { %759 = vmatpush.msrb.mxu2 %v263_v34  ;;  %778 = vmatpush.msrb.mxu3 %v280_v35  ;;  %v271_v7 = vld [vmem:[%s2301_s1 + $0x7a0] sm:$0xff]  ;;  %v221_v8 = vld [vmem:[%s2301_s1 + $0x610] sm:$0xff]  ;;  %v238_v9 = vld [vmem:[%s2301_s1 + $0x698] sm:$0xff] }
  0x70   :  { %720 = vmatpush.msrb.mxu0 %v230_v36  ;;  %739 = vmatpush.msrb.mxu1 %v247_v37  ;;  %v253_v10 = vld [vmem:[%s2301_s1 + $0x710] sm:$0xff]  ;;  %v270_v11 = vld [vmem:[%s2301_s1 + $0x798] sm:$0xff]  ;;  %v220_v12 = vld [vmem:[%s2301_s1 + $0x608] sm:$0xff] }
  0x71   :  { %760 = vmatpush.msrb.mxu2 %v262_v38  ;;  %779 = vmatpush.msrb.mxu3 %v279_v39  ;;  %v237_v13 = vld [vmem:[%s2301_s1 + $0x690] sm:$0xff]  ;;  %v252_v14 = vld [vmem:[%s2301_s1 + $0x708] sm:$0xff]  ;;  %v219_v16 = vld [vmem:[%s2301_s1 + $0x600] sm:$0xff] }
  0x72   :  { %721 = vmatpush.msrb.mxu0 %v229_v40  ;;  %740 = vmatpush.msrb.mxu1 %v246_v41  ;;  %v269_v15 = vld [vmem:[%s2301_s1 + $0x790] sm:$0xff]  ;;  %v236_v17 = vld [vmem:[%s2301_s1 + $0x688] sm:$0xff]  ;;  %v251_v18 = vld [vmem:[%s2301_s1 + $0x700] sm:$0xff] }
  0x73   :  { %761 = vmatpush.msrb.mxu2 %v261_v42  ;;  %780 = vmatpush.msrb.mxu3 %v278_v43  ;;  %v268_v19 = vld [vmem:[%s2301_s1 + $0x788] sm:$0xff]  ;;  %v298_v20 = vld [vmem:[%s2301_s1 + $0x878] sm:$0xff]  ;;  %v235_v22 = vld [vmem:[%s2301_s1 + $0x680] sm:$0xff] }
  0x74   :  { %722 = vmatpush.msrb.mxu0 %v228_v44  ;;  %741 = vmatpush.msrb.mxu1 %v245_v45  ;;  %v330_v21 = vld [vmem:[%s2301_s1 + $0x978] sm:$0xff]  ;;  %v267_v23 = vld [vmem:[%s2301_s1 + $0x780] sm:$0xff]  ;;  %v297_v24 = vld [vmem:[%s2301_s1 + $0x870] sm:$0xff] }
  0x75   :  { %762 = vmatpush.msrb.mxu2 %v260_v46  ;;  %781 = vmatpush.msrb.mxu3 %v277_v47  ;;  %v314_v25 = vld [vmem:[%s2301_s1 + $0x8f8] sm:$0xff]  ;;  %v329_v26 = vld [vmem:[%s2301_s1 + $0x970] sm:$0xff]  ;;  %v328_v28 = vld [vmem:[%s2301_s1 + $0x968] sm:$0xff] }
  0x76   :  { %723 = vmatpush.msrb.mxu0 %v227_v48  ;;  %742 = vmatpush.msrb.mxu1 %v244_v49  ;;  %v346_v27 = vld [vmem:[%s2301_s1 + $0x9f8] sm:$0xff]  ;;  %v295_v31 = vld [vmem:[%s2301_s1 + $0x860] sm:$0xff]  ;;  %v344_v35 = vld [vmem:[%s2301_s1 + $0x9e8] sm:$0xff] }
  0x77   :  { %763 = vmatpush.msrb.mxu2 %v259_v50  ;;  %782 = vmatpush.msrb.mxu3 %v276_v51  ;;  %v327_v34 = vld [vmem:[%s2301_s1 + $0x960] sm:$0xff]  ;;  %v294_v36 = vld [vmem:[%s2301_s1 + $0x858] sm:$0xff]  ;;  %v293_v40 = vld [vmem:[%s2301_s1 + $0x850] sm:$0xff] }
  0x78   :  { %724 = vmatpush.msrb.mxu0 %v226_v52  ;;  %743 = vmatpush.msrb.mxu1 %v243_v53  ;;  %v311_v37 = vld [vmem:[%s2301_s1 + $0x8e0] sm:$0xff]  ;;  %v326_v38 = vld [vmem:[%s2301_s1 + $0x958] sm:$0xff]  ;;  %v325_v42 = vld [vmem:[%s2301_s1 + $0x950] sm:$0xff] }
  0x79   :  { %764 = vmatpush.msrb.mxu2 %v258_v54  ;;  %783 = vmatpush.msrb.mxu3 %v275_v55  ;;  %v343_v39 = vld [vmem:[%s2301_s1 + $0x9e0] sm:$0xff]  ;;  %v310_v41 = vld [vmem:[%s2301_s1 + $0x8d8] sm:$0xff]  ;;  %v292_v44 = vld [vmem:[%s2301_s1 + $0x848] sm:$0xff] }
  0x7a   :  { %725 = vmatpush.msrb.mxu0 %v225_v56  ;;  %744 = vmatpush.msrb.mxu1 %v242_v57  ;;  %v342_v43 = vld [vmem:[%s2301_s1 + $0x9d8] sm:$0xff]  ;;  %v309_v45 = vld [vmem:[%s2301_s1 + $0x8d0] sm:$0xff]  ;;  %v324_v46 = vld [vmem:[%s2301_s1 + $0x948] sm:$0xff] }
  0x7b   :  { %765 = vmatpush.msrb.mxu2 %v257_v58  ;;  %784 = vmatpush.msrb.mxu3 %v274_v59  ;;  %v341_v47 = vld [vmem:[%s2301_s1 + $0x9d0] sm:$0xff]  ;;  %v291_v48 = vld [vmem:[%s2301_s1 + $0x840] sm:$0xff]  ;;  %v308_v49 = vld [vmem:[%s2301_s1 + $0x8c8] sm:$0xff] }
  0x7c   :  { %726 = vmatpush.msrb.mxu0 %v224_v60  ;;  %745 = vmatpush.msrb.mxu1 %v241_v61  ;;  %v323_v50 = vld [vmem:[%s2301_s1 + $0x940] sm:$0xff]  ;;  %v340_v51 = vld [vmem:[%s2301_s1 + $0x9c8] sm:$0xff]  ;;  %v290_v52 = vld [vmem:[%s2301_s1 + $0x838] sm:$0xff] }
  0x7d   :  { %766 = vmatpush.msrb.mxu2 %v256_v62  ;;  %785 = vmatpush.msrb.mxu3 %v273_v63  ;;  %v307_v53 = vld [vmem:[%s2301_s1 + $0x8c0] sm:$0xff]  ;;  %v322_v54 = vld [vmem:[%s2301_s1 + $0x938] sm:$0xff]  ;;  %v289_v56 = vld [vmem:[%s2301_s1 + $0x830] sm:$0xff] }
  0x7e   :  { %727 = vmatpush.msrb.mxu0 %v223_v0  ;;  %746 = vmatpush.msrb.mxu1 %v240_v1  ;;  %v339_v55 = vld [vmem:[%s2301_s1 + $0x9c0] sm:$0xff]  ;;  %v306_v57 = vld [vmem:[%s2301_s1 + $0x8b8] sm:$0xff]  ;;  %v321_v58 = vld [vmem:[%s2301_s1 + $0x930] sm:$0xff] }
  0x7f   :  { %767 = vmatpush.msrb.mxu2 %v255_v2  ;;  %786 = vmatpush.msrb.mxu3 %v272_v3  ;;  %v338_v59 = vld [vmem:[%s2301_s1 + $0x9b8] sm:$0xff]  ;;  %v288_v60 = vld [vmem:[%s2301_s1 + $0x828] sm:$0xff]  ;;  %v305_v61 = vld [vmem:[%s2301_s1 + $0x8b0] sm:$0xff] }
  0x80   :  { %728 = vmatpush.msrb.mxu0 %v222_v4  ;;  %747 = vmatpush.msrb.mxu1 %v239_v5  ;;  %v320_v62 = vld [vmem:[%s2301_s1 + $0x928] sm:$0xff]  ;;  %v337_v63 = vld [vmem:[%s2301_s1 + $0x9b0] sm:$0xff]  ;;  %v287_v0 = vld [vmem:[%s2301_s1 + $0x820] sm:$0xff] }
  0x81   :  { %768 = vmatpush.msrb.mxu2 %v254_v6  ;;  %787 = vmatpush.msrb.mxu3 %v271_v7  ;;  %v304_v1 = vld [vmem:[%s2301_s1 + $0x8a8] sm:$0xff]  ;;  %v319_v2 = vld [vmem:[%s2301_s1 + $0x920] sm:$0xff]  ;;  %v286_v4 = vld [vmem:[%s2301_s1 + $0x818] sm:$0xff] }
  0x82   :  { %729 = vmatpush.msrb.mxu0 %v221_v8  ;;  %748 = vmatpush.msrb.mxu1 %v238_v9  ;;  %v336_v3 = vld [vmem:[%s2301_s1 + $0x9a8] sm:$0xff]  ;;  %v303_v5 = vld [vmem:[%s2301_s1 + $0x8a0] sm:$0xff]  ;;  %v318_v6 = vld [vmem:[%s2301_s1 + $0x918] sm:$0xff] }
  0x83   :  { %769 = vmatpush.msrb.mxu2 %v253_v10  ;;  %788 = vmatpush.msrb.mxu3 %v270_v11  ;;  %v335_v7 = vld [vmem:[%s2301_s1 + $0x9a0] sm:$0xff]  ;;  %v285_v8 = vld [vmem:[%s2301_s1 + $0x810] sm:$0xff]  ;;  %v302_v9 = vld [vmem:[%s2301_s1 + $0x898] sm:$0xff] }
  0x84   :  { %730 = vmatpush.msrb.mxu0 %v220_v12  ;;  %749 = vmatpush.msrb.mxu1 %v237_v13  ;;  %v317_v10 = vld [vmem:[%s2301_s1 + $0x910] sm:$0xff]  ;;  %v334_v11 = vld [vmem:[%s2301_s1 + $0x998] sm:$0xff]  ;;  %v284_v12 = vld [vmem:[%s2301_s1 + $0x808] sm:$0xff] }
  0x85   :  { %770 = vmatpush.msrb.mxu2 %v252_v14  ;;  %789 = vmatpush.msrb.mxu3 %v269_v15  ;;  %v301_v13 = vld [vmem:[%s2301_s1 + $0x890] sm:$0xff]  ;;  %v316_v14 = vld [vmem:[%s2301_s1 + $0x908] sm:$0xff] }
  0x86   :  { %731 = vmatpush.msrb.mxu0 %v219_v16  ;;  %750 = vmatpush.msrb.mxu1 %v236_v17  ;;  %v333_v15 = vld [vmem:[%s2301_s1 + $0x990] sm:$0xff]  ;;  %v283_v16 = vld [vmem:[%s2301_s1 + $0x800] sm:$0xff]  ;;  %v300_v17 = vld [vmem:[%s2301_s1 + $0x888] sm:$0xff] }
  0x87   :  { %771 = vmatpush.msrb.mxu2 %v251_v18  ;;  %790 = vmatpush.msrb.mxu3 %v268_v19  ;;  %v315_v18 = vld [vmem:[%s2301_s1 + $0x900] sm:$0xff]  ;;  %v332_v19 = vld [vmem:[%s2301_s1 + $0x988] sm:$0xff] }
  0x88   :  { %732 = vmatmul.f32.vlgmr.msrb.gmra.mxu0 %v1721_v29  ;;  %772 = vmatmul.f32.vlgmr.msrb.gmra.mxu2 %v1723_v30  ;;  %v296_v29 = vld [vmem:[%s2301_s1 + $0x868] sm:$0xff]  ;;  %v313_v30 = vld [vmem:[%s2301_s1 + $0x8f0] sm:$0xff] }
  0x89   :  { %796 = vmatpush.msra.mxu0 %v298_v20  ;;  %836 = vmatpush.msra.mxu2 %v330_v21  ;;  %v444_v20 = vld.sshfl [vmem:[#allocation1] sm:$0xff pattern:$0x73625140]  ;;  %v446_v21 = vld.sshfl [vmem:[#allocation1 + $0x10] sm:$0xff pattern:$0x73625140] }
  0x8a   :  { %751 = vmatpush.msrb.mxu1 %v235_v22  ;;  %791 = vmatpush.msrb.mxu3 %v267_v23  ;;  %v362_v22 = vld [vmem:[%s2301_s1 + $0xa78] sm:$0xff] }
  0x8b   :  { %752 = vmatmul.f32.vlgmr.msrb.gmra.mxu1 %v1725_v32  ;;  %792 = vmatmul.f32.vlgmr.msrb.gmra.mxu3 %v1733_v33  ;;  %v345_v32 = vld [vmem:[%s2301_s1 + $0x9f0] sm:$0xff]  ;;  %v312_v33 = vld [vmem:[%s2301_s1 + $0x8e8] sm:$0xff]  ;;  %v394_v23 = vld [vmem:[%s2301_s1 + $0xb78] sm:$0xff] }
  0x8c   :  { %797 = vmatpush.msra.mxu0 %v297_v24  ;;  %816 = vmatpush.msra.mxu1 %v314_v25  ;;  %v299_v24 = vld [vmem:[%s2301_s1 + $0x880] sm:$0xff] }
  0x8d   :  { %837 = vmatpush.msra.mxu2 %v329_v26  ;;  %856 = vmatpush.msra.mxu3 %v346_v27  ;;  %v331_v25 = vld [vmem:[%s2301_s1 + $0x980] sm:$0xff]  ;;  %v445_v26 = vld.sshfl [vmem:[#allocation1 + $0x8] sm:$0xff pattern:$0x73625140] }
  0x8e   :  { %798 = vmatpush.msra.mxu0 %v296_v29  ;;  %817 = vmatpush.msra.mxu1 %v313_v30  ;;  %v447_v27 = vld.sshfl [vmem:[#allocation1 + $0x18] sm:$0xff pattern:$0x73625140]  ;;  %v361_v29 = vld [vmem:[%s2301_s1 + $0xa70] sm:$0xff] }
  0x8f   :  { %838 = vmatpush.msra.mxu2 %v328_v28  ;;  %857 = vmatpush.msra.mxu3 %v345_v32  ;;  %v378_v30 = vld [vmem:[%s2301_s1 + $0xaf8] sm:$0xff]  ;;  %v393_v28 = vld [vmem:[%s2301_s1 + $0xb70] sm:$0xff] }
  0x90   :  { %799 = vmatpush.msra.mxu0 %v295_v31  ;;  %818 = vmatpush.msra.mxu1 %v312_v33  ;;  %v410_v32 = vld [vmem:[%s2301_s1 + $0xbf8] sm:$0xff]  ;;  %v360_v31 = vld [vmem:[%s2301_s1 + $0xa68] sm:$0xff]  ;;  %v377_v33 = vld [vmem:[%s2301_s1 + $0xaf0] sm:$0xff] }
  0x91   :  { %839 = vmatpush.msra.mxu2 %v327_v34  ;;  %858 = vmatpush.msra.mxu3 %v344_v35  ;;  %v392_v34 = vld [vmem:[%s2301_s1 + $0xb68] sm:$0xff]  ;;  %v409_v35 = vld [vmem:[%s2301_s1 + $0xbf0] sm:$0xff] }
  0x92   :  { %800 = vmatpush.msra.mxu0 %v294_v36  ;;  %819 = vmatpush.msra.mxu1 %v311_v37  ;;  %v359_v36 = vld [vmem:[%s2301_s1 + $0xa60] sm:$0xff]  ;;  %v376_v37 = vld [vmem:[%s2301_s1 + $0xae8] sm:$0xff] }
  0x93   :  { %840 = vmatpush.msra.mxu2 %v326_v38  ;;  %859 = vmatpush.msra.mxu3 %v343_v39  ;;  %v391_v38 = vld [vmem:[%s2301_s1 + $0xb60] sm:$0xff]  ;;  %v408_v39 = vld [vmem:[%s2301_s1 + $0xbe8] sm:$0xff] }
  0x94   :  { %801 = vmatpush.msra.mxu0 %v293_v40  ;;  %820 = vmatpush.msra.mxu1 %v310_v41  ;;  %v358_v40 = vld [vmem:[%s2301_s1 + $0xa58] sm:$0xff]  ;;  %v375_v41 = vld [vmem:[%s2301_s1 + $0xae0] sm:$0xff] }
  0x95   :  { %841 = vmatpush.msra.mxu2 %v325_v42  ;;  %860 = vmatpush.msra.mxu3 %v342_v43  ;;  %v390_v42 = vld [vmem:[%s2301_s1 + $0xb58] sm:$0xff]  ;;  %v407_v43 = vld [vmem:[%s2301_s1 + $0xbe0] sm:$0xff] }
  0x96   :  { %802 = vmatpush.msra.mxu0 %v292_v44  ;;  %821 = vmatpush.msra.mxu1 %v309_v45  ;;  %v357_v44 = vld [vmem:[%s2301_s1 + $0xa50] sm:$0xff]  ;;  %v374_v45 = vld [vmem:[%s2301_s1 + $0xad8] sm:$0xff] }
  0x97   :  { %842 = vmatpush.msra.mxu2 %v324_v46  ;;  %861 = vmatpush.msra.mxu3 %v341_v47  ;;  %v389_v46 = vld [vmem:[%s2301_s1 + $0xb50] sm:$0xff]  ;;  %v406_v47 = vld [vmem:[%s2301_s1 + $0xbd8] sm:$0xff] }
  0x98   :  { %803 = vmatpush.msra.mxu0 %v291_v48  ;;  %822 = vmatpush.msra.mxu1 %v308_v49  ;;  %v356_v48 = vld [vmem:[%s2301_s1 + $0xa48] sm:$0xff]  ;;  %v373_v49 = vld [vmem:[%s2301_s1 + $0xad0] sm:$0xff] }
  0x99   :  { %843 = vmatpush.msra.mxu2 %v323_v50  ;;  %862 = vmatpush.msra.mxu3 %v340_v51  ;;  %v388_v50 = vld [vmem:[%s2301_s1 + $0xb48] sm:$0xff]  ;;  %v405_v51 = vld [vmem:[%s2301_s1 + $0xbd0] sm:$0xff] }
  0x9a   :  { %804 = vmatpush.msra.mxu0 %v290_v52  ;;  %823 = vmatpush.msra.mxu1 %v307_v53  ;;  %v355_v52 = vld [vmem:[%s2301_s1 + $0xa40] sm:$0xff]  ;;  %v372_v53 = vld [vmem:[%s2301_s1 + $0xac8] sm:$0xff] }
  0x9b   :  { %844 = vmatpush.msra.mxu2 %v322_v54  ;;  %863 = vmatpush.msra.mxu3 %v339_v55  ;;  %v387_v54 = vld [vmem:[%s2301_s1 + $0xb40] sm:$0xff]  ;;  %v404_v55 = vld [vmem:[%s2301_s1 + $0xbc8] sm:$0xff] }
  0x9c   :  { %805 = vmatpush.msra.mxu0 %v289_v56  ;;  %824 = vmatpush.msra.mxu1 %v306_v57  ;;  %v354_v56 = vld [vmem:[%s2301_s1 + $0xa38] sm:$0xff]  ;;  %v371_v57 = vld [vmem:[%s2301_s1 + $0xac0] sm:$0xff] }
  0x9d   :  { %845 = vmatpush.msra.mxu2 %v321_v58  ;;  %864 = vmatpush.msra.mxu3 %v338_v59  ;;  %v386_v58 = vld [vmem:[%s2301_s1 + $0xb38] sm:$0xff]  ;;  %v403_v59 = vld [vmem:[%s2301_s1 + $0xbc0] sm:$0xff] }
  0x9e   :  { %806 = vmatpush.msra.mxu0 %v288_v60  ;;  %825 = vmatpush.msra.mxu1 %v305_v61  ;;  %v353_v60 = vld [vmem:[%s2301_s1 + $0xa30] sm:$0xff]  ;;  %v370_v61 = vld [vmem:[%s2301_s1 + $0xab8] sm:$0xff] }
  0x9f   :  { %846 = vmatpush.msra.mxu2 %v320_v62  ;;  %865 = vmatpush.msra.mxu3 %v337_v63  ;;  %v385_v62 = vld [vmem:[%s2301_s1 + $0xb30] sm:$0xff]  ;;  %v402_v63 = vld [vmem:[%s2301_s1 + $0xbb8] sm:$0xff] }
  0xa0   :  { %807 = vmatpush.msra.mxu0 %v287_v0  ;;  %826 = vmatpush.msra.mxu1 %v304_v1  ;;  %v352_v0 = vld [vmem:[%s2301_s1 + $0xa28] sm:$0xff]  ;;  %v369_v1 = vld [vmem:[%s2301_s1 + $0xab0] sm:$0xff] }
  0xa1   :  { %847 = vmatpush.msra.mxu2 %v319_v2  ;;  %866 = vmatpush.msra.mxu3 %v336_v3  ;;  %v384_v2 = vld [vmem:[%s2301_s1 + $0xb28] sm:$0xff]  ;;  %v401_v3 = vld [vmem:[%s2301_s1 + $0xbb0] sm:$0xff] }
  0xa2   :  { %808 = vmatpush.msra.mxu0 %v286_v4  ;;  %827 = vmatpush.msra.mxu1 %v303_v5  ;;  %v351_v4 = vld [vmem:[%s2301_s1 + $0xa20] sm:$0xff]  ;;  %v368_v5 = vld [vmem:[%s2301_s1 + $0xaa8] sm:$0xff] }
  0xa3   :  { %848 = vmatpush.msra.mxu2 %v318_v6  ;;  %867 = vmatpush.msra.mxu3 %v335_v7  ;;  %v383_v6 = vld [vmem:[%s2301_s1 + $0xb20] sm:$0xff]  ;;  %v400_v7 = vld [vmem:[%s2301_s1 + $0xba8] sm:$0xff] }
  0xa4   :  { %809 = vmatpush.msra.mxu0 %v285_v8  ;;  %828 = vmatpush.msra.mxu1 %v302_v9  ;;  %v350_v8 = vld [vmem:[%s2301_s1 + $0xa18] sm:$0xff]  ;;  %v367_v9 = vld [vmem:[%s2301_s1 + $0xaa0] sm:$0xff] }
  0xa5   :  { %849 = vmatpush.msra.mxu2 %v317_v10  ;;  %868 = vmatpush.msra.mxu3 %v334_v11  ;;  %v382_v10 = vld [vmem:[%s2301_s1 + $0xb18] sm:$0xff]  ;;  %v399_v11 = vld [vmem:[%s2301_s1 + $0xba0] sm:$0xff] }
  0xa6   :  { %810 = vmatpush.msra.mxu0 %v284_v12  ;;  %829 = vmatpush.msra.mxu1 %v301_v13  ;;  %v349_v12 = vld [vmem:[%s2301_s1 + $0xa10] sm:$0xff]  ;;  %v366_v13 = vld [vmem:[%s2301_s1 + $0xa98] sm:$0xff] }
  0xa7   :  { %850 = vmatpush.msra.mxu2 %v316_v14  ;;  %869 = vmatpush.msra.mxu3 %v333_v15  ;;  %v381_v14 = vld [vmem:[%s2301_s1 + $0xb10] sm:$0xff]  ;;  %v398_v15 = vld [vmem:[%s2301_s1 + $0xb98] sm:$0xff] }
  0xa8   :  { %811 = vmatpush.msra.mxu0 %v283_v16  ;;  %830 = vmatpush.msra.mxu1 %v300_v17  ;;  %v348_v16 = vld [vmem:[%s2301_s1 + $0xa08] sm:$0xff]  ;;  %v365_v17 = vld [vmem:[%s2301_s1 + $0xa90] sm:$0xff] }
  0xa9   :  { %851 = vmatpush.msra.mxu2 %v315_v18  ;;  %870 = vmatpush.msra.mxu3 %v332_v19  ;;  %v380_v18 = vld [vmem:[%s2301_s1 + $0xb08] sm:$0xff]  ;;  %v397_v19 = vld [vmem:[%s2301_s1 + $0xb90] sm:$0xff] }
  0xaa   :  { %812 = vmatmul.f32.vlgmr.msra.gmra.mxu0 %v444_v20  ;;  %852 = vmatmul.f32.vlgmr.msra.gmra.mxu2 %v446_v21  ;;  %v347_v20 = vld [vmem:[%s2301_s1 + $0xa00] sm:$0xff]  ;;  %v364_v21 = vld [vmem:[%s2301_s1 + $0xa88] sm:$0xff] }
  0xab   :  { %876 = vmatpush.msrb.mxu0 %v362_v22  ;;  %916 = vmatpush.msrb.mxu2 %v394_v23  ;;  %v379_v22 = vld [vmem:[%s2301_s1 + $0xb00] sm:$0xff]  ;;  %v396_v23 = vld [vmem:[%s2301_s1 + $0xb88] sm:$0xff] }
  0xac   :  { %831 = vmatpush.msra.mxu1 %v299_v24  ;;  %871 = vmatpush.msra.mxu3 %v331_v25  ;;  %v448_v24 = vld.sshfl [vmem:[#allocation1 + $0x20] sm:$0xff pattern:$0x73625140]  ;;  %v450_v25 = vld.sshfl [vmem:[#allocation1 + $0x30] sm:$0xff pattern:$0x73625140] }
  0xad   :  { %832 = vmatmul.f32.vlgmr.msra.gmra.mxu1 %v445_v26  ;;  %872 = vmatmul.f32.vlgmr.msra.gmra.mxu3 %v447_v27  ;;  %v363_v26 = vld [vmem:[%s2301_s1 + $0xa80] sm:$0xff] }
  0xae   :  { %877 = vmatpush.msrb.mxu0 %v361_v29  ;;  %896 = vmatpush.msrb.mxu1 %v378_v30  ;;  %v395_v27 = vld [vmem:[%s2301_s1 + $0xb80] sm:$0xff]  ;;  %v449_v29 = vld.sshfl [vmem:[#allocation1 + $0x28] sm:$0xff pattern:$0x73625140] }
  0xaf   :  { %917 = vmatpush.msrb.mxu2 %v393_v28  ;;  %936 = vmatpush.msrb.mxu3 %v410_v32  ;;  %v451_v30 = vld.sshfl [vmem:[#allocation1 + $0x38] sm:$0xff pattern:$0x73625140]  ;;  %v1008_v28 = vld [vmem:[%s2302_s2] ss:$0 sm:$0xff] }
  0xb0   :  { %878 = vmatpush.msrb.mxu0 %v360_v31  ;;  %897 = vmatpush.msrb.mxu1 %v377_v33 }
  0xb1   :  { %918 = vmatpush.msrb.mxu2 %v392_v34  ;;  %937 = vmatpush.msrb.mxu3 %v409_v35 }
  0xb2   :  { %879 = vmatpush.msrb.mxu0 %v359_v36  ;;  %898 = vmatpush.msrb.mxu1 %v376_v37 }
  0xb3   :  { %919 = vmatpush.msrb.mxu2 %v391_v38  ;;  %938 = vmatpush.msrb.mxu3 %v408_v39 }
  0xb4   :  { %880 = vmatpush.msrb.mxu0 %v358_v40  ;;  %899 = vmatpush.msrb.mxu1 %v375_v41 }
  0xb5   :  { %920 = vmatpush.msrb.mxu2 %v390_v42  ;;  %939 = vmatpush.msrb.mxu3 %v407_v43 }
  0xb6   :  { %881 = vmatpush.msrb.mxu0 %v357_v44  ;;  %900 = vmatpush.msrb.mxu1 %v374_v45 }
  0xb7   :  { %921 = vmatpush.msrb.mxu2 %v389_v46  ;;  %940 = vmatpush.msrb.mxu3 %v406_v47 }
  0xb8   :  { %882 = vmatpush.msrb.mxu0 %v356_v48  ;;  %901 = vmatpush.msrb.mxu1 %v373_v49 }
  0xb9   :  { %922 = vmatpush.msrb.mxu2 %v388_v50  ;;  %941 = vmatpush.msrb.mxu3 %v405_v51 }
  0xba   :  { %883 = vmatpush.msrb.mxu0 %v355_v52  ;;  %902 = vmatpush.msrb.mxu1 %v372_v53  ;;  %v960_v53 = vld [vmem:[%s2303_s3 + $0x18] sm:$0xff] }
  0xbb   :  { %923 = vmatpush.msrb.mxu2 %v387_v54  ;;  %942 = vmatpush.msrb.mxu3 %v404_v55 }
  0xbc   :  { %884 = vmatpush.msrb.mxu0 %v354_v56  ;;  %903 = vmatpush.msrb.mxu1 %v371_v57  ;;  %v959_v57 = vld [vmem:[%s2303_s3 + $0x10] sm:$0xff] }
  0xbd   :  { %924 = vmatpush.msrb.mxu2 %v386_v58  ;;  %943 = vmatpush.msrb.mxu3 %v403_v59  ;;  %v958_v59 = vld [vmem:[%s2303_s3 + $0x8] sm:$0xff] }
  0xbe   :  { %885 = vmatpush.msrb.mxu0 %v353_v60  ;;  %904 = vmatpush.msrb.mxu1 %v370_v61  ;;  %v957_v61 = vld [vmem:[%s2303_s3] sm:$0xff] }
  0xbf   :  { %925 = vmatpush.msrb.mxu2 %v385_v62  ;;  %944 = vmatpush.msrb.mxu3 %v402_v63  ;;  %v493_v32 = vpop.f32.mrf.mxu0 }
  0xc0   :  { %886 = vmatpush.msrb.mxu0 %v352_v0  ;;  %905 = vmatpush.msrb.mxu1 %v369_v1  ;;  %v494_v31 = vadd.f32 %v1008_v28, %v493_v32 }
  0xc1   :  { %926 = vmatpush.msrb.mxu2 %v384_v2  ;;  %945 = vmatpush.msrb.mxu3 %v401_v3 }
  0xc2   :  { %887 = vmatpush.msrb.mxu0 %v351_v4  ;;  %906 = vmatpush.msrb.mxu1 %v368_v5  ;;  %v513_v33 = vpop.f32.mrf.mxu1 }
  0xc3   :  { %927 = vmatpush.msrb.mxu2 %v383_v6  ;;  %946 = vmatpush.msrb.mxu3 %v400_v7  ;;  %v514_v34 = vadd.f32 %v513_v33, %v494_v31 }
  0xc4   :  { %888 = vmatpush.msrb.mxu0 %v350_v8  ;;  %907 = vmatpush.msrb.mxu1 %v367_v9 }
  0xc5   :  { %928 = vmatpush.msrb.mxu2 %v382_v10  ;;  %947 = vmatpush.msrb.mxu3 %v399_v11  ;;  %v533_v35 = vpop.f32.mrf.mxu2 }
  0xc6   :  { %889 = vmatpush.msrb.mxu0 %v349_v12  ;;  %908 = vmatpush.msrb.mxu1 %v366_v13  ;;  %v534_v36 = vadd.f32 %v533_v35, %v514_v34 }
  0xc7   :  { %929 = vmatpush.msrb.mxu2 %v381_v14  ;;  %948 = vmatpush.msrb.mxu3 %v398_v15 }
  0xc8   :  { %890 = vmatpush.msrb.mxu0 %v348_v16  ;;  %909 = vmatpush.msrb.mxu1 %v365_v17  ;;  %v553_v37 = vpop.f32.mrf.mxu3 }
  0xc9   :  { %930 = vmatpush.msrb.mxu2 %v380_v18  ;;  %949 = vmatpush.msrb.mxu3 %v397_v19  ;;  %v554_v38 = vadd.f32 %v553_v37, %v534_v36 }
  0xca   :  { %891 = vmatpush.msrb.mxu0 %v347_v20  ;;  %910 = vmatpush.msrb.mxu1 %v364_v21  ;;  %v1009_v20 = vld [vmem:[%s2304_s4] ss:$0 sm:$0xff] }
  0xcb   :  { %931 = vmatpush.msrb.mxu2 %v379_v22  ;;  %950 = vmatpush.msrb.mxu3 %v396_v23  ;;  %v573_v39 = vpop.f32.mrf.mxu0 }
  0xcc   :  { %892 = vmatmul.f32.vlgmr.msrb.gmra.mxu0 %v448_v24  ;;  %932 = vmatmul.f32.vlgmr.msrb.gmra.mxu2 %v450_v25  ;;  %v574_v40 = vadd.f32 %v573_v39, %v554_v38 }
  0xcd   :  { %911 = vmatpush.msrb.mxu1 %v363_v26  ;;  %951 = vmatpush.msrb.mxu3 %v395_v27 }
  0xce   :  { %912 = vmatmul.f32.vlgmr.msrb.gmra.mxu1 %v449_v29  ;;  %952 = vmatmul.f32.vlgmr.msrb.gmra.mxu3 %v451_v30  ;;  %v593_v41 = vpop.f32.mrf.mxu1 }
  0xcf   :  { %v594_v42 = vadd.f32 %v593_v41, %v574_v40  ;;  %v613_v43 = vpop.f32.mrf.mxu2  ;;  %981 = vmatpush.msra.mxu0 %v960_v53 }
  0xd1   :  { %v614_v44 = vadd.f32 %v613_v43, %v594_v42  ;;  %982 = vmatpush.msra.mxu0 %v959_v57 }
  0xd2   :  { %v633_v45 = vpop.f32.mrf.mxu3 }
  0xd3   :  { %v634_v47 = vadd.f32 %v633_v45, %v614_v44  ;;  %983 = vmatpush.msra.mxu0 %v958_v59 }
  0xd5   :  { %984 = vmatpush.msra.mxu0 %v957_v61 }
  0xe3   :  { %v653_v46 = vpop.f32.mrf.mxu0 }
  0xe4   :  { %v654_v48 = vadd.f32 %v653_v46, %v634_v47 }
  0xe6   :  { %v673_v49 = vpop.f32.mrf.mxu1 }
  0xe7   :  { %v674_v51 = vadd.f32 %v673_v49, %v654_v48 }
  0xe9   :  { %v693_v50 = vpop.f32.mrf.mxu2 }
  0xea   :  { %v694_v52 = vadd.f32 %v693_v50, %v674_v51 }
  0xec   :  { %v713_v54 = vpop.f32.mrf.mxu3 }
  0xed   :  { %v714_v56 = vadd.f32 %v713_v54, %v694_v52 }
 0x105   :  { %v733_v55 = vpop.f32.mrf.mxu0 }
 0x106   :  { %v734_v58 = vadd.f32 %v733_v55, %v714_v56 }
 0x108   :  { %v753_v60 = vpop.f32.mrf.mxu1 }
 0x109   :  { %v754_v63 = vadd.f32 %v753_v60, %v734_v58 }
 0x10b   :  { %v773_v62 = vpop.f32.mrf.mxu2 }
 0x10c   :  { %v774_v0 = vadd.f32 %v773_v62, %v754_v63 }
 0x10e   :  { %v793_v1 = vpop.f32.mrf.mxu3 }
 0x10f   :  { %v794_v3 = vadd.f32 %v793_v1, %v774_v0 }
 0x127   :  { %v813_v2 = vpop.f32.mrf.mxu0 }
 0x128   :  { %v814_v4 = vadd.f32 %v813_v2, %v794_v3 }
 0x12a   :  { %v833_v5 = vpop.f32.mrf.mxu1 }
 0x12b   :  { %v834_v7 = vadd.f32 %v833_v5, %v814_v4 }
 0x12d   :  { %v853_v6 = vpop.f32.mrf.mxu2 }
 0x12e   :  { %v854_v8 = vadd.f32 %v853_v6, %v834_v7 }
 0x130   :  { %v873_v9 = vpop.f32.mrf.mxu3 }
 0x131   :  { %v874_v10 = vadd.f32 %v873_v9, %v854_v8 }
 0x149   :  { %v893_v11 = vpop.f32.mrf.mxu0 }
 0x14a   :  { %v894_v12 = vadd.f32 %v893_v11, %v874_v10 }
 0x14b   :  { %v913_v13 = vpop.f32.mrf.mxu1 }
 0x14c   :  { %v914_v14 = vadd.f32 %v913_v13, %v894_v12 }
 0x14f   :  { %v933_v15 = vpop.f32.mrf.mxu2 }
 0x150   :  { %v934_v16 = vadd.f32 %v933_v15, %v914_v14 }
 0x151   :  { %v953_v17 = vpop.f32.mrf.mxu3 }
 0x152   :  { %v954_v18 = vadd.f32 %v953_v17, %v934_v16 }
 0x154   :  { %v956_v19 = vmax.f32 %v954_v18, 0.0 }
 0x156   :  { %1006 = vmatmul.msk.f32.vlgmr.msra.gmra.mxu0 %vm965_vm0, %v956_v19 }
 0x1d3   :  { %v986_v21 = vpop.f32.mrf.mxu0 }
 0x1d4   :  { %v987_v22 = vadd.f32 %v1009_v20, %v986_v21 }
 0x1d6   :  { %989 = vst [vmem:[#allocation2] sm:$0x3] %v987_v22 }
 0x1d7   :  { %1000 = dma.vmem_to_hbm [thread:$0]  %s996_s0, 32, %s998_s21, [#allocation3]  }
 0x1d8   :  { %1034 = dma.done.wait [#allocation3], 32  }
 0x1d9   :  { %1035 = vsyncadd [#allocation3], 4294967264 }
 0x1da   :  { %1005 = vsyncpa [#allocation3], 1 }

</bundles_post_ra>
